<compile_context>
chip_gen: v7x
topology: tpu7x:2x2x1
jax: 0.10.0
libtpu: 0.0.40
codegen_flags: <defaults>
</compile_context>

<pallas_src>
import functools

import jax
import jax.numpy as jnp
import numpy as np
from jax import lax
from jax.experimental import pallas as pl
from jax.experimental.pallas import tpu as pltpu

_LPAD = 16  # bf16 second-minor tile is 16 rows -> aligned interior column.


def _pick_row_block(h, w, target_m=256):
    """Largest divisor rb of h with rb*w <= target_m (bounds the f32 matmul
    result / epilogue live set; keeps MXU M efficiency without spilling)."""
    best = 1
    for rb in range(1, h + 1):
        if h % rb == 0 and rb * w <= target_m:
            best = rb
    return best


def _ibasic_block_kernel(x_ref, s1_ref, b1_ref, w1_ref, s2_ref, b2_ref,
                         a_ref, w2_ref, s3_ref, b3_ref, out_ref,
                         pad_a, pad_b, col_ref, *, rb):
    # x_ref / out_ref blocks: (H, W, Cp) f32   (batch dim squeezed by BlockSpec)
    # pad_a / pad_b:          (H+2, Wp, Cp) bf16, interior at [1:H+1, 16:16+W)
    # col_ref:                (2, rb*W, 9*Cp) bf16 double-buffered im2col
    H, W, Cp = x_ref.shape
    NB = H // rb
    LPAD = _LPAD
    Wp = pad_a.shape[1]

    # ---- (re)zero only the halo actually read by the 3x3 windows: rows 0 and
    #      H+1, and columns LPAD-1 / LPAD+W.  Interiors are fully overwritten
    #      every step.  Done every grid step (not only program_id==0) so it
    #      stays correct under megacore grid partitioning. ----
    zrow = jnp.zeros((1, Wp, Cp), pad_a.dtype)
    zcol = jnp.zeros((H + 2, 1, Cp), pad_a.dtype)
    for pad in (pad_a, pad_b):
        pad[0:1, :, :] = zrow
        pad[H + 1:H + 2, :, :] = zrow
        pad[:, LPAD - 1:LPAD, :] = zcol
        pad[:, LPAD + W:LPAD + W + 1, :] = zcol

    s1 = s1_ref[...]
    b1 = b1_ref[...]
    s2 = s2_ref[...]
    b2 = b2_ref[...]
    s3 = s3_ref[...]
    b3 = b3_ref[...]
    alpha = a_ref[...]

    def row_loop(body):
        # body(r0, slot): r0 = first output row of the block, slot = col buffer.
        if NB <= 4:
            for i in range(NB):            # static unroll for small trip counts
                body(i * rb, i % 2)
        else:
            def fb(i, carry):              # bounded live ranges for big NB
                body(pl.multiple_of(i * rb, rb), lax.rem(i, 2))
                return carry
            lax.fori_loop(0, NB, fb, 0, unroll=2)

    # ---- bn1(x) -> aligned interior of pad_a (bf16) ----
    def bn1_body(r0, slot):
        del slot
        xb = x_ref[pl.ds(r0, rb), :, :]                       # (rb, W, Cp) f32
        pad_a[pl.ds(1 + r0, rb), pl.ds(LPAD, W), :] = (
            (xb * s1 + b1).astype(pad_a.dtype))
    row_loop(bn1_body)

    def conv_block(pad_in, w_ref, r0, slot):
        # im2col for output rows [r0, r0+rb): one bf16 matmul with K = 9*Cp.
        for dy in range(3):
            for dx in range(3):
                tap = dy * 3 + dx
                win = pad_in[pl.ds(r0 + dy, rb), pl.ds(LPAD - 1 + dx, W), :]
                col_ref[slot, :, tap * Cp:(tap + 1) * Cp] = win.reshape(rb * W, Cp)
        return jnp.dot(col_ref[slot], w_ref[...],
                       preferred_element_type=jnp.float32)    # (rb*W, Cp) f32

    # ---- conv1 -> bn2 -> prelu -> aligned interior of pad_b (bf16) ----
    def conv1_body(r0, slot):
        z = conv_block(pad_a, w1_ref, r0, slot)
        z = z * s2 + b2
        z = jnp.where(z >= 0, z, alpha * z)
        pad_b[pl.ds(1 + r0, rb), pl.ds(LPAD, W), :] = (
            z.reshape(rb, W, Cp).astype(pad_b.dtype))
    row_loop(conv1_body)

    # ---- conv2 -> bn3 -> residual add -> out (lane-dense f32 store) ----
    def conv2_body(r0, slot):
        z = conv_block(pad_b, w2_ref, r0, slot)
        z = z * s3 + b3
        res = z.reshape(rb, W, Cp) + x_ref[pl.ds(r0, rb), :, :]
        out_ref[pl.ds(r0, rb), :, :] = res.astype(out_ref.dtype)
    row_loop(conv2_body)


def ibasic_block_pallas(x_nchw, params, eps=1e-5):
    """x_nchw: (N, C, H, W) float32. Returns (N, C, H, W) float32."""
    N, C, H, W = x_nchw.shape
    if (params["w1"].shape[:2] != (C, C)) or (params["w2"].shape[:2] != (C, C)):
        # TODO(synk): planes != inplanes (needs downsample) not supported.
        raise NotImplementedError("IBasicBlock kernel assumes inplanes == planes")

    Cp = ((C + 127) // 128) * 128          # lane-dense channel padding
    RB = _pick_row_block(H, W)
    LPAD = _LPAD
    Wp = LPAD + ((W + 1 + 7) // 8) * 8     # interior at LPAD, halo LPAD-1 / LPAD+W

    x = jnp.transpose(x_nchw, (0, 2, 3, 1))                        # NHWC
    x = jnp.pad(x, ((0, 0), (0, 0), (0, 0), (0, Cp - C)))          # pad channels

    def fold_bn(g, b, m, v):
        s = g / jnp.sqrt(v + eps)
        t = b - m * s
        return (jnp.pad(s, (0, Cp - C)).reshape(1, Cp),
                jnp.pad(t, (0, Cp - C)).reshape(1, Cp))

    def pack_w(w):
        # torch (O, I, 3, 3) -> im2col layout (9*Cp, Cp), bf16 MXU operand.
        w = jnp.transpose(w, (2, 3, 1, 0))                         # (3,3,I,O)
        w = jnp.pad(w, ((0, 0), (0, 0), (0, Cp - C), (0, Cp - C)))
        return w.reshape(9 * Cp, Cp).astype(jnp.bfloat16)

    s1, b1 = fold_bn(*params["bn1"])
    s2, b2 = fold_bn(*params["bn2"])
    s3, b3 = fold_bn(*params["bn3"])
    alpha = jnp.pad(params["alpha"], (0, Cp - C)).reshape(1, Cp)
    w1 = pack_w(params["w1"])
    w2 = pack_w(params["w2"])

    vec_spec = lambda: pl.BlockSpec((1, Cp), lambda n: (0, 0))
    wgt_spec = lambda: pl.BlockSpec((9 * Cp, Cp), lambda n: (0, 0))
    img_spec = lambda: pl.BlockSpec((None, H, W, Cp), lambda n: (n, 0, 0, 0))

    # ---- VMEM budget: actual footprint (+50% headroom), capped to the chip ----
    img_bytes = H * W * Cp * 4
    footprint = (4 * img_bytes                         # in + out, double-buffered
                 + 2 * (H + 2) * Wp * Cp * 2           # bf16 padded scratches
                 + 2 * RB * W * 9 * Cp * 2             # double-buffered im2col
                 + 2 * 2 * 9 * Cp * Cp * 2             # two weights, double-buffered
                 + 8 * Cp * 4)                         # folded BN / alpha vectors
    try:
        cap = int(pltpu.get_tpu_info().vmem_capacity_bytes)
    except Exception:
        cap = 128 * 1024 * 1024
    vmem_limit = int(min(cap * 3 // 4, max(32 * 1024 * 1024, footprint * 3 // 2)))

    flops = 4 * N * H * W * 9 * Cp * Cp                # two 3x3 convs
    bytes_accessed = (2 * N * H * W * Cp * 4           # x in + out (f32)
                      + 2 * 9 * Cp * Cp * 2            # bf16 packed weights
                      + 7 * Cp * 4)                    # folded BN / alpha vecs

    kernel = functools.partial(_ibasic_block_kernel, rb=RB)

    out = pl.pallas_call(
        kernel,
        out_shape=jax.ShapeDtypeStruct((N, H, W, Cp), x.dtype),
        grid_spec=pltpu.PrefetchScalarGridSpec(
            num_scalar_prefetch=0,
            grid=(N,),
            in_specs=[
                img_spec(),                          # x
                vec_spec(), vec_spec(),              # s1, b1
                wgt_spec(),                          # w1 (im2col layout)
                vec_spec(), vec_spec(),              # s2, b2
                vec_spec(),                          # alpha
                wgt_spec(),                          # w2 (im2col layout)
                vec_spec(), vec_spec(),              # s3, b3
            ],
            out_specs=img_spec(),
            scratch_shapes=[
                pltpu.VMEM((H + 2, Wp, Cp), jnp.bfloat16),      # pad_a
                pltpu.VMEM((H + 2, Wp, Cp), jnp.bfloat16),      # pad_b
                pltpu.VMEM((2, RB * W, 9 * Cp), jnp.bfloat16),  # im2col (2 bufs)
            ],
        ),
        compiler_params=pltpu.CompilerParams(
            dimension_semantics=("parallel",),
            vmem_limit_bytes=vmem_limit,
        ),
        cost_estimate=pl.CostEstimate(flops=flops, transcendentals=0,
                                      bytes_accessed=bytes_accessed),
    )(x, s1, b1, w1, s2, b2, alpha, w2, s3, b3)

    out = out[..., :C]                                  # drop padded lanes
    return jnp.transpose(out, (0, 3, 1, 2))             # back to NCHW


def ibasic_block_ref(x, params, eps=1e-5):
    """Pure-JAX f32 reference (NCHW), mirroring the PyTorch forward in eval mode."""
    def bn(t, g, b, m, v):
        g, b, m, v = (a[None, :, None, None] for a in (g, b, m, v))
        return (t - m) / jnp.sqrt(v + eps) * g + b

    def conv(t, w):
        return lax.conv_general_dilated(
            t, w, window_strides=(1, 1), padding=((1, 1), (1, 1)),
            dimension_numbers=("NCHW", "OIHW", "NCHW"))

    out = bn(x, *params["bn1"])
    out = conv(out, params["w1"])
    out = bn(out, *params["bn2"])
    a = params["alpha"][None, :, None, None]
    out = jnp.where(out >= 0, out, a * out)
    out = conv(out, params["w2"])
    out = bn(out, *params["bn3"])
    return out + x


def make_params(key, inplanes, planes):
    ks = jax.random.split(key, 16)

    def bn_params(k0, k1, k2, k3, c):
        return (jax.random.uniform(k0, (c,), jnp.float32, 0.5, 1.5),   # gamma
                jax.random.normal(k1, (c,), jnp.float32) * 0.1,        # beta
                jax.random.normal(k2, (c,), jnp.float32) * 0.1,        # running_mean
                jax.random.uniform(k3, (c,), jnp.float32, 0.5, 1.5))   # running_var

    return {
        "bn1": bn_params(ks[0], ks[1], ks[2], ks[3], inplanes),
        "w1": jax.random.normal(ks[4], (planes, inplanes, 3, 3), jnp.float32) * 0.1,
        "bn2": bn_params(ks[5], ks[6], ks[7], ks[8], planes),
        "alpha": jnp.full((planes,), 0.25, jnp.float32),
        "w2": jax.random.normal(ks[9], (planes, planes, 3, 3), jnp.float32) * 0.1,
        "bn3": bn_params(ks[10], ks[11], ks[12], ks[13], planes),
    }


if __name__ == "__main__":
    key = jax.random.PRNGKey(0)
    kx, kp = jax.random.split(key)

    N, C, H, W = 2, 4, 16, 16          # inplanes = planes = 4, stride = 1
    x = jax.random.normal(kx, (N, C, H, W), jnp.float32)
    params = make_params(kp, C, C)

    out = jax.block_until_ready(ibasic_block_pallas(x, params))
    ref = jax.block_until_ready(ibasic_block_ref(x, params))

    # bf16 MXU operands (f32 accumulation) vs. pure-f32 reference -> ~1e-2 tol.
    np.testing.assert_allclose(np.asarray(out), np.asarray(ref),
                               rtol=5e-2, atol=5e-2)
    print("KERNEL_OK")
</pallas_src>

<mosaic_0001>
module attributes {stable_mosaic.version = 11 : i64} {
  func.func @_ibasic_block_kernel(%arg0: i32, %arg1: memref<1x16x16x128xf32, #tpu.memory_space<vmem>>, %arg2: memref<1x128xf32, #tpu.memory_space<vmem>>, %arg3: memref<1x128xf32, #tpu.memory_space<vmem>>, %arg4: memref<1152x128xbf16, #tpu.memory_space<vmem>>, %arg5: memref<1x128xf32, #tpu.memory_space<vmem>>, %arg6: memref<1x128xf32, #tpu.memory_space<vmem>>, %arg7: memref<1x128xf32, #tpu.memory_space<vmem>>, %arg8: memref<1152x128xbf16, #tpu.memory_space<vmem>>, %arg9: memref<1x128xf32, #tpu.memory_space<vmem>>, %arg10: memref<1x128xf32, #tpu.memory_space<vmem>>, %arg11: memref<1x16x16x128xf32, #tpu.memory_space<vmem>>, %arg12: memref<18x40x128xbf16, #tpu.memory_space<vmem>>, %arg13: memref<18x40x128xbf16, #tpu.memory_space<vmem>>, %arg14: memref<2x256x1152xbf16, #tpu.memory_space<vmem>>) attributes {dimension_semantics = [#tpu.dimension_semantics<parallel>], iteration_bounds = array<i64: 2>, scalar_prefetch = 0 : i64, scratch_operands = 3 : i64, tpu.core_type = #tpu.core_type<tc>, window_params = [{transform_indices = @transform_0, window_bounds = array<i64: 1, 16, 16, 128>}, {pipeline_mode = #tpu.pipeline_mode<synchronous>, transform_indices = @transform_1, window_bounds = array<i64: 1, 128>}, {pipeline_mode = #tpu.pipeline_mode<synchronous>, transform_indices = @transform_2, window_bounds = array<i64: 1, 128>}, {pipeline_mode = #tpu.pipeline_mode<synchronous>, transform_indices = @transform_3, window_bounds = array<i64: 1152, 128>}, {pipeline_mode = #tpu.pipeline_mode<synchronous>, transform_indices = @transform_4, window_bounds = array<i64: 1, 128>}, {pipeline_mode = #tpu.pipeline_mode<synchronous>, transform_indices = @transform_5, window_bounds = array<i64: 1, 128>}, {pipeline_mode = #tpu.pipeline_mode<synchronous>, transform_indices = @transform_6, window_bounds = array<i64: 1, 128>}, {pipeline_mode = #tpu.pipeline_mode<synchronous>, transform_indices = @transform_7, window_bounds = array<i64: 1152, 128>}, {pipeline_mode = #tpu.pipeline_mode<synchronous>, transform_indices = @transform_8, window_bounds = array<i64: 1, 128>}, {pipeline_mode = #tpu.pipeline_mode<synchronous>, transform_indices = @transform_9, window_bounds = array<i64: 1, 128>}, {transform_indices = @transform_10, window_bounds = array<i64: 1, 16, 16, 128>}]} {
    %cst = arith.constant 0.000000e+00 : bf16
    %0 = vector.broadcast %cst : bf16 to vector<1x40x128xbf16>
    %cst_0 = arith.constant 0.000000e+00 : bf16
    %1 = vector.broadcast %cst_0 : bf16 to vector<18x1x128xbf16>
    %c0 = arith.constant 0 : index
    %c0_1 = arith.constant 0 : index
    %c0_2 = arith.constant 0 : index
    %2 = vector.load %arg12[%c0, %c0_1, %c0_2] : memref<18x40x128xbf16, #tpu.memory_space<vmem>>, vector<1x40x128xbf16>
    tpu.vector_store %arg12[%c0, %c0_1, %c0_2], %0 {strides = array<i32>} : memref<18x40x128xbf16, #tpu.memory_space<vmem>>, vector<1x40x128xbf16>,
    %c17 = arith.constant 17 : index
    %c0_3 = arith.constant 0 : index
    %c0_4 = arith.constant 0 : index
    %3 = vector.load %arg12[%c17, %c0_3, %c0_4] : memref<18x40x128xbf16, #tpu.memory_space<vmem>>, vector<1x40x128xbf16>
    tpu.vector_store %arg12[%c17, %c0_3, %c0_4], %0 {strides = array<i32>} : memref<18x40x128xbf16, #tpu.memory_space<vmem>>, vector<1x40x128xbf16>,
    %c0_5 = arith.constant 0 : index
    %c15 = arith.constant 15 : index
    %c0_6 = arith.constant 0 : index
    %4 = vector.load %arg12[%c0_5, %c15, %c0_6] : memref<18x40x128xbf16, #tpu.memory_space<vmem>>, vector<18x1x128xbf16>
    tpu.vector_store %arg12[%c0_5, %c15, %c0_6], %1 {strides = array<i32>} : memref<18x40x128xbf16, #tpu.memory_space<vmem>>, vector<18x1x128xbf16>,
    %c0_7 = arith.constant 0 : index
    %c32 = arith.constant 32 : index
    %c0_8 = arith.constant 0 : index
    %5 = vector.load %arg12[%c0_7, %c32, %c0_8] : memref<18x40x128xbf16, #tpu.memory_space<vmem>>, vector<18x1x128xbf16>
    tpu.vector_store %arg12[%c0_7, %c32, %c0_8], %1 {strides = array<i32>} : memref<18x40x128xbf16, #tpu.memory_space<vmem>>, vector<18x1x128xbf16>,
    %c0_9 = arith.constant 0 : index
    %c0_10 = arith.constant 0 : index
    %c0_11 = arith.constant 0 : index
    %6 = vector.load %arg13[%c0_9, %c0_10, %c0_11] : memref<18x40x128xbf16, #tpu.memory_space<vmem>>, vector<1x40x128xbf16>
    tpu.vector_store %arg13[%c0_9, %c0_10, %c0_11], %0 {strides = array<i32>} : memref<18x40x128xbf16, #tpu.memory_space<vmem>>, vector<1x40x128xbf16>,
    %c17_12 = arith.constant 17 : index
    %c0_13 = arith.constant 0 : index
    %c0_14 = arith.constant 0 : index
    %7 = vector.load %arg13[%c17_12, %c0_13, %c0_14] : memref<18x40x128xbf16, #tpu.memory_space<vmem>>, vector<1x40x128xbf16>
    tpu.vector_store %arg13[%c17_12, %c0_13, %c0_14], %0 {strides = array<i32>} : memref<18x40x128xbf16, #tpu.memory_space<vmem>>, vector<1x40x128xbf16>,
    %c0_15 = arith.constant 0 : index
    %c15_16 = arith.constant 15 : index
    %c0_17 = arith.constant 0 : index
    %8 = vector.load %arg13[%c0_15, %c15_16, %c0_17] : memref<18x40x128xbf16, #tpu.memory_space<vmem>>, vector<18x1x128xbf16>
    tpu.vector_store %arg13[%c0_15, %c15_16, %c0_17], %1 {strides = array<i32>} : memref<18x40x128xbf16, #tpu.memory_space<vmem>>, vector<18x1x128xbf16>,
    %c0_18 = arith.constant 0 : index
    %c32_19 = arith.constant 32 : index
    %c0_20 = arith.constant 0 : index
    %9 = vector.load %arg13[%c0_18, %c32_19, %c0_20] : memref<18x40x128xbf16, #tpu.memory_space<vmem>>, vector<18x1x128xbf16>
    tpu.vector_store %arg13[%c0_18, %c32_19, %c0_20], %1 {strides = array<i32>} : memref<18x40x128xbf16, #tpu.memory_space<vmem>>, vector<18x1x128xbf16>,
    %c0_21 = arith.constant 0 : index
    %c0_22 = arith.constant 0 : index
    %10 = vector.load %arg2[%c0_21, %c0_22] : memref<1x128xf32, #tpu.memory_space<vmem>>, vector<1x128xf32>
    %c0_23 = arith.constant 0 : index
    %c0_24 = arith.constant 0 : index
    %11 = vector.load %arg3[%c0_23, %c0_24] : memref<1x128xf32, #tpu.memory_space<vmem>>, vector<1x128xf32>
    %c0_25 = arith.constant 0 : index
    %c0_26 = arith.constant 0 : index
    %12 = vector.load %arg5[%c0_25, %c0_26] : memref<1x128xf32, #tpu.memory_space<vmem>>, vector<1x128xf32>
    %c0_27 = arith.constant 0 : index
    %c0_28 = arith.constant 0 : index
    %13 = vector.load %arg6[%c0_27, %c0_28] : memref<1x128xf32, #tpu.memory_space<vmem>>, vector<1x128xf32>
    %c0_29 = arith.constant 0 : index
    %c0_30 = arith.constant 0 : index
    %14 = vector.load %arg9[%c0_29, %c0_30] : memref<1x128xf32, #tpu.memory_space<vmem>>, vector<1x128xf32>
    %c0_31 = arith.constant 0 : index
    %c0_32 = arith.constant 0 : index
    %15 = vector.load %arg10[%c0_31, %c0_32] : memref<1x128xf32, #tpu.memory_space<vmem>>, vector<1x128xf32>
    %c0_33 = arith.constant 0 : index
    %c0_34 = arith.constant 0 : index
    %16 = vector.load %arg7[%c0_33, %c0_34] : memref<1x128xf32, #tpu.memory_space<vmem>>, vector<1x128xf32>
    %c0_35 = arith.constant 0 : index
    %c0_36 = arith.constant 0 : index
    %c0_37 = arith.constant 0 : index
    %c0_38 = arith.constant 0 : index
    %17 = vector.load %arg1[%c0_35, %c0_36, %c0_37, %c0_38] : memref<1x16x16x128xf32, #tpu.memory_space<vmem>>, vector<1x16x16x128xf32>
    %18 = vector.shape_cast %17 : vector<1x16x16x128xf32> to vector<16x16x128xf32>
    %19 = vector.shape_cast %10 : vector<1x128xf32> to vector<1x1x128xf32>
    %20 = vector.broadcast %19 : vector<1x1x128xf32> to vector<16x16x128xf32>
    %21 = arith.mulf %18, %20 : vector<16x16x128xf32>
    %22 = vector.shape_cast %11 : vector<1x128xf32> to vector<1x1x128xf32>
    %23 = vector.broadcast %22 : vector<1x1x128xf32> to vector<16x16x128xf32>
    %24 = arith.addf %21, %23 : vector<16x16x128xf32>
    %25 = arith.truncf %24 : vector<16x16x128xf32> to vector<16x16x128xbf16>
    %c1 = arith.constant 1 : index
    %c16 = arith.constant 16 : index
    %c0_39 = arith.constant 0 : index
    %26 = vector.load %arg12[%c1, %c16, %c0_39] : memref<18x40x128xbf16, #tpu.memory_space<vmem>>, vector<16x16x128xbf16>
    tpu.vector_store %arg12[%c1, %c16, %c0_39], %25 {strides = array<i32>} : memref<18x40x128xbf16, #tpu.memory_space<vmem>>, vector<16x16x128xbf16>,
    %c0_40 = arith.constant 0 : index
    %c15_41 = arith.constant 15 : index
    %c0_42 = arith.constant 0 : index
    %27 = vector.load %arg12[%c0_40, %c15_41, %c0_42] : memref<18x40x128xbf16, #tpu.memory_space<vmem>>, vector<16x16x128xbf16>
    %28 = vector.shape_cast %27 : vector<16x16x128xbf16> to vector<256x128xbf16>
    %c0_43 = arith.constant 0 : index
    %c0_44 = arith.constant 0 : index
    %c0_45 = arith.constant 0 : index
    %29 = vector.load %arg14[%c0_43, %c0_44, %c0_45] : memref<2x256x1152xbf16, #tpu.memory_space<vmem>>, vector<1x256x128xbf16>
    %30 = vector.shape_cast %29 : vector<1x256x128xbf16> to vector<256x128xbf16>
    %31 = vector.shape_cast %28 : vector<256x128xbf16> to vector<1x256x128xbf16>
    tpu.vector_store %arg14[%c0_43, %c0_44, %c0_45], %31 {strides = array<i32>} : memref<2x256x1152xbf16, #tpu.memory_space<vmem>>, vector<1x256x128xbf16>,
    %c0_46 = arith.constant 0 : index
    %c16_47 = arith.constant 16 : index
    %c0_48 = arith.constant 0 : index
    %32 = vector.load %arg12[%c0_46, %c16_47, %c0_48] : memref<18x40x128xbf16, #tpu.memory_space<vmem>>, vector<16x16x128xbf16>
    %33 = vector.shape_cast %32 : vector<16x16x128xbf16> to vector<256x128xbf16>
    %c0_49 = arith.constant 0 : index
    %c0_50 = arith.constant 0 : index
    %c128 = arith.constant 128 : index
    %34 = vector.load %arg14[%c0_49, %c0_50, %c128] : memref<2x256x1152xbf16, #tpu.memory_space<vmem>>, vector<1x256x128xbf16>
    %35 = vector.shape_cast %34 : vector<1x256x128xbf16> to vector<256x128xbf16>
    %36 = vector.shape_cast %33 : vector<256x128xbf16> to vector<1x256x128xbf16>
    tpu.vector_store %arg14[%c0_49, %c0_50, %c128], %36 {strides = array<i32>} : memref<2x256x1152xbf16, #tpu.memory_space<vmem>>, vector<1x256x128xbf16>,
    %c0_51 = arith.constant 0 : index
    %c17_52 = arith.constant 17 : index
    %c0_53 = arith.constant 0 : index
    %37 = vector.load %arg12[%c0_51, %c17_52, %c0_53] : memref<18x40x128xbf16, #tpu.memory_space<vmem>>, vector<16x16x128xbf16>
    %38 = vector.shape_cast %37 : vector<16x16x128xbf16> to vector<256x128xbf16>
    %c0_54 = arith.constant 0 : index
    %c0_55 = arith.constant 0 : index
    %c256 = arith.constant 256 : index
    %39 = vector.load %arg14[%c0_54, %c0_55, %c256] : memref<2x256x1152xbf16, #tpu.memory_space<vmem>>, vector<1x256x128xbf16>
    %40 = vector.shape_cast %39 : vector<1x256x128xbf16> to vector<256x128xbf16>
    %41 = vector.shape_cast %38 : vector<256x128xbf16> to vector<1x256x128xbf16>
    tpu.vector_store %arg14[%c0_54, %c0_55, %c256], %41 {strides = array<i32>} : memref<2x256x1152xbf16, #tpu.memory_space<vmem>>, vector<1x256x128xbf16>,
    %c1_56 = arith.constant 1 : index
    %c15_57 = arith.constant 15 : index
    %c0_58 = arith.constant 0 : index
    %42 = vector.load %arg12[%c1_56, %c15_57, %c0_58] : memref<18x40x128xbf16, #tpu.memory_space<vmem>>, vector<16x16x128xbf16>
    %43 = vector.shape_cast %42 : vector<16x16x128xbf16> to vector<256x128xbf16>
    %c0_59 = arith.constant 0 : index
    %c0_60 = arith.constant 0 : index
    %c384 = arith.constant 384 : index
    %44 = vector.load %arg14[%c0_59, %c0_60, %c384] : memref<2x256x1152xbf16, #tpu.memory_space<vmem>>, vector<1x256x128xbf16>
    %45 = vector.shape_cast %44 : vector<1x256x128xbf16> to vector<256x128xbf16>
    %46 = vector.shape_cast %43 : vector<256x128xbf16> to vector<1x256x128xbf16>
    tpu.vector_store %arg14[%c0_59, %c0_60, %c384], %46 {strides = array<i32>} : memref<2x256x1152xbf16, #tpu.memory_space<vmem>>, vector<1x256x128xbf16>,
    %c1_61 = arith.constant 1 : index
    %c16_62 = arith.constant 16 : index
    %c0_63 = arith.constant 0 : index
    %47 = vector.load %arg12[%c1_61, %c16_62, %c0_63] : memref<18x40x128xbf16, #tpu.memory_space<vmem>>, vector<16x16x128xbf16>
    %48 = vector.shape_cast %47 : vector<16x16x128xbf16> to vector<256x128xbf16>
    %c0_64 = arith.constant 0 : index
    %c0_65 = arith.constant 0 : index
    %c512 = arith.constant 512 : index
    %49 = vector.load %arg14[%c0_64, %c0_65, %c512] : memref<2x256x1152xbf16, #tpu.memory_space<vmem>>, vector<1x256x128xbf16>
    %50 = vector.shape_cast %49 : vector<1x256x128xbf16> to vector<256x128xbf16>
    %51 = vector.shape_cast %48 : vector<256x128xbf16> to vector<1x256x128xbf16>
    tpu.vector_store %arg14[%c0_64, %c0_65, %c512], %51 {strides = array<i32>} : memref<2x256x1152xbf16, #tpu.memory_space<vmem>>, vector<1x256x128xbf16>,
    %c1_66 = arith.constant 1 : index
    %c17_67 = arith.constant 17 : index
    %c0_68 = arith.constant 0 : index
    %52 = vector.load %arg12[%c1_66, %c17_67, %c0_68] : memref<18x40x128xbf16, #tpu.memory_space<vmem>>, vector<16x16x128xbf16>
    %53 = vector.shape_cast %52 : vector<16x16x128xbf16> to vector<256x128xbf16>
    %c0_69 = arith.constant 0 : index
    %c0_70 = arith.constant 0 : index
    %c640 = arith.constant 640 : index
    %54 = vector.load %arg14[%c0_69, %c0_70, %c640] : memref<2x256x1152xbf16, #tpu.memory_space<vmem>>, vector<1x256x128xbf16>
    %55 = vector.shape_cast %54 : vector<1x256x128xbf16> to vector<256x128xbf16>
    %56 = vector.shape_cast %53 : vector<256x128xbf16> to vector<1x256x128xbf16>
    tpu.vector_store %arg14[%c0_69, %c0_70, %c640], %56 {strides = array<i32>} : memref<2x256x1152xbf16, #tpu.memory_space<vmem>>, vector<1x256x128xbf16>,
    %c2 = arith.constant 2 : index
    %c15_71 = arith.constant 15 : index
    %c0_72 = arith.constant 0 : index
    %57 = vector.load %arg12[%c2, %c15_71, %c0_72] : memref<18x40x128xbf16, #tpu.memory_space<vmem>>, vector<16x16x128xbf16>
    %58 = vector.shape_cast %57 : vector<16x16x128xbf16> to vector<256x128xbf16>
    %c0_73 = arith.constant 0 : index
    %c0_74 = arith.constant 0 : index
    %c768 = arith.constant 768 : index
    %59 = vector.load %arg14[%c0_73, %c0_74, %c768] : memref<2x256x1152xbf16, #tpu.memory_space<vmem>>, vector<1x256x128xbf16>
    %60 = vector.shape_cast %59 : vector<1x256x128xbf16> to vector<256x128xbf16>
    %61 = vector.shape_cast %58 : vector<256x128xbf16> to vector<1x256x128xbf16>
    tpu.vector_store %arg14[%c0_73, %c0_74, %c768], %61 {strides = array<i32>} : memref<2x256x1152xbf16, #tpu.memory_space<vmem>>, vector<1x256x128xbf16>,
    %c2_75 = arith.constant 2 : index
    %c16_76 = arith.constant 16 : index
    %c0_77 = arith.constant 0 : index
    %62 = vector.load %arg12[%c2_75, %c16_76, %c0_77] : memref<18x40x128xbf16, #tpu.memory_space<vmem>>, vector<16x16x128xbf16>
    %63 = vector.shape_cast %62 : vector<16x16x128xbf16> to vector<256x128xbf16>
    %c0_78 = arith.constant 0 : index
    %c0_79 = arith.constant 0 : index
    %c896 = arith.constant 896 : index
    %64 = vector.load %arg14[%c0_78, %c0_79, %c896] : memref<2x256x1152xbf16, #tpu.memory_space<vmem>>, vector<1x256x128xbf16>
    %65 = vector.shape_cast %64 : vector<1x256x128xbf16> to vector<256x128xbf16>
    %66 = vector.shape_cast %63 : vector<256x128xbf16> to vector<1x256x128xbf16>
    tpu.vector_store %arg14[%c0_78, %c0_79, %c896], %66 {strides = array<i32>} : memref<2x256x1152xbf16, #tpu.memory_space<vmem>>, vector<1x256x128xbf16>,
    %c2_80 = arith.constant 2 : index
    %c17_81 = arith.constant 17 : index
    %c0_82 = arith.constant 0 : index
    %67 = vector.load %arg12[%c2_80, %c17_81, %c0_82] : memref<18x40x128xbf16, #tpu.memory_space<vmem>>, vector<16x16x128xbf16>
    %68 = vector.shape_cast %67 : vector<16x16x128xbf16> to vector<256x128xbf16>
    %c0_83 = arith.constant 0 : index
    %c0_84 = arith.constant 0 : index
    %c1024 = arith.constant 1024 : index
    %69 = vector.load %arg14[%c0_83, %c0_84, %c1024] : memref<2x256x1152xbf16, #tpu.memory_space<vmem>>, vector<1x256x128xbf16>
    %70 = vector.shape_cast %69 : vector<1x256x128xbf16> to vector<256x128xbf16>
    %71 = vector.shape_cast %68 : vector<256x128xbf16> to vector<1x256x128xbf16>
    tpu.vector_store %arg14[%c0_83, %c0_84, %c1024], %71 {strides = array<i32>} : memref<2x256x1152xbf16, #tpu.memory_space<vmem>>, vector<1x256x128xbf16>,
    %c0_85 = arith.constant 0 : index
    %c0_86 = arith.constant 0 : index
    %c0_87 = arith.constant 0 : index
    %72 = vector.load %arg14[%c0_85, %c0_86, %c0_87] : memref<2x256x1152xbf16, #tpu.memory_space<vmem>>, vector<1x256x1152xbf16>
    %73 = vector.shape_cast %72 : vector<1x256x1152xbf16> to vector<256x1152xbf16>
    %c0_88 = arith.constant 0 : index
    %c0_89 = arith.constant 0 : index
    %74 = vector.load %arg4[%c0_88, %c0_89] : memref<1152x128xbf16, #tpu.memory_space<vmem>>, vector<1152x128xbf16>
    %cst_90 = arith.constant dense<0.000000e+00> : vector<256x128xf32>
    %75 = tpu.matmul %73, %74, %cst_90 {dimension_numbers = #tpu.dot_dimension_numbers<[1], [0], [0], [1], [0, 0, 1, 1], [], []>} : vector<256x1152xbf16>, vector<1152x128xbf16>, vector<256x128xf32> -> vector<256x128xf32>
    %76 = vector.broadcast %12 : vector<1x128xf32> to vector<256x128xf32>
    %77 = arith.mulf %75, %76 : vector<256x128xf32>
    %78 = vector.broadcast %13 : vector<1x128xf32> to vector<256x128xf32>
    %79 = arith.addf %77, %78 : vector<256x128xf32>
    %cst_91 = arith.constant 0.000000e+00 : f32
    %80 = vector.broadcast %cst_91 : f32 to vector<256x128xf32>
    %81 = arith.cmpf oge, %79, %80 : vector<256x128xf32>
    %82 = vector.broadcast %16 : vector<1x128xf32> to vector<256x128xf32>
    %83 = arith.mulf %82, %79 : vector<256x128xf32>
    %84 = arith.select %81, %79, %83 : vector<256x128xi1>, vector<256x128xf32>
    %85 = vector.shape_cast %84 : vector<256x128xf32> to vector<16x16x128xf32>
    %86 = arith.truncf %85 : vector<16x16x128xf32> to vector<16x16x128xbf16>
    %c1_92 = arith.constant 1 : index
    %c16_93 = arith.constant 16 : index
    %c0_94 = arith.constant 0 : index
    %87 = vector.load %arg13[%c1_92, %c16_93, %c0_94] : memref<18x40x128xbf16, #tpu.memory_space<vmem>>, vector<16x16x128xbf16>
    tpu.vector_store %arg13[%c1_92, %c16_93, %c0_94], %86 {strides = array<i32>} : memref<18x40x128xbf16, #tpu.memory_space<vmem>>, vector<16x16x128xbf16>,
    %c0_95 = arith.constant 0 : index
    %c15_96 = arith.constant 15 : index
    %c0_97 = arith.constant 0 : index
    %88 = vector.load %arg13[%c0_95, %c15_96, %c0_97] : memref<18x40x128xbf16, #tpu.memory_space<vmem>>, vector<16x16x128xbf16>
    %89 = vector.shape_cast %88 : vector<16x16x128xbf16> to vector<256x128xbf16>
    %c0_98 = arith.constant 0 : index
    %c0_99 = arith.constant 0 : index
    %c0_100 = arith.constant 0 : index
    %90 = vector.load %arg14[%c0_98, %c0_99, %c0_100] : memref<2x256x1152xbf16, #tpu.memory_space<vmem>>, vector<1x256x128xbf16>
    %91 = vector.shape_cast %90 : vector<1x256x128xbf16> to vector<256x128xbf16>
    %92 = vector.shape_cast %89 : vector<256x128xbf16> to vector<1x256x128xbf16>
    tpu.vector_store %arg14[%c0_98, %c0_99, %c0_100], %92 {strides = array<i32>} : memref<2x256x1152xbf16, #tpu.memory_space<vmem>>, vector<1x256x128xbf16>,
    %c0_101 = arith.constant 0 : index
    %c16_102 = arith.constant 16 : index
    %c0_103 = arith.constant 0 : index
    %93 = vector.load %arg13[%c0_101, %c16_102, %c0_103] : memref<18x40x128xbf16, #tpu.memory_space<vmem>>, vector<16x16x128xbf16>
    %94 = vector.shape_cast %93 : vector<16x16x128xbf16> to vector<256x128xbf16>
    %c0_104 = arith.constant 0 : index
    %c0_105 = arith.constant 0 : index
    %c128_106 = arith.constant 128 : index
    %95 = vector.load %arg14[%c0_104, %c0_105, %c128_106] : memref<2x256x1152xbf16, #tpu.memory_space<vmem>>, vector<1x256x128xbf16>
    %96 = vector.shape_cast %95 : vector<1x256x128xbf16> to vector<256x128xbf16>
    %97 = vector.shape_cast %94 : vector<256x128xbf16> to vector<1x256x128xbf16>
    tpu.vector_store %arg14[%c0_104, %c0_105, %c128_106], %97 {strides = array<i32>} : memref<2x256x1152xbf16, #tpu.memory_space<vmem>>, vector<1x256x128xbf16>,
    %c0_107 = arith.constant 0 : index
    %c17_108 = arith.constant 17 : index
    %c0_109 = arith.constant 0 : index
    %98 = vector.load %arg13[%c0_107, %c17_108, %c0_109] : memref<18x40x128xbf16, #tpu.memory_space<vmem>>, vector<16x16x128xbf16>
    %99 = vector.shape_cast %98 : vector<16x16x128xbf16> to vector<256x128xbf16>
    %c0_110 = arith.constant 0 : index
    %c0_111 = arith.constant 0 : index
    %c256_112 = arith.constant 256 : index
    %100 = vector.load %arg14[%c0_110, %c0_111, %c256_112] : memref<2x256x1152xbf16, #tpu.memory_space<vmem>>, vector<1x256x128xbf16>
    %101 = vector.shape_cast %100 : vector<1x256x128xbf16> to vector<256x128xbf16>
    %102 = vector.shape_cast %99 : vector<256x128xbf16> to vector<1x256x128xbf16>
    tpu.vector_store %arg14[%c0_110, %c0_111, %c256_112], %102 {strides = array<i32>} : memref<2x256x1152xbf16, #tpu.memory_space<vmem>>, vector<1x256x128xbf16>,
    %c1_113 = arith.constant 1 : index
    %c15_114 = arith.constant 15 : index
    %c0_115 = arith.constant 0 : index
    %103 = vector.load %arg13[%c1_113, %c15_114, %c0_115] : memref<18x40x128xbf16, #tpu.memory_space<vmem>>, vector<16x16x128xbf16>
    %104 = vector.shape_cast %103 : vector<16x16x128xbf16> to vector<256x128xbf16>
    %c0_116 = arith.constant 0 : index
    %c0_117 = arith.constant 0 : index
    %c384_118 = arith.constant 384 : index
    %105 = vector.load %arg14[%c0_116, %c0_117, %c384_118] : memref<2x256x1152xbf16, #tpu.memory_space<vmem>>, vector<1x256x128xbf16>
    %106 = vector.shape_cast %105 : vector<1x256x128xbf16> to vector<256x128xbf16>
    %107 = vector.shape_cast %104 : vector<256x128xbf16> to vector<1x256x128xbf16>
    tpu.vector_store %arg14[%c0_116, %c0_117, %c384_118], %107 {strides = array<i32>} : memref<2x256x1152xbf16, #tpu.memory_space<vmem>>, vector<1x256x128xbf16>,
    %c1_119 = arith.constant 1 : index
    %c16_120 = arith.constant 16 : index
    %c0_121 = arith.constant 0 : index
    %108 = vector.load %arg13[%c1_119, %c16_120, %c0_121] : memref<18x40x128xbf16, #tpu.memory_space<vmem>>, vector<16x16x128xbf16>
    %109 = vector.shape_cast %108 : vector<16x16x128xbf16> to vector<256x128xbf16>
    %c0_122 = arith.constant 0 : index
    %c0_123 = arith.constant 0 : index
    %c512_124 = arith.constant 512 : index
    %110 = vector.load %arg14[%c0_122, %c0_123, %c512_124] : memref<2x256x1152xbf16, #tpu.memory_space<vmem>>, vector<1x256x128xbf16>
    %111 = vector.shape_cast %110 : vector<1x256x128xbf16> to vector<256x128xbf16>
    %112 = vector.shape_cast %109 : vector<256x128xbf16> to vector<1x256x128xbf16>
    tpu.vector_store %arg14[%c0_122, %c0_123, %c512_124], %112 {strides = array<i32>} : memref<2x256x1152xbf16, #tpu.memory_space<vmem>>, vector<1x256x128xbf16>,
    %c1_125 = arith.constant 1 : index
    %c17_126 = arith.constant 17 : index
    %c0_127 = arith.constant 0 : index
    %113 = vector.load %arg13[%c1_125, %c17_126, %c0_127] : memref<18x40x128xbf16, #tpu.memory_space<vmem>>, vector<16x16x128xbf16>
    %114 = vector.shape_cast %113 : vector<16x16x128xbf16> to vector<256x128xbf16>
    %c0_128 = arith.constant 0 : index
    %c0_129 = arith.constant 0 : index
    %c640_130 = arith.constant 640 : index
    %115 = vector.load %arg14[%c0_128, %c0_129, %c640_130] : memref<2x256x1152xbf16, #tpu.memory_space<vmem>>, vector<1x256x128xbf16>
    %116 = vector.shape_cast %115 : vector<1x256x128xbf16> to vector<256x128xbf16>
    %117 = vector.shape_cast %114 : vector<256x128xbf16> to vector<1x256x128xbf16>
    tpu.vector_store %arg14[%c0_128, %c0_129, %c640_130], %117 {strides = array<i32>} : memref<2x256x1152xbf16, #tpu.memory_space<vmem>>, vector<1x256x128xbf16>,
    %c2_131 = arith.constant 2 : index
    %c15_132 = arith.constant 15 : index
    %c0_133 = arith.constant 0 : index
    %118 = vector.load %arg13[%c2_131, %c15_132, %c0_133] : memref<18x40x128xbf16, #tpu.memory_space<vmem>>, vector<16x16x128xbf16>
    %119 = vector.shape_cast %118 : vector<16x16x128xbf16> to vector<256x128xbf16>
    %c0_134 = arith.constant 0 : index
    %c0_135 = arith.constant 0 : index
    %c768_136 = arith.constant 768 : index
    %120 = vector.load %arg14[%c0_134, %c0_135, %c768_136] : memref<2x256x1152xbf16, #tpu.memory_space<vmem>>, vector<1x256x128xbf16>
    %121 = vector.shape_cast %120 : vector<1x256x128xbf16> to vector<256x128xbf16>
    %122 = vector.shape_cast %119 : vector<256x128xbf16> to vector<1x256x128xbf16>
    tpu.vector_store %arg14[%c0_134, %c0_135, %c768_136], %122 {strides = array<i32>} : memref<2x256x1152xbf16, #tpu.memory_space<vmem>>, vector<1x256x128xbf16>,
    %c2_137 = arith.constant 2 : index
    %c16_138 = arith.constant 16 : index
    %c0_139 = arith.constant 0 : index
    %123 = vector.load %arg13[%c2_137, %c16_138, %c0_139] : memref<18x40x128xbf16, #tpu.memory_space<vmem>>, vector<16x16x128xbf16>
    %124 = vector.shape_cast %123 : vector<16x16x128xbf16> to vector<256x128xbf16>
    %c0_140 = arith.constant 0 : index
    %c0_141 = arith.constant 0 : index
    %c896_142 = arith.constant 896 : index
    %125 = vector.load %arg14[%c0_140, %c0_141, %c896_142] : memref<2x256x1152xbf16, #tpu.memory_space<vmem>>, vector<1x256x128xbf16>
    %126 = vector.shape_cast %125 : vector<1x256x128xbf16> to vector<256x128xbf16>
    %127 = vector.shape_cast %124 : vector<256x128xbf16> to vector<1x256x128xbf16>
    tpu.vector_store %arg14[%c0_140, %c0_141, %c896_142], %127 {strides = array<i32>} : memref<2x256x1152xbf16, #tpu.memory_space<vmem>>, vector<1x256x128xbf16>,
    %c2_143 = arith.constant 2 : index
    %c17_144 = arith.constant 17 : index
    %c0_145 = arith.constant 0 : index
    %128 = vector.load %arg13[%c2_143, %c17_144, %c0_145] : memref<18x40x128xbf16, #tpu.memory_space<vmem>>, vector<16x16x128xbf16>
    %129 = vector.shape_cast %128 : vector<16x16x128xbf16> to vector<256x128xbf16>
    %c0_146 = arith.constant 0 : index
    %c0_147 = arith.constant 0 : index
    %c1024_148 = arith.constant 1024 : index
    %130 = vector.load %arg14[%c0_146, %c0_147, %c1024_148] : memref<2x256x1152xbf16, #tpu.memory_space<vmem>>, vector<1x256x128xbf16>
    %131 = vector.shape_cast %130 : vector<1x256x128xbf16> to vector<256x128xbf16>
    %132 = vector.shape_cast %129 : vector<256x128xbf16> to vector<1x256x128xbf16>
    tpu.vector_store %arg14[%c0_146, %c0_147, %c1024_148], %132 {strides = array<i32>} : memref<2x256x1152xbf16, #tpu.memory_space<vmem>>, vector<1x256x128xbf16>,
    %c0_149 = arith.constant 0 : index
    %c0_150 = arith.constant 0 : index
    %c0_151 = arith.constant 0 : index
    %133 = vector.load %arg14[%c0_149, %c0_150, %c0_151] : memref<2x256x1152xbf16, #tpu.memory_space<vmem>>, vector<1x256x1152xbf16>
    %134 = vector.shape_cast %133 : vector<1x256x1152xbf16> to vector<256x1152xbf16>
    %c0_152 = arith.constant 0 : index
    %c0_153 = arith.constant 0 : index
    %135 = vector.load %arg8[%c0_152, %c0_153] : memref<1152x128xbf16, #tpu.memory_space<vmem>>, vector<1152x128xbf16>
    %cst_154 = arith.constant dense<0.000000e+00> : vector<256x128xf32>
    %136 = tpu.matmul %134, %135, %cst_154 {dimension_numbers = #tpu.dot_dimension_numbers<[1], [0], [0], [1], [0, 0, 1, 1], [], []>} : vector<256x1152xbf16>, vector<1152x128xbf16>, vector<256x128xf32> -> vector<256x128xf32>
    %137 = vector.broadcast %14 : vector<1x128xf32> to vector<256x128xf32>
    %138 = arith.mulf %136, %137 : vector<256x128xf32>
    %139 = vector.broadcast %15 : vector<1x128xf32> to vector<256x128xf32>
    %140 = arith.addf %138, %139 : vector<256x128xf32>
    %141 = vector.shape_cast %140 : vector<256x128xf32> to vector<16x16x128xf32>
    %c0_155 = arith.constant 0 : index
    %c0_156 = arith.constant 0 : index
    %c0_157 = arith.constant 0 : index
    %c0_158 = arith.constant 0 : index
    %142 = vector.load %arg1[%c0_155, %c0_156, %c0_157, %c0_158] : memref<1x16x16x128xf32, #tpu.memory_space<vmem>>, vector<1x16x16x128xf32>
    %143 = vector.shape_cast %142 : vector<1x16x16x128xf32> to vector<16x16x128xf32>
    %144 = arith.addf %141, %143 : vector<16x16x128xf32>
    %c0_159 = arith.constant 0 : index
    %c0_160 = arith.constant 0 : index
    %c0_161 = arith.constant 0 : index
    %c0_162 = arith.constant 0 : index
    %145 = vector.load %arg11[%c0_159, %c0_160, %c0_161, %c0_162] : memref<1x16x16x128xf32, #tpu.memory_space<vmem>>, vector<1x16x16x128xf32>
    %146 = vector.shape_cast %145 : vector<1x16x16x128xf32> to vector<16x16x128xf32>
    %147 = vector.shape_cast %144 : vector<16x16x128xf32> to vector<1x16x16x128xf32>
    tpu.vector_store %arg11[%c0_159, %c0_160, %c0_161, %c0_162], %147 {strides = array<i32>} : memref<1x16x16x128xf32, #tpu.memory_space<vmem>>, vector<1x16x16x128xf32>,
    return
  }
  func.func @transform_0(%arg0: i32) -> (i32, i32, i32, i32) {
    %c0_i32 = arith.constant 0 : i32
    %c0_i32_0 = arith.constant 0 : i32
    %c0_i32_1 = arith.constant 0 : i32
    %c0_i32_2 = arith.constant 0 : i32
    return %arg0, %c0_i32, %c0_i32_0, %c0_i32_1 : i32, i32, i32, i32
  }
  func.func @transform_1(%arg0: i32) -> (i32, i32) {
    %c0_i32 = arith.constant 0 : i32
    %c0_i32_0 = arith.constant 0 : i32
    %c0_i32_1 = arith.constant 0 : i32
    return %c0_i32, %c0_i32_0 : i32, i32
  }
  func.func @transform_2(%arg0: i32) -> (i32, i32) {
    %c0_i32 = arith.constant 0 : i32
    %c0_i32_0 = arith.constant 0 : i32
    %c0_i32_1 = arith.constant 0 : i32
    return %c0_i32, %c0_i32_0 : i32, i32
  }
  func.func @transform_3(%arg0: i32) -> (i32, i32) {
    %c0_i32 = arith.constant 0 : i32
    %c0_i32_0 = arith.constant 0 : i32
    %c0_i32_1 = arith.constant 0 : i32
    return %c0_i32, %c0_i32_0 : i32, i32
  }
  func.func @transform_4(%arg0: i32) -> (i32, i32) {
    %c0_i32 = arith.constant 0 : i32
    %c0_i32_0 = arith.constant 0 : i32
    %c0_i32_1 = arith.constant 0 : i32
    return %c0_i32, %c0_i32_0 : i32, i32
  }
  func.func @transform_5(%arg0: i32) -> (i32, i32) {
    %c0_i32 = arith.constant 0 : i32
    %c0_i32_0 = arith.constant 0 : i32
    %c0_i32_1 = arith.constant 0 : i32
    return %c0_i32, %c0_i32_0 : i32, i32
  }
  func.func @transform_6(%arg0: i32) -> (i32, i32) {
    %c0_i32 = arith.constant 0 : i32
    %c0_i32_0 = arith.constant 0 : i32
    %c0_i32_1 = arith.constant 0 : i32
    return %c0_i32, %c0_i32_0 : i32, i32
  }
  func.func @transform_7(%arg0: i32) -> (i32, i32) {
    %c0_i32 = arith.constant 0 : i32
    %c0_i32_0 = arith.constant 0 : i32
    %c0_i32_1 = arith.constant 0 : i32
    return %c0_i32, %c0_i32_0 : i32, i32
  }
  func.func @transform_8(%arg0: i32) -> (i32, i32) {
    %c0_i32 = arith.constant 0 : i32
    %c0_i32_0 = arith.constant 0 : i32
    %c0_i32_1 = arith.constant 0 : i32
    return %c0_i32, %c0_i32_0 : i32, i32
  }
  func.func @transform_9(%arg0: i32) -> (i32, i32) {
    %c0_i32 = arith.constant 0 : i32
    %c0_i32_0 = arith.constant 0 : i32
    %c0_i32_1 = arith.constant 0 : i32
    return %c0_i32, %c0_i32_0 : i32, i32
  }
  func.func @transform_10(%arg0: i32) -> (i32, i32, i32, i32) {
    %c0_i32 = arith.constant 0 : i32
    %c0_i32_0 = arith.constant 0 : i32
    %c0_i32_1 = arith.constant 0 : i32
    %c0_i32_2 = arith.constant 0 : i32
    return %arg0, %c0_i32, %c0_i32_0, %c0_i32_1 : i32, i32, i32, i32
  }
}

</mosaic_0001>

<bundles_post_ra>
// kernel: tpu_custom_call.1
= control target key start
LH: loop header
LB: loop body
LE: loop exit
PB: predicated region body
PF: predicated region fallthrough
CT: control target
= control target key end

     0   :  { %15 = vsyncpa [#allocation6], 0  ;;  %s16780_s0 = inlined_call_operand.hbm [shape: f32[2,16,16,128], index: 0, kind: input, shape index: {}]   ;;  %s16781_s1 = inlined_call_operand.vmem [shape: f32[1,128], index: 1, kind: input, shape index: {}]   ;;  %s16782_s2 = inlined_call_operand.vmem [shape: f32[1,128], index: 2, kind: input, shape index: {}]   ;;  %s16783_s3 = inlined_call_operand.hbm [shape: bf16[1152,128], index: 3, kind: input, shape index: {}]   ;;  %s16784_s4 = inlined_call_operand.vmem [shape: f32[1,128], index: 4, kind: input, shape index: {}]   ;;  %s16785_s5 = inlined_call_operand.vmem [shape: f32[1,128], index: 5, kind: input, shape index: {}]   ;;  %s16786_s6 = inlined_call_operand.vmem [shape: f32[1,128], index: 6, kind: input, shape index: {}]   ;;  %s16787_s7 = inlined_call_operand.hbm [shape: bf16[1152,128], index: 7, kind: input, shape index: {}]   ;;  %s16788_s8 = inlined_call_operand.vmem [shape: f32[1,128], index: 8, kind: input, shape index: {}]   ;;  %s16789_s9 = inlined_call_operand.vmem [shape: f32[1,128], index: 9, kind: input, shape index: {}]   ;;  %s16790_s10 = inlined_call_operand.hbm [shape: f32[2,16,16,128], index: 10, kind: output, shape index: {}]  }
   0x1   :  { %17 = vsyncpa [#allocation6 + $0x1], 0 }
   0x2   :  { %18 = vsyncpa [#allocation9], 0 }
   0x3   :  { %19 = vsyncpa [#allocation7], 0 }
   0x4   :  { %21 = vsyncpa [#allocation7 + $0x1], 0  ;;  %s13784_s13 = smov 0   ;;  %s13786_s14 = smov 0  }
   0x5   :  { %s13788_s15 = smov 0   ;;  %s13790_s16 = smov 0  }
   0x6 LB: > { %16804 = sst [smem:[#allocation15_spill]] %s13704_s13  ;;  %s13805_s17 = sadd.s32 4294967295, %s13716_s16   ;;  %s13716_s16 = sphi %s13790_s16, %s16949_s16   ;;  %s13712_s15 = sphi %s13788_s15, %s16948_s15   ;;  %s13708_s14 = sphi %s13786_s14, %s16947_s14   ;;  %s13704_s13 = sphi %s13784_s13, %s16946_s13  }
   0x7   : > { %s11418_s18 = sadd.s32 4294967294, %s13716_s16   ;;  %p47_p0 = scmp.ne.s32.totalorder %s13708_s14, %s13704_s13 }
   0x8   : > { %p16791_p1 = scmp.eq.s32.totalorder %s13805_s17, 0  ;;  %p266_p3 = scmp.eq.s32.totalorder %s11418_s18, 1 }
   0x9   : > { %p11419_p5 = scmp.ge.s32.totalorder %s13716_s16, 1  ;;  %p273_p7 = scmp.lt.s32.totalorder %s13716_s16, 3 }
   0xa   : > { %p13814_p4 = por %p16791_p1, %p47_p0  ;;  %p13819_p6 = por %p266_p3, %p47_p0 }
   0xb   : > { %p13824_p8 = pnand %p11419_p5, %p273_p7  ;;  %s13718_s22 = smov [#allocation8]  }
   0xc   : > { %s16805_s19 = scalar_select %p13814_p4, 1, 0 }
   0xd   : > { %s16806_s20 = scalar_select %p13819_p6, 1, 0 }
   0xe   : > { %s291_s23 = sshll.u32 %s13718_s22, 4  ;;  %p13249_p9 = pneg %p13824_p8  ;;  %s13828_s23 = int_to_ptr.vmem [resolvable:$true] %s291_s23 }
   0xf   : > { %16807 = sst [smem:[#allocation16_spill]] %s16806_s20  ;;  %s13719_s25 = smov [#allocation10]  }
  0x10   : > { %p13835_p11 = pnand %p13249_p9, %p16791_p1  ;;  %s313_s26 = sshll.u32 %s13719_s25, 4  ;;  %s13839_s26 = int_to_ptr.vmem [resolvable:$true] %s313_s26 }
  0x11   : > { %s13560_s29 = scalar_lea.hbm %s16783_s3, 9216 }
  0x12   : > { %p13561_p12 = scmp.ne.s32.totalorder %s16783_s3, %s13560_s29  ;;  %p13562_p13 = pneg %p13835_p11 }
  0x13   : > { %p13567_p5 = scmp.lt.u32.totalorder %s13560_s29, %s16783_s3 }
  0x14   : > { %p13563_p0 = pnand %p13562_p13, %p13561_p12 }
  0x16   : > { %p13564_p3 = pneg %p13563_p0 }
  0x18   : > { %p13569_p7 = pnand %p13567_p5, %p13564_p3 }
  0x1a   : > { %13572 = shalt.err (!%p13569_p7)
}
  0x1b   : > { %s13573_s22 = scalar_lea.vmem %s13828_s23, 9216  ;;  %p13581_p2 = scmp.lt.s32.totalorder %s13828_s23, %s13828_s23 }
  0x1c   : > { %p13574_p9 = scmp.ne.s32.totalorder %s13828_s23, %s13573_s22  ;;  %p13582_p12 = scmp.lt.s32.totalorder %s13573_s22, %s13573_s22 }
  0x1e   : > { %p13576_p10 = pnand %p13574_p9, %p13562_p13  ;;  %p13583_p0 = por %p13582_p12, %p13581_p2 }
  0x20   : > { %p13577_p1 = pneg %p13576_p10 }
  0x22   : > { %p13584_p6 = pnand %p13583_p0, %p13577_p1 }
  0x24   : > { %13587 = shalt.err (!%p13584_p6)
}
  0x25   : > { %s13720_s25 = smov 64   ;;  %s13721_s27 = smov 4  }
  0x26   : > { %13252 = dma.hbm_to_vmem [thread:$0]  (!%p13835_p11), %s16783_s3, 9216, %s13828_s23, [#allocation9], %s13720_s25, %s13720_s25, %s13721_s27  }
  0x27   : > { %s13588_s12 = scalar_lea.hbm %s16787_s7, 9216 }
  0x28   : > { %p13589_p2 = scmp.ne.s32.totalorder %s16787_s7, %s13588_s12  ;;  %p13595_p10 = scmp.lt.u32.totalorder %s13588_s12, %s16787_s7 }
  0x2a   : > { %p13591_p1 = pnand %p13589_p2, %p13562_p13 }
  0x2c   : > { %p13592_p6 = pneg %p13591_p1 }
  0x2e   : > { %p13597_p3 = pnand %p13595_p10, %p13592_p6 }
  0x30   : > { %13600 = shalt.err (!%p13597_p3)
}
  0x31   : > { %s13601_s23 = scalar_lea.vmem %s13839_s26, 9216  ;;  %p13609_p12 = scmp.lt.s32.totalorder %s13839_s26, %s13839_s26 }
  0x32   : > { %p13602_p5 = scmp.ne.s32.totalorder %s13839_s26, %s13601_s23  ;;  %p13610_p0 = scmp.lt.s32.totalorder %s13601_s23, %s13601_s23 }
  0x34   : > { %p13604_p7 = pnand %p13602_p5, %p13562_p13  ;;  %p13611_p2 = por %p13610_p0, %p13609_p12 }
  0x36   : > { %p13605_p9 = pneg %p13604_p7 }
  0x38   : > { %p13612_p1 = pnand %p13611_p2, %p13605_p9 }
  0x3a   : > { %13615 = shalt.err (!%p13612_p1)
}
  0x3b   : > { %13255 = dma.hbm_to_vmem [thread:$0]  (!%p13835_p11), %s16787_s7, 9216, %s13839_s26, [#allocation9], %s13720_s25, %s13720_s25, %s13721_s27  }
  0x3c   : > { %s13894_s28 = sadd.s32 1, %s13716_s16   ;;  %s34_s24 = sadd.s32 1, %s13712_s15 }
  0x3d   : > { %s31_s29 = ssub.s32 %s13716_s16, %s13894_s28  ;;  %p41_p13 = scmp.ne.s32.totalorder %s13712_s15, %s13708_s14 }
  0x3e   : > { %p32_p6 = scmp.eq.s32.totalorder %s31_s29, 0  ;;  %p42_p10 = scmp.eq.s32.totalorder %s13716_s16, 0 }
  0x3f   : > { %p16810_p3 = scmp.eq.s32.totalorder %s13805_s17, 1  ;;  %p13266_p7 = scmp.lt.s32.totalorder %s13716_s16, 2 }
  0x40   : > { %s13910_s11 = scalar_select %p32_p6, %s13712_s15, %s34_s24  }
  0x41   : > { %p13904_p5 = por %p16810_p3, %p41_p13  ;;  %p43_p9 = por %p42_p10, %p41_p13 }
  0x42   : > { %s333_s12 = sand.u32 1, %s13712_s15   ;;  %s12035_s26 = sshll.u32 %s13716_s16, 12 }
  0x43   : > { %s16811_s30 = scalar_select %p13904_p5, 1, 0 }
  0x44   : > { %s11423_s18 = sshll.u32 %s333_s12, 8  ;;  %s13917_s22 = scalar_lea.hbm %s16780_s0, %s12035_s26 }
  0x45   : > { %s337_s23 = scalar_lea.vmem [#allocation5], %s11423_s18  ;;  %p13921_p11 = pnand %p13266_p7, %p43_p9 }
  0x46   : > { %s344_s13 = sshll.u32 %s337_s23, 4  ;;  %s13925_s24 = scalar_lea.sflag [#allocation6], %s333_s12  ;;  %s13919_s13 = int_to_ptr.vmem [resolvable:$true] %s344_s13 }
  0x47   : > { %s13616_s29 = scalar_lea.hbm %s13917_s22, 4096  ;;  %p13618_p0 = pneg %p13921_p11 }
  0x48   : > { %p13617_p12 = scmp.ne.s32.totalorder %s13917_s22, %s13616_s29  ;;  %s13621_s25 = scalar_lea.hbm %s16780_s0, 8192 }
  0x49   : > { %p13622_p13 = scmp.lt.u32.totalorder %s13917_s22, %s16780_s0  ;;  %p13623_p6 = scmp.lt.u32.totalorder %s13621_s25, %s13616_s29 }
  0x4a   : > { %p13619_p2 = pnand %p13618_p0, %p13617_p12  ;;  %p13625_p3 = scmp.lt.u32.totalorder %s13616_s29, %s13917_s22 }
  0x4b   : > { %p13624_p10 = por %p13623_p6, %p13622_p13 }
  0x4c   : > { %p13620_p1 = pneg %p13619_p2 }
  0x4d   : > { %p13626_p7 = por %p13625_p3, %p13624_p10 }
  0x4f   : > { %p13627_p9 = pnand %p13626_p7, %p13620_p1 }
  0x51   : > { %13630 = shalt.err (!%p13627_p9)
}
  0x52   : > { %s13631_s12 = scalar_lea.vmem %s13919_s13, 4096  ;;  %s13722_s18 = smov [#allocation5]  }
  0x53   : > { %p13632_p12 = scmp.ne.s32.totalorder %s13919_s13, %s13631_s12  ;;  %s13636_s26 = sshll.u32 %s13722_s18, 4  ;;  %s13637_s26 = int_to_ptr.vmem [resolvable:$false] %s13636_s26 }
  0x54   : > { %s13638_s27 = scalar_lea.vmem %s13637_s26, 8192  ;;  %p13639_p4 = scmp.lt.s32.totalorder %s13919_s13, %s13637_s26 }
  0x55   : > { %p13634_p2 = pnand %p13632_p12, %p13618_p0  ;;  %p13640_p13 = scmp.lt.s32.totalorder %s13638_s27, %s13631_s12 }
  0x57   : > { %p13635_p5 = pneg %p13634_p2  ;;  %p13641_p6 = por %p13640_p13, %p13639_p4 }
  0x59   : > { %p13642_p10 = pnand %p13641_p6, %p13635_p5 }
  0x5b   : > { %13645 = shalt.err (!%p13642_p10)
}
  0x5c   : > { %s13723_s29 = smov 128   ;;  %s13724_s25 = smov 8  }
  0x5d   : > { %13259 = dma.hbm_to_vmem [thread:$0]  (!%p13921_p11), %s13917_s22, 4096, %s13919_s13, %s13925_s24, %s13723_s29, %s13723_s29, %s13724_s25  }
  0x5e   : > { %356 = sbr.rel (%p13824_p8) target bundleno = 1384 (0x568), region = 60 }
  0x65   : > { %s13956_s23 = sand.u32 1, %s13708_s14   ;;  %p16813_p4 = scmp.ne.s32.totalorder %s16805_s19, 0 }
  0x66   : > { %s11427_s12 = sshll.u32 %s13956_s23, 8  ;;  %s359_s18 = scalar_lea.sflag [#allocation6], %s13956_s23 }
  0x67   : > { %s13962_s26 = scalar_lea.vmem [#allocation5], %s11427_s12 }
  0x68   : > { %13691 = dma.done.wait (%p16813_p4), %s359_s18, 4096  }
  0x69   : > { %13693 = vsyncadd (%p16813_p4), %s359_s18, 4294963200  ;;  %p16814_p5 = scmp.eq.s32.totalorder %s13805_s17, 0 }
  0x6b   : > { %13695 = dma.done.wait (%p16814_p5), [#allocation9], 18432   ;;  %p16815_p8 = pmov %p16814_p5 }
  0x6c   : > { %v13725_v0 = vmov 0   ;;  %v13311_v1 = vld [vmem:[#allocation8 + $0x40] sm:$0xff]   ;;  %v13315_v5 = vld [vmem:[#allocation8 + $0x48] sm:$0xff]   ;;  %v13319_v9 = vld [vmem:[#allocation8 + $0x50] sm:$0xff]   ;;  %vm420_vm0 = vsmask.f32 7950 }
  0x6d   : > { %13697 = vsyncadd (%p16815_p8), [#allocation9], 4294948864  ;;  %410 = vst [vmem:[#allocation2 + $0x8] sm:$0xf] %v13725_v0  ;;  %v13312_v2 = vld [vmem:[#allocation8 + $0xc0] sm:$0xff]   ;;  %12197 = vmatprep.subr.bf16.mxu0 %v13311_v1  ;;  %v13316_v6 = vld [vmem:[#allocation8 + $0xc8] sm:$0xff]  }
  0x6e   : > { %411 = vst [vmem:[#allocation2 + $0xc] sm:$0xf] %v13725_v0  ;;  %409 = vst [vmem:[#allocation2 + $0x4] sm:$0xf] %v13725_v0  ;;  %v13313_v3 = vld [vmem:[#allocation8] sm:$0xff]   ;;  %12309 = vmatprep.subr.bf16.mxu1 %v13312_v2  ;;  %v13317_v7 = vld [vmem:[#allocation8 + $0x8] sm:$0xff]  }
  0x6f   : > { %412 = vst [vmem:[#allocation2 + $0x10] sm:$0xf] %v13725_v0  ;;  %415 = vst [vmem:[#allocation2 + $0x158] sm:$0xf] %v13725_v0  ;;  %v13314_v4 = vld [vmem:[#allocation8 + $0x80] sm:$0xff]   ;;  %12198 = vmatpush3.bf16.msra.mxu0 %v13313_v3  ;;  %v13318_v8 = vld [vmem:[#allocation8 + $0x88] sm:$0xff]  }
  0x70   : > { %416 = vst [vmem:[#allocation2 + $0x15c] sm:$0xf] %v13725_v0  ;;  %417 = vst [vmem:[#allocation2 + $0x160] sm:$0xf] %v13725_v0  ;;  %12310 = vmatpush3.bf16.msra.mxu1 %v13314_v4  ;;  %12199 = vmatprep.subr.bf16.mxu0 %v13315_v5  ;;  %v13320_v10 = vld [vmem:[#allocation8 + $0xd0] sm:$0xff]   ;;  %v13323_v13 = vld [vmem:[#allocation8 + $0x58] sm:$0xff]  }
  0x71   : > { %418 = vst [vmem:[#allocation2 + $0x164] sm:$0xf] %v13725_v0  ;;  %534 = vst [vmem:[#allocation3 + $0x4] sm:$0xf] %v13725_v0  ;;  %12311 = vmatprep.subr.bf16.mxu1 %v13316_v6  ;;  %v13321_v11 = vld [vmem:[#allocation8 + $0x10] sm:$0xff]   ;;  %v13324_v14 = vld [vmem:[#allocation8 + $0xd8] sm:$0xff]  }
  0x72   : > { %535 = vst [vmem:[#allocation3 + $0x8] sm:$0xf] %v13725_v0  ;;  %536 = vst [vmem:[#allocation3 + $0xc] sm:$0xf] %v13725_v0  ;;  %v13322_v12 = vld [vmem:[#allocation8 + $0x90] sm:$0xff]   ;;  %v13325_v15 = vld [vmem:[#allocation8 + $0x18] sm:$0xff]  }
  0x73   : > { %537 = vst [vmem:[#allocation3 + $0x10] sm:$0xf] %v13725_v0  ;;  %540 = vst [vmem:[#allocation3 + $0x158] sm:$0xf] %v13725_v0  ;;  %12200 = vmatpush3.bf16.msra.mxu0 %v13317_v7  ;;  %v13326_v16 = vld [vmem:[#allocation8 + $0x98] sm:$0xff]   ;;  %v13327_v17 = vld [vmem:[#allocation8 + $0x60] sm:$0xff]  }
  0x74   : > { %541 = vst [vmem:[#allocation3 + $0x15c] sm:$0xf] %v13725_v0  ;;  %542 = vst [vmem:[#allocation3 + $0x160] sm:$0xf] %v13725_v0  ;;  %12312 = vmatpush3.bf16.msra.mxu1 %v13318_v8  ;;  %12201 = vmatprep.subr.bf16.mxu0 %v13319_v9  ;;  %vm477_vm1 = vsmask.f32 256 }
  0x75   : > { %543 = vst [vmem:[#allocation3 + $0x164] sm:$0xf] %v13725_v0  ;;  %12313 = vmatprep.subr.bf16.mxu1 %v13320_v10  ;;  %v13328_v18 = vld [vmem:[#allocation8 + $0xe0] sm:$0xff]   ;;  %v13331_v21 = vld [vmem:[#allocation8 + $0x68] sm:$0xff]   ;;  %vm419_vm2 = vcmask 1043459   ;;  %v16816_v25 = vmov 0 }
  0x76   : > { %v13329_v19 = vld [vmem:[#allocation8 + $0x20] sm:$0xff]   ;;  %v13332_v22 = vld [vmem:[#allocation8 + $0xe8] sm:$0xff]   ;;  %vm13973_vm3 = vmand %vm419_vm2, %vm420_vm0  ;;  %vm476_vm4 = vcmask 1040384   ;;  %v16819_v29 = vmov 0  ;;  %vm976_vm6 = vsmask.f32 4368 }
  0x77   : > { %12202 = vmatpush3.bf16.msra.mxu0 %v13321_v11  ;;  %v13330_v20 = vld [vmem:[#allocation8 + $0xa0] sm:$0xff]   ;;  %v13333_v23 = vld [vmem:[#allocation8 + $0x28] sm:$0xff]   ;;  %v16817_v25 = vsel %vm13973_vm3, 4294967295, %v16816_v25  ;;  %v13335_v26 = vld [vmem:[#allocation8 + $0x70] sm:$0xff]   ;;  %vm1602_vm7 = vsmask.f32 3328 }
  0x78   : > { %12314 = vmatpush3.bf16.msra.mxu1 %v13322_v12  ;;  %12203 = vmatprep.subr.bf16.mxu0 %v13323_v13  ;;  %v13334_v24 = vld [vmem:[#allocation8 + $0xa8] sm:$0xff]   ;;  %16818 = vst [vmem:[#allocation17_spill] sm:$0xff] %v16817_v25  ;;  %v13336_v27 = vld [vmem:[#allocation8 + $0xf0] sm:$0xff]   ;;  %vm13978_vm5 = vmand %vm476_vm4, %vm477_vm1  ;;  %vm1603_vm8 = vsmask.f32 7440  ;;  %v16822_v7 = vmov 0 }
  0x79   : > { %12315 = vmatprep.subr.bf16.mxu1 %v13324_v14  ;;  %v13337_v28 = vld [vmem:[#allocation8 + $0x30] sm:$0xff]   ;;  %v16820_v29 = vsel %vm13978_vm5, 4294967295, %v16819_v29  ;;  %v13339_v31 = vld [vmem:[#allocation8 + $0x78] sm:$0xff]   ;;  %v425_v36 = vld [vmem:[#allocation2 + $0x18] sm:$0x8]  ;;  %s16579_s25 = scalar_lea.vmem [#allocation11], %s11427_s12 }
  0x7a   : > { %16821 = vst [vmem:[#allocation18_spill] sm:$0xff] %v16820_v29  ;;  %v13338_v30 = vld [vmem:[#allocation8 + $0xb0] sm:$0xff]   ;;  %v13340_v32 = vld [vmem:[#allocation8 + $0xf8] sm:$0xff]   ;;  %v426_v39 = vsel %vm13973_vm3, 0, %v425_v36  ;;  %v659_v40 = vld [vmem:[%s13962_s26] sm:$0xff]  ;;  %s12100_s12 = sshll.u32 %s13805_s17, 12 }
  0x7b   : > { %12204 = vmatpush3.bf16.msra.mxu0 %v13325_v15  ;;  %v13341_v33 = vld [vmem:[#allocation8 + $0x38] sm:$0xff]   ;;  %v13985_v37 = vld [vmem:[%s16781_s1] ss:$0 sm:$0xff]  ;;  %v660_v41 = vld [vmem:[%s13962_s26 + $0x8] sm:$0xff]  ;;  %427 = vst [vmem:[#allocation2 + $0x18] sm:$0x8] %v426_v39  ;;  %s16731_s22 = scalar_lea.hbm %s16790_s10, %s12100_s12 }
  0x7c   : > { %12316 = vmatpush3.bf16.msra.mxu1 %v13326_v16  ;;  %12205 = vmatprep.subr.bf16.mxu0 %v13327_v17  ;;  %v13342_v34 = vld [vmem:[#allocation8 + $0xb8] sm:$0xff]   ;;  %v13990_v38 = vld [vmem:[%s16782_s2] ss:$0 sm:$0xff]  ;;  %v422_v42 = vld [vmem:[#allocation2 + $0x4] sm:$0x8]  ;;  %v697_v43 = vmul.f32 %v13985_v37, %v659_v40  ;;  %v698_v44 = vmul.f32 %v13985_v37, %v660_v41  ;;  %s11326_s18 = sshll.u32 %s16579_s25, 4  ;;  %s16733_s18 = int_to_ptr.vmem [resolvable:$true] %s11326_s18 }
  0x7d   : > { %12317 = vmatprep.subr.bf16.mxu1 %v13328_v18  ;;  %v13343_v35 = vld [vmem:[#allocation2 + $0x8] sm:$0xff]   ;;  %v423_v45 = vsel %vm13973_vm3, 0, %v422_v42  ;;  %v13344_v48 = vld [vmem:[#allocation8 + $0x140] sm:$0xff]   ;;  %vm14006_vm9 = vmor %vm477_vm1, %vm976_vm6  ;;  %s11313_s17 = scalar_lea.sflag [#allocation7], %s13956_s23  ;;  %p16941_p0 = scmp.ne.s32.totalorder %s16811_s30, 0 }
  0x7e   : > { %5094 = vmatprep.mubr.bf16.mxu0 %v13343_v35  ;;  %v929_v46 = vld [vmem:[#allocation2 + $0x8] sm:$0xf]  ;;  %v930_v47 = vld [vmem:[#allocation2 + $0xc] sm:$0xf]  ;;  %424 = vst [vmem:[#allocation2 + $0x4] sm:$0x8] %v423_v45  ;;  %v735_v53 = vadd.f32 %v13990_v38, %v697_v43  ;;  %v736_v54 = vadd.f32 %v13990_v38, %v698_v44  ;;  %vm14031_vm10 = vmor %vm1602_vm7, %vm1603_vm8 }
  0x7f   : > { %12206 = vmatpush3.bf16.msra.mxu0 %v13329_v19  ;;  %v984_v49 = vshrl.u32 %v929_v46, 16  ;;  %v993_v50 = vshrl.u32 %v930_v47, 16  ;;  %v996_v51 = vshll.u32 %v930_v47, 16  ;;  %v479_v52 = vld [vmem:[#allocation2 + $0x10] sm:$0x1]  ;;  %v987_v55 = vshll.u32 %v929_v46, 16 }
  0x80   : > { %12318 = vmatpush3.bf16.msra.mxu1 %v13330_v20  ;;  %12207 = vmatprep.subr.bf16.mxu0 %v13331_v21  ;;  %v480_v56 = vsel %vm13978_vm5, 0, %v479_v52  ;;  %v1554_v57 = vld [vmem:[#allocation2 + $0x8] sm:$0xf]  ;;  %v1555_v58 = vld [vmem:[#allocation2 + $0xc] sm:$0xf]  ;;  %v12036_v63 = vpack.c.bf16 %v735_v53, %v735_v53  ;;  %v12037_v0 = vpack.c.bf16 %v736_v54, %v736_v54  ;;  %v16823_v7 = vsel %vm14006_vm9, 4294967295, %v16822_v7 }
  0x81   : > { %12319 = vmatprep.subr.bf16.mxu1 %v13332_v22  ;;  %v986_v59 = vrot.slane %v984_v49, 7  ;;  %v995_v60 = vrot.slane %v993_v50, 7  ;;  %481 = vst [vmem:[#allocation2 + $0x10] sm:$0x1] %v480_v56  ;;  %v1606_v61 = vshrl.u32 %v1554_v57, 16  ;;  %v1609_v62 = vshll.u32 %v1554_v57, 16 }
  0x82   : > { %v1615_v1 = vshll.u32 %v1555_v58, 16  ;;  %v1619_v2 = vshrl.u32 %v1555_v58, 16  ;;  %v428_v6 = vld [vmem:[#allocation2 + $0x2c] sm:$0x8]  ;;  %896 = vst [vmem:[#allocation2 + $0x1c] sm:$0xf] %v12036_v63 }
  0x83   : > { %12208 = vmatpush3.bf16.msra.mxu0 %v13333_v23  ;;  %v991_v3 = vrot.slane %v986_v59, 4  ;;  %v998_v4 = vor.u32 %v996_v51, %v995_v60  ;;  %v1608_v5 = vrot.slane %v1606_v61, 4  ;;  %897 = vst [vmem:[#allocation2 + $0x20] sm:$0xf] %v12037_v0  ;;  %16824 = vst [vmem:[#allocation19_spill] sm:$0xff] %v16823_v7  ;;  %v1611_v8 = vrot.slane %v1609_v62, 5 }
  0x84   : > { %12320 = vmatpush3.bf16.msra.mxu1 %v13334_v24  ;;  %12209 = vmatprep.subr.bf16.mxu0 %v13335_v26  ;;  %v14010_v9 = vrot.slane %v1615_v1, 5  ;;  %v1621_v10 = vrot.slane %v1619_v2, 4  ;;  %v429_v11 = vsel %vm13973_vm3, 0, %v428_v6  ;;  %v661_v12 = vld [vmem:[%s13962_s26 + $0x10] sm:$0xff]  ;;  %v662_v13 = vld [vmem:[%s13962_s26 + $0x18] sm:$0xff]  ;;  %v989_v15 = vor.u32 %v987_v55, %v986_v59  ;;  %v13345_v47 = vld [vmem:[#allocation8 + $0x100] sm:$0xff]  }
  0x85   : > { %12321 = vmatprep.subr.bf16.mxu1 %v13336_v27  ;;  %v2069_v14 = vld [vmem:[#allocation2 + $0x18] sm:$0x8]  ;;  %430 = vst [vmem:[#allocation2 + $0x2c] sm:$0x8] %v429_v11  ;;  %v699_v16 = vmul.f32 %v13985_v37, %v661_v12  ;;  %v700_v17 = vmul.f32 %v13985_v37, %v662_v13  ;;  %v482_v19 = vld [vmem:[#allocation2 + $0x24] sm:$0x1]  ;;  %v1612_v22 = vor.u32 %v1611_v8, %v1608_v5 }
  0x86   : > { %v931_v18 = vld [vmem:[#allocation2 + $0x18] sm:$0x8]  ;;  %v2118_v20 = vshrl.u32 %v2069_v14, 16  ;;  %v928_v21 = vld [vmem:[#allocation2 + $0x4] sm:$0x8]  ;;  %v1622_v23 = vor.u32 %v1621_v10, %v14010_v9  ;;  %v999_v36 = vsel %vm14006_vm9, %v991_v3, %v998_v4  ;;  %s13726_s13 = smov [#allocation11]  }
  0x87   : > { %12210 = vmatpush3.bf16.msra.mxu0 %v13337_v28  ;;  %v1001_v24 = vshrl.u32 %v931_v18, 16  ;;  %v431_v26 = vld [vmem:[#allocation2 + $0x40] sm:$0x8]  ;;  %v979_v27 = vshrl.u32 %v928_v21, 16  ;;  %v737_v28 = vadd.f32 %v13990_v38, %v699_v16  ;;  %v1613_v41 = vrot.slane %v1612_v22, 4  ;;  %v13348_v58 = vld [vmem:[#allocation8 + $0x148] sm:$0xff]  }
  0x88   : > { %12322 = vmatpush3.bf16.msra.mxu1 %v13338_v30  ;;  %12211 = vmatprep.subr.bf16.mxu0 %v13339_v31  ;;  %v738_v30 = vadd.f32 %v13990_v38, %v700_v17  ;;  %v483_v31 = vsel %vm13978_vm5, 0, %v482_v19  ;;  %v14025_v35 = vrot.slane %v2118_v20, 11  ;;  %v1556_v39 = vld [vmem:[#allocation2 + $0x10] sm:$0x1]  ;;  %v1623_v42 = vrot.slane %v1622_v23, 4  ;;  %v13349_v21 = vld [vmem:[#allocation8 + $0x108] sm:$0xff]  }
  0x89   : > { %12323 = vmatprep.subr.bf16.mxu1 %v13340_v32  ;;  %v663_v32 = vld [vmem:[%s13962_s26 + $0x20] sm:$0xff]  ;;  %484 = vst [vmem:[#allocation2 + $0x24] sm:$0x1] %v483_v31  ;;  %v11465_v43 = vrot.slane %v979_v27, 11  ;;  %v1625_v44 = vshll.u32 %v1556_v39, 16  ;;  %v432_v46 = vsel %vm13973_vm3, 0, %v431_v26  ;;  %v1618_v55 = vsel %vm14031_vm10, %v1613_v41, %v14010_v9 }
  0x8a   : > { %v12104_v45 = vpack.c.bf16 %v738_v30, %v737_v28  ;;  %433 = vst [vmem:[#allocation2 + $0x40] sm:$0x8] %v432_v46  ;;  %v701_v49 = vmul.f32 %v13985_v37, %v663_v32  ;;  %v2070_v52 = vld [vmem:[#allocation2 + $0x1c] sm:$0xf]  ;;  %v2071_v53 = vld [vmem:[#allocation2 + $0x20] sm:$0xf] }
  0x8b   : > { %12212 = vmatpush3.bf16.msra.mxu0 %v13341_v33  ;;  %v664_v33 = vld [vmem:[%s13962_s26 + $0x28] sm:$0xff]  ;;  %v990_v54 = vsel %vm14006_vm9, %v11465_v43, %v989_v15  ;;  %v1627_v56 = vrot.slane %v1625_v44, 5  ;;  %v2123_v59 = vshrl.u32 %v2070_v52, 16  ;;  %v2126_v60 = vshll.u32 %v2070_v52, 16  ;;  %v933_v10 = vld [vmem:[#allocation2 + $0x20] sm:$0xf] }
  0x8c   : > { %12324 = vmatpush3.bf16.msra.mxu1 %v13342_v34  ;;  %12421 = vmatprep.subr.bf16.mxu0 %v13344_v48  ;;  %v485_v34 = vld [vmem:[#allocation2 + $0x38] sm:$0x1]  ;;  %v14037_v48 = vrot.slane %v1001_v24, 11  ;;  %v702_v50 = vmul.f32 %v13985_v37, %v664_v33  ;;  %v13346_v57 = vld [vmem:[#allocation2 + $0x1c] sm:$0xff]   ;;  %12181 = vst [vmem:[#allocation2 + $0x30] sm:$0xff] %v12104_v45   ;;  %v2132_v61 = vshrl.u32 %v2071_v53, 16  ;;  %v11481_v63 = vcombine.low %v990_v54, %v999_v36 }
  0x8d   : > { %v486_v51 = vsel %vm13978_vm5, 0, %v485_v34  ;;  %v2135_v62 = vshll.u32 %v2071_v53, 16  ;;  %v1628_v0 = vsel %vm14031_vm10, %v1623_v42, %v1627_v56  ;;  %v2072_v1 = vld [vmem:[#allocation2 + $0x2c] sm:$0x8]  ;;  %v932_v2 = vld [vmem:[#allocation2 + $0x1c] sm:$0xf]  ;;  %v14051_v3 = vadd.f32 %v13990_v38, %v701_v49 }
  0x8e   : > { %487 = vst [vmem:[#allocation2 + $0x38] sm:$0x1] %v486_v51  ;;  %v14054_v4 = vadd.f32 %v13990_v38, %v702_v50  ;;  %v2125_v5 = vrot.slane %v2123_v59, 7  ;;  %v2134_v6 = vrot.slane %v2132_v61, 7  ;;  %v11513_v8 = vcombine.low %v1618_v55, %v1628_v0  ;;  %5095 = vmatmul.mubr.bf16.vlgmr.msra.gmra.mrb[0].mxu0 %v11481_v63  ;;  %v1557_v15 = vld [vmem:[#allocation2 + $0x1c] sm:$0xf] }
  0x8f   : > { %v2140_v9 = vshrl.u32 %v2072_v1, 16  ;;  %v1006_v11 = vshrl.u32 %v932_v2, 16  ;;  %v1009_v12 = vshll.u32 %v932_v2, 16  ;;  %v1015_v13 = vshrl.u32 %v933_v10, 16  ;;  %12422 = vmatpush3.bf16.msra.mxu0 %v13345_v47  ;;  %5102 = vmatprep.mubr.bf16.mxu0 %v13346_v57  ;;  %v1558_v20 = vld [vmem:[#allocation2 + $0x20] sm:$0xf] }
  0x90   : > { %v1018_v14 = vshll.u32 %v933_v10, 16  ;;  %v2128_v16 = vor.u32 %v2126_v60, %v2125_v5  ;;  %v2130_v17 = vrot.slane %v2125_v5, 4  ;;  %v2137_v18 = vor.u32 %v2135_v62, %v2134_v6  ;;  %12423 = vmatprep.subr.bf16.mxu0 %v13348_v58  ;;  %v934_v61 = vld [vmem:[#allocation2 + $0x2c] sm:$0x8]  ;;  %v13435_v7 = vld [vmem:[#allocation10 + $0x50] sm:$0xff]   ;;  %s13650_s20 = sshll.u32 %s13726_s13, 4  ;;  %s13651_s20 = int_to_ptr.vmem [resolvable:$false] %s13650_s20 }
  0x91   : > { %v11530_v19 = vrot.slane %v2140_v9, 11  ;;  %v1008_v22 = vrot.slane %v1006_v11, 7  ;;  %v1017_v23 = vrot.slane %v1015_v13, 7  ;;  %v1630_v24 = vshrl.u32 %v1557_v15, 16  ;;  %v2075_v56 = vld [vmem:[#allocation2 + $0x40] sm:$0x8]  ;;  %p13653_p7 = scmp.lt.s32.totalorder %s16733_s18, %s13651_s20 }
  0x92   : > { %v1633_v26 = vshll.u32 %v1557_v15, 16  ;;  %v2129_v27 = vsel %vm14006_vm9, %v14025_v35, %v2128_v16  ;;  %v2138_v28 = vsel %vm14006_vm9, %v2130_v17, %v2137_v18  ;;  %v1639_v32 = vshll.u32 %v1558_v20, 16  ;;  %v1559_v35 = vld [vmem:[#allocation2 + $0x24] sm:$0x1]  ;;  %s13652_s24 = scalar_lea.vmem %s13651_s20, 8192 }
  0x93   : > { %v2073_v30 = vld [vmem:[#allocation2 + $0x30] sm:$0xf]  ;;  %v2074_v31 = vld [vmem:[#allocation2 + $0x34] sm:$0xf]  ;;  %v1643_v33 = vshrl.u32 %v1558_v20, 16  ;;  %v11545_v34 = vcombine.low %v2129_v27, %v2138_v28  ;;  %v1011_v43 = vor.u32 %v1009_v12, %v1008_v22  ;;  %v1013_v44 = vrot.slane %v1008_v22, 4  ;;  %12424 = vmatpush3.bf16.msra.mxu0 %v13349_v21 }
  0x94   : > { %v2145_v36 = vshrl.u32 %v2073_v30, 16  ;;  %v2148_v39 = vshll.u32 %v2073_v30, 16  ;;  %v2154_v41 = vshrl.u32 %v2074_v31, 16  ;;  %v2157_v42 = vshll.u32 %v2074_v31, 16  ;;  %v13347_v55 = vld [vmem:[#allocation2 + $0x30] sm:$0xff]   ;;  %v13352_v15 = vld [vmem:[#allocation8 + $0x150] sm:$0xff]  }
  0x95   : > { %v1020_v45 = vor.u32 %v1018_v14, %v1017_v23  ;;  %5255 = vmatprep.mubr.bf16.mxu1 %v11545_v34  ;;  %v1632_v49 = vrot.slane %v1630_v24, 4  ;;  %v1635_v50 = vrot.slane %v1633_v26, 5  ;;  %v1012_v51 = vsel %vm14006_vm9, %v14037_v48, %v1011_v43  ;;  %v935_v2 = vld [vmem:[#allocation2 + $0x30] sm:$0xf]  ;;  %v936_v9 = vld [vmem:[#allocation2 + $0x34] sm:$0xf]  ;;  %12425 = vmatprep.subr.bf16.mxu0 %v13352_v15 }
  0x96   : > { %v2147_v46 = vrot.slane %v2145_v36, 7  ;;  %v2156_v47 = vrot.slane %v2154_v41, 7  ;;  %5256 = vmatmul.mubr.bf16.vlgmr.msra.gmra.mrb[0].mxu1 %v11513_v8  ;;  %v1641_v53 = vrot.slane %v1639_v32, 5  ;;  %v1645_v54 = vrot.slane %v1643_v33, 4  ;;  %v1560_v10 = vld [vmem:[#allocation2 + $0x30] sm:$0xf] }
  0x97   : > { %v1021_v52 = vsel %vm14006_vm9, %v1013_v44, %v1020_v45  ;;  %v1636_v62 = vor.u32 %v1635_v50, %v1632_v49  ;;  %v1649_v0 = vshll.u32 %v1559_v35, 16  ;;  %v12040_v1 = vpack.c.bf16 %v14051_v3, %v14051_v3  ;;  %v1561_v3 = vld [vmem:[#allocation2 + $0x34] sm:$0xf]  ;;  %v1562_v20 = vld [vmem:[#allocation2 + $0x38] sm:$0x1]  ;;  %v665_v26 = vld [vmem:[%s13962_s26 + $0x30] sm:$0xff] }
  0x98   : > { %v2150_v57 = vor.u32 %v2148_v39, %v2147_v46  ;;  %v2152_v58 = vrot.slane %v2147_v46, 4  ;;  %v2159_v59 = vor.u32 %v2157_v42, %v2156_v47  ;;  %v11482_v60 = vcombine.low %v1012_v51, %v1021_v52  ;;  %v434_v24 = vld [vmem:[#allocation2 + $0x54] sm:$0x8]  ;;  %v13353_v32 = vld [vmem:[#allocation8 + $0x110] sm:$0xff]   ;;  %v666_v49 = vld [vmem:[%s13962_s26 + $0x38] sm:$0xff] }
  0x99   : > { %v1646_v63 = vor.u32 %v1645_v54, %v1641_v53  ;;  %v12041_v6 = vpack.c.bf16 %v14054_v4, %v14054_v4  ;;  %v2162_v8 = vshrl.u32 %v2075_v56, 16  ;;  %v1637_v12 = vrot.slane %v1636_v62, 4  ;;  %900 = vst [vmem:[#allocation2 + $0x44] sm:$0xf] %v12040_v1  ;;  %12426 = vmatpush3.bf16.msra.mxu0 %v13353_v32  ;;  %v937_v50 = vld [vmem:[#allocation2 + $0x40] sm:$0x8] }
  0x9a   : > { %v2151_v48 = vsel %vm14006_vm9, %v11530_v19, %v2150_v57  ;;  %v2160_v5 = vsel %vm14006_vm9, %v2152_v58, %v2159_v59  ;;  %5103 = vmatmul.mubr.bf16.gmra.mrb[4].mxu0 %v11482_v60  ;;  %v1651_v14 = vrot.slane %v1649_v0, 5  ;;  %v1023_v17 = vshrl.u32 %v934_v61, 16 }
  0x9b   : > { %v11546_v11 = vcombine.low %v2151_v48, %v2160_v5  ;;  %v1647_v13 = vrot.slane %v1646_v63, 4  ;;  %5110 = vmatprep.mubr.bf16.mxu0 %v13347_v55  ;;  %901 = vst [vmem:[#allocation2 + $0x48] sm:$0xf] %v12041_v6  ;;  %v14074_v16 = vrot.slane %v2162_v8, 11  ;;  %v1028_v18 = vshrl.u32 %v935_v2, 16 }
  0x9c   : > { %v1031_v19 = vshll.u32 %v935_v2, 16  ;;  %v1642_v4 = vsel %vm14031_vm10, %v1637_v12, %v1641_v53  ;;  %v1037_v22 = vshrl.u32 %v936_v9, 16  ;;  %v1040_v23 = vshll.u32 %v936_v9, 16 }
  0x9d   : > { %5263 = vmatprep.mubr.bf16.mxu1 %v11546_v11  ;;  %v1652_v21 = vsel %vm14031_vm10, %v1647_v13, %v1651_v14  ;;  %v11467_v28 = vrot.slane %v1023_v17, 11  ;;  %v1030_v30 = vrot.slane %v1028_v18, 7  ;;  %v1654_v31 = vshrl.u32 %v1560_v10, 16  ;;  %v488_v14 = vld [vmem:[#allocation2 + $0x4c] sm:$0x1] }
  0x9e   : > { %v11514_v27 = vcombine.low %v1642_v4, %v1652_v21  ;;  %v1039_v33 = vrot.slane %v1037_v22, 7  ;;  %v1657_v34 = vshll.u32 %v1560_v10, 16  ;;  %v1663_v36 = vshll.u32 %v1561_v3, 16 }
  0x9f   : > { %v1667_v39 = vshrl.u32 %v1561_v3, 16  ;;  %v1033_v41 = vor.u32 %v1031_v19, %v1030_v30  ;;  %v1035_v42 = vrot.slane %v1030_v30, 4  ;;  %v1656_v43 = vrot.slane %v1654_v31, 4  ;;  %v13356_v31 = vld [vmem:[#allocation8 + $0x158] sm:$0xff]  }
  0xa0   : > { %5264 = vmatmul.mubr.bf16.gmra.mrb[4].mxu1 %v11514_v27  ;;  %v1673_v44 = vshll.u32 %v1562_v20, 16  ;;  %v1042_v45 = vor.u32 %v1040_v23, %v1039_v33  ;;  %v1659_v46 = vrot.slane %v1657_v34, 5  ;;  %v1665_v47 = vrot.slane %v1663_v36, 5  ;;  %v2076_v51 = vld [vmem:[#allocation2 + $0x44] sm:$0xf]  ;;  %12427 = vmatprep.subr.bf16.mxu0 %v13356_v31 }
  0xa1   : > { %v1669_v35 = vrot.slane %v1667_v39, 4  ;;  %v1034_v52 = vsel %vm14006_vm9, %v11467_v28, %v1033_v41  ;;  %v435_v54 = vsel %vm13973_vm3, 0, %v434_v24  ;;  %v703_v55 = vmul.f32 %v13985_v37, %v665_v26  ;;  %v938_v2 = vld [vmem:[#allocation2 + $0x44] sm:$0xf]  ;;  %v437_v24 = vld [vmem:[#allocation2 + $0x68] sm:$0x8] }
  0xa2   : > { %v1675_v53 = vrot.slane %v1673_v44, 5  ;;  %v2077_v56 = vld [vmem:[#allocation2 + $0x48] sm:$0xf]  ;;  %v2167_v57 = vshrl.u32 %v2076_v51, 16  ;;  %v2170_v58 = vshll.u32 %v2076_v51, 16  ;;  %v1043_v59 = vsel %vm14006_vm9, %v1035_v42, %v1042_v45  ;;  %v667_v45 = vld [vmem:[%s13962_s26 + $0x40] sm:$0xff] }
  0xa3   : > { %v1660_v60 = vor.u32 %v1659_v46, %v1656_v43  ;;  %436 = vst [vmem:[#allocation2 + $0x54] sm:$0x8] %v435_v54  ;;  %v2176_v61 = vshrl.u32 %v2077_v56, 16  ;;  %v2179_v62 = vshll.u32 %v2077_v56, 16  ;;  %v11483_v63 = vcombine.low %v1034_v52, %v1043_v59  ;;  %v13350_v1 = vld [vmem:[#allocation2 + $0x44] sm:$0xff]   ;;  %v668_v46 = vld [vmem:[%s13962_s26 + $0x48] sm:$0xff] }
  0xa4   : > { %v1670_v0 = vor.u32 %v1669_v35, %v1665_v47  ;;  %v2169_v48 = vrot.slane %v2167_v57, 7  ;;  %v704_v6 = vmul.f32 %v13985_v37, %v666_v49  ;;  %v741_v8 = vadd.f32 %v13990_v38, %v703_v55  ;;  %v939_v11 = vld [vmem:[#allocation2 + $0x48] sm:$0xf]  ;;  %v1563_v19 = vld [vmem:[#allocation2 + $0x44] sm:$0xf] }
  0xa5   : > { %v1661_v5 = vrot.slane %v1660_v60, 4  ;;  %v2178_v9 = vrot.slane %v2176_v61, 7  ;;  %5111 = vmatmul.mubr.bf16.gmra.mrb[8].mxu0 %v11483_v63  ;;  %v1045_v12 = vshrl.u32 %v937_v50, 16  ;;  %v1050_v13 = vshrl.u32 %v938_v2, 16  ;;  %v1564_v20 = vld [vmem:[#allocation2 + $0x48] sm:$0xf] }
  0xa6   : > { %v1671_v10 = vrot.slane %v1670_v0, 4  ;;  %v2172_v3 = vor.u32 %v2170_v58, %v2169_v48  ;;  %v2174_v15 = vrot.slane %v2169_v48, 4  ;;  %5118 = vmatprep.mubr.bf16.mxu0 %v13350_v1  ;;  %v742_v18 = vadd.f32 %v13990_v38, %v704_v6  ;;  %v13357_v41 = vld [vmem:[#allocation8 + $0x118] sm:$0xff]   ;;  %v440_v57 = vld [vmem:[#allocation2 + $0x7c] sm:$0x8] }
  0xa7   : > { %v1666_v17 = vsel %vm14031_vm10, %v1661_v5, %v1665_v47  ;;  %v2181_v4 = vor.u32 %v2179_v62, %v2178_v9  ;;  %v11468_v22 = vrot.slane %v1045_v12, 11  ;;  %v1052_v23 = vrot.slane %v1050_v13, 7  ;;  %v491_v47 = vld [vmem:[#allocation2 + $0x60] sm:$0x1]  ;;  %12428 = vmatpush3.bf16.msra.mxu0 %v13357_v41  ;;  %v670_v48 = vld [vmem:[%s13962_s26 + $0x58] sm:$0xff]  ;;  %v671_v5 = vld [vmem:[%s13962_s26 + $0x60] sm:$0xff] }
  0xa8   : > { %v1676_v21 = vsel %vm14031_vm10, %v1671_v10, %v1675_v53  ;;  %v2173_v26 = vsel %vm14006_vm9, %v14074_v16, %v2172_v3  ;;  %v12109_v28 = vpack.c.bf16 %v742_v18, %v741_v8  ;;  %v1053_v30 = vshll.u32 %v938_v2, 16  ;;  %v669_v62 = vld [vmem:[%s13962_s26 + $0x50] sm:$0xff]  ;;  %v13361_v12 = vld [vmem:[#allocation8 + $0x120] sm:$0xff]  }
  0xa9   : > { %v11515_v27 = vcombine.low %v1666_v17, %v1676_v21  ;;  %v2182_v32 = vsel %vm14006_vm9, %v2174_v15, %v2181_v4  ;;  %v1057_v34 = vrot.slane %v1052_v23, 4  ;;  %v1059_v36 = vshrl.u32 %v939_v11, 16 }
  0xaa   : > { %v2078_v33 = vld [vmem:[#allocation2 + $0x54] sm:$0x8]  ;;  %v1062_v39 = vshll.u32 %v939_v11, 16  ;;  %v11547_v42 = vcombine.low %v2173_v26, %v2182_v32  ;;  %12182 = vst [vmem:[#allocation2 + $0x58] sm:$0xff] %v12109_v28   ;;  %v1055_v44 = vor.u32 %v1053_v30, %v1052_v23  ;;  %v489_v16 = vsel %vm13978_vm5, 0, %v488_v14 }
  0xab   : > { %v2184_v43 = vshrl.u32 %v2078_v33, 16  ;;  %v1061_v35 = vrot.slane %v1059_v36, 7  ;;  %490 = vst [vmem:[#allocation2 + $0x4c] sm:$0x1] %v489_v16  ;;  %v1678_v49 = vshrl.u32 %v1563_v19, 16  ;;  %v1681_v50 = vshll.u32 %v1563_v19, 16 }
  0xac   : > { %v1687_v51 = vshll.u32 %v1564_v20, 16  ;;  %v14105_v52 = vld [vmem:[#allocation2 + $0x54] sm:$0x8]  ;;  %5271 = vmatprep.mubr.bf16.mxu1 %v11547_v42  ;;  %v1056_v54 = vsel %vm14006_vm9, %v11468_v22, %v1055_v44  ;;  %v1691_v55 = vshrl.u32 %v1564_v20, 16  ;;  %v438_v56 = vsel %vm13973_vm3, 0, %v437_v24 }
  0xad   : > { %v14107_v53 = vrot.slane %v2184_v43, 11  ;;  %5272 = vmatmul.mubr.bf16.gmra.mrb[8].mxu1 %v11515_v27  ;;  %v1064_v58 = vor.u32 %v1062_v39, %v1061_v35  ;;  %v1680_v59 = vrot.slane %v1678_v49, 4  ;;  %v1683_v60 = vrot.slane %v1681_v50, 5  ;;  %439 = vst [vmem:[#allocation2 + $0x68] sm:$0x8] %v438_v56  ;;  %v13360_v11 = vld [vmem:[#allocation8 + $0x160] sm:$0xff]  }
  0xae   : > { %v14113_v61 = vrot.slane %v1687_v51, 5  ;;  %v1693_v63 = vrot.slane %v1691_v55, 4  ;;  %v705_v0 = vmul.f32 %v13985_v37, %v667_v45  ;;  %v706_v1 = vmul.f32 %v13985_v37, %v668_v46  ;;  %12429 = vmatprep.subr.bf16.mxu0 %v13360_v11 }
  0xaf   : > { %v1067_v2 = vshrl.u32 %v14105_v52, 16  ;;  %v1065_v6 = vsel %vm14006_vm9, %v1057_v34, %v1064_v58  ;;  %v1684_v8 = vor.u32 %v1683_v60, %v1680_v59  ;;  %v492_v9 = vsel %vm13978_vm5, 0, %v491_v47  ;;  %12430 = vmatpush3.bf16.msra.mxu0 %v13361_v12 }
  0xb0   : > { %v441_v10 = vsel %vm13973_vm3, 0, %v440_v57  ;;  %v11484_v13 = vcombine.low %v1056_v54, %v1065_v6  ;;  %v1694_v14 = vor.u32 %v1693_v63, %v14113_v61  ;;  %v743_v3 = vadd.f32 %v13990_v38, %v705_v0  ;;  %493 = vst [vmem:[#allocation2 + $0x60] sm:$0x1] %v492_v9 }
  0xb1   : > { %v744_v15 = vadd.f32 %v13990_v38, %v706_v1  ;;  %442 = vst [vmem:[#allocation2 + $0x7c] sm:$0x8] %v441_v10  ;;  %v2079_v17 = vld [vmem:[#allocation2 + $0x58] sm:$0xf]  ;;  %v2080_v18 = vld [vmem:[#allocation2 + $0x5c] sm:$0xf]  ;;  %v707_v4 = vmul.f32 %v13985_v37, %v669_v62  ;;  %v708_v21 = vmul.f32 %v13985_v37, %v670_v48  ;;  %v14133_v22 = vmul.f32 %v13985_v37, %v671_v5 }
  0xb2   : > { %v1685_v19 = vrot.slane %v1684_v8, 4  ;;  %v13351_v20 = vld [vmem:[#allocation2 + $0x58] sm:$0xff]   ;;  %v2189_v23 = vshrl.u32 %v2079_v17, 16  ;;  %v2192_v24 = vshll.u32 %v2079_v17, 16  ;;  %v2198_v26 = vshrl.u32 %v2080_v18, 16  ;;  %5119 = vmatmul.mubr.bf16.gmra.mrb[12].mxu0 %v11484_v13 }
  0xb3   : > { %v2201_v27 = vshll.u32 %v2080_v18, 16  ;;  %v1565_v28 = vld [vmem:[#allocation2 + $0x4c] sm:$0x1]  ;;  %v1695_v31 = vrot.slane %v1694_v14, 4  ;;  %5126 = vmatprep.mubr.bf16.mxu0 %v13351_v20  ;;  %v12044_v33 = vpack.c.bf16 %v743_v3, %v743_v3  ;;  %v12045_v39 = vpack.c.bf16 %v744_v15, %v744_v15  ;;  %v941_v42 = vld [vmem:[#allocation2 + $0x58] sm:$0xf] }
  0xb4   : > { %v1690_v30 = vsel %vm14031_vm10, %v1685_v19, %v14113_v61  ;;  %v1697_v32 = vshll.u32 %v1565_v28, 16  ;;  %v2191_v34 = vrot.slane %v2189_v23, 7  ;;  %v2200_v36 = vrot.slane %v2198_v26, 7  ;;  %v2081_v41 = vld [vmem:[#allocation2 + $0x68] sm:$0x8] }
  0xb5   : > { %v14139_v43 = vadd.f32 %v13990_v38, %v707_v4  ;;  %904 = vst [vmem:[#allocation2 + $0x6c] sm:$0xf] %v12044_v33  ;;  %v2206_v16 = vshrl.u32 %v2081_v41, 16  ;;  %v942_v45 = vld [vmem:[#allocation2 + $0x5c] sm:$0xf]  ;;  %v11469_v46 = vrot.slane %v1067_v2, 11  ;;  %v746_v12 = vadd.f32 %v13990_v38, %v708_v21 }
  0xb6   : > { %v1699_v44 = vrot.slane %v1697_v32, 5  ;;  %v1072_v47 = vshrl.u32 %v941_v42, 16  ;;  %v2194_v35 = vor.u32 %v2192_v24, %v2191_v34  ;;  %v2196_v49 = vrot.slane %v2191_v34, 4  ;;  %905 = vst [vmem:[#allocation2 + $0x70] sm:$0xf] %v12045_v39 }
  0xb7   : > { %v2203_v50 = vor.u32 %v2201_v27, %v2200_v36  ;;  %v1075_v51 = vshll.u32 %v941_v42, 16  ;;  %v1566_v52 = vld [vmem:[#allocation2 + $0x58] sm:$0xf]  ;;  %v14143_v55 = vrot.slane %v2206_v16, 11  ;;  %v1081_v57 = vshrl.u32 %v942_v45, 16 }
  0xb8   : > { %v1700_v54 = vsel %vm14031_vm10, %v1695_v31, %v1699_v44  ;;  %v1074_v56 = vrot.slane %v1072_v47, 7  ;;  %v1567_v58 = vld [vmem:[#allocation2 + $0x5c] sm:$0xf]  ;;  %v2195_v59 = vsel %vm14006_vm9, %v14107_v53, %v2194_v35  ;;  %v1084_v62 = vshll.u32 %v942_v45, 16  ;;  %v1568_v63 = vld [vmem:[#allocation2 + $0x60] sm:$0x1] }
  0xb9   : > { %v2204_v60 = vsel %vm14006_vm9, %v2196_v49, %v2203_v50  ;;  %v11516_v61 = vcombine.low %v1690_v30, %v1700_v54  ;;  %v1083_v48 = vrot.slane %v1081_v57, 7  ;;  %v1702_v5 = vshrl.u32 %v1566_v52, 16  ;;  %v2084_v13 = vld [vmem:[#allocation2 + $0x7c] sm:$0x8]  ;;  %v943_v14 = vld [vmem:[#allocation2 + $0x68] sm:$0x8] }
  0xba   : > { %v11548_v0 = vcombine.low %v2195_v59, %v2204_v60  ;;  %v1077_v1 = vor.u32 %v1075_v51, %v1074_v56  ;;  %v1079_v2 = vrot.slane %v1074_v56, 4  ;;  %v1705_v6 = vshll.u32 %v1566_v52, 16 }
  0xbb   : > { %v1711_v8 = vshll.u32 %v1567_v58, 16  ;;  %v1715_v9 = vshrl.u32 %v1567_v58, 16  ;;  %v1086_v11 = vor.u32 %v1084_v62, %v1083_v48  ;;  %v1721_v53 = vshll.u32 %v1568_v63, 16  ;;  %v443_v48 = vld [vmem:[#allocation2 + $0x90] sm:$0x8] }
  0xbc   : > { %5279 = vmatprep.mubr.bf16.mxu1 %v11548_v0  ;;  %v1078_v10 = vsel %vm14006_vm9, %v11469_v46, %v1077_v1  ;;  %v2082_v3 = vld [vmem:[#allocation2 + $0x6c] sm:$0xf]  ;;  %v1704_v15 = vrot.slane %v1702_v5, 4  ;;  %v1707_v17 = vrot.slane %v1705_v6, 5  ;;  %v12114_v34 = vpack.c.bf16 %v746_v12, %v14139_v43  ;;  %v494_v46 = vld [vmem:[#allocation2 + $0x74] sm:$0x1] }
  0xbd   : > { %5280 = vmatmul.mubr.bf16.gmra.mrb[12].mxu1 %v11516_v61  ;;  %v1713_v18 = vrot.slane %v1711_v8, 5  ;;  %v1717_v19 = vrot.slane %v1715_v9, 4  ;;  %v2083_v20 = vld [vmem:[#allocation2 + $0x70] sm:$0xf]  ;;  %v2211_v4 = vshrl.u32 %v2082_v3, 16  ;;  %v2214_v23 = vshll.u32 %v2082_v3, 16 }
  0xbe   : > { %v1087_v24 = vsel %vm14006_vm9, %v1079_v2, %v1086_v11  ;;  %v1723_v26 = vrot.slane %v1721_v53, 5  ;;  %v13354_v27 = vld [vmem:[#allocation2 + $0x6c] sm:$0xff]   ;;  %v2220_v28 = vshrl.u32 %v2083_v20, 16  ;;  %v2223_v30 = vshll.u32 %v2083_v20, 16  ;;  %12183 = vst [vmem:[#allocation2 + $0x80] sm:$0xff] %v12114_v34   ;;  %v13364_v43 = vld [vmem:[#allocation8 + $0x168] sm:$0xff]  }
  0xbf   : > { %v11485_v31 = vcombine.low %v1078_v10, %v1087_v24  ;;  %v1708_v21 = vor.u32 %v1707_v17, %v1704_v15  ;;  %v2213_v32 = vrot.slane %v2211_v4, 7  ;;  %v1718_v33 = vor.u32 %v1717_v19, %v1713_v18  ;;  %v944_v39 = vld [vmem:[#allocation2 + $0x6c] sm:$0xf]  ;;  %v945_v44 = vld [vmem:[#allocation2 + $0x70] sm:$0xf]  ;;  %12431 = vmatprep.subr.bf16.mxu0 %v13364_v43  ;;  %v672_v5 = vld [vmem:[%s13962_s26 + $0x68] sm:$0xff] }
  0xc0   : > { %v2228_v36 = vshrl.u32 %v2084_v13, 16  ;;  %v2222_v41 = vrot.slane %v2220_v28, 7  ;;  %v1089_v16 = vshrl.u32 %v943_v14, 16  ;;  %v1094_v45 = vshrl.u32 %v944_v39, 16  ;;  %v1569_v51 = vld [vmem:[#allocation2 + $0x6c] sm:$0xf] }
  0xc1   : > { %5127 = vmatmul.mubr.bf16.gmra.mrb[16].mxu0 %v11485_v31  ;;  %v1709_v42 = vrot.slane %v1708_v21, 4  ;;  %v2216_v47 = vor.u32 %v2214_v23, %v2213_v32  ;;  %v2218_v35 = vrot.slane %v2213_v32, 4  ;;  %v1719_v49 = vrot.slane %v1718_v33, 4  ;;  %v1570_v52 = vld [vmem:[#allocation2 + $0x70] sm:$0xf]  ;;  %v13365_v6 = vld [vmem:[#allocation8 + $0x128] sm:$0xff]  }
  0xc2   : > { %5134 = vmatprep.mubr.bf16.mxu0 %v13354_v27  ;;  %v14156_v50 = vrot.slane %v2228_v36, 11  ;;  %v2225_v54 = vor.u32 %v2223_v30, %v2222_v41  ;;  %v11470_v57 = vrot.slane %v1089_v16, 11  ;;  %v1096_v58 = vrot.slane %v1094_v45, 7  ;;  %v673_v11 = vld [vmem:[%s13962_s26 + $0x70] sm:$0xff]  ;;  %12432 = vmatpush3.bf16.msra.mxu0 %v13365_v6  ;;  %v946_v19 = vld [vmem:[#allocation2 + $0x7c] sm:$0x8] }
  0xc3   : > { %v1714_v56 = vsel %vm14031_vm10, %v1709_v42, %v1713_v18  ;;  %v2217_v59 = vsel %vm14006_vm9, %v14143_v55, %v2216_v47  ;;  %v1724_v60 = vsel %vm14031_vm10, %v1719_v49, %v1723_v26  ;;  %v1097_v61 = vshll.u32 %v944_v39, 16  ;;  %v13368_v41 = vld [vmem:[#allocation8 + $0x170] sm:$0xff]  }
  0xc4   : > { %v1103_v62 = vshrl.u32 %v945_v44, 16  ;;  %v2226_v63 = vsel %vm14006_vm9, %v2218_v35, %v2225_v54  ;;  %v11517_v0 = vcombine.low %v1714_v56, %v1724_v60  ;;  %v1101_v1 = vrot.slane %v1096_v58, 4  ;;  %12433 = vmatprep.subr.bf16.mxu0 %v13368_v41 }
  0xc5   : > { %v1106_v2 = vshll.u32 %v945_v44, 16  ;;  %v11549_v8 = vcombine.low %v2217_v59, %v2226_v63  ;;  %v1099_v9 = vor.u32 %v1097_v61, %v1096_v58  ;;  %v495_v55 = vsel %vm13978_vm5, 0, %v494_v46  ;;  %v2085_v20 = vld [vmem:[#allocation2 + $0x80] sm:$0xf]  ;;  %v2086_v4 = vld [vmem:[#allocation2 + $0x84] sm:$0xf] }
  0xc6   : > { %v1105_v10 = vrot.slane %v1103_v62, 7  ;;  %496 = vst [vmem:[#allocation2 + $0x74] sm:$0x1] %v495_v55  ;;  %v1726_v53 = vshrl.u32 %v1569_v51, 16  ;;  %v1729_v12 = vshll.u32 %v1569_v51, 16  ;;  %v1735_v13 = vshll.u32 %v1570_v52, 16 }
  0xc7   : > { %v1739_v14 = vshrl.u32 %v1570_v52, 16  ;;  %5287 = vmatprep.mubr.bf16.mxu1 %v11549_v8  ;;  %v1100_v3 = vsel %vm14006_vm9, %v11470_v57, %v1099_v9  ;;  %v444_v17 = vsel %vm13973_vm3, 0, %v443_v48  ;;  %v710_v18 = vmul.f32 %v13985_v37, %v672_v5  ;;  %v13355_v39 = vld [vmem:[#allocation2 + $0x80] sm:$0xff]   ;;  %v497_v51 = vld [vmem:[#allocation2 + $0x88] sm:$0x1]  ;;  %v13370_v63 = vld [vmem:[#allocation8 + $0x1c0] sm:$0xff]  }
  0xc8   : > { %v1108_v15 = vor.u32 %v1106_v2, %v1105_v10  ;;  %5288 = vmatmul.mubr.bf16.gmra.mrb[16].mxu1 %v11517_v0  ;;  %v1728_v23 = vrot.slane %v1726_v53, 4  ;;  %v1731_v24 = vrot.slane %v1729_v12, 5  ;;  %445 = vst [vmem:[#allocation2 + $0x90] sm:$0x8] %v444_v17  ;;  %v747_v26 = vadd.f32 %v13990_v38, %v14133_v22  ;;  %v947_v45 = vld [vmem:[#allocation2 + $0x80] sm:$0xf]  ;;  %12533 = vmatprep.subr.bf16.mxu1 %v13370_v63 }
  0xc9   : > { %v14179_v27 = vmul.f32 %v13985_v37, %v673_v11  ;;  %v2233_v28 = vshrl.u32 %v2085_v20, 16  ;;  %v2236_v30 = vshll.u32 %v2085_v20, 16  ;;  %v2242_v31 = vshrl.u32 %v2086_v4, 16  ;;  %v948_v35 = vld [vmem:[#allocation2 + $0x84] sm:$0xf]  ;;  %v674_v53 = vld [vmem:[%s13962_s26 + $0x78] sm:$0xff] }
  0xca   : > { %v2245_v21 = vshll.u32 %v2086_v4, 16  ;;  %v1109_v32 = vsel %vm14006_vm9, %v1101_v1, %v1108_v15  ;;  %v1732_v33 = vor.u32 %v1731_v24, %v1728_v23  ;;  %v1737_v34 = vrot.slane %v1735_v13, 5  ;;  %v1572_v52 = vld [vmem:[#allocation2 + $0x80] sm:$0xf]  ;;  %v1573_v6 = vld [vmem:[#allocation2 + $0x84] sm:$0xf] }
  0xcb   : > { %v1741_v36 = vrot.slane %v1739_v14, 4  ;;  %v2235_v42 = vrot.slane %v2233_v28, 7  ;;  %v2244_v44 = vrot.slane %v2242_v31, 7  ;;  %v11486_v16 = vcombine.low %v1100_v3, %v1109_v32  ;;  %v13369_v59 = vld [vmem:[#allocation8 + $0x130] sm:$0xff]   ;;  %v13371_v12 = vld [vmem:[#allocation8 + $0x180] sm:$0xff]   ;;  %v13372_v20 = vld [vmem:[#allocation8 + $0x1c8] sm:$0xff]  }
  0xcc   : > { %v748_v22 = vadd.f32 %v13990_v38, %v710_v18  ;;  %v1733_v37 = vrot.slane %v1732_v33, 4  ;;  %v12048_v47 = vpack.c.bf16 %v747_v26, %v747_v26  ;;  %v1111_v49 = vshrl.u32 %v946_v19, 16  ;;  %12434 = vmatpush3.bf16.msra.mxu0 %v13369_v59  ;;  %v446_v11 = vld [vmem:[#allocation2 + $0xa4] sm:$0x8]  ;;  %12534 = vmatpush3.bf16.msra.mxu1 %v13371_v12  ;;  %v13374_v59 = vld [vmem:[#allocation8 + $0x188] sm:$0xff]  }
  0xcd   : > { %v1742_v46 = vor.u32 %v1741_v36, %v1737_v34  ;;  %v2238_v43 = vor.u32 %v2236_v30, %v2235_v42  ;;  %v2240_v54 = vrot.slane %v2235_v42, 4  ;;  %v2247_v56 = vor.u32 %v2245_v21, %v2244_v44  ;;  %5135 = vmatmul.mubr.bf16.gmra.mrb[20].mxu0 %v11486_v16  ;;  %v1571_v57 = vld [vmem:[#allocation2 + $0x74] sm:$0x1]  ;;  %12535 = vmatprep.subr.bf16.mxu1 %v13372_v20  ;;  %v14211_v42 = vld [vmem:[%s16782_s2] ss:$0 sm:$0xff] }
  0xce   : > { %v12049_v58 = vpack.c.bf16 %v748_v22, %v748_v22  ;;  %v1738_v60 = vsel %vm14031_vm10, %v1733_v37, %v1737_v34  ;;  %v1745_v61 = vshll.u32 %v1571_v57, 16  ;;  %5142 = vmatprep.mubr.bf16.mxu0 %v13355_v39  ;;  %908 = vst [vmem:[#allocation2 + $0x94] sm:$0xf] %v12048_v47  ;;  %v11471_v62 = vrot.slane %v1111_v49, 11  ;;  %v14205_v39 = vld [vmem:[%s16781_s1] ss:$0 sm:$0xff] }
  0xcf   : > { %v1743_v38 = vrot.slane %v1742_v46, 4  ;;  %v2239_v0 = vsel %vm14006_vm9, %v14156_v50, %v2238_v43  ;;  %v2248_v1 = vsel %vm14006_vm9, %v2240_v54, %v2247_v56  ;;  %v2087_v2 = vld [vmem:[#allocation2 + $0x90] sm:$0x8]  ;;  %v1116_v48 = vshrl.u32 %v947_v45, 16 }
  0xd0   : > { %909 = vst [vmem:[#allocation2 + $0x98] sm:$0xf] %v12049_v58  ;;  %v1119_v5 = vshll.u32 %v947_v45, 16  ;;  %v11550_v8 = vcombine.low %v2239_v0, %v2248_v1  ;;  %v1747_v9 = vrot.slane %v1745_v61, 5  ;;  %v2250_v10 = vshrl.u32 %v2087_v2, 16  ;;  %12536 = vmatpush3.bf16.msra.mxu1 %v13374_v59  ;;  %v678_v59 = vld [vmem:[%s13962_s26 + $0x98] sm:$0xff] }
  0xd1   : > { %v1125_v55 = vshrl.u32 %v948_v35, 16  ;;  %v1118_v13 = vrot.slane %v1116_v48, 7  ;;  %v1128_v14 = vshll.u32 %v948_v35, 16  ;;  %v498_v50 = vsel %vm13978_vm5, 0, %v497_v51  ;;  %v949_v32 = vld [vmem:[#allocation2 + $0x90] sm:$0x8] }
  0xd2   : > { %v1750_v3 = vshrl.u32 %v1572_v52, 16  ;;  %5295 = vmatprep.mubr.bf16.mxu1 %v11550_v8  ;;  %v1748_v15 = vsel %vm14031_vm10, %v1743_v38, %v1747_v9  ;;  %v14196_v17 = vrot.slane %v2250_v10, 11  ;;  %499 = vst [vmem:[#allocation2 + $0x88] sm:$0x1] %v498_v50  ;;  %v1753_v19 = vshll.u32 %v1572_v52, 16  ;;  %v13375_v8 = vld [vmem:[#allocation8 + $0x1d0] sm:$0xff]  }
  0xd3   : > { %v1127_v18 = vrot.slane %v1125_v55, 7  ;;  %v11518_v4 = vcombine.low %v1738_v60, %v1748_v15  ;;  %v1121_v23 = vor.u32 %v1119_v5, %v1118_v13  ;;  %v1123_v24 = vrot.slane %v1118_v13, 4  ;;  %v500_v5 = vld [vmem:[#allocation2 + $0x9c] sm:$0x1]  ;;  %12537 = vmatprep.subr.bf16.mxu1 %v13375_v8 }
  0xd4   : > { %v1752_v26 = vrot.slane %v1750_v3, 4  ;;  %v1755_v30 = vrot.slane %v1753_v19, 5  ;;  %v1759_v31 = vshll.u32 %v1573_v6, 16  ;;  %v1763_v21 = vshrl.u32 %v1573_v6, 16  ;;  %v13376_v3 = vld [vmem:[#allocation8 + $0x190] sm:$0xff]  }
  0xd5   : > { %v1130_v28 = vor.u32 %v1128_v14, %v1127_v18  ;;  %5296 = vmatmul.mubr.bf16.gmra.mrb[20].mxu1 %v11518_v4  ;;  %v2088_v33 = vld [vmem:[#allocation2 + $0x94] sm:$0xf]  ;;  %v1122_v34 = vsel %vm14006_vm9, %v11471_v62, %v1121_v23  ;;  %v447_v36 = vsel %vm13973_vm3, 0, %v446_v11  ;;  %v712_v41 = vmul.f32 %v14205_v39, %v674_v53 }
  0xd6   : > { %v749_v44 = vadd.f32 %v14211_v42, %v14179_v27  ;;  %v2255_v22 = vshrl.u32 %v2088_v33, 16  ;;  %v2258_v45 = vshll.u32 %v2088_v33, 16  ;;  %v1756_v46 = vor.u32 %v1755_v30, %v1752_v26  ;;  %448 = vst [vmem:[#allocation2 + $0xa4] sm:$0x8] %v447_v36  ;;  %v950_v43 = vld [vmem:[#allocation2 + $0x94] sm:$0xf]  ;;  %12538 = vmatpush3.bf16.msra.mxu1 %v13376_v3 }
  0xd7   : > { %v2089_v16 = vld [vmem:[#allocation2 + $0x98] sm:$0xf]  ;;  %v1131_v37 = vsel %vm14006_vm9, %v1123_v24, %v1130_v28  ;;  %v1761_v51 = vrot.slane %v1759_v31, 5  ;;  %v1765_v57 = vrot.slane %v1763_v21, 4  ;;  %v750_v58 = vadd.f32 %v14211_v42, %v712_v41  ;;  %v1575_v6 = vld [vmem:[#allocation2 + $0x94] sm:$0xf] }
  0xd8   : > { %v2264_v47 = vshrl.u32 %v2089_v16, 16  ;;  %v2267_v35 = vshll.u32 %v2089_v16, 16  ;;  %v11487_v49 = vcombine.low %v1122_v34, %v1131_v37  ;;  %v13358_v52 = vld [vmem:[#allocation2 + $0x94] sm:$0xff]   ;;  %v2257_v54 = vrot.slane %v2255_v22, 7  ;;  %v13377_v24 = vld [vmem:[#allocation8 + $0x1d8] sm:$0xff]  }
  0xd9   : > { %v1757_v56 = vrot.slane %v1756_v46, 4  ;;  %v951_v27 = vld [vmem:[#allocation2 + $0x98] sm:$0xf]  ;;  %v1574_v38 = vld [vmem:[#allocation2 + $0x88] sm:$0x1]  ;;  %v1133_v61 = vshrl.u32 %v949_v32, 16  ;;  %v1766_v48 = vor.u32 %v1765_v57, %v1761_v51  ;;  %v12119_v55 = vpack.c.bf16 %v750_v58, %v749_v44  ;;  %12539 = vmatprep.subr.bf16.mxu1 %v13377_v24 }
  0xda   : > { %v2266_v60 = vrot.slane %v2264_v47, 7  ;;  %5143 = vmatmul.mubr.bf16.gmra.mrb[24].mxu0 %v11487_v49  ;;  %v1138_v62 = vshrl.u32 %v950_v43, 16  ;;  %v1141_v63 = vshll.u32 %v950_v43, 16  ;;  %v2260_v0 = vor.u32 %v2258_v45, %v2257_v54  ;;  %v1576_v53 = vld [vmem:[#allocation2 + $0x98] sm:$0xf]  ;;  %v675_v23 = vld [vmem:[%s13962_s26 + $0x80] sm:$0xff] }
  0xdb   : > { %v2262_v1 = vrot.slane %v2257_v54, 4  ;;  %v1762_v2 = vsel %vm14031_vm10, %v1757_v56, %v1761_v51  ;;  %5150 = vmatprep.mubr.bf16.mxu0 %v13358_v52  ;;  %v1769_v10 = vshll.u32 %v1574_v38, 16  ;;  %v11472_v11 = vrot.slane %v1133_v61, 11  ;;  %12184 = vst [vmem:[#allocation2 + $0xa8] sm:$0xff] %v12119_v55   ;;  %v449_v31 = vld [vmem:[#allocation2 + $0xb8] sm:$0x8] }
  0xdc   : > { %v2269_v9 = vor.u32 %v2267_v35, %v2266_v60  ;;  %v2261_v12 = vsel %vm14006_vm9, %v14196_v17, %v2260_v0  ;;  %v1767_v13 = vrot.slane %v1766_v48, 4  ;;  %v1140_v14 = vrot.slane %v1138_v62, 7  ;;  %v676_v36 = vld [vmem:[%s13962_s26 + $0x88] sm:$0xff]  ;;  %v677_v49 = vld [vmem:[%s13962_s26 + $0x90] sm:$0xff] }
  0xdd   : > { %v1147_v50 = vshrl.u32 %v951_v27, 16  ;;  %v1771_v18 = vrot.slane %v1769_v10, 5  ;;  %v2090_v19 = vld [vmem:[#allocation2 + $0xa4] sm:$0x8]  ;;  %v1150_v20 = vshll.u32 %v951_v27, 16  ;;  %v501_v4 = vsel %vm13978_vm5, 0, %v500_v5 }
  0xde   : > { %v2270_v15 = vsel %vm14006_vm9, %v2262_v1, %v2269_v9  ;;  %v2272_v17 = vshrl.u32 %v2090_v19, 16  ;;  %v1143_v28 = vor.u32 %v1141_v63, %v1140_v14  ;;  %v1145_v30 = vrot.slane %v1140_v14, 4  ;;  %502 = vst [vmem:[#allocation2 + $0x9c] sm:$0x1] %v501_v4  ;;  %v952_v41 = vld [vmem:[#allocation2 + $0xa4] sm:$0x8] }
  0xdf   : > { %v11551_v26 = vcombine.low %v2261_v12, %v2270_v15  ;;  %v1772_v21 = vsel %vm14031_vm10, %v1767_v13, %v1771_v18  ;;  %v1149_v32 = vrot.slane %v1147_v50, 7  ;;  %v1774_v33 = vshrl.u32 %v1575_v6, 16  ;;  %v503_v15 = vld [vmem:[#allocation2 + $0xb0] sm:$0x1] }
  0xe0   : > { %v1777_v34 = vshll.u32 %v1575_v6, 16  ;;  %v11519_v44 = vcombine.low %v1762_v2, %v1772_v21  ;;  %v14231_v16 = vrot.slane %v2272_v17, 11  ;;  %v1144_v22 = vsel %vm14006_vm9, %v11472_v11, %v1143_v28 }
  0xe1   : > { %5303 = vmatprep.mubr.bf16.mxu1 %v11551_v26  ;;  %v1783_v45 = vshll.u32 %v1576_v53, 16  ;;  %v1152_v37 = vor.u32 %v1150_v20, %v1149_v32  ;;  %v1776_v46 = vrot.slane %v1774_v33, 4  ;;  %v1787_v35 = vshrl.u32 %v1576_v53, 16  ;;  %v13379_v53 = vld [vmem:[#allocation8 + $0x198] sm:$0xff]  }
  0xe2   : > { %v1779_v47 = vrot.slane %v1777_v34, 5  ;;  %5304 = vmatmul.mubr.bf16.gmra.mrb[24].mxu1 %v11519_v44  ;;  %v450_v52 = vsel %vm13973_vm3, 0, %v449_v31  ;;  %v713_v43 = vmul.f32 %v14205_v39, %v675_v23  ;;  %v714_v54 = vmul.f32 %v14205_v39, %v676_v36  ;;  %v2091_v60 = vld [vmem:[#allocation2 + $0xa8] sm:$0xf]  ;;  %v2092_v38 = vld [vmem:[#allocation2 + $0xac] sm:$0xf] }
  0xe3   : > { %v1785_v51 = vrot.slane %v1783_v45, 5  ;;  %v1153_v56 = vsel %vm14006_vm9, %v1145_v30, %v1152_v37  ;;  %v1789_v58 = vrot.slane %v1787_v35, 4  ;;  %451 = vst [vmem:[#allocation2 + $0xb8] sm:$0x8] %v450_v52  ;;  %v1155_v27 = vshrl.u32 %v952_v41, 16  ;;  %v13359_v55 = vld [vmem:[#allocation2 + $0xa8] sm:$0xff]   ;;  %12540 = vmatpush3.bf16.msra.mxu1 %v13379_v53 }
  0xe4   : > { %v1780_v57 = vor.u32 %v1779_v47, %v1776_v46  ;;  %v11488_v61 = vcombine.low %v1144_v22, %v1153_v56  ;;  %v751_v62 = vadd.f32 %v14211_v42, %v713_v43  ;;  %v752_v63 = vadd.f32 %v14211_v42, %v714_v54  ;;  %v953_v50 = vld [vmem:[#allocation2 + $0xa8] sm:$0xf]  ;;  %v954_v3 = vld [vmem:[#allocation2 + $0xac] sm:$0xf]  ;;  %v13382_v47 = vld [vmem:[#allocation8 + $0x1e0] sm:$0xff]  }
  0xe5   : > { %v14246_v0 = vmul.f32 %v14205_v39, %v677_v49  ;;  %v2277_v1 = vshrl.u32 %v2091_v60, 16  ;;  %v2280_v2 = vshll.u32 %v2091_v60, 16  ;;  %v2286_v48 = vshrl.u32 %v2092_v38, 16  ;;  %v1577_v6 = vld [vmem:[#allocation2 + $0x9c] sm:$0x1]  ;;  %v13380_v26 = vld [vmem:[#allocation8 + $0x178] sm:$0xff]   ;;  %12541 = vmatprep.subr.bf16.mxu1 %v13382_v47 }
  0xe6   : > { %v2289_v5 = vshll.u32 %v2092_v38, 16  ;;  %5151 = vmatmul.mubr.bf16.gmra.mrb[28].mxu0 %v11488_v61  ;;  %v1781_v8 = vrot.slane %v1780_v57, 4  ;;  %v1790_v9 = vor.u32 %v1789_v58, %v1785_v51  ;;  %v1793_v10 = vshll.u32 %v1577_v6, 16  ;;  %v1578_v24 = vld [vmem:[#allocation2 + $0xa8] sm:$0xf]  ;;  %12435 = vmatprep.subr.bf16.mxu0 %v13380_v26  ;;  %v13383_v54 = vld [vmem:[#allocation8 + $0x1a0] sm:$0xff]  }
  0xe7   : > { %v12052_v11 = vpack.c.bf16 %v751_v62, %v751_v62  ;;  %v2279_v12 = vrot.slane %v2277_v1, 7  ;;  %v2288_v13 = vrot.slane %v2286_v48, 7  ;;  %v12053_v14 = vpack.c.bf16 %v752_v63, %v752_v63  ;;  %5158 = vmatprep.mubr.bf16.mxu0 %v13359_v55  ;;  %v1579_v21 = vld [vmem:[#allocation2 + $0xac] sm:$0xf]  ;;  %12542 = vmatpush3.bf16.msra.mxu1 %v13383_v54  ;;  %v680_v54 = vld [vmem:[%s13962_s26 + $0xa8] sm:$0xff] }
  0xe8   : > { %v14249_v18 = vmul.f32 %v14205_v39, %v678_v59  ;;  %v1786_v19 = vsel %vm14031_vm10, %v1781_v8, %v1785_v51  ;;  %v1791_v20 = vrot.slane %v1790_v9, 4  ;;  %v1795_v4 = vrot.slane %v1793_v10, 5  ;;  %v13381_v44 = vld [vmem:[#allocation8 + $0x138] sm:$0xff]  }
  0xe9   : > { %912 = vst [vmem:[#allocation2 + $0xbc] sm:$0xf] %v12052_v11  ;;  %v11473_v23 = vrot.slane %v1155_v27, 11  ;;  %v2282_v17 = vor.u32 %v2280_v2, %v2279_v12  ;;  %v2284_v28 = vrot.slane %v2279_v12, 4  ;;  %v2291_v30 = vor.u32 %v2289_v5, %v2288_v13  ;;  %913 = vst [vmem:[#allocation2 + $0xc0] sm:$0xf] %v12053_v14  ;;  %12436 = vmatpush3.bf16.msra.mxu0 %v13381_v44 }
  0xea   : > { %v1160_v31 = vshrl.u32 %v953_v50, 16  ;;  %v1796_v32 = vsel %vm14031_vm10, %v1791_v20, %v1795_v4  ;;  %v2093_v33 = vld [vmem:[#allocation2 + $0xb8] sm:$0x8]  ;;  %v1163_v34 = vshll.u32 %v953_v50, 16  ;;  %v1169_v36 = vshrl.u32 %v954_v3, 16 }
  0xeb   : > { %v1172_v41 = vshll.u32 %v954_v3, 16  ;;  %v2283_v22 = vsel %vm14006_vm9, %v14231_v16, %v2282_v17  ;;  %v2292_v45 = vsel %vm14006_vm9, %v2284_v28, %v2291_v30  ;;  %v11520_v37 = vcombine.low %v1786_v19, %v1796_v32  ;;  %v452_v43 = vld [vmem:[#allocation2 + $0xcc] sm:$0x8]  ;;  %v955_v61 = vld [vmem:[#allocation2 + $0xb8] sm:$0x8] }
  0xec   : > { %v2294_v46 = vshrl.u32 %v2093_v33, 16  ;;  %v11552_v35 = vcombine.low %v2283_v22, %v2292_v45  ;;  %v1162_v49 = vrot.slane %v1160_v31, 7  ;;  %v1171_v51 = vrot.slane %v1169_v36, 7  ;;  %v13384_v14 = vld [vmem:[#allocation8 + $0x1e8] sm:$0xff]   ;;  %v506_v33 = vld [vmem:[#allocation2 + $0xc4] sm:$0x1] }
  0xed   : > { %v504_v52 = vsel %vm13978_vm5, 0, %v503_v15  ;;  %v1798_v57 = vshrl.u32 %v1578_v24, 16  ;;  %v1801_v16 = vshll.u32 %v1578_v24, 16  ;;  %v1807_v58 = vshll.u32 %v1579_v21, 16  ;;  %12543 = vmatprep.subr.bf16.mxu1 %v13384_v14 }
  0xee   : > { %v14262_v56 = vrot.slane %v2294_v46, 11  ;;  %505 = vst [vmem:[#allocation2 + $0xb0] sm:$0x1] %v504_v52  ;;  %5311 = vmatprep.mubr.bf16.mxu1 %v11552_v35  ;;  %v1165_v27 = vor.u32 %v1163_v34, %v1162_v49  ;;  %v1167_v59 = vrot.slane %v1162_v49, 4  ;;  %v1174_v60 = vor.u32 %v1172_v41, %v1171_v51  ;;  %v455_v52 = vld [vmem:[#allocation2 + $0xe0] sm:$0x8] }
  0xef   : > { %v1811_v38 = vshrl.u32 %v1579_v21, 16  ;;  %5312 = vmatmul.mubr.bf16.gmra.mrb[28].mxu1 %v11520_v37  ;;  %v1800_v63 = vrot.slane %v1798_v57, 4  ;;  %v1803_v1 = vrot.slane %v1801_v16, 5  ;;  %v14264_v2 = vrot.slane %v1807_v58, 5  ;;  %v13386_v57 = vld [vmem:[#allocation8 + $0x1a8] sm:$0xff]  }
  0xf0   : > { %v2094_v62 = vld [vmem:[#allocation2 + $0xbc] sm:$0xf]  ;;  %v453_v48 = vsel %vm13973_vm3, 0, %v452_v43  ;;  %v2095_v5 = vld [vmem:[#allocation2 + $0xc0] sm:$0xf]  ;;  %v1166_v9 = vsel %vm14006_vm9, %v11473_v23, %v1165_v27  ;;  %v1175_v10 = vsel %vm14006_vm9, %v1167_v59, %v1174_v60  ;;  %v753_v15 = vadd.f32 %v14211_v42, %v14246_v0  ;;  %v679_v43 = vld [vmem:[%s13962_s26 + $0xa0] sm:$0xff]  ;;  %12544 = vmatpush3.bf16.msra.mxu1 %v13386_v57 }
  0xf1   : > { %v2299_v6 = vshrl.u32 %v2094_v62, 16  ;;  %v2302_v8 = vshll.u32 %v2094_v62, 16  ;;  %454 = vst [vmem:[#allocation2 + $0xcc] sm:$0x8] %v453_v48  ;;  %v2308_v55 = vshrl.u32 %v2095_v5, 16  ;;  %v2311_v11 = vshll.u32 %v2095_v5, 16 }
  0xf2   : > { %v11489_v53 = vcombine.low %v1166_v9, %v1175_v10  ;;  %v1804_v12 = vor.u32 %v1803_v1, %v1800_v63  ;;  %v13362_v13 = vld [vmem:[#allocation2 + $0xbc] sm:$0xff]   ;;  %v1813_v3 = vrot.slane %v1811_v38, 4  ;;  %v754_v19 = vadd.f32 %v14211_v42, %v14249_v18  ;;  %v509_v57 = vld [vmem:[#allocation2 + $0xd8] sm:$0x1] }
  0xf3   : > { %v2301_v50 = vrot.slane %v2299_v6, 7  ;;  %v956_v20 = vld [vmem:[#allocation2 + $0xbc] sm:$0xf]  ;;  %v2310_v4 = vrot.slane %v2308_v55, 7  ;;  %v957_v24 = vld [vmem:[#allocation2 + $0xc0] sm:$0xf]  ;;  %v717_v14 = vmul.f32 %v14205_v39, %v679_v43 }
  0xf4   : > { %5159 = vmatmul.mubr.bf16.gmra.mrb[32].mxu0 %v11489_v53  ;;  %v1805_v23 = vrot.slane %v1804_v12, 4  ;;  %v1177_v26 = vshrl.u32 %v955_v61, 16  ;;  %v1182_v17 = vshrl.u32 %v956_v20, 16  ;;  %v1814_v21 = vor.u32 %v1813_v3, %v14264_v2  ;;  %v1581_v0 = vld [vmem:[#allocation2 + $0xbc] sm:$0xf]  ;;  %v681_v60 = vld [vmem:[%s13962_s26 + $0xb0] sm:$0xff] }
  0xf5   : > { %v2304_v28 = vor.u32 %v2302_v8, %v2301_v50  ;;  %v2306_v30 = vrot.slane %v2301_v50, 4  ;;  %v1580_v31 = vld [vmem:[#allocation2 + $0xb0] sm:$0x1]  ;;  %5166 = vmatprep.mubr.bf16.mxu0 %v13362_v13  ;;  %v12124_v32 = vpack.c.bf16 %v754_v19, %v753_v15  ;;  %v2313_v34 = vor.u32 %v2311_v11, %v2310_v4  ;;  %v1582_v59 = vld [vmem:[#allocation2 + $0xc0] sm:$0xf] }
  0xf6   : > { %v1810_v18 = vsel %vm14031_vm10, %v1805_v23, %v14264_v2  ;;  %v1817_v36 = vshll.u32 %v1580_v31, 16  ;;  %v11474_v41 = vrot.slane %v1177_v26, 11  ;;  %v1815_v22 = vrot.slane %v1814_v21, 4  ;;  %v13387_v1 = vld [vmem:[#allocation8 + $0x1f0] sm:$0xff]  }
  0xf7   : > { %v2305_v44 = vsel %vm14006_vm9, %v14262_v56, %v2304_v28  ;;  %12185 = vst [vmem:[#allocation2 + $0xd0] sm:$0xff] %v12124_v32   ;;  %v1184_v45 = vrot.slane %v1182_v17, 7  ;;  %v1185_v37 = vshll.u32 %v956_v20, 16  ;;  %v2314_v46 = vsel %vm14006_vm9, %v2306_v30, %v2313_v34  ;;  %12545 = vmatprep.subr.bf16.mxu1 %v13387_v1  ;;  %v13388_v53 = vld [vmem:[#allocation8 + $0x1b0] sm:$0xff]  }
  0xf8   : > { %v1819_v47 = vrot.slane %v1817_v36, 5  ;;  %v2096_v35 = vld [vmem:[#allocation2 + $0xcc] sm:$0x8]  ;;  %v1191_v49 = vshrl.u32 %v957_v24, 16  ;;  %v1194_v51 = vshll.u32 %v957_v24, 16  ;;  %v11553_v16 = vcombine.low %v2305_v44, %v2314_v46  ;;  %12546 = vmatpush3.bf16.msra.mxu1 %v13388_v53 }
  0xf9   : > { %v2316_v58 = vshrl.u32 %v2096_v35, 16  ;;  %v1187_v27 = vor.u32 %v1185_v37, %v1184_v45  ;;  %v1189_v56 = vrot.slane %v1184_v45, 4  ;;  %v507_v62 = vsel %vm13978_vm5, 0, %v506_v33  ;;  %v958_v11 = vld [vmem:[#allocation2 + $0xcc] sm:$0x8] }
  0xfa   : > { %v1820_v38 = vsel %vm14031_vm10, %v1815_v22, %v1819_v47  ;;  %v1193_v61 = vrot.slane %v1191_v49, 7  ;;  %v1822_v63 = vshrl.u32 %v1581_v0, 16  ;;  %5319 = vmatprep.mubr.bf16.mxu1 %v11553_v16  ;;  %508 = vst [vmem:[#allocation2 + $0xc4] sm:$0x1] %v507_v62  ;;  %v1825_v6 = vshll.u32 %v1581_v0, 16  ;;  %v13389_v44 = vld [vmem:[#allocation8 + $0x1f8] sm:$0xff]  }
  0xfb   : > { %v11521_v2 = vcombine.low %v1810_v18, %v1820_v38  ;;  %v14292_v48 = vrot.slane %v2316_v58, 11  ;;  %v1188_v5 = vsel %vm14006_vm9, %v11474_v41, %v1187_v27  ;;  %v1831_v10 = vshll.u32 %v1582_v59, 16  ;;  %v13390_v35 = vld [vmem:[#allocation8 + $0x1b8] sm:$0xff]   ;;  %12547 = vmatprep.subr.bf16.mxu1 %v13389_v44 }
  0xfc   : > { %v1196_v8 = vor.u32 %v1194_v51, %v1193_v61  ;;  %v1824_v9 = vrot.slane %v1822_v63, 4  ;;  %v1835_v55 = vshrl.u32 %v1582_v59, 16  ;;  %v1827_v12 = vrot.slane %v1825_v6, 5  ;;  %12548 = vmatpush3.bf16.msra.mxu1 %v13390_v35 }
  0xfd   : > { %5320 = vmatmul.mubr.bf16.gmra.mrb[32].mxu1 %v11521_v2  ;;  %v456_v13 = vsel %vm13973_vm3, 0, %v455_v52  ;;  %v718_v50 = vmul.f32 %v14205_v39, %v680_v54  ;;  %v1833_v20 = vrot.slane %v1831_v10, 5  ;;  %v14303_v23 = vmul.f32 %v14205_v39, %v681_v60  ;;  %v458_v2 = vld [vmem:[#allocation2 + $0xf4] sm:$0x8]  ;;  %v682_v10 = vld [vmem:[%s13962_s26 + $0xb8] sm:$0xff] }
  0xfe   : > { %v2097_v3 = vld [vmem:[#allocation2 + $0xd0] sm:$0xf]  ;;  %v2098_v15 = vld [vmem:[#allocation2 + $0xd4] sm:$0xf]  ;;  %v1197_v19 = vsel %vm14006_vm9, %v1189_v56, %v1196_v8  ;;  %v1837_v4 = vrot.slane %v1835_v55, 4  ;;  %v1828_v31 = vor.u32 %v1827_v12, %v1824_v9  ;;  %v755_v33 = vadd.f32 %v14211_v42, %v717_v14 }
  0xff   : > { %457 = vst [vmem:[#allocation2 + $0xe0] sm:$0x8] %v456_v13  ;;  %v2321_v24 = vshrl.u32 %v2097_v3, 16  ;;  %v2324_v26 = vshll.u32 %v2097_v3, 16  ;;  %v2330_v17 = vshrl.u32 %v2098_v15, 16  ;;  %v2333_v28 = vshll.u32 %v2098_v15, 16 }
 0x100   : > { %v11490_v30 = vcombine.low %v1188_v5, %v1197_v19  ;;  %v1838_v21 = vor.u32 %v1837_v4, %v1833_v20  ;;  %v13363_v32 = vld [vmem:[#allocation2 + $0xd0] sm:$0xff]   ;;  %v756_v36 = vadd.f32 %v14211_v42, %v718_v50  ;;  %v1199_v41 = vshrl.u32 %v958_v11, 16 }
 0x101   : > { %v959_v0 = vld [vmem:[#allocation2 + $0xd0] sm:$0xf]  ;;  %v2323_v34 = vrot.slane %v2321_v24, 7  ;;  %v2332_v18 = vrot.slane %v2330_v17, 7  ;;  %v1583_v22 = vld [vmem:[#allocation2 + $0xc4] sm:$0x1]  ;;  %v12056_v46 = vpack.c.bf16 %v755_v33, %v755_v33 }
 0x102   : > { %5167 = vmatmul.mubr.bf16.gmra.mrb[36].mxu0 %v11490_v30  ;;  %v1829_v45 = vrot.slane %v1828_v31, 4  ;;  %v1839_v37 = vrot.slane %v1838_v21, 4  ;;  %v1204_v47 = vshrl.u32 %v959_v0, 16  ;;  %v1841_v43 = vshll.u32 %v1583_v22, 16  ;;  %v960_v54 = vld [vmem:[#allocation2 + $0xd4] sm:$0xf] }
 0x103   : > { %v2326_v49 = vor.u32 %v2324_v26, %v2323_v34  ;;  %v2328_v51 = vrot.slane %v2323_v34, 4  ;;  %v2335_v52 = vor.u32 %v2333_v28, %v2332_v18  ;;  %5174 = vmatprep.mubr.bf16.mxu0 %v13363_v32  ;;  %v12057_v58 = vpack.c.bf16 %v756_v36, %v756_v36  ;;  %916 = vst [vmem:[#allocation2 + $0xe4] sm:$0xf] %v12056_v46  ;;  %v1584_v59 = vld [vmem:[#allocation2 + $0xd0] sm:$0xf] }
 0x104   : > { %v1834_v16 = vsel %vm14031_vm10, %v1829_v45, %v1833_v20  ;;  %v11475_v27 = vrot.slane %v1199_v41, 11  ;;  %v1206_v56 = vrot.slane %v1204_v47, 7  ;;  %v1843_v61 = vrot.slane %v1841_v43, 5  ;;  %v1585_v1 = vld [vmem:[#allocation2 + $0xd4] sm:$0xf] }
 0x105   : > { %v2327_v60 = vsel %vm14006_vm9, %v14292_v48, %v2326_v49  ;;  %v2336_v38 = vsel %vm14006_vm9, %v2328_v51, %v2335_v52  ;;  %v1207_v63 = vshll.u32 %v959_v0, 16  ;;  %917 = vst [vmem:[#allocation2 + $0xe8] sm:$0xf] %v12057_v58  ;;  %v1213_v9 = vshrl.u32 %v960_v54, 16  ;;  %v13392_v3 = vld [vmem:[#allocation8 + $0x200] sm:$0xff]  }
 0x106   : > { %v2099_v62 = vld [vmem:[#allocation2 + $0xe0] sm:$0x8]  ;;  %v11554_v5 = vcombine.low %v2327_v60, %v2336_v38  ;;  %v1211_v8 = vrot.slane %v1206_v56, 4  ;;  %v1844_v55 = vsel %vm14031_vm10, %v1839_v37, %v1843_v61  ;;  %v1216_v53 = vshll.u32 %v960_v54, 16  ;;  %13141 = vmatprep.subr.bf16.mxu0 %v13392_v3  ;;  %v512_v61 = vld [vmem:[#allocation2 + $0xec] sm:$0x1] }
 0x107   : > { %v2338_v6 = vshrl.u32 %v2099_v62, 16  ;;  %v1209_v11 = vor.u32 %v1207_v63, %v1206_v56  ;;  %v510_v48 = vsel %vm13978_vm5, 0, %v509_v57  ;;  %v11522_v12 = vcombine.low %v1834_v16, %v1844_v55  ;;  %v961_v30 = vld [vmem:[#allocation2 + $0xe0] sm:$0x8] }
 0x108   : > { %5327 = vmatprep.mubr.bf16.mxu1 %v11554_v5  ;;  %v1215_v14 = vrot.slane %v1213_v9, 7  ;;  %511 = vst [vmem:[#allocation2 + $0xd8] sm:$0x1] %v510_v48  ;;  %v1846_v50 = vshrl.u32 %v1584_v59, 16  ;;  %v1849_v19 = vshll.u32 %v1584_v59, 16  ;;  %v1855_v20 = vshll.u32 %v1585_v1, 16 }
 0x109   : > { %v14319_v13 = vrot.slane %v2338_v6, 11  ;;  %v1210_v15 = vsel %vm14006_vm9, %v11475_v27, %v1209_v11  ;;  %v1859_v4 = vshrl.u32 %v1585_v1, 16  ;;  %5328 = vmatmul.mubr.bf16.gmra.mrb[36].mxu1 %v11522_v12  ;;  %v459_v17 = vsel %vm13973_vm3, 0, %v458_v2  ;;  %v683_v11 = vld [vmem:[%s13962_s26 + $0xc0] sm:$0xff] }
 0x10a   : > { %v1218_v24 = vor.u32 %v1216_v53, %v1215_v14  ;;  %v1848_v26 = vrot.slane %v1846_v50, 4  ;;  %v720_v28 = vmul.f32 %v14205_v39, %v682_v10  ;;  %v2100_v31 = vld [vmem:[#allocation2 + $0xe4] sm:$0xf]  ;;  %v1851_v21 = vrot.slane %v1849_v19, 5  ;;  %460 = vst [vmem:[#allocation2 + $0xf4] sm:$0x8] %v459_v17 }
 0x10b   : > { %v1857_v32 = vrot.slane %v1855_v20, 5  ;;  %v1861_v33 = vrot.slane %v1859_v4, 4  ;;  %v757_v0 = vadd.f32 %v14211_v42, %v14303_v23  ;;  %v2343_v34 = vshrl.u32 %v2100_v31, 16  ;;  %v962_v44 = vld [vmem:[#allocation2 + $0xe4] sm:$0xf]  ;;  %v684_v53 = vld [vmem:[%s13962_s26 + $0xc8] sm:$0xff] }
 0x10c   : > { %v2346_v18 = vshll.u32 %v2100_v31, 16  ;;  %v1219_v36 = vsel %vm14006_vm9, %v1211_v8, %v1218_v24  ;;  %v758_v41 = vadd.f32 %v14211_v42, %v720_v28  ;;  %v2101_v22 = vld [vmem:[#allocation2 + $0xe8] sm:$0xf]  ;;  %v1852_v37 = vor.u32 %v1851_v21, %v1848_v26  ;;  %v1587_v5 = vld [vmem:[#allocation2 + $0xe4] sm:$0xf] }
 0x10d   : > { %v11491_v45 = vcombine.low %v1210_v15, %v1219_v36  ;;  %v1862_v46 = vor.u32 %v1861_v33, %v1857_v32  ;;  %v13366_v47 = vld [vmem:[#allocation2 + $0xe4] sm:$0xff]   ;;  %v1221_v35 = vshrl.u32 %v961_v30, 16  ;;  %v2345_v49 = vrot.slane %v2343_v34, 7 }
 0x10e   : > { %v2352_v51 = vshrl.u32 %v2101_v22, 16  ;;  %v2355_v52 = vshll.u32 %v2101_v22, 16  ;;  %v12129_v43 = vpack.c.bf16 %v758_v41, %v757_v0  ;;  %v963_v54 = vld [vmem:[#allocation2 + $0xe8] sm:$0xf]  ;;  %v1853_v57 = vrot.slane %v1852_v37, 4  ;;  %v685_v15 = vld [vmem:[%s13962_s26 + $0xd0] sm:$0xff] }
 0x10f   : > { %5175 = vmatmul.mubr.bf16.gmra.mrb[40].mxu0 %v11491_v45  ;;  %v1586_v23 = vld [vmem:[#allocation2 + $0xd8] sm:$0x1]  ;;  %v1863_v16 = vrot.slane %v1862_v46, 4  ;;  %v11476_v58 = vrot.slane %v1221_v35, 11  ;;  %v1226_v27 = vshrl.u32 %v962_v44, 16  ;;  %v2348_v56 = vor.u32 %v2346_v18, %v2345_v49 }
 0x110   : > { %v2350_v59 = vrot.slane %v2345_v49, 4  ;;  %v2354_v60 = vrot.slane %v2352_v51, 7  ;;  %v1865_v38 = vshll.u32 %v1586_v23, 16  ;;  %5182 = vmatprep.mubr.bf16.mxu0 %v13366_v47  ;;  %12186 = vst [vmem:[#allocation2 + $0xf8] sm:$0xff] %v12129_v43   ;;  %v1858_v62 = vsel %vm14031_vm10, %v1853_v57, %v1857_v32  ;;  %v1588_v3 = vld [vmem:[#allocation2 + $0xe8] sm:$0xf] }
 0x111   : > { %v1228_v63 = vrot.slane %v1226_v27, 7  ;;  %v1229_v1 = vshll.u32 %v962_v44, 16  ;;  %v1235_v2 = vshrl.u32 %v963_v54, 16  ;;  %v2349_v6 = vsel %vm14006_vm9, %v14319_v13, %v2348_v56  ;;  %v2102_v10 = vld [vmem:[#allocation2 + $0xf4] sm:$0x8] }
 0x112   : > { %v2357_v8 = vor.u32 %v2355_v52, %v2354_v60  ;;  %v1867_v9 = vrot.slane %v1865_v38, 5  ;;  %v1238_v55 = vshll.u32 %v963_v54, 16  ;;  %v2360_v48 = vshrl.u32 %v2102_v10, 16  ;;  %v461_v30 = vld [vmem:[#allocation2 + $0x108] sm:$0x8] }
 0x113   : > { %v1231_v12 = vor.u32 %v1229_v1, %v1228_v63  ;;  %v1233_v14 = vrot.slane %v1228_v63, 4  ;;  %v1237_v50 = vrot.slane %v1235_v2, 7  ;;  %v513_v13 = vsel %vm13978_vm5, 0, %v512_v61  ;;  %v964_v44 = vld [vmem:[#allocation2 + $0xf4] sm:$0x8] }
 0x114   : > { %v2358_v19 = vsel %vm14006_vm9, %v2350_v59, %v2357_v8  ;;  %v1868_v20 = vsel %vm14031_vm10, %v1863_v16, %v1867_v9  ;;  %v1870_v4 = vshrl.u32 %v1587_v5, 16  ;;  %v11540_v17 = vrot.slane %v2360_v48, 11  ;;  %514 = vst [vmem:[#allocation2 + $0xec] sm:$0x1] %v513_v13  ;;  %v515_v38 = vld [vmem:[#allocation2 + $0x100] sm:$0x1] }
 0x115   : > { %v11555_v24 = vcombine.low %v2349_v6, %v2358_v19  ;;  %v11523_v26 = vcombine.low %v1858_v62, %v1868_v20  ;;  %v1232_v28 = vsel %vm14006_vm9, %v11476_v58, %v1231_v12  ;;  %v1240_v31 = vor.u32 %v1238_v55, %v1237_v50 }
 0x116   : > { %v1872_v21 = vrot.slane %v1870_v4, 4  ;;  %v1873_v32 = vshll.u32 %v1587_v5, 16  ;;  %v1879_v33 = vshll.u32 %v1588_v3, 16  ;;  %v1883_v18 = vshrl.u32 %v1588_v3, 16 }
 0x117   : > { %5335 = vmatprep.mubr.bf16.mxu1 %v11555_v24  ;;  %v2103_v0 = vld [vmem:[#allocation2 + $0xf8] sm:$0xf]  ;;  %v2104_v34 = vld [vmem:[#allocation2 + $0xfc] sm:$0xf]  ;;  %v721_v36 = vmul.f32 %v14205_v39, %v683_v11  ;;  %v722_v41 = vmul.f32 %v14205_v39, %v684_v53  ;;  %v14350_v22 = vmul.f32 %v14205_v39, %v685_v15  ;;  %v1241_v35 = vsel %vm14006_vm9, %v1233_v14, %v1240_v31 }
 0x118   : > { %5336 = vmatmul.mubr.bf16.gmra.mrb[40].mxu1 %v11523_v26  ;;  %v2365_v45 = vshrl.u32 %v2103_v0, 16  ;;  %v2368_v37 = vshll.u32 %v2103_v0, 16  ;;  %v2374_v46 = vshrl.u32 %v2104_v34, 16  ;;  %v2377_v47 = vshll.u32 %v2104_v34, 16  ;;  %v13367_v43 = vld [vmem:[#allocation2 + $0xf8] sm:$0xff]   ;;  %v686_v0 = vld [vmem:[%s13962_s26 + $0xd8] sm:$0xff] }
 0x119   : > { %v1875_v49 = vrot.slane %v1873_v32, 5  ;;  %v1881_v51 = vrot.slane %v1879_v33, 5  ;;  %v1885_v52 = vrot.slane %v1883_v18, 4  ;;  %v11492_v57 = vcombine.low %v1232_v28, %v1241_v35  ;;  %v965_v59 = vld [vmem:[#allocation2 + $0xf8] sm:$0xf] }
 0x11a   : > { %v2367_v54 = vrot.slane %v2365_v45, 7  ;;  %v2376_v23 = vrot.slane %v2374_v46, 7  ;;  %v462_v16 = vsel %vm13973_vm3, 0, %v461_v30  ;;  %v759_v27 = vadd.f32 %v14211_v42, %v721_v36  ;;  %v966_v60 = vld [vmem:[#allocation2 + $0xfc] sm:$0xf] }
 0x11b   : > { %v1876_v39 = vor.u32 %v1875_v49, %v1872_v21  ;;  %v1886_v58 = vor.u32 %v1885_v52, %v1881_v51  ;;  %463 = vst [vmem:[#allocation2 + $0x108] sm:$0x8] %v462_v16  ;;  %v760_v56 = vadd.f32 %v14211_v42, %v722_v41  ;;  %5183 = vmatmul.mubr.bf16.gmra.mrb[44].mxu0 %v11492_v57  ;;  %v1589_v1 = vld [vmem:[#allocation2 + $0xec] sm:$0x1]  ;;  %v1243_v2 = vshrl.u32 %v964_v44, 16 }
 0x11c   : > { %v2370_v61 = vor.u32 %v2368_v37, %v2367_v54  ;;  %v2372_v62 = vrot.slane %v2367_v54, 4  ;;  %v2379_v63 = vor.u32 %v2377_v47, %v2376_v23  ;;  %v1889_v8 = vshll.u32 %v1589_v1, 16  ;;  %5190 = vmatprep.mubr.bf16.mxu0 %v13367_v43  ;;  %v1590_v53 = vld [vmem:[#allocation2 + $0xf8] sm:$0xf]  ;;  %v1591_v3 = vld [vmem:[#allocation2 + $0xfc] sm:$0xf] }
 0x11d   : > { %v1877_v5 = vrot.slane %v1876_v39, 4  ;;  %v1887_v6 = vrot.slane %v1886_v58, 4  ;;  %v12060_v9 = vpack.c.bf16 %v759_v27, %v759_v27  ;;  %v12061_v55 = vpack.c.bf16 %v760_v56, %v760_v56  ;;  %v464_v28 = vld [vmem:[#allocation2 + $0x11c] sm:$0x8]  ;;  %v14376_v52 = vld [vmem:[%s16781_s1] ss:$0 sm:$0xff] }
 0x11e   : > { %v2371_v10 = vsel %vm14006_vm9, %v11540_v17, %v2370_v61  ;;  %v2380_v42 = vsel %vm14006_vm9, %v2372_v62, %v2379_v63  ;;  %v11477_v11 = vrot.slane %v1243_v2, 11  ;;  %v1891_v14 = vrot.slane %v1889_v8, 5  ;;  %v14384_v39 = vld [vmem:[%s16782_s2] ss:$0 sm:$0xff]  ;;  %v3238_v25 = vld [vmem:[#allocation2 + $0xfc] sm:$0xf] }
 0x11f   : > { %v11556_v48 = vcombine.low %v2371_v10, %v2380_v42  ;;  %v1882_v12 = vsel %vm14031_vm10, %v1877_v5, %v1881_v51  ;;  %920 = vst [vmem:[#allocation2 + $0x10c] sm:$0xf] %v12060_v9  ;;  %v1248_v50 = vshrl.u32 %v965_v59, 16  ;;  %921 = vst [vmem:[#allocation2 + $0x110] sm:$0xf] %v12061_v55  ;;  %v1251_v15 = vshll.u32 %v965_v59, 16 }
 0x120   : > { %v1257_v19 = vshrl.u32 %v966_v60, 16  ;;  %v1260_v20 = vshll.u32 %v966_v60, 16  ;;  %v516_v13 = vsel %vm13978_vm5, 0, %v515_v38  ;;  %v1892_v4 = vsel %vm14031_vm10, %v1887_v6, %v1891_v14  ;;  %v518_v6 = vld [vmem:[#allocation2 + $0x114] sm:$0x1] }
 0x121   : > { %5343 = vmatprep.mubr.bf16.mxu1 %v11556_v48  ;;  %v1250_v24 = vrot.slane %v1248_v50, 7  ;;  %517 = vst [vmem:[#allocation2 + $0x100] sm:$0x1] %v516_v13  ;;  %v1894_v26 = vshrl.u32 %v1590_v53, 16  ;;  %v1897_v17 = vshll.u32 %v1590_v53, 16  ;;  %v11524_v30 = vcombine.low %v1882_v12, %v1892_v4 }
 0x122   : > { %v2105_v31 = vld [vmem:[#allocation2 + $0x108] sm:$0x8]  ;;  %v1259_v21 = vrot.slane %v1257_v19, 7  ;;  %v1903_v32 = vshll.u32 %v1591_v3, 16  ;;  %v1907_v33 = vshrl.u32 %v1591_v3, 16  ;;  %v465_v51 = vsel %vm13973_vm3, 0, %v464_v28 }
 0x123   : > { %v2382_v34 = vshrl.u32 %v2105_v31, 16  ;;  %v1253_v18 = vor.u32 %v1251_v15, %v1250_v24  ;;  %v1255_v36 = vrot.slane %v1250_v24, 4  ;;  %v1896_v41 = vrot.slane %v1894_v26, 4  ;;  %5344 = vmatmul.mubr.bf16.gmra.mrb[44].mxu1 %v11524_v30  ;;  %v967_v47 = vld [vmem:[#allocation2 + $0x108] sm:$0x8] }
 0x124   : > { %v1262_v44 = vor.u32 %v1260_v20, %v1259_v21  ;;  %v1899_v45 = vrot.slane %v1897_v17, 5  ;;  %v1905_v37 = vrot.slane %v1903_v32, 5  ;;  %v1909_v46 = vrot.slane %v1907_v33, 4  ;;  %466 = vst [vmem:[#allocation2 + $0x11c] sm:$0x8] %v465_v51 }
 0x125   : > { %v11541_v35 = vrot.slane %v2382_v34, 11  ;;  %v1254_v49 = vsel %vm14006_vm9, %v11477_v11, %v1253_v18  ;;  %v724_v43 = vmul.f32 %v14376_v52, %v686_v0  ;;  %v761_v58 = vadd.f32 %v14384_v39, %v14350_v22  ;;  %v467_v18 = vld [vmem:[#allocation2 + $0x130] sm:$0x8] }
 0x126   : > { %v2106_v54 = vld [vmem:[#allocation2 + $0x10c] sm:$0xf]  ;;  %v1263_v23 = vsel %vm14006_vm9, %v1255_v36, %v1262_v44  ;;  %v1900_v57 = vor.u32 %v1899_v45, %v1896_v41  ;;  %v1910_v16 = vor.u32 %v1909_v46, %v1905_v37  ;;  %v2107_v56 = vld [vmem:[#allocation2 + $0x110] sm:$0xf]  ;;  %v1265_v22 = vshrl.u32 %v967_v47, 16  ;;  %v688_v46 = vld [vmem:[%s13962_s26 + $0xe8] sm:$0xff] }
 0x127   : > { %v968_v27 = vld [vmem:[#allocation2 + $0x10c] sm:$0xf]  ;;  %v2387_v59 = vshrl.u32 %v2106_v54, 16  ;;  %v2390_v60 = vshll.u32 %v2106_v54, 16  ;;  %v11493_v38 = vcombine.low %v1254_v49, %v1263_v23  ;;  %v762_v61 = vadd.f32 %v14384_v39, %v724_v43  ;;  %v969_v55 = vld [vmem:[#allocation2 + $0x110] sm:$0xf] }
 0x128   : > { %v2396_v62 = vshrl.u32 %v2107_v56, 16  ;;  %v2399_v63 = vshll.u32 %v2107_v56, 16  ;;  %v1592_v1 = vld [vmem:[#allocation2 + $0x100] sm:$0x1]  ;;  %v1901_v2 = vrot.slane %v1900_v57, 4  ;;  %v1911_v5 = vrot.slane %v1910_v16, 4 }
 0x129   : > { %v2389_v8 = vrot.slane %v2387_v59, 7  ;;  %5191 = vmatmul.mubr.bf16.gmra.mrb[48].mxu0 %v11493_v38  ;;  %v1913_v9 = vshll.u32 %v1592_v1, 16  ;;  %v13373_v10 = vld [vmem:[#allocation2 + $0x10c] sm:$0xff]   ;;  %v12134_v42 = vpack.c.bf16 %v762_v61, %v761_v58  ;;  %v1270_v48 = vshrl.u32 %v968_v27, 16  ;;  %v689_v47 = vld [vmem:[%s13962_s26 + $0xf0] sm:$0xff] }
 0x12a   : > { %v2398_v11 = vrot.slane %v2396_v62, 7  ;;  %v1906_v53 = vsel %vm14031_vm10, %v1901_v2, %v1905_v37  ;;  %v1273_v12 = vshll.u32 %v968_v27, 16  ;;  %v1593_v14 = vld [vmem:[#allocation2 + $0x10c] sm:$0xf]  ;;  %5198 = vmatprep.mubr.bf16.mxu0 %v13373_v10  ;;  %v11478_v19 = vrot.slane %v1265_v22, 11  ;;  %v687_v36 = vld [vmem:[%s13962_s26 + $0xe0] sm:$0xff] }
 0x12b   : > { %v2392_v50 = vor.u32 %v2390_v60, %v2389_v8  ;;  %v2394_v3 = vrot.slane %v2389_v8, 4  ;;  %v1915_v15 = vrot.slane %v1913_v9, 5  ;;  %12187 = vst [vmem:[#allocation2 + $0x120] sm:$0xff] %v12134_v42   ;;  %v1272_v13 = vrot.slane %v1270_v48, 7  ;;  %v2108_v28 = vld [vmem:[#allocation2 + $0x11c] sm:$0x8] }
 0x12c   : > { %v2401_v20 = vor.u32 %v2399_v63, %v2398_v11  ;;  %v1279_v4 = vshrl.u32 %v969_v55, 16  ;;  %v1282_v24 = vshll.u32 %v969_v55, 16  ;;  %v519_v30 = vsel %vm13978_vm5, 0, %v518_v6  ;;  %v1594_v31 = vld [vmem:[#allocation2 + $0x110] sm:$0xf] }
 0x12d   : > { %v2393_v26 = vsel %vm14006_vm9, %v11541_v35, %v2392_v50  ;;  %v1916_v17 = vsel %vm14031_vm10, %v1911_v5, %v1915_v15  ;;  %v1918_v21 = vshrl.u32 %v1593_v14, 16  ;;  %v2404_v0 = vshrl.u32 %v2108_v28, 16  ;;  %520 = vst [vmem:[#allocation2 + $0x114] sm:$0x1] %v519_v30 }
 0x12e   : > { %v2402_v32 = vsel %vm14006_vm9, %v2394_v3, %v2401_v20  ;;  %v11525_v33 = vcombine.low %v1906_v53, %v1916_v17  ;;  %v1275_v34 = vor.u32 %v1273_v12, %v1272_v13  ;;  %v1277_v44 = vrot.slane %v1272_v13, 4  ;;  %v970_v53 = vld [vmem:[#allocation2 + $0x11c] sm:$0x8] }
 0x12f   : > { %v11557_v41 = vcombine.low %v2393_v26, %v2402_v32  ;;  %v1281_v45 = vrot.slane %v1279_v4, 7  ;;  %v1920_v37 = vrot.slane %v1918_v21, 4  ;;  %v11542_v35 = vrot.slane %v2404_v0, 11 }
 0x130   : > { %v1276_v49 = vsel %vm14006_vm9, %v11478_v19, %v1275_v34  ;;  %v1921_v51 = vshll.u32 %v1593_v14, 16  ;;  %v1927_v43 = vshll.u32 %v1594_v31, 16  ;;  %v1931_v23 = vshrl.u32 %v1594_v31, 16 }
 0x131   : > { %5351 = vmatprep.mubr.bf16.mxu1 %v11557_v41  ;;  %v1284_v54 = vor.u32 %v1282_v24, %v1281_v45  ;;  %v468_v57 = vsel %vm13973_vm3, 0, %v467_v18  ;;  %v725_v16 = vmul.f32 %v14376_v52, %v687_v36  ;;  %v726_v60 = vmul.f32 %v14376_v52, %v688_v46  ;;  %v521_v24 = vld [vmem:[#allocation2 + $0x128] sm:$0x1]  ;;  %v470_v36 = vld [vmem:[#allocation2 + $0x144] sm:$0x8] }
 0x132   : > { %5352 = vmatmul.mubr.bf16.gmra.mrb[48].mxu1 %v11525_v33  ;;  %v2109_v58 = vld [vmem:[#allocation2 + $0x120] sm:$0xf]  ;;  %v2110_v27 = vld [vmem:[#allocation2 + $0x124] sm:$0xf]  ;;  %v1923_v56 = vrot.slane %v1921_v51, 5  ;;  %v1929_v59 = vrot.slane %v1927_v43, 5  ;;  %v14409_v38 = vmul.f32 %v14376_v52, %v689_v47 }
 0x133   : > { %469 = vst [vmem:[#allocation2 + $0x130] sm:$0x8] %v468_v57  ;;  %v2409_v61 = vshrl.u32 %v2109_v58, 16  ;;  %v2412_v62 = vshll.u32 %v2109_v58, 16  ;;  %v2418_v63 = vshrl.u32 %v2110_v27, 16  ;;  %v2421_v1 = vshll.u32 %v2110_v27, 16 }
 0x134   : > { %v1285_v2 = vsel %vm14006_vm9, %v1277_v44, %v1284_v54  ;;  %v1924_v5 = vor.u32 %v1923_v56, %v1920_v37  ;;  %v1933_v6 = vrot.slane %v1931_v23, 4  ;;  %v13378_v8 = vld [vmem:[#allocation2 + $0x120] sm:$0xff]   ;;  %v763_v9 = vadd.f32 %v14384_v39, %v725_v16  ;;  %v1595_v22 = vld [vmem:[#allocation2 + $0x114] sm:$0x1]  ;;  %v690_v51 = vld [vmem:[%s13962_s26 + $0xf8] sm:$0xff] }
 0x135   : > { %v2411_v10 = vrot.slane %v2409_v61, 7  ;;  %v2420_v42 = vrot.slane %v2418_v63, 7  ;;  %v11494_v55 = vcombine.low %v1276_v49, %v1285_v2  ;;  %v764_v11 = vadd.f32 %v14384_v39, %v726_v60  ;;  %v971_v3 = vld [vmem:[#allocation2 + $0x120] sm:$0xf]  ;;  %v972_v15 = vld [vmem:[#allocation2 + $0x124] sm:$0xf] }
 0x136   : > { %v1925_v48 = vrot.slane %v1924_v5, 4  ;;  %v1934_v12 = vor.u32 %v1933_v6, %v1929_v59  ;;  %v1937_v14 = vshll.u32 %v1595_v22, 16  ;;  %v12064_v50 = vpack.c.bf16 %v763_v9, %v763_v9  ;;  %v1596_v26 = vld [vmem:[#allocation2 + $0x120] sm:$0xf]  ;;  %v1597_v18 = vld [vmem:[#allocation2 + $0x124] sm:$0xf] }
 0x137   : > { %v2414_v19 = vor.u32 %v2412_v62, %v2411_v10  ;;  %v2416_v20 = vrot.slane %v2411_v10, 4  ;;  %v2423_v13 = vor.u32 %v2421_v1, %v2420_v42  ;;  %5199 = vmatmul.mubr.bf16.gmra.mrb[52].mxu0 %v11494_v55  ;;  %v12065_v4 = vpack.c.bf16 %v764_v11, %v764_v11 }
 0x138   : > { %v1930_v17 = vsel %vm14031_vm10, %v1925_v48, %v1929_v59  ;;  %v1935_v28 = vrot.slane %v1934_v12, 4  ;;  %v1939_v30 = vrot.slane %v1937_v14, 5  ;;  %5206 = vmatprep.mubr.bf16.mxu0 %v13378_v8  ;;  %924 = vst [vmem:[#allocation2 + $0x134] sm:$0xf] %v12064_v50  ;;  %v1287_v31 = vshrl.u32 %v970_v53, 16 }
 0x139   : > { %v2415_v21 = vsel %vm14006_vm9, %v11542_v35, %v2414_v19  ;;  %v2424_v32 = vsel %vm14006_vm9, %v2416_v20, %v2423_v13  ;;  %925 = vst [vmem:[#allocation2 + $0x138] sm:$0xf] %v12065_v4  ;;  %v1292_v0 = vshrl.u32 %v971_v3, 16  ;;  %v1295_v34 = vshll.u32 %v971_v3, 16 }
 0x13a   : > { %v2111_v33 = vld [vmem:[#allocation2 + $0x130] sm:$0x8]  ;;  %v11558_v41 = vcombine.low %v2415_v21, %v2424_v32  ;;  %v1940_v44 = vsel %vm14031_vm10, %v1935_v28, %v1939_v30  ;;  %v11479_v37 = vrot.slane %v1287_v31, 11  ;;  %v1301_v49 = vshrl.u32 %v972_v15, 16 }
 0x13b   : > { %v2426_v45 = vshrl.u32 %v2111_v33, 16  ;;  %v11526_v46 = vcombine.low %v1930_v17, %v1940_v44  ;;  %v1294_v47 = vrot.slane %v1292_v0, 7  ;;  %v1304_v35 = vshll.u32 %v972_v15, 16  ;;  %v973_v63 = vld [vmem:[#allocation2 + $0x130] sm:$0x8] }
 0x13c   : > { %5359 = vmatprep.mubr.bf16.mxu1 %v11558_v41  ;;  %v522_v54 = vsel %vm13978_vm5, 0, %v521_v24  ;;  %v1942_v23 = vshrl.u32 %v1596_v26, 16  ;;  %v1945_v57 = vshll.u32 %v1596_v26, 16  ;;  %v1303_v27 = vrot.slane %v1301_v49, 7 }
 0x13d   : > { %v14424_v43 = vrot.slane %v2426_v45, 11  ;;  %5360 = vmatmul.mubr.bf16.gmra.mrb[52].mxu1 %v11526_v46  ;;  %v1297_v16 = vor.u32 %v1295_v34, %v1294_v47  ;;  %v1299_v58 = vrot.slane %v1294_v47, 4  ;;  %523 = vst [vmem:[#allocation2 + $0x128] sm:$0x1] %v522_v54  ;;  %v1951_v56 = vshll.u32 %v1597_v18, 16 }
 0x13e   : > { %v1944_v59 = vrot.slane %v1942_v23, 4  ;;  %v1947_v60 = vrot.slane %v1945_v57, 5  ;;  %v1955_v61 = vshrl.u32 %v1597_v18, 16  ;;  %v471_v62 = vsel %vm13973_vm3, 0, %v470_v36  ;;  %v524_v34 = vld [vmem:[#allocation2 + $0x13c] sm:$0x1] }
 0x13f   : > { %v2112_v1 = vld [vmem:[#allocation2 + $0x134] sm:$0xf]  ;;  %v1298_v2 = vsel %vm14006_vm9, %v11479_v37, %v1297_v16  ;;  %v1306_v5 = vor.u32 %v1304_v35, %v1303_v27  ;;  %v1953_v6 = vrot.slane %v1951_v56, 5  ;;  %472 = vst [vmem:[#allocation2 + $0x144] sm:$0x8] %v471_v62  ;;  %v728_v8 = vmul.f32 %v14376_v52, %v690_v51 }
 0x140   : > { %v2113_v9 = vld [vmem:[#allocation2 + $0x138] sm:$0xf]  ;;  %v2431_v10 = vshrl.u32 %v2112_v1, 16  ;;  %v2434_v42 = vshll.u32 %v2112_v1, 16  ;;  %v1948_v55 = vor.u32 %v1947_v60, %v1944_v59  ;;  %v1957_v22 = vrot.slane %v1955_v61, 4 }
 0x141   : > { %v13385_v11 = vld [vmem:[#allocation2 + $0x134] sm:$0xff]   ;;  %v2440_v53 = vshrl.u32 %v2113_v9, 16  ;;  %v2443_v48 = vshll.u32 %v2113_v9, 16  ;;  %v1307_v12 = vsel %vm14006_vm9, %v1299_v58, %v1306_v5  ;;  %v765_v14 = vadd.f32 %v14384_v39, %v14409_v38  ;;  %v2693_v37 = vld [vmem:[#allocation2 + $0x1c] sm:$0xf] }
 0x142   : > { %v974_v50 = vld [vmem:[#allocation2 + $0x134] sm:$0xf]  ;;  %v2433_v3 = vrot.slane %v2431_v10, 7  ;;  %v11495_v15 = vcombine.low %v1298_v2, %v1307_v12  ;;  %v1949_v19 = vrot.slane %v1948_v55, 4  ;;  %v1958_v20 = vor.u32 %v1957_v22, %v1953_v6  ;;  %v975_v4 = vld [vmem:[#allocation2 + $0x138] sm:$0xf] }
 0x143   : > { %v2442_v52 = vrot.slane %v2440_v53, 7  ;;  %v766_v13 = vadd.f32 %v14384_v39, %v728_v8  ;;  %v1309_v24 = vshrl.u32 %v973_v63, 16  ;;  %v1314_v26 = vshrl.u32 %v974_v50, 16  ;;  %v1599_v18 = vld [vmem:[#allocation2 + $0x134] sm:$0xf] }
 0x144   : > { %v2436_v17 = vor.u32 %v2434_v42, %v2433_v3  ;;  %v2438_v28 = vrot.slane %v2433_v3, 4  ;;  %5207 = vmatmul.mubr.bf16.gmra.mrb[56].mxu0 %v11495_v15  ;;  %v1598_v30 = vld [vmem:[#allocation2 + $0x128] sm:$0x1]  ;;  %v1954_v31 = vsel %vm14031_vm10, %v1949_v19, %v1953_v6  ;;  %v1959_v21 = vrot.slane %v1958_v20, 4  ;;  %v1600_v51 = vld [vmem:[#allocation2 + $0x138] sm:$0xf] }
 0x145   : > { %v2445_v38 = vor.u32 %v2443_v48, %v2442_v52  ;;  %v1961_v32 = vshll.u32 %v1598_v30, 16  ;;  %5214 = vmatprep.mubr.bf16.mxu0 %v13385_v11  ;;  %v12139_v33 = vpack.c.bf16 %v766_v13, %v765_v14  ;;  %v11480_v0 = vrot.slane %v1309_v24, 11  ;;  %v2694_v54 = vld [vmem:[#allocation2 + $0x20] sm:$0xf]  ;;  %v2695_v10 = vld [vmem:[#allocation2 + $0x24] sm:$0x1] }
 0x146   : > { %v2437_v39 = vsel %vm14006_vm9, %v14424_v43, %v2436_v17  ;;  %v2114_v36 = vld [vmem:[#allocation2 + $0x144] sm:$0x8]  ;;  %v1316_v41 = vrot.slane %v1314_v26, 7  ;;  %v1317_v44 = vshll.u32 %v974_v50, 16  ;;  %v1323_v45 = vshrl.u32 %v975_v4, 16 }
 0x147   : > { %v2446_v46 = vsel %vm14006_vm9, %v2438_v28, %v2445_v38  ;;  %v1963_v47 = vrot.slane %v1961_v32, 5  ;;  %12188 = vst [vmem:[#allocation2 + $0x148] sm:$0xff] %v12139_v33   ;;  %v2448_v49 = vshrl.u32 %v2114_v36, 16  ;;  %v1326_v35 = vshll.u32 %v975_v4, 16  ;;  %v3206_v12 = vld [vmem:[#allocation2 + $0x2c] sm:$0x8] }
 0x148   : > { %v11559_v23 = vcombine.low %v2437_v39, %v2446_v46  ;;  %v1319_v57 = vor.u32 %v1317_v44, %v1316_v41  ;;  %v1321_v16 = vrot.slane %v1316_v41, 4  ;;  %v1325_v58 = vrot.slane %v1323_v45, 7  ;;  %v3207_v30 = vld [vmem:[#allocation2 + $0x30] sm:$0xf]  ;;  %v3208_v33 = vld [vmem:[#allocation2 + $0x34] sm:$0xf] }
 0x149   : > { %v1964_v43 = vsel %vm14031_vm10, %v1959_v21, %v1963_v47  ;;  %v14447_v27 = vrot.slane %v2448_v49, 11  ;;  %v525_v56 = vsel %vm13978_vm5, 0, %v524_v34  ;;  %v1966_v59 = vshrl.u32 %v1599_v18, 16  ;;  %v2696_v46 = vld [vmem:[#allocation2 + $0x30] sm:$0xf] }
 0x14a   : > { %5367 = vmatprep.mubr.bf16.mxu1 %v11559_v23  ;;  %v11527_v60 = vcombine.low %v1954_v31, %v1964_v43  ;;  %v1320_v61 = vsel %vm14006_vm9, %v11480_v0, %v1319_v57  ;;  %v1328_v62 = vor.u32 %v1326_v35, %v1325_v58  ;;  %526 = vst [vmem:[#allocation2 + $0x13c] sm:$0x1] %v525_v56  ;;  %v1969_v63 = vshll.u32 %v1599_v18, 16  ;;  %v2697_v58 = vld [vmem:[#allocation2 + $0x34] sm:$0xf] }
 0x14b   : > { %v1968_v1 = vrot.slane %v1966_v59, 4  ;;  %v1975_v2 = vshll.u32 %v1600_v51, 16  ;;  %v1979_v5 = vshrl.u32 %v1600_v51, 16  ;;  %v2742_v6 = vshrl.u32 %v2693_v37, 16  ;;  %v13393_v59 = vld [vmem:[#allocation2 + $0x30] sm:$0xff]  }
 0x14c   : > { %5368 = vmatmul.mubr.bf16.gmra.mrb[56].mxu1 %v11527_v60  ;;  %v1329_v8 = vsel %vm14006_vm9, %v1321_v16, %v1328_v62  ;;  %v1971_v9 = vrot.slane %v1969_v63, 5  ;;  %v2745_v42 = vshll.u32 %v2693_v37, 16  ;;  %v2751_v55 = vshll.u32 %v2694_v54, 16  ;;  %v2698_v62 = vld [vmem:[#allocation2 + $0x38] sm:$0x1] }
 0x14d   : > { %v11496_v22 = vcombine.low %v1320_v61, %v1329_v8  ;;  %v1977_v11 = vrot.slane %v1975_v2, 5  ;;  %v1981_v53 = vrot.slane %v1979_v5, 4  ;;  %v2744_v48 = vrot.slane %v2742_v6, 4  ;;  %v13391_v2 = vld [vmem:[#allocation2 + $0x1c] sm:$0xff]  }
 0x14e   : > { %v2115_v14 = vld [vmem:[#allocation2 + $0x148] sm:$0xf]  ;;  %v2116_v50 = vld [vmem:[#allocation2 + $0x14c] sm:$0xf]  ;;  %v1972_v3 = vor.u32 %v1971_v9, %v1968_v1  ;;  %v2747_v15 = vrot.slane %v2745_v42, 5  ;;  %v2753_v19 = vrot.slane %v2751_v55, 5 }
 0x14f   : > { %v2453_v20 = vshrl.u32 %v2115_v14, 16  ;;  %v2456_v52 = vshll.u32 %v2115_v14, 16  ;;  %v2462_v13 = vshrl.u32 %v2116_v50, 16  ;;  %v2465_v4 = vshll.u32 %v2116_v50, 16  ;;  %5215 = vmatmul.mubr.bf16.gmra.mrb[60].mxu0 %v11496_v22  ;;  %v3210_v55 = vld [vmem:[#allocation2 + $0x44] sm:$0xf] }
 0x150   : > { %v1973_v24 = vrot.slane %v1972_v3, 4  ;;  %v1982_v26 = vor.u32 %v1981_v53, %v1977_v11  ;;  %v2748_v17 = vor.u32 %v2747_v15, %v2744_v48  ;;  %v2755_v28 = vshrl.u32 %v2694_v54, 16 }
 0x151   : > { %v2455_v31 = vrot.slane %v2453_v20, 7  ;;  %v2464_v21 = vrot.slane %v2462_v13, 7  ;;  %v1601_v38 = vld [vmem:[#allocation2 + $0x13c] sm:$0x1]  ;;  %v2761_v32 = vshll.u32 %v2695_v10, 16  ;;  %v3255_v0 = vshrl.u32 %v3206_v12, 16 }
 0x152   : > { %v1978_v34 = vsel %vm14031_vm10, %v1973_v24, %v1977_v11  ;;  %v1983_v18 = vrot.slane %v1982_v26, 4  ;;  %v1985_v39 = vshll.u32 %v1601_v38, 16  ;;  %v2749_v36 = vrot.slane %v2748_v17, 4  ;;  %v3211_v12 = vld [vmem:[#allocation2 + $0x48] sm:$0xf] }
 0x153   : > { %v2458_v41 = vor.u32 %v2456_v52, %v2455_v31  ;;  %v2460_v44 = vrot.slane %v2455_v31, 4  ;;  %v2467_v45 = vor.u32 %v2465_v4, %v2464_v21  ;;  %v2757_v37 = vrot.slane %v2755_v28, 4  ;;  %v13397_v4 = vld [vmem:[#allocation8 + $0x208] sm:$0xff]  }
 0x154   : > { %v1987_v47 = vrot.slane %v1985_v39, 5  ;;  %v2754_v49 = vsel %vm14031_vm10, %v2749_v36, %v2753_v19  ;;  %v2763_v35 = vrot.slane %v2761_v32, 5  ;;  %v11593_v51 = vrot.slane %v3255_v0, 11  ;;  %v13395_v32 = vld [vmem:[#allocation2 + $0x44] sm:$0xff]  }
 0x155   : > { %v2459_v54 = vsel %vm14006_vm9, %v14447_v27, %v2458_v41  ;;  %v2468_v23 = vsel %vm14006_vm9, %v2460_v44, %v2467_v45  ;;  %v2758_v57 = vor.u32 %v2757_v37, %v2753_v19  ;;  %v3260_v16 = vshrl.u32 %v3207_v30, 16  ;;  %v3209_v27 = vld [vmem:[#allocation2 + $0x40] sm:$0x8]  ;;  %v2700_v0 = vld [vmem:[#allocation2 + $0x48] sm:$0xf] }
 0x156   : > { %v11560_v43 = vcombine.low %v2459_v54, %v2468_v23  ;;  %v1988_v56 = vsel %vm14031_vm10, %v1983_v18, %v1987_v47  ;;  %v3263_v60 = vshll.u32 %v3207_v30, 16  ;;  %v3269_v61 = vshrl.u32 %v3208_v33, 16  ;;  %v2699_v30 = vld [vmem:[#allocation2 + $0x44] sm:$0xf]  ;;  %v13555_v18 = vld [vmem:[#allocation8 + $0x200] sm:$0xff]  }
 0x157   : > { %v11528_v63 = vcombine.low %v1978_v34, %v1988_v56  ;;  %v2759_v1 = vrot.slane %v2758_v57, 4  ;;  %v3262_v5 = vrot.slane %v3260_v16, 7  ;;  %v3272_v6 = vshll.u32 %v3208_v33, 16  ;;  %v13402_v34 = vld [vmem:[#allocation8 + $0x210] sm:$0xff]   ;;  %v2701_v45 = vld [vmem:[#allocation2 + $0x4c] sm:$0x1] }
 0x158   : > { %5375 = vmatprep.mubr.bf16.mxu1 %v11560_v43  ;;  %v3271_v8 = vrot.slane %v3269_v61, 7  ;;  %v2766_v9 = vshrl.u32 %v2696_v46, 16  ;;  %v2769_v10 = vshll.u32 %v2696_v46, 16  ;;  %v2775_v42 = vshll.u32 %v2697_v58, 16  ;;  %v3212_v37 = vld [vmem:[#allocation2 + $0x54] sm:$0x8] }
 0x159   : > { %5376 = vmatmul.mubr.bf16.gmra.mrb[60].mxu1 %v11528_v63  ;;  %v2764_v22 = vsel %vm14031_vm10, %v2759_v1, %v2763_v35  ;;  %v3265_v11 = vor.u32 %v3263_v60, %v3262_v5  ;;  %v3267_v53 = vrot.slane %v3262_v5, 4  ;;  %v2779_v48 = vshrl.u32 %v2697_v58, 16  ;;  %v13394_v43 = vld [vmem:[#allocation2 + $0x30] sm:$0xff]   ;;  %v3214_v61 = vld [vmem:[#allocation2 + $0x5c] sm:$0xf] }
 0x15a   : > { %v11577_v14 = vcombine.low %v2754_v49, %v2764_v22  ;;  %5577 = vmatprep.mubr.bf16.mxu1 %v13393_v59  ;;  %v3274_v50 = vor.u32 %v3272_v6, %v3271_v8  ;;  %v2768_v3 = vrot.slane %v2766_v9, 4  ;;  %v2771_v15 = vrot.slane %v2769_v10, 5  ;;  %v2702_v5 = vld [vmem:[#allocation2 + $0x58] sm:$0xf]  ;;  %v13407_v6 = vld [vmem:[#allocation8 + $0x218] sm:$0xff]  }
 0x15b   : > { %v3266_v19 = vsel %vm14006_vm9, %v11593_v51, %v3265_v11  ;;  %v2777_v20 = vrot.slane %v2775_v42, 5  ;;  %v2781_v52 = vrot.slane %v2779_v48, 4  ;;  %v2785_v13 = vshll.u32 %v2698_v62, 16  ;;  %v3213_v51 = vld [vmem:[#allocation2 + $0x58] sm:$0xf] }
 0x15c   : > { %5416 = vmatprep.mubr.bf16.mxu0 %v11577_v14  ;;  %v3275_v24 = vsel %vm14006_vm9, %v3267_v53, %v3274_v50  ;;  %v2772_v26 = vor.u32 %v2771_v15, %v2768_v3  ;;  %v3277_v17 = vshrl.u32 %v3209_v27, 16  ;;  %v3282_v28 = vshrl.u32 %v3210_v55, 16  ;;  %v2703_v48 = vld [vmem:[#allocation2 + $0x5c] sm:$0xf] }
 0x15d   : > { %5417 = vmatmul.mubr.bf16.vlgmr.msra.gmra.mrb[64].mxu0 %v13391_v2  ;;  %v11609_v31 = vcombine.low %v3266_v19, %v3275_v24  ;;  %v2782_v21 = vor.u32 %v2781_v52, %v2777_v20  ;;  %v2787_v38 = vrot.slane %v2785_v13, 5  ;;  %v3285_v33 = vshll.u32 %v3210_v55, 16  ;;  %v13398_v15 = vld [vmem:[#allocation2 + $0x58] sm:$0xff]  }
 0x15e   : > { %13142 = vmatpush3.bf16.msra.mxu0 %v13555_v18  ;;  %v2773_v39 = vrot.slane %v2772_v26, 4  ;;  %v11594_v36 = vrot.slane %v3277_v17, 11  ;;  %v3284_v41 = vrot.slane %v3282_v28, 7  ;;  %v3291_v44 = vshrl.u32 %v3211_v12, 16  ;;  %v2704_v26 = vld [vmem:[#allocation2 + $0x60] sm:$0x1] }
 0x15f   : > { %v2783_v46 = vrot.slane %v2782_v21, 4  ;;  %v3294_v47 = vshll.u32 %v3211_v12, 16  ;;  %v2790_v49 = vshrl.u32 %v2699_v30, 16  ;;  %v2793_v35 = vshll.u32 %v2699_v30, 16  ;;  %13143 = vmatprep.subr.bf16.mxu0 %v13397_v4 }
 0x160   : > { %v2778_v54 = vsel %vm14031_vm10, %v2773_v39, %v2777_v20  ;;  %v3287_v23 = vor.u32 %v3285_v33, %v3284_v41  ;;  %v3289_v57 = vrot.slane %v3284_v41, 4  ;;  %v3293_v16 = vrot.slane %v3291_v44, 7  ;;  %v3216_v41 = vld [vmem:[#allocation2 + $0x6c] sm:$0xf] }
 0x161   : > { %5578 = vmatmul.mubr.bf16.vlgmr.msra.gmra.mrb[64].mxu1 %v11609_v31  ;;  %v2788_v58 = vsel %vm14031_vm10, %v2783_v46, %v2787_v38  ;;  %v2792_v56 = vrot.slane %v2790_v49, 4  ;;  %v2795_v59 = vrot.slane %v2793_v35, 5  ;;  %v2799_v60 = vshll.u32 %v2700_v0, 16  ;;  %v14478_v42 = vpop.f32.mrb[0].mxu0  ;;  %v3215_v38 = vld [vmem:[#allocation2 + $0x68] sm:$0x8] }
 0x162   : > { %v11578_v62 = vcombine.low %v2778_v54, %v2788_v58  ;;  %5585 = vmatprep.mubr.bf16.mxu1 %v13395_v32  ;;  %v3288_v63 = vsel %vm14006_vm9, %v11594_v36, %v3287_v23  ;;  %v3296_v1 = vor.u32 %v3294_v47, %v3293_v16  ;;  %v2803_v2 = vshrl.u32 %v2700_v0, 16  ;;  %13144 = vmatpush3.bf16.msra.mxu0 %v13397_v4  ;;  %v14482_v12 = vpop.f32.mrb[1].mxu0  ;;  %v13412_v32 = vld [vmem:[#allocation8 + $0x220] sm:$0xff]   ;;  %v13396_v0 = vld [vmem:[#allocation2 + $0x44] sm:$0xff]   ;;  %v2705_v47 = vld [vmem:[#allocation2 + $0x6c] sm:$0xf] }
 0x163   : > { %v2796_v27 = vor.u32 %v2795_v59, %v2792_v56  ;;  %v2801_v8 = vrot.slane %v2799_v60, 5  ;;  %v2809_v9 = vshll.u32 %v2701_v45, 16  ;;  %v3299_v10 = vshrl.u32 %v3212_v37, 16  ;;  %13145 = vmatprep.subr.bf16.mxu0 %v13402_v34  ;;  %v14484_v20 = vpop.f32.mrb[2].mxu0  ;;  %v3217_v46 = vld [vmem:[#allocation2 + $0x70] sm:$0xf] }
 0x164   : > { %5424 = vmatprep.mubr.bf16.mxu0 %v11578_v62  ;;  %v3297_v55 = vsel %vm14006_vm9, %v3289_v57, %v3296_v1  ;;  %v2805_v22 = vrot.slane %v2803_v2, 4  ;;  %v3304_v11 = vshrl.u32 %v3213_v51, 16  ;;  %v3307_v53 = vshll.u32 %v3213_v51, 16  ;;  %v14486_v17 = vpop.f32.mrb[3].mxu0  ;;  %v13417_v23 = vld [vmem:[#allocation8 + $0x228] sm:$0xff]  }
 0x165   : > { %5425 = vmatmul.mubr.bf16.gmra.mrb[68].mxu0 %v13394_v43  ;;  %v11610_v14 = vcombine.low %v3288_v63, %v3297_v55  ;;  %v2797_v50 = vrot.slane %v2796_v27, 4  ;;  %v2811_v3 = vrot.slane %v2809_v9, 5  ;;  %v11595_v19 = vrot.slane %v3299_v10, 11  ;;  %v2706_v63 = vld [vmem:[#allocation2 + $0x70] sm:$0xf] }
 0x166   : > { %v2806_v52 = vor.u32 %v2805_v22, %v2801_v8  ;;  %v3306_v13 = vrot.slane %v3304_v11, 7  ;;  %v3313_v4 = vshrl.u32 %v3214_v61, 16  ;;  %v3316_v24 = vshll.u32 %v3214_v61, 16  ;;  %13146 = vmatpush3.bf16.msra.mxu0 %v13402_v34  ;;  %v13400_v27 = vld [vmem:[#allocation2 + $0x6c] sm:$0xff]   ;;  %v2707_v9 = vld [vmem:[#allocation2 + $0x74] sm:$0x1] }
 0x167   : > { %v2802_v28 = vsel %vm14031_vm10, %v2797_v50, %v2801_v8  ;;  %v2814_v30 = vshrl.u32 %v2702_v5, 16  ;;  %v2817_v31 = vshll.u32 %v2702_v5, 16  ;;  %v2823_v21 = vshll.u32 %v2703_v48, 16  ;;  %13147 = vmatprep.subr.bf16.mxu0 %v13407_v6 }
 0x168   : > { %v2807_v33 = vrot.slane %v2806_v52, 4  ;;  %v3309_v18 = vor.u32 %v3307_v53, %v3306_v13  ;;  %v3311_v39 = vrot.slane %v3306_v13, 4  ;;  %v3315_v36 = vrot.slane %v3313_v4, 7  ;;  %v3218_v53 = vld [vmem:[#allocation2 + $0x7c] sm:$0x8] }
 0x169   : > { %5586 = vmatmul.mubr.bf16.gmra.mrb[68].mxu1 %v11610_v14  ;;  %v2816_v44 = vrot.slane %v2814_v30, 4  ;;  %v2819_v34 = vrot.slane %v2817_v31, 5  ;;  %v2825_v45 = vrot.slane %v2823_v21, 5  ;;  %v2827_v37 = vshrl.u32 %v2703_v48, 16  ;;  %v14494_v57 = vpop.f32.mrb[0].mxu1  ;;  %v13422_v48 = vld [vmem:[#allocation8 + $0x230] sm:$0xff]  }
 0x16a   : > { %v2812_v49 = vsel %vm14031_vm10, %v2807_v33, %v2811_v3  ;;  %5593 = vmatprep.mubr.bf16.mxu1 %v13398_v15  ;;  %v3310_v35 = vsel %vm14006_vm9, %v11595_v19, %v3309_v18  ;;  %v3318_v51 = vor.u32 %v3316_v24, %v3315_v36  ;;  %v2833_v54 = vshll.u32 %v2704_v26, 16  ;;  %13148 = vmatpush3.bf16.msra.mxu0 %v13407_v6  ;;  %v14498_v1 = vpop.f32.mrb[1].mxu1  ;;  %v3219_v19 = vld [vmem:[#allocation2 + $0x80] sm:$0xf]  ;;  %v13399_v13 = vld [vmem:[#allocation2 + $0x58] sm:$0xff]  }
 0x16b   : > { %v11579_v16 = vcombine.low %v2802_v28, %v2812_v49  ;;  %v2820_v58 = vor.u32 %v2819_v34, %v2816_v44  ;;  %v2829_v43 = vrot.slane %v2827_v37, 4  ;;  %v3321_v56 = vshrl.u32 %v3215_v38, 16  ;;  %13149 = vmatprep.subr.bf16.mxu0 %v13412_v32  ;;  %v14502_v52 = vpop.f32.mrb[2].mxu1  ;;  %v3220_v30 = vld [vmem:[#allocation2 + $0x84] sm:$0xf]  ;;  %v13427_v37 = vld [vmem:[#allocation8 + $0x238] sm:$0xff]  }
 0x16c   : > { %v3319_v59 = vsel %vm14006_vm9, %v3311_v39, %v3318_v51  ;;  %v2835_v60 = vrot.slane %v2833_v54, 5  ;;  %v3326_v61 = vshrl.u32 %v3216_v41, 16  ;;  %v3329_v62 = vshll.u32 %v3216_v41, 16  ;;  %v14504_v31 = vpop.f32.mrb[3].mxu1  ;;  %v2708_v18 = vld [vmem:[#allocation2 + $0x80] sm:$0xf] }
 0x16d   : > { %5432 = vmatprep.mubr.bf16.mxu0 %v11579_v16  ;;  %v11611_v2 = vcombine.low %v3310_v35, %v3319_v59  ;;  %v2821_v5 = vrot.slane %v2820_v58, 4  ;;  %v2830_v6 = vor.u32 %v2829_v43, %v2825_v45  ;;  %v11596_v8 = vrot.slane %v3321_v56, 11  ;;  %v2709_v34 = vld [vmem:[#allocation2 + $0x84] sm:$0xf] }
 0x16e   : > { %5433 = vmatmul.mubr.bf16.gmra.mrb[72].mxu0 %v13396_v0  ;;  %v3328_v10 = vrot.slane %v3326_v61, 7  ;;  %v3335_v55 = vshrl.u32 %v3217_v46, 16  ;;  %v3338_v22 = vshll.u32 %v3217_v46, 16  ;;  %v2838_v11 = vshrl.u32 %v2705_v47, 16 }
 0x16f   : > { %v2826_v14 = vsel %vm14031_vm10, %v2821_v5, %v2825_v45  ;;  %v2831_v50 = vrot.slane %v2830_v6, 4  ;;  %v2841_v3 = vshll.u32 %v2705_v47, 16  ;;  %v2847_v15 = vshll.u32 %v2706_v63, 16  ;;  %13150 = vmatpush3.bf16.msra.mxu0 %v13412_v32  ;;  %v14508_v32 = vpop.f32.mrb[4].mxu0  ;;  %v2710_v6 = vld [vmem:[#allocation2 + $0x88] sm:$0x1] }
 0x170   : > { %v3331_v4 = vor.u32 %v3329_v62, %v3328_v10  ;;  %v3333_v24 = vrot.slane %v3328_v10, 4  ;;  %v3337_v26 = vrot.slane %v3335_v55, 7  ;;  %v2840_v28 = vrot.slane %v2838_v11, 4  ;;  %13151 = vmatprep.subr.bf16.mxu0 %v13417_v23  ;;  %v14512_v45 = vpop.f32.mrb[5].mxu0  ;;  %v13403_v62 = vld [vmem:[#allocation2 + $0x80] sm:$0xff]  }
 0x171   : > { %5594 = vmatmul.mubr.bf16.gmra.mrb[72].mxu1 %v11611_v2  ;;  %v2836_v21 = vsel %vm14031_vm10, %v2831_v50, %v2835_v60  ;;  %v2843_v38 = vrot.slane %v2841_v3, 5  ;;  %v2849_v33 = vrot.slane %v2847_v15, 5  ;;  %v2851_v0 = vshrl.u32 %v2706_v63, 16  ;;  %v14522_v11 = vpop.f32.mrb[6].mxu0 }
 0x172   : > { %v11580_v39 = vcombine.low %v2826_v14, %v2836_v21  ;;  %5601 = vmatprep.mubr.bf16.mxu1 %v13400_v27  ;;  %v3332_v36 = vsel %vm14006_vm9, %v11596_v8, %v3331_v4  ;;  %v3340_v41 = vor.u32 %v3338_v22, %v3337_v26  ;;  %v2857_v44 = vshll.u32 %v2707_v9, 16  ;;  %v3221_v22 = vld [vmem:[#allocation2 + $0x90] sm:$0x8] }
 0x173   : > { %v2844_v46 = vor.u32 %v2843_v38, %v2840_v28  ;;  %v2853_v47 = vrot.slane %v2851_v0, 4  ;;  %v3343_v49 = vshrl.u32 %v3218_v53, 16  ;;  %v3348_v35 = vshrl.u32 %v3219_v19, 16  ;;  %13152 = vmatpush3.bf16.msra.mxu0 %v13417_v23  ;;  %v14514_v51 = vpop.f32.mrb[4].mxu1  ;;  %v13401_v53 = vld [vmem:[#allocation2 + $0x6c] sm:$0xff]  }
 0x174   : > { %5440 = vmatprep.mubr.bf16.mxu0 %v11580_v39  ;;  %v3341_v54 = vsel %vm14006_vm9, %v3333_v24, %v3340_v41  ;;  %v2859_v16 = vrot.slane %v2857_v44, 5  ;;  %v3351_v58 = vshll.u32 %v3219_v19, 16  ;;  %v3357_v43 = vshrl.u32 %v3220_v30, 16  ;;  %v14518_v56 = vpop.f32.mrb[5].mxu1  ;;  %13153 = vmatprep.subr.bf16.mxu0 %v13422_v48  ;;  %v3222_v19 = vld [vmem:[#allocation2 + $0x94] sm:$0xf] }
 0x175   : > { %v11612_v59 = vcombine.low %v3332_v36, %v3341_v54  ;;  %v2845_v60 = vrot.slane %v2844_v46, 4  ;;  %v2854_v61 = vor.u32 %v2853_v47, %v2849_v33  ;;  %v11597_v63 = vrot.slane %v3343_v49, 11  ;;  %v14526_v21 = vpop.f32.mrb[6].mxu1 }
 0x176   : > { %5441 = vmatmul.mubr.bf16.gmra.mrb[76].mxu0 %v13399_v13  ;;  %v3350_v2 = vrot.slane %v3348_v35, 7  ;;  %v3359_v23 = vrot.slane %v3357_v43, 7  ;;  %v3360_v5 = vshll.u32 %v3220_v30, 16  ;;  %v2862_v27 = vshrl.u32 %v2708_v18, 16  ;;  %v3223_v13 = vld [vmem:[#allocation2 + $0x98] sm:$0xf] }
 0x177   : > { %v2850_v8 = vsel %vm14031_vm10, %v2845_v60, %v2849_v33  ;;  %v2855_v9 = vrot.slane %v2854_v61, 4  ;;  %v2865_v10 = vshll.u32 %v2708_v18, 16  ;;  %v2871_v55 = vshll.u32 %v2709_v34, 16  ;;  %13154 = vmatpush3.bf16.msra.mxu0 %v13422_v48  ;;  %v2711_v30 = vld [vmem:[#allocation2 + $0x94] sm:$0xf]  ;;  %v14532_v18 = vpop.f32.mrb[7].mxu0 }
 0x178   : > { %v3353_v14 = vor.u32 %v3351_v58, %v3350_v2  ;;  %v3355_v50 = vrot.slane %v3350_v2, 4  ;;  %v3362_v3 = vor.u32 %v3360_v5, %v3359_v23  ;;  %v2864_v15 = vrot.slane %v2862_v27, 4  ;;  %13155 = vmatprep.subr.bf16.mxu0 %v13427_v37  ;;  %v2712_v35 = vld [vmem:[#allocation2 + $0x98] sm:$0xf]  ;;  %v14534_v60 = vpop.f32.mrb[7].mxu1 }
 0x179   : > { %5602 = vmatmul.mubr.bf16.gmra.mrb[76].mxu1 %v11612_v59  ;;  %v2860_v4 = vsel %vm14031_vm10, %v2855_v9, %v2859_v16  ;;  %v2867_v24 = vrot.slane %v2865_v10, 5  ;;  %v2873_v26 = vrot.slane %v2871_v55, 5  ;;  %v2875_v28 = vshrl.u32 %v2709_v34, 16  ;;  %v13405_v58 = vld [vmem:[#allocation2 + $0x94] sm:$0xff]   ;;  %v14538_v9 = vpop.f32.mrb[8].mxu0  ;;  %v13404_v10 = vld [vmem:[#allocation2 + $0x80] sm:$0xff]  }
 0x17a   : > { %v11581_v38 = vcombine.low %v2850_v8, %v2860_v4  ;;  %5609 = vmatprep.mubr.bf16.mxu1 %v13403_v62  ;;  %v3354_v48 = vsel %vm14006_vm9, %v11597_v63, %v3353_v14  ;;  %v3363_v33 = vsel %vm14006_vm9, %v3355_v50, %v3362_v3  ;;  %v2881_v0 = vshll.u32 %v2710_v6, 16  ;;  %v2713_v63 = vld [vmem:[#allocation2 + $0x9c] sm:$0x1]  ;;  %v3224_v8 = vld [vmem:[#allocation2 + $0xa4] sm:$0x8] }
 0x17b   : > { %v11613_v39 = vcombine.low %v3354_v48, %v3363_v33  ;;  %v2868_v36 = vor.u32 %v2867_v24, %v2864_v15  ;;  %v2877_v41 = vrot.slane %v2875_v28, 4  ;;  %v3365_v44 = vshrl.u32 %v3221_v22, 16  ;;  %13156 = vmatpush3.bf16.msra.mxu0 %v13427_v37  ;;  %v3226_v3 = vld [vmem:[#allocation2 + $0xac] sm:$0xf]  ;;  %v2714_v24 = vld [vmem:[#allocation2 + $0xa8] sm:$0xf] }
 0x17c   : > { %5448 = vmatprep.mubr.bf16.mxu0 %v11581_v38  ;;  %v2883_v34 = vrot.slane %v2881_v0, 5  ;;  %v3370_v46 = vshrl.u32 %v3222_v19, 16  ;;  %v3373_v47 = vshll.u32 %v3222_v19, 16  ;;  %v3379_v49 = vshrl.u32 %v3223_v13, 16  ;;  %v2715_v33 = vld [vmem:[#allocation2 + $0xac] sm:$0xf] }
 0x17d   : > { %v2869_v54 = vrot.slane %v2868_v36, 4  ;;  %v2878_v16 = vor.u32 %v2877_v41, %v2873_v26  ;;  %v11598_v43 = vrot.slane %v3365_v44, 11  ;;  %v3382_v59 = vshll.u32 %v3223_v13, 16  ;;  %v14548_v0 = vpop.f32.mrb[9].mxu0 }
 0x17e   : > { %5449 = vmatmul.mubr.bf16.gmra.mrb[80].mxu0 %v13401_v53  ;;  %v3372_v61 = vrot.slane %v3370_v46, 7  ;;  %v3381_v62 = vrot.slane %v3379_v49, 7  ;;  %v2886_v2 = vshrl.u32 %v2711_v30, 16  ;;  %v2889_v23 = vshll.u32 %v2711_v30, 16  ;;  %v3225_v53 = vld [vmem:[#allocation2 + $0xa8] sm:$0xf] }
 0x17f   : > { %v2874_v37 = vsel %vm14031_vm10, %v2869_v54, %v2873_v26  ;;  %v2879_v5 = vrot.slane %v2878_v16, 4  ;;  %v2895_v6 = vshll.u32 %v2712_v35, 16  ;;  %v2899_v27 = vshrl.u32 %v2712_v35, 16 }
 0x180   : > { %v3375_v55 = vor.u32 %v3373_v47, %v3372_v61  ;;  %v3377_v22 = vrot.slane %v3372_v61, 4  ;;  %v3384_v14 = vor.u32 %v3382_v59, %v3381_v62  ;;  %v2888_v50 = vrot.slane %v2886_v2, 4  ;;  %v14542_v26 = vpop.f32.mrb[8].mxu1  ;;  %v13408_v59 = vld [vmem:[#allocation2 + $0xa8] sm:$0xff]  }
 0x181   : > { %5610 = vmatmul.mubr.bf16.gmra.mrb[80].mxu1 %v11613_v39  ;;  %v2884_v15 = vsel %vm14031_vm10, %v2879_v5, %v2883_v34  ;;  %v2891_v19 = vrot.slane %v2889_v23, 5  ;;  %v2897_v13 = vrot.slane %v2895_v6, 5  ;;  %v2901_v4 = vrot.slane %v2899_v27, 4  ;;  %v14550_v34 = vpop.f32.mrb[9].mxu1  ;;  %v2716_v5 = vld [vmem:[#allocation2 + $0xb0] sm:$0x1] }
 0x182   : > { %v11582_v28 = vcombine.low %v2874_v37, %v2884_v15  ;;  %5617 = vmatprep.mubr.bf16.mxu1 %v13405_v58  ;;  %v3376_v30 = vsel %vm14006_vm9, %v11598_v43, %v3375_v55  ;;  %v3385_v38 = vsel %vm14006_vm9, %v3377_v22, %v3384_v14  ;;  %v2905_v48 = vshll.u32 %v2713_v63, 16  ;;  %v13406_v22 = vld [vmem:[#allocation2 + $0x94] sm:$0xff]   ;;  %v14556_v15 = vpop.f32.mrb[10].mxu0 }
 0x183   : > { %v11614_v39 = vcombine.low %v3376_v30, %v3385_v38  ;;  %v2892_v36 = vor.u32 %v2891_v19, %v2888_v50  ;;  %v2902_v41 = vor.u32 %v2901_v4, %v2897_v13  ;;  %v3387_v44 = vshrl.u32 %v3224_v8, 16  ;;  %v3227_v8 = vld [vmem:[#allocation2 + $0xb8] sm:$0x8] }
 0x184   : > { %5456 = vmatprep.mubr.bf16.mxu0 %v11582_v28  ;;  %v2907_v46 = vrot.slane %v2905_v48, 5  ;;  %v3392_v47 = vshrl.u32 %v3225_v53, 16  ;;  %v3395_v49 = vshll.u32 %v3225_v53, 16  ;;  %v3401_v35 = vshrl.u32 %v3226_v3, 16  ;;  %v3228_v53 = vld [vmem:[#allocation2 + $0xbc] sm:$0xf] }
 0x185   : > { %v2893_v54 = vrot.slane %v2892_v36, 4  ;;  %v2903_v16 = vrot.slane %v2902_v41, 4  ;;  %v11599_v58 = vrot.slane %v3387_v44, 11  ;;  %v3404_v43 = vshll.u32 %v3226_v3, 16  ;;  %v3229_v3 = vld [vmem:[#allocation2 + $0xc0] sm:$0xf] }
 0x186   : > { %5457 = vmatmul.mubr.bf16.gmra.mrb[84].mxu0 %v13404_v10  ;;  %v3394_v61 = vrot.slane %v3392_v47, 7  ;;  %v3403_v62 = vrot.slane %v3401_v35, 7  ;;  %v2910_v63 = vshrl.u32 %v2714_v24, 16  ;;  %v2913_v2 = vshll.u32 %v2714_v24, 16  ;;  %v2717_v28 = vld [vmem:[#allocation2 + $0xbc] sm:$0xf] }
 0x187   : > { %v2898_v23 = vsel %vm14031_vm10, %v2893_v54, %v2897_v13  ;;  %v2908_v37 = vsel %vm14031_vm10, %v2903_v16, %v2907_v46  ;;  %v2919_v6 = vshll.u32 %v2715_v33, 16  ;;  %v2923_v27 = vshrl.u32 %v2715_v33, 16  ;;  %v14562_v47 = vpop.f32.mrb[10].mxu1  ;;  %v13410_v35 = vld [vmem:[#allocation2 + $0xbc] sm:$0xff]  }
 0x188   : > { %v11583_v55 = vcombine.low %v2898_v23, %v2908_v37  ;;  %v3397_v14 = vor.u32 %v3395_v49, %v3394_v61  ;;  %v3399_v50 = vrot.slane %v3394_v61, 4  ;;  %v3406_v10 = vor.u32 %v3404_v43, %v3403_v62 }
 0x189   : > { %5618 = vmatmul.mubr.bf16.gmra.mrb[84].mxu1 %v11614_v39  ;;  %v2912_v19 = vrot.slane %v2910_v63, 4  ;;  %v2915_v4 = vrot.slane %v2913_v2, 5  ;;  %v2921_v13 = vrot.slane %v2919_v6, 5  ;;  %v2925_v24 = vrot.slane %v2923_v27, 4  ;;  %v2718_v39 = vld [vmem:[#allocation2 + $0xc0] sm:$0xf] }
 0x18a   : > { %5464 = vmatprep.mubr.bf16.mxu0 %v11583_v55  ;;  %5625 = vmatprep.mubr.bf16.mxu1 %v13408_v59  ;;  %v3398_v30 = vsel %vm14006_vm9, %v11599_v58, %v3397_v14  ;;  %v3407_v38 = vsel %vm14006_vm9, %v3399_v50, %v3406_v10  ;;  %v2929_v48 = vshll.u32 %v2716_v5, 16  ;;  %v3409_v33 = vshrl.u32 %v3227_v8, 16  ;;  %v2719_v63 = vld [vmem:[#allocation2 + $0xc4] sm:$0x1]  ;;  %v3230_v6 = vld [vmem:[#allocation2 + $0xcc] sm:$0x8] }
 0x18b   : > { %v11615_v36 = vcombine.low %v3398_v30, %v3407_v38  ;;  %v2916_v41 = vor.u32 %v2915_v4, %v2912_v19  ;;  %v2926_v44 = vor.u32 %v2925_v24, %v2921_v13  ;;  %v3414_v46 = vshrl.u32 %v3228_v53, 16  ;;  %v3231_v50 = vld [vmem:[#allocation2 + $0xd0] sm:$0xf]  ;;  %v3232_v10 = vld [vmem:[#allocation2 + $0xd4] sm:$0xf]  ;;  %v13409_v19 = vld [vmem:[#allocation2 + $0xa8] sm:$0xff]  }
 0x18c   : > { %v2931_v49 = vrot.slane %v2929_v48, 5  ;;  %v11600_v54 = vrot.slane %v3409_v33, 11  ;;  %v3417_v16 = vshll.u32 %v3228_v53, 16  ;;  %v3423_v43 = vshrl.u32 %v3229_v3, 16  ;;  %v14568_v53 = vpop.f32.mrb[11].mxu0  ;;  %v14572_v33 = vpop.f32.mrb[11].mxu1 }
 0x18d   : > { %v2917_v59 = vrot.slane %v2916_v41, 4  ;;  %v2927_v61 = vrot.slane %v2926_v44, 4  ;;  %v3416_v58 = vrot.slane %v3414_v46, 7  ;;  %v3426_v62 = vshll.u32 %v3229_v3, 16 }
 0x18e   : > { %5465 = vmatmul.mubr.bf16.gmra.mrb[88].mxu0 %v13406_v22  ;;  %v3425_v2 = vrot.slane %v3423_v43, 7  ;;  %v2934_v23 = vshrl.u32 %v2717_v28, 16  ;;  %v2937_v37 = vshll.u32 %v2717_v28, 16  ;;  %v2943_v5 = vshll.u32 %v2718_v39, 16  ;;  %v2720_v28 = vld [vmem:[#allocation2 + $0xd0] sm:$0xf] }
 0x18f   : > { %v2922_v27 = vsel %vm14031_vm10, %v2917_v59, %v2921_v13  ;;  %v2932_v8 = vsel %vm14031_vm10, %v2927_v61, %v2931_v49  ;;  %v3419_v55 = vor.u32 %v3417_v16, %v3416_v58  ;;  %v3421_v14 = vrot.slane %v3416_v58, 4  ;;  %v14576_v61 = vpop.f32.mrb[12].mxu0 }
 0x190   : > { %v11584_v3 = vcombine.low %v2922_v27, %v2932_v8  ;;  %v3428_v22 = vor.u32 %v3426_v62, %v3425_v2  ;;  %v2936_v4 = vrot.slane %v2934_v23, 4  ;;  %v2939_v24 = vrot.slane %v2937_v37, 5  ;;  %v14578_v27 = vpop.f32.mrb[12].mxu1  ;;  %v13413_v8 = vld [vmem:[#allocation2 + $0xd0] sm:$0xff]  }
 0x191   : > { %5626 = vmatmul.mubr.bf16.gmra.mrb[88].mxu1 %v11615_v36  ;;  %v3420_v30 = vsel %vm14006_vm9, %v11600_v54, %v3419_v55  ;;  %v2945_v13 = vrot.slane %v2943_v5, 5  ;;  %v2947_v38 = vshrl.u32 %v2718_v39, 16  ;;  %v2953_v48 = vshll.u32 %v2719_v63, 16  ;;  %v2721_v63 = vld [vmem:[#allocation2 + $0xd4] sm:$0xf] }
 0x192   : > { %5472 = vmatprep.mubr.bf16.mxu0 %v11584_v3  ;;  %5633 = vmatprep.mubr.bf16.mxu1 %v13410_v35  ;;  %v3429_v41 = vsel %vm14006_vm9, %v3421_v14, %v3428_v22  ;;  %v2940_v44 = vor.u32 %v2939_v24, %v2936_v4  ;;  %v3431_v46 = vshrl.u32 %v3230_v6, 16  ;;  %v3436_v49 = vshrl.u32 %v3231_v50, 16  ;;  %v2722_v35 = vld [vmem:[#allocation2 + $0xd8] sm:$0x1]  ;;  %v3233_v3 = vld [vmem:[#allocation2 + $0xe0] sm:$0x8] }
 0x193   : > { %v11616_v16 = vcombine.low %v3420_v30, %v3429_v41  ;;  %v2949_v43 = vrot.slane %v2947_v38, 4  ;;  %v2955_v59 = vrot.slane %v2953_v48, 5  ;;  %v3439_v36 = vshll.u32 %v3231_v50, 16  ;;  %v3234_v38 = vld [vmem:[#allocation2 + $0xe4] sm:$0xf] }
 0x194   : > { %v2941_v54 = vrot.slane %v2940_v44, 4  ;;  %v11601_v58 = vrot.slane %v3431_v46, 11  ;;  %v3438_v39 = vrot.slane %v3436_v49, 7  ;;  %v3445_v62 = vshrl.u32 %v3232_v10, 16  ;;  %v3235_v44 = vld [vmem:[#allocation2 + $0xe8] sm:$0xf] }
 0x195   : > { %v2950_v2 = vor.u32 %v2949_v43, %v2945_v13  ;;  %v3448_v23 = vshll.u32 %v3232_v10, 16  ;;  %v2958_v37 = vshrl.u32 %v2720_v28, 16  ;;  %v2961_v5 = vshll.u32 %v2720_v28, 16  ;;  %v13411_v10 = vld [vmem:[#allocation2 + $0xbc] sm:$0xff]  }
 0x196   : > { %5473 = vmatmul.mubr.bf16.gmra.mrb[92].mxu0 %v13409_v19  ;;  %v2946_v6 = vsel %vm14031_vm10, %v2941_v54, %v2945_v13  ;;  %v3441_v55 = vor.u32 %v3439_v36, %v3438_v39  ;;  %v3443_v14 = vrot.slane %v3438_v39, 4  ;;  %v3447_v50 = vrot.slane %v3445_v62, 7 }
 0x197   : > { %v2951_v22 = vrot.slane %v2950_v2, 4  ;;  %v2960_v4 = vrot.slane %v2958_v37, 4  ;;  %v2963_v24 = vrot.slane %v2961_v5, 5  ;;  %v2967_v30 = vshll.u32 %v2721_v63, 16  ;;  %v2723_v2 = vld [vmem:[#allocation2 + $0xe4] sm:$0xf] }
 0x198   : > { %v3442_v28 = vsel %vm14006_vm9, %v11601_v58, %v3441_v55  ;;  %v3450_v48 = vor.u32 %v3448_v23, %v3447_v50  ;;  %v2971_v41 = vshrl.u32 %v2721_v63, 16  ;;  %v2977_v19 = vshll.u32 %v2722_v35, 16  ;;  %v2724_v37 = vld [vmem:[#allocation2 + $0xe8] sm:$0xf] }
 0x199   : > { %5634 = vmatmul.mubr.bf16.gmra.mrb[92].mxu1 %v11616_v16  ;;  %v2956_v13 = vsel %vm14031_vm10, %v2951_v22, %v2955_v59  ;;  %v2964_v46 = vor.u32 %v2963_v24, %v2960_v4  ;;  %v2969_v49 = vrot.slane %v2967_v30, 5  ;;  %v3453_v43 = vshrl.u32 %v3233_v3, 16  ;;  %v14588_v16 = vpop.f32.mrb[13].mxu0  ;;  %v13415_v3 = vld [vmem:[#allocation2 + $0xe4] sm:$0xff]   ;;  %v3236_v30 = vld [vmem:[#allocation2 + $0xf4] sm:$0x8] }
 0x19a   : > { %v11585_v36 = vcombine.low %v2946_v6, %v2956_v13  ;;  %5641 = vmatprep.mubr.bf16.mxu1 %v13413_v8  ;;  %v3451_v54 = vsel %vm14006_vm9, %v3443_v14, %v3450_v48  ;;  %v2973_v39 = vrot.slane %v2971_v41, 4  ;;  %v2979_v62 = vrot.slane %v2977_v19, 5  ;;  %v2725_v6 = vld [vmem:[#allocation2 + $0xec] sm:$0x1]  ;;  %v14590_v8 = vpop.f32.mrb[13].mxu1 }
 0x19b   : > { %v11617_v58 = vcombine.low %v3442_v28, %v3451_v54  ;;  %v2965_v23 = vrot.slane %v2964_v46, 4  ;;  %v11602_v63 = vrot.slane %v3453_v43, 11  ;;  %v3458_v35 = vshrl.u32 %v3234_v38, 16  ;;  %v14594_v28 = vpop.f32.mrb[14].mxu0  ;;  %v14596_v48 = vpop.f32.mrb[14].mxu1 }
 0x19c   : > { %5480 = vmatprep.mubr.bf16.mxu0 %v11585_v36  ;;  %v2974_v59 = vor.u32 %v2973_v39, %v2969_v49  ;;  %v3461_v5 = vshll.u32 %v3234_v38, 16  ;;  %v3467_v55 = vshrl.u32 %v3235_v44, 16  ;;  %v3470_v50 = vshll.u32 %v3235_v44, 16  ;;  %v14598_v13 = vpop.f32.mrb[15].mxu0  ;;  %v14600_v46 = vpop.f32.mrb[15].mxu1 }
 0x19d   : > { %v2970_v14 = vsel %vm14031_vm10, %v2965_v23, %v2969_v49  ;;  %v3460_v22 = vrot.slane %v3458_v35, 7  ;;  %v2982_v4 = vshrl.u32 %v2723_v2, 16  ;;  %v2985_v24 = vshll.u32 %v2723_v2, 16  ;;  %v3237_v39 = vld [vmem:[#allocation2 + $0xf8] sm:$0xf]  ;;  %v14602_v2 = vpop.f32.mrb[16].mxu0 }
 0x19e   : > { %5481 = vmatmul.mubr.bf16.gmra.mrb[96].mxu0 %v13411_v10  ;;  %v2975_v41 = vrot.slane %v2974_v59, 4  ;;  %v3469_v38 = vrot.slane %v3467_v55, 7  ;;  %v2991_v19 = vshll.u32 %v2724_v37, 16  ;;  %v2995_v44 = vshrl.u32 %v2724_v37, 16  ;;  %16827 = vst [vmem:[#allocation20_spill] sm:$0xff] %v14602_v2  ;;  %v13414_v35 = vld [vmem:[#allocation2 + $0xd0] sm:$0xff]  }
 0x19f   : > { %v3463_v43 = vor.u32 %v3461_v5, %v3460_v22  ;;  %v3465_v49 = vrot.slane %v3460_v22, 4  ;;  %v2984_v36 = vrot.slane %v2982_v4, 4  ;;  %v2987_v54 = vrot.slane %v2985_v24, 5  ;;  %v14608_v4 = vpop.f32.mrb[16].mxu1 }
 0x1a0   : > { %v2980_v23 = vsel %vm14031_vm10, %v2975_v41, %v2979_v62  ;;  %v3472_v10 = vor.u32 %v3470_v50, %v3469_v38  ;;  %v2993_v59 = vrot.slane %v2991_v19, 5  ;;  %v2997_v55 = vrot.slane %v2995_v44, 4  ;;  %v2726_v50 = vld [vmem:[#allocation2 + $0xf8] sm:$0xf]  ;;  %v14612_v44 = vpop.f32.mrb[17].mxu0 }
 0x1a1   : > { %5642 = vmatmul.mubr.bf16.gmra.mrb[96].mxu1 %v11617_v58  ;;  %v11586_v37 = vcombine.low %v2970_v14, %v2980_v23  ;;  %v3464_v29 = vsel %vm14006_vm9, %v11602_v63, %v3463_v43  ;;  %v2988_v5 = vor.u32 %v2987_v54, %v2984_v36  ;;  %v3001_v22 = vshll.u32 %v2725_v6, 16  ;;  %v13418_v43 = vld [vmem:[#allocation2 + $0xf8] sm:$0xff]   ;;  %v2728_v23 = vld [vmem:[#allocation2 + $0x100] sm:$0x1] }
 0x1a2   : > { %5649 = vmatprep.mubr.bf16.mxu1 %v13415_v3  ;;  %v3473_v24 = vsel %vm14006_vm9, %v3465_v49, %v3472_v10  ;;  %v2998_v2 = vor.u32 %v2997_v55, %v2993_v59  ;;  %v3475_v62 = vshrl.u32 %v3236_v30, 16  ;;  %v3480_v41 = vshrl.u32 %v3237_v39, 16  ;;  %v14624_v10 = vpop.f32.mrb[17].mxu1 }
 0x1a3   : > { %5488 = vmatprep.mubr.bf16.mxu0 %v11586_v37  ;;  %v11618_v38 = vcombine.low %v3464_v29, %v3473_v24  ;;  %v2989_v19 = vrot.slane %v2988_v5, 4  ;;  %v3003_v58 = vrot.slane %v3001_v22, 5  ;;  %v3483_v14 = vshll.u32 %v3237_v39, 16  ;;  %v2727_v39 = vld [vmem:[#allocation2 + $0xfc] sm:$0xf]  ;;  %v14628_v5 = vpop.f32.mrb[18].mxu0 }
 0x1a4   : > { %v2999_v63 = vrot.slane %v2998_v2, 4  ;;  %v11603_v6 = vrot.slane %v3475_v62, 11  ;;  %v3482_v36 = vrot.slane %v3480_v41, 7  ;;  %v3489_v54 = vshrl.u32 %v3238_v25, 16  ;;  %v3240_v22 = vld [vmem:[#allocation2 + $0x10c] sm:$0xf] }
 0x1a5   : > { %v2994_v3 = vsel %vm14031_vm10, %v2989_v19, %v2993_v59  ;;  %v3492_v49 = vshll.u32 %v3238_v25, 16  ;;  %v14618_v30 = vadd.f32 %v14482_v12, %v14478_v42  ;;  %v14622_v29 = vadd.f32 %v14498_v1, %v14494_v57  ;;  %v3239_v25 = vld [vmem:[#allocation2 + $0x108] sm:$0x8]  ;;  %v14630_v42 = vpop.f32.mrb[18].mxu1  ;;  %v14640_v24 = vpop.f32.mrb[19].mxu0 }
 0x1a6   : > { %5489 = vmatmul.mubr.bf16.gmra.mrb[100].mxu0 %v13414_v35  ;;  %v3004_v2 = vsel %vm14031_vm10, %v2999_v63, %v3003_v58  ;;  %v3485_v55 = vor.u32 %v3483_v14, %v3482_v36  ;;  %v3487_v37 = vrot.slane %v3482_v36, 4  ;;  %v3491_v59 = vrot.slane %v3489_v54, 7  ;;  %v14642_v62 = vpop.f32.mrb[19].mxu1  ;;  %v13416_v41 = vld [vmem:[#allocation2 + $0xe4] sm:$0xff]   ;;  %v3241_v36 = vld [vmem:[#allocation2 + $0x110] sm:$0xf] }
 0x1a7   : > { %16828 = vst [vmem:[#allocation21_spill] sm:$0xff] %v14622_v29  ;;  %v11587_v12 = vcombine.low %v2994_v3, %v3004_v2  ;;  %v14634_v57 = vadd.f32 %v14486_v17, %v14484_v20  ;;  %v14638_v1 = vadd.f32 %v14504_v31, %v14502_v52  ;;  %v3006_v35 = vshrl.u32 %v2726_v50, 16  ;;  %v14648_v29 = vpop.f32.mrb[20].mxu0 }
 0x1a8   : > { %v3486_v19 = vsel %vm14006_vm9, %v11603_v6, %v3485_v55  ;;  %v3494_v58 = vor.u32 %v3492_v49, %v3491_v59  ;;  %v3009_v14 = vshll.u32 %v2726_v50, 16  ;;  %v3015_v63 = vshll.u32 %v2727_v39, 16 }
 0x1a9   : > { %16829 = vst [vmem:[#allocation22_spill] sm:$0xff] %v14634_v57  ;;  %16830 = vst [vmem:[#allocation23_spill] sm:$0xff] %v14638_v1  ;;  %5650 = vmatmul.mubr.bf16.gmra.mrb[100].mxu1 %v11618_v38  ;;  %5496 = vmatprep.mubr.bf16.mxu0 %v11587_v12  ;;  %v3008_v20 = vrot.slane %v3006_v35, 4  ;;  %v3019_v17 = vshrl.u32 %v2727_v39, 16  ;;  %v3025_v52 = vshll.u32 %v2728_v23, 16  ;;  %v3497_v31 = vshrl.u32 %v3239_v25, 16 }
 0x1aa   : > { %5657 = vmatprep.mubr.bf16.mxu1 %v13418_v43  ;;  %v3495_v54 = vsel %vm14006_vm9, %v3487_v37, %v3494_v58  ;;  %v3011_v3 = vrot.slane %v3009_v14, 5  ;;  %v3017_v2 = vrot.slane %v3015_v63, 5  ;;  %v3502_v1 = vshrl.u32 %v3240_v22, 16  ;;  %v2729_v57 = vld [vmem:[#allocation2 + $0x10c] sm:$0xf]  ;;  %v14650_v38 = vpop.f32.mrb[20].mxu1 }
 0x1ab   : > { %v11619_v6 = vcombine.low %v3486_v19, %v3495_v54  ;;  %v3021_v50 = vrot.slane %v3019_v17, 4  ;;  %v3027_v49 = vrot.slane %v3025_v52, 5  ;;  %v11604_v55 = vrot.slane %v3497_v31, 11  ;;  %v14652_v43 = vpop.f32.mrb[21].mxu0  ;;  %v13420_v37 = vld [vmem:[#allocation2 + $0x10c] sm:$0xff]   ;;  %v14662_v14 = vpop.f32.mrb[21].mxu1 }
 0x1ac   : > { %v3012_v59 = vor.u32 %v3011_v3, %v3008_v20  ;;  %v3504_v39 = vrot.slane %v3502_v1, 7  ;;  %v3505_v23 = vshll.u32 %v3240_v22, 16  ;;  %v3511_v25 = vshrl.u32 %v3241_v36, 16  ;;  %v2730_v17 = vld [vmem:[#allocation2 + $0x110] sm:$0xf]  ;;  %v14664_v52 = vpop.f32.mrb[22].mxu0 }
 0x1ad   : > { %v3022_v12 = vor.u32 %v3021_v50, %v3017_v2  ;;  %v3514_v35 = vshll.u32 %v3241_v36, 16  ;;  %v14656_v58 = vadd.f32 %v14512_v45, %v14508_v32  ;;  %v14660_v19 = vadd.f32 %v14518_v56, %v14514_v51  ;;  %v2731_v45 = vld [vmem:[#allocation2 + $0x114] sm:$0x1]  ;;  %v14674_v56 = vpop.f32.mrb[22].mxu1 }
 0x1ae   : > { %5497 = vmatmul.mubr.bf16.gmra.mrb[104].mxu0 %v13416_v41  ;;  %v3013_v63 = vrot.slane %v3012_v59, 4  ;;  %v3507_v1 = vor.u32 %v3505_v23, %v3504_v39  ;;  %v3509_v22 = vrot.slane %v3504_v39, 4  ;;  %v3513_v20 = vrot.slane %v3511_v25, 7  ;;  %v14676_v41 = vpop.f32.mrb[23].mxu0  ;;  %v3243_v25 = vld [vmem:[#allocation2 + $0x120] sm:$0xf] }
 0x1af   : > { %16831 = vst [vmem:[#allocation24_spill] sm:$0xff] %v14656_v58  ;;  %16832 = vst [vmem:[#allocation25_spill] sm:$0xff] %v14660_v19  ;;  %v3023_v31 = vrot.slane %v3022_v12, 4  ;;  %v14668_v36 = vadd.f32 %v14532_v18, %v14522_v11  ;;  %v14672_v32 = vadd.f32 %v14534_v60, %v14526_v21  ;;  %v3030_v51 = vshrl.u32 %v2729_v57, 16  ;;  %v3242_v11 = vld [vmem:[#allocation2 + $0x11c] sm:$0x8] }
 0x1b0   : > { %v3018_v54 = vsel %vm14031_vm10, %v3013_v63, %v3017_v2  ;;  %v3508_v3 = vsel %vm14006_vm9, %v11604_v55, %v3507_v1  ;;  %v3516_v50 = vor.u32 %v3514_v35, %v3513_v20  ;;  %v3033_v59 = vshll.u32 %v2729_v57, 16  ;;  %v14682_v18 = vpop.f32.mrb[23].mxu1  ;;  %v14686_v12 = vpop.f32.mrb[24].mxu0  ;;  %v13419_v2 = vld [vmem:[#allocation2 + $0xf8] sm:$0xff]   ;;  %v3244_v63 = vld [vmem:[#allocation2 + $0x124] sm:$0xf] }
 0x1b1   : > { %16833 = vst [vmem:[#allocation26_spill] sm:$0xff] %v14668_v36  ;;  %16834 = vst [vmem:[#allocation27_spill] sm:$0xff] %v14672_v32  ;;  %5658 = vmatmul.mubr.bf16.gmra.mrb[104].mxu1 %v11619_v6  ;;  %v3028_v21 = vsel %vm14031_vm10, %v3023_v31, %v3027_v49  ;;  %v3032_v60 = vrot.slane %v3030_v51, 4  ;;  %v3039_v39 = vshll.u32 %v2730_v17, 16  ;;  %v3043_v23 = vshrl.u32 %v2730_v17, 16  ;;  %v14690_v49 = vpop.f32.mrb[25].mxu0 }
 0x1b2   : > { %v11588_v32 = vcombine.low %v3018_v54, %v3028_v21  ;;  %5665 = vmatprep.mubr.bf16.mxu1 %v13420_v37  ;;  %v3517_v55 = vsel %vm14006_vm9, %v3509_v22, %v3516_v50  ;;  %v3035_v57 = vrot.slane %v3033_v59, 5  ;;  %v3049_v35 = vshll.u32 %v2731_v45, 16  ;;  %v14692_v54 = vpop.f32.mrb[26].mxu0  ;;  %v2732_v50 = vld [vmem:[#allocation2 + $0x120] sm:$0xf] }
 0x1b3   : > { %v11620_v1 = vcombine.low %v3508_v3, %v3517_v55  ;;  %v3041_v6 = vrot.slane %v3039_v39, 5  ;;  %v3045_v20 = vrot.slane %v3043_v23, 4  ;;  %v3519_v36 = vshrl.u32 %v3242_v11, 16  ;;  %v14694_v45 = vpop.f32.mrb[27].mxu0  ;;  %v13423_v59 = vld [vmem:[#allocation2 + $0x120] sm:$0xff]  }
 0x1b4   : > { %5504 = vmatprep.mubr.bf16.mxu0 %v11588_v32  ;;  %v3036_v17 = vor.u32 %v3035_v57, %v3032_v60  ;;  %v3051_v31 = vrot.slane %v3049_v35, 5  ;;  %v3524_v51 = vshrl.u32 %v3243_v25, 16  ;;  %v3527_v19 = vshll.u32 %v3243_v25, 16  ;;  %v2733_v39 = vld [vmem:[#allocation2 + $0x124] sm:$0xf] }
 0x1b5   : > { %v3046_v37 = vor.u32 %v3045_v20, %v3041_v6  ;;  %v11605_v21 = vrot.slane %v3519_v36, 11  ;;  %v3533_v58 = vshrl.u32 %v3244_v63, 16  ;;  %v3536_v22 = vshll.u32 %v3244_v63, 16  ;;  %v14704_v23 = vpop.f32.mrb[24].mxu1  ;;  %v2734_v57 = vld [vmem:[#allocation2 + $0x128] sm:$0x1] }
 0x1b6   : > { %5505 = vmatmul.mubr.bf16.gmra.mrb[108].mxu0 %v13419_v2  ;;  %v3037_v3 = vrot.slane %v3036_v17, 4  ;;  %v3526_v11 = vrot.slane %v3524_v51, 7  ;;  %v14698_v32 = vadd.f32 %v14548_v0, %v14538_v9  ;;  %v14702_v60 = vadd.f32 %v14550_v34, %v14542_v26  ;;  %v14714_v9 = vpop.f32.mrb[25].mxu1  ;;  %v3245_v63 = vld [vmem:[#allocation2 + $0x130] sm:$0x8] }
 0x1b7   : > { %v3047_v36 = vrot.slane %v3046_v37, 4  ;;  %v3535_v25 = vrot.slane %v3533_v58, 7  ;;  %v14708_v55 = vadd.f32 %v14568_v53, %v14556_v15  ;;  %v14712_v2 = vadd.f32 %v14572_v33, %v14562_v47  ;;  %v14718_v20 = vpop.f32.mrb[26].mxu1  ;;  %v3246_v33 = vld [vmem:[#allocation2 + $0x134] sm:$0xf]  ;;  %v13421_v37 = vld [vmem:[#allocation2 + $0x10c] sm:$0xff]  }
 0x1b8   : > { %16835 = vst [vmem:[#allocation28_spill] sm:$0xff] %v14698_v32  ;;  %16836 = vst [vmem:[#allocation29_spill] sm:$0xff] %v14702_v60  ;;  %v3042_v26 = vsel %vm14031_vm10, %v3037_v3, %v3041_v6  ;;  %v3529_v0 = vor.u32 %v3527_v19, %v3526_v11  ;;  %v3531_v34 = vrot.slane %v3526_v11, 4  ;;  %v3054_v35 = vshrl.u32 %v2732_v50, 16  ;;  %v14722_v17 = vpop.f32.mrb[27].mxu1 }
 0x1b9   : > { %16837 = vst [vmem:[#allocation30_spill] sm:$0xff] %v14708_v55  ;;  %16838 = vst [vmem:[#allocation31_spill] sm:$0xff] %v14712_v2  ;;  %5666 = vmatmul.mubr.bf16.gmra.mrb[108].mxu1 %v11620_v1  ;;  %v3052_v15 = vsel %vm14031_vm10, %v3047_v36, %v3051_v31  ;;  %v3538_v53 = vor.u32 %v3536_v22, %v3535_v25  ;;  %v3057_v58 = vshll.u32 %v2732_v50, 16  ;;  %v3063_v47 = vshll.u32 %v2733_v39, 16  ;;  %v3247_v11 = vld [vmem:[#allocation2 + $0x138] sm:$0xf] }
 0x1ba   : > { %v11589_v51 = vcombine.low %v3042_v26, %v3052_v15  ;;  %5673 = vmatprep.mubr.bf16.mxu1 %v13423_v59  ;;  %v3530_v19 = vsel %vm14006_vm9, %v11605_v21, %v3529_v0  ;;  %v3056_v6 = vrot.slane %v3054_v35, 4  ;;  %v3067_v3 = vshrl.u32 %v2733_v39, 16  ;;  %v14726_v2 = vpop.f32.mrb[28].mxu0  ;;  %v2735_v32 = vld [vmem:[#allocation2 + $0x134] sm:$0xf] }
 0x1bb   : > { %v3539_v1 = vsel %vm14006_vm9, %v3531_v34, %v3538_v53  ;;  %v3059_v31 = vrot.slane %v3057_v58, 5  ;;  %v3065_v22 = vrot.slane %v3063_v47, 5  ;;  %v3073_v50 = vshll.u32 %v2734_v57, 16  ;;  %v14730_v36 = vpop.f32.mrb[29].mxu0  ;;  %v13425_v53 = vld [vmem:[#allocation2 + $0x134] sm:$0xff]  }
 0x1bc   : > { %5512 = vmatprep.mubr.bf16.mxu0 %v11589_v51  ;;  %v11621_v25 = vcombine.low %v3530_v19, %v3539_v1  ;;  %v3069_v26 = vrot.slane %v3067_v3, 4  ;;  %v3541_v59 = vshrl.u32 %v3245_v63, 16  ;;  %v3546_v15 = vshrl.u32 %v3246_v33, 16  ;;  %v14732_v55 = vpop.f32.mrb[30].mxu0 }
 0x1bd   : > { %v3060_v21 = vor.u32 %v3059_v31, %v3056_v6  ;;  %v3075_v39 = vrot.slane %v3073_v50, 5  ;;  %v3549_v0 = vshll.u32 %v3246_v33, 16  ;;  %v3555_v35 = vshrl.u32 %v3247_v11, 16  ;;  %v14734_v60 = vpop.f32.mrb[31].mxu0  ;;  %v2736_v33 = vld [vmem:[#allocation2 + $0x138] sm:$0xf] }
 0x1be   : > { %5513 = vmatmul.mubr.bf16.gmra.mrb[112].mxu0 %v13421_v37  ;;  %v3070_v34 = vor.u32 %v3069_v26, %v3065_v22  ;;  %v11606_v58 = vrot.slane %v3541_v59, 11  ;;  %v3548_v57 = vrot.slane %v3546_v15, 7  ;;  %v3558_v47 = vshll.u32 %v3247_v11, 16  ;;  %v13424_v50 = vld [vmem:[#allocation2 + $0x120] sm:$0xff]   ;;  %v3249_v15 = vld [vmem:[#allocation2 + $0x148] sm:$0xf] }
 0x1bf   : > { %v3061_v51 = vrot.slane %v3060_v21, 4  ;;  %v3557_v19 = vrot.slane %v3555_v35, 7  ;;  %v14738_v63 = vadd.f32 %v14588_v16, %v14576_v61  ;;  %v14742_v6 = vadd.f32 %v14590_v8, %v14578_v27  ;;  %v2737_v27 = vld [vmem:[#allocation2 + $0x13c] sm:$0x1]  ;;  %v3248_v59 = vld [vmem:[#allocation2 + $0x144] sm:$0x8] }
 0x1c0   : > { %v3071_v3 = vrot.slane %v3070_v34, 4  ;;  %v3551_v1 = vor.u32 %v3549_v0, %v3548_v57  ;;  %v3553_v37 = vrot.slane %v3548_v57, 4  ;;  %v14746_v31 = vadd.f32 %v14598_v13, %v14594_v28 }
 0x1c1   : > { %5674 = vmatmul.mubr.bf16.gmra.mrb[112].mxu1 %v11621_v25  ;;  %v3066_v11 = vsel %vm14031_vm10, %v3061_v51, %v3065_v22  ;;  %v3560_v26 = vor.u32 %v3558_v47, %v3557_v19  ;;  %v14752_v61 = vadd.f32 %v14600_v46, %v14596_v48  ;;  %v3078_v16 = vshrl.u32 %v2735_v32, 16  ;;  %v3250_v46 = vld [vmem:[#allocation2 + $0x14c] sm:$0xf] }
 0x1c2   : > { %v3076_v8 = vsel %vm14031_vm10, %v3071_v3, %v3075_v39  ;;  %5681 = vmatprep.mubr.bf16.mxu1 %v13425_v53  ;;  %v3552_v28 = vsel %vm14006_vm9, %v11606_v58, %v3551_v1  ;;  %v3081_v13 = vshll.u32 %v2735_v32, 16  ;;  %v3087_v25 = vshll.u32 %v2736_v33, 16  ;;  %v14760_v35 = vpop.f32.mrb[28].mxu1  ;;  %v13428_v58 = vld [vmem:[#allocation2 + $0x148] sm:$0xff]  }
 0x1c3   : > { %v11590_v22 = vcombine.low %v3066_v11, %v3076_v8  ;;  %v3561_v21 = vsel %vm14006_vm9, %v3553_v37, %v3560_v26  ;;  %v3080_v0 = vrot.slane %v3078_v16, 4  ;;  %v3091_v48 = vshrl.u32 %v2736_v33, 16  ;;  %v14762_v47 = vpop.f32.mrb[29].mxu1  ;;  %v527_v16 = vld [vmem:[#allocation2 + $0x150] sm:$0x1] }
 0x1c4   : > { %v11622_v34 = vcombine.low %v3552_v28, %v3561_v21  ;;  %v3083_v57 = vrot.slane %v3081_v13, 5  ;;  %v3089_v39 = vrot.slane %v3087_v25, 5  ;;  %v3097_v53 = vshll.u32 %v2737_v27, 16  ;;  %v14764_v1 = vpop.f32.mrb[30].mxu1  ;;  %v16839_v25 = vld [vmem:[#allocation20_spill] sm:$0xff] }
 0x1c5   : > { %5520 = vmatprep.mubr.bf16.mxu0 %v11590_v22  ;;  %v3093_v32 = vrot.slane %v3091_v48, 4  ;;  %v3563_v51 = vshrl.u32 %v3248_v59, 16  ;;  %v3568_v19 = vshrl.u32 %v3249_v15, 16  ;;  %v3571_v3 = vshll.u32 %v3249_v15, 16  ;;  %v14766_v8 = vpop.f32.mrb[31].mxu1 }
 0x1c6   : > { %5521 = vmatmul.mubr.bf16.gmra.mrb[116].mxu0 %v13424_v50  ;;  %v3084_v37 = vor.u32 %v3083_v57, %v3080_v0  ;;  %v3099_v33 = vrot.slane %v3097_v53, 5  ;;  %v3577_v11 = vshrl.u32 %v3250_v46, 16  ;;  %v3580_v26 = vshll.u32 %v3250_v46, 16  ;;  %v2738_v59 = vld [vmem:[#allocation2 + $0x148] sm:$0xf] }
 0x1c7   : > { %v3094_v28 = vor.u32 %v3093_v32, %v3089_v39  ;;  %v11607_v27 = vrot.slane %v3563_v51, 11  ;;  %v3570_v13 = vrot.slane %v3568_v19, 7  ;;  %v14770_v22 = vadd.f32 %v14612_v44, %v16839_v25  ;;  %v14772_v21 = vpop.f32.mrb[32].mxu0  ;;  %v2739_v46 = vld [vmem:[#allocation2 + $0x14c] sm:$0xf] }
 0x1c8   : > { %v3085_v15 = vrot.slane %v3084_v37, 4  ;;  %v3579_v48 = vrot.slane %v3577_v11, 7  ;;  %v14776_v50 = vadd.f32 %v14624_v10, %v14608_v4  ;;  %v14780_v0 = vadd.f32 %v14640_v24, %v14628_v5  ;;  %v14782_v57 = vpop.f32.mrb[33].mxu0  ;;  %v13431_v37 = vld [vmem:[#allocation10 + $0x40] sm:$0xff]  }
 0x1c9   : > { %16840 = vst [vmem:[#allocation20_spill] sm:$0xff] %v14770_v22  ;;  %5682 = vmatmul.mubr.bf16.gmra.mrb[116].mxu1 %v11622_v34  ;;  %v3095_v53 = vrot.slane %v3094_v28, 4  ;;  %v3573_v44 = vor.u32 %v3571_v3, %v3570_v13  ;;  %v3575_v32 = vrot.slane %v3570_v13, 4  ;;  %v14786_v51 = vadd.f32 %v14642_v62, %v14630_v42  ;;  %v14788_v19 = vpop.f32.mrb[34].mxu0  ;;  %v13426_v10 = vld [vmem:[#allocation2 + $0x134] sm:$0xff]   ;;  %12669 = vmatprep.subr.bf16.mxu1 %v13431_v37 }
 0x1ca   : > { %16841 = vst [vmem:[#allocation32_spill] sm:$0xff] %v14776_v50  ;;  %16842 = vst [vmem:[#allocation33_spill] sm:$0xff] %v14780_v0  ;;  %v3090_v4 = vsel %vm14031_vm10, %v3085_v15, %v3089_v39  ;;  %5689 = vmatprep.mubr.bf16.mxu1 %v13428_v58  ;;  %v3582_v5 = vor.u32 %v3580_v26, %v3579_v48  ;;  %v528_v11 = vsel %vm13978_vm5, 0, %v527_v16  ;;  %v3102_v34 = vshrl.u32 %v2738_v59, 16  ;;  %v473_v28 = vld [vmem:[#allocation2 + $0x158] sm:$0x8] }
 0x1cb   : > { %16843 = vst [vmem:[#allocation34_spill] sm:$0xff] %v14786_v51  ;;  %v14794_v3 = vpop.f32.mrb[35].mxu0  ;;  %v3100_v42 = vsel %vm14031_vm10, %v3095_v53, %v3099_v33  ;;  %v3574_v62 = vsel %vm14006_vm9, %v11607_v27, %v3573_v44  ;;  %529 = vst [vmem:[#allocation2 + $0x150] sm:$0x1] %v528_v11  ;;  %v3105_v13 = vshll.u32 %v2738_v59, 16  ;;  %v3111_v25 = vshll.u32 %v2739_v46, 16 }
 0x1cc   : > { %v3252_v39 = vld [vmem:[#allocation2 + $0x15c] sm:$0xf]  ;;  %v3253_v15 = vld [vmem:[#allocation2 + $0x160] sm:$0xf]  ;;  %v11591_v58 = vcombine.low %v3090_v4, %v3100_v42  ;;  %v3583_v26 = vsel %vm14006_vm9, %v3575_v32, %v3582_v5  ;;  %v3104_v16 = vrot.slane %v3102_v34, 4  ;;  %v3115_v48 = vshrl.u32 %v2739_v46, 16 }
 0x1cd   : > { %v11623_v51 = vcombine.low %v3574_v62, %v3583_v26  ;;  %v3107_v0 = vrot.slane %v3105_v13, 5  ;;  %v14802_v50 = vrot.slane %v3111_v25, 5  ;;  %v13430_v33 = vld [vmem:[#allocation2 + $0x15c] sm:$0xff]   ;;  %v474_v27 = vsel %vm13973_vm3, 0, %v473_v28  ;;  %v13432_v44 = vld [vmem:[#allocation10] sm:$0xff]  }
 0x1ce   : > { %5528 = vmatprep.mubr.bf16.mxu0 %v11591_v58  ;;  %v3117_v59 = vrot.slane %v3115_v48, 4  ;;  %475 = vst [vmem:[#allocation2 + $0x158] sm:$0x8] %v474_v27  ;;  %v3590_v11 = vshrl.u32 %v3252_v39, 16  ;;  %v3593_v37 = vshll.u32 %v3252_v39, 16  ;;  %v3599_v4 = vshrl.u32 %v3253_v15, 16  ;;  %12670 = vmatpush3.bf16.msra.mxu1 %v13432_v44 }
 0x1cf   : > { %v3830_v42 = vld [vmem:[#allocation2 + $0x30] sm:$0xf]  ;;  %5529 = vmatmul.mubr.bf16.gmra.mrb[120].mxu0 %v13426_v10  ;;  %v3108_v32 = vor.u32 %v3107_v0, %v3104_v16  ;;  %v3602_v5 = vshll.u32 %v3253_v15, 16  ;;  %v14808_v46 = vadd.f32 %v14652_v43, %v14648_v29  ;;  %v14812_v34 = vadd.f32 %v14662_v14, %v14650_v38  ;;  %v3831_v28 = vld [vmem:[#allocation2 + $0x34] sm:$0xf] }
 0x1d0   : > { %v3118_v62 = vor.u32 %v3117_v59, %v14802_v50  ;;  %v3592_v13 = vrot.slane %v3590_v11, 7  ;;  %v3601_v25 = vrot.slane %v3599_v4, 7  ;;  %v14817_v39 = vadd.f32 %v14676_v41, %v14664_v52  ;;  %v3832_v0 = vld [vmem:[#allocation2 + $0x38] sm:$0x1]  ;;  %v14819_v10 = vpop.f32.mrb[32].mxu1 }
 0x1d1   : > { %16846 = vst [vmem:[#allocation18_spill] sm:$0xff] %v14808_v46  ;;  %16847 = vst [vmem:[#allocation35_spill] sm:$0xff] %v14812_v34  ;;  %5690 = vmatmul.mubr.bf16.gmra.mrb[120].mxu1 %v11623_v51  ;;  %v3109_v29 = vrot.slane %v3108_v32, 4  ;;  %v14823_v43 = vadd.f32 %v14682_v18, %v14674_v56  ;;  %v3879_v38 = vshrl.u32 %v3830_v42, 16  ;;  %v3882_v14 = vshll.u32 %v3830_v42, 16  ;;  %v14825_v58 = vpop.f32.mrb[33].mxu1 }
 0x1d2   : > { %16848 = vst [vmem:[#allocation36_spill] sm:$0xff] %v14817_v39  ;;  %v3833_v15 = vld [vmem:[#allocation2 + $0x44] sm:$0xf]  ;;  %v2740_v26 = vld [vmem:[#allocation2 + $0x150] sm:$0x1]  ;;  %v3119_v16 = vrot.slane %v3118_v62, 4  ;;  %5697 = vmatprep.mubr.bf16.mxu1 %v13430_v33  ;;  %v3595_v48 = vor.u32 %v3593_v37, %v3592_v13  ;;  %v3604_v41 = vor.u32 %v3602_v5, %v3601_v25 }
 0x1d3   : > { %16849 = vst [vmem:[#allocation37_spill] sm:$0xff] %v14823_v43  ;;  %v3597_v52 = vrot.slane %v3592_v13, 4  ;;  %v14827_v27 = vpop.f32.mrb[34].mxu1  ;;  %v3114_v51 = vsel %vm14031_vm10, %v3109_v29, %v14802_v50  ;;  %v3121_v44 = vshll.u32 %v2740_v26, 16  ;;  %v3881_v56 = vrot.slane %v3879_v38, 4 }
 0x1d4   : > { %v3884_v18 = vrot.slane %v3882_v14, 5  ;;  %v3834_v59 = vld [vmem:[#allocation2 + $0x48] sm:$0xf]  ;;  %v14832_v11 = vpop.f32.mrb[35].mxu1  ;;  %v3888_v42 = vshll.u32 %v3831_v28, 16  ;;  %v3892_v33 = vshrl.u32 %v3831_v28, 16 }
 0x1d5   : > { %v3605_v4 = vsel %vm14006_vm9, %v3597_v52, %v3604_v41  ;;  %v3898_v37 = vshll.u32 %v3832_v0, 16  ;;  %v3835_v32 = vld [vmem:[#allocation2 + $0x4c] sm:$0x1]  ;;  %v3123_v5 = vrot.slane %v3121_v44, 5  ;;  %v3251_v62 = vld [vmem:[#allocation2 + $0x158] sm:$0x8] }
 0x1d6   : > { %v3885_v13 = vor.u32 %v3884_v18, %v3881_v56  ;;  %v3903_v25 = vshrl.u32 %v3833_v15, 16  ;;  %v3906_v53 = vshll.u32 %v3833_v15, 16  ;;  %v14836_v43 = vpop.f32.mrb[36].mxu0  ;;  %v3585_v50 = vshrl.u32 %v3251_v62, 16  ;;  %v13429_v41 = vld [vmem:[#allocation2 + $0x148] sm:$0xff]  }
 0x1d7   : > { %v3890_v29 = vrot.slane %v3888_v42, 5  ;;  %v3894_v38 = vrot.slane %v3892_v33, 4  ;;  %v3900_v14 = vrot.slane %v3898_v37, 5  ;;  %v14838_v26 = vpop.f32.mrb[37].mxu0  ;;  %v3124_v52 = vsel %vm14031_vm10, %v3119_v16, %v3123_v5  ;;  %v3836_v46 = vld [vmem:[#allocation2 + $0x58] sm:$0xf] }
 0x1d8   : > { %v3886_v28 = vrot.slane %v3885_v13, 4  ;;  %v3905_v0 = vrot.slane %v3903_v25, 4  ;;  %v3908_v39 = vrot.slane %v3906_v53, 5  ;;  %v14842_v44 = vpop.f32.mrb[38].mxu0  ;;  %v11592_v56 = vcombine.low %v3114_v51, %v3124_v52  ;;  %v3837_v16 = vld [vmem:[#allocation2 + $0x5c] sm:$0xf] }
 0x1d9   : > { %v11608_v18 = vrot.slane %v3585_v50, 11  ;;  %v3895_v15 = vor.u32 %v3894_v38, %v3890_v29  ;;  %v3912_v34 = vshll.u32 %v3834_v59, 16  ;;  %v14844_v62 = vpop.f32.mrb[39].mxu0  ;;  %v3916_v37 = vshrl.u32 %v3834_v59, 16  ;;  %v3838_v5 = vld [vmem:[#allocation2 + $0x60] sm:$0x1] }
 0x1da   : > { %v3891_v42 = vsel %vm14031_vm10, %v3886_v28, %v3890_v29  ;;  %v3909_v33 = vor.u32 %v3908_v39, %v3905_v0  ;;  %v3922_v22 = vshll.u32 %v3835_v32, 16  ;;  %5536 = vmatprep.mubr.bf16.mxu0 %v11592_v56  ;;  %v14852_v25 = vadd.f32 %v14690_v49, %v14686_v12  ;;  %v3839_v50 = vld [vmem:[#allocation2 + $0x6c] sm:$0xf]  ;;  %v13433_v59 = vld [vmem:[#allocation10 + $0x48] sm:$0xff]   ;;  %v3840_v49 = vld [vmem:[#allocation2 + $0x70] sm:$0xf] }
 0x1db   : > { %v3596_v53 = vsel %vm14006_vm9, %v11608_v18, %v3595_v48  ;;  %v3896_v13 = vrot.slane %v3895_v15, 4  ;;  %v3914_v51 = vrot.slane %v3912_v34, 5  ;;  %5537 = vmatmul.mubr.bf16.gmra.mrb[124].mxu0 %v13429_v41  ;;  %v3918_v29 = vrot.slane %v3916_v37, 4  ;;  %12671 = vmatprep.subr.bf16.mxu1 %v13433_v59  ;;  %v3841_v56 = vld [vmem:[#allocation2 + $0x74] sm:$0x1] }
 0x1dc   : > { %v11624_v38 = vcombine.low %v3596_v53, %v3605_v4  ;;  %v3910_v52 = vrot.slane %v3909_v33, 4  ;;  %v3924_v39 = vrot.slane %v3922_v22, 5  ;;  %v14858_v28 = vadd.f32 %v14714_v9, %v14704_v23  ;;  %v14870_v41 = vpop.f32.mrb[36].mxu1  ;;  %v13434_v23 = vld [vmem:[#allocation10 + $0x8] sm:$0xff]  }
 0x1dd   : > { %v3901_v32 = vsel %vm14031_vm10, %v3896_v13, %v3900_v14  ;;  %v14862_v34 = vadd.f32 %v14694_v45, %v14692_v54  ;;  %v14866_v12 = vadd.f32 %v14722_v17, %v14718_v20  ;;  %v3919_v4 = vor.u32 %v3918_v29, %v3914_v51  ;;  %v14872_v18 = vpop.f32.mrb[37].mxu1  ;;  %12672 = vmatpush3.bf16.msra.mxu1 %v13434_v23  ;;  %v3842_v29 = vld [vmem:[#allocation2 + $0x80] sm:$0xf] }
 0x1de   : > { %5698 = vmatmul.mubr.bf16.gmra.mrb[124].mxu1 %v11624_v38  ;;  %v11641_v48 = vcombine.low %v3891_v42, %v3901_v32  ;;  %v3915_v22 = vsel %vm14031_vm10, %v3910_v52, %v3914_v51  ;;  %v3927_v14 = vshrl.u32 %v3836_v46, 16  ;;  %v3930_v9 = vshll.u32 %v3836_v46, 16  ;;  %v14874_v33 = vpop.f32.mrb[38].mxu1  ;;  %12673 = vmatprep.subr.bf16.mxu1 %v13435_v7 }
 0x1df   : > { %v3936_v0 = vshll.u32 %v3837_v16, 16  ;;  %v3940_v54 = vshrl.u32 %v3837_v16, 16  ;;  %v3946_v45 = vshll.u32 %v3838_v5, 16  ;;  %v3920_v20 = vrot.slane %v3919_v4, 4  ;;  %v14876_v38 = vpop.f32.mrb[39].mxu1 }
 0x1e0   : > { %13157 = vmatprep.mubr.bf16.mxu0 %v11641_v48  ;;  %v3929_v17 = vrot.slane %v3927_v14, 4  ;;  %v3951_v15 = vshrl.u32 %v3839_v50, 16  ;;  %v3954_v42 = vshll.u32 %v3839_v50, 16  ;;  %v3932_v37 = vrot.slane %v3930_v9, 5  ;;  %v3843_v4 = vld [vmem:[#allocation2 + $0x84] sm:$0xf] }
 0x1e1   : > { %v3938_v53 = vrot.slane %v3936_v0, 5  ;;  %v3942_v13 = vrot.slane %v3940_v54, 4  ;;  %v3948_v51 = vrot.slane %v3946_v45, 5  ;;  %v3925_v46 = vsel %vm14031_vm10, %v3920_v20, %v3924_v39  ;;  %v3844_v45 = vld [vmem:[#allocation2 + $0x88] sm:$0x1] }
 0x1e2   : > { %v3953_v16 = vrot.slane %v3951_v15, 4  ;;  %v3956_v5 = vrot.slane %v3954_v42, 5  ;;  %v3960_v52 = vshll.u32 %v3840_v49, 16  ;;  %v11642_v59 = vcombine.low %v3915_v22, %v3925_v46  ;;  %v14880_v14 = vpop.f32.mrb[40].mxu0 }
 0x1e3   : > { %v3933_v32 = vor.u32 %v3932_v37, %v3929_v17  ;;  %v3943_v48 = vor.u32 %v3942_v13, %v3938_v53  ;;  %v3964_v50 = vshrl.u32 %v3840_v49, 16  ;;  %v3970_v0 = vshll.u32 %v3841_v56, 16  ;;  %v14886_v39 = vpop.f32.mrb[41].mxu0  ;;  %v3845_v17 = vld [vmem:[#allocation2 + $0x94] sm:$0xf] }
 0x1e4   : > { %v3957_v23 = vor.u32 %v3956_v5, %v3953_v16  ;;  %v3962_v9 = vrot.slane %v3960_v52, 5  ;;  %v14884_v54 = vadd.f32 %v14730_v36, %v14726_v2  ;;  %13158 = vmatmul.mubr.bf16.vlgmr.msra.gmra.mrb[128].mxu0 %v11642_v59  ;;  %v14890_v49 = vadd.f32 %v14762_v47, %v14760_v35  ;;  %v14892_v42 = vpop.f32.mrb[42].mxu0  ;;  %v3846_v13 = vld [vmem:[#allocation2 + $0x98] sm:$0xf] }
 0x1e5   : > { %v3934_v20 = vrot.slane %v3933_v32, 4  ;;  %v3944_v15 = vrot.slane %v3943_v48, 4  ;;  %v3966_v22 = vrot.slane %v3964_v50, 4  ;;  %v3972_v56 = vrot.slane %v3970_v0, 5  ;;  %v14902_v46 = vpop.f32.mrb[43].mxu0 }
 0x1e6   : > { %v3958_v37 = vrot.slane %v3957_v23, 4  ;;  %v14896_v2 = vadd.f32 %v14734_v60, %v14732_v55  ;;  %v14900_v36 = vadd.f32 %v14766_v8, %v14764_v1  ;;  %v3975_v5 = vshrl.u32 %v3842_v29, 16  ;;  %v3847_v32 = vld [vmem:[#allocation2 + $0x9c] sm:$0x1] }
 0x1e7   : > { %v3939_v35 = vsel %vm14031_vm10, %v3934_v20, %v3938_v53  ;;  %v3949_v47 = vsel %vm14031_vm10, %v3944_v15, %v3948_v51  ;;  %v3967_v16 = vor.u32 %v3966_v22, %v3962_v9  ;;  %v3978_v55 = vshll.u32 %v3842_v29, 16 }
 0x1e8   : > { %v11643_v52 = vcombine.low %v3939_v35, %v3949_v47  ;;  %v3963_v60 = vsel %vm14031_vm10, %v3958_v37, %v3962_v9  ;;  %v3984_v59 = vshll.u32 %v3843_v4, 16  ;;  %v3977_v8 = vrot.slane %v3975_v5, 4 }
 0x1e9   : > { %v3968_v1 = vrot.slane %v3967_v16, 4  ;;  %v3988_v48 = vshrl.u32 %v3843_v4, 16  ;;  %v3994_v50 = vshll.u32 %v3844_v45, 16  ;;  %v3980_v23 = vrot.slane %v3978_v55, 5  ;;  %v3848_v16 = vld [vmem:[#allocation2 + $0xa8] sm:$0xf] }
 0x1ea   : > { %13161 = vmatprep.mubr.bf16.mxu0 %v11643_v52  ;;  %v3986_v0 = vrot.slane %v3984_v59, 5  ;;  %v3999_v53 = vshrl.u32 %v3845_v17, 16  ;;  %v4002_v20 = vshll.u32 %v3845_v17, 16  ;;  %v4008_v35 = vshll.u32 %v3846_v13, 16  ;;  %v3849_v17 = vld [vmem:[#allocation2 + $0xac] sm:$0xf] }
 0x1eb   : > { %v3973_v51 = vsel %vm14031_vm10, %v3968_v1, %v3972_v56  ;;  %v3990_v15 = vrot.slane %v3988_v48, 4  ;;  %v3996_v22 = vrot.slane %v3994_v50, 5  ;;  %v3981_v29 = vor.u32 %v3980_v23, %v3977_v8  ;;  %v14912_v5 = vpop.f32.mrb[40].mxu1  ;;  %v13436_v50 = vld [vmem:[#allocation10 + $0x10] sm:$0xff]  }
 0x1ec   : > { %v11644_v9 = vcombine.low %v3963_v60, %v3973_v51  ;;  %v4001_v37 = vrot.slane %v3999_v53, 4  ;;  %v4004_v47 = vrot.slane %v4002_v20, 5  ;;  %v4010_v45 = vrot.slane %v4008_v35, 5  ;;  %v14914_v59 = vpop.f32.mrb[41].mxu1  ;;  %v3851_v20 = vld [vmem:[#allocation2 + $0xbc] sm:$0xf]  ;;  %12674 = vmatpush3.bf16.msra.mxu1 %v13436_v50 }
 0x1ed   : > { %v3991_v4 = vor.u32 %v3990_v15, %v3986_v0  ;;  %v4012_v52 = vshrl.u32 %v3846_v13, 16  ;;  %v4018_v55 = vshll.u32 %v3847_v32, 16  ;;  %v3982_v56 = vrot.slane %v3981_v29, 4  ;;  %v14920_v48 = vpop.f32.mrb[42].mxu1  ;;  %v3850_v32 = vld [vmem:[#allocation2 + $0xb0] sm:$0x1] }
 0x1ee   : > { %13162 = vmatmul.mubr.bf16.gmra.mrb[132].mxu0 %v11644_v9  ;;  %v4005_v1 = vor.u32 %v4004_v47, %v4001_v37  ;;  %v12263_v60 = vadd.f32 %v14782_v57, %v14772_v21  ;;  %v12375_v8 = vadd.f32 %v14825_v58, %v14819_v10  ;;  %v12266_v13 = vadd.f32 %v14794_v3, %v14788_v19  ;;  %v14924_v51 = vpop.f32.mrb[43].mxu1  ;;  %v3852_v58 = vld [vmem:[#allocation2 + $0xc0] sm:$0xf]  ;;  %v14932_v35 = vpop.f32.mrb[44].mxu0 }
 0x1ef   : > { %v3992_v7 = vrot.slane %v3991_v4, 4  ;;  %v4014_v23 = vrot.slane %v4012_v52, 4  ;;  %v4020_v53 = vrot.slane %v4018_v55, 5  ;;  %v3987_v15 = vsel %vm14031_vm10, %v3982_v56, %v3986_v0  ;;  %v14936_v37 = vpop.f32.mrb[45].mxu0 }
 0x1f0   : > { %v4006_v21 = vrot.slane %v4005_v1, 4  ;;  %v14928_v57 = vadd.f32 %v12375_v8, %v12263_v60  ;;  %v12378_v10 = vadd.f32 %v14832_v11, %v14827_v27  ;;  %v4023_v9 = vshrl.u32 %v3848_v16, 16  ;;  %v14942_v27 = vpop.f32.mrb[46].mxu0  ;;  %v3853_v60 = vld [vmem:[#allocation2 + $0xc4] sm:$0x1] }
 0x1f1   : > { %v3997_v19 = vsel %vm14031_vm10, %v3992_v7, %v3996_v22  ;;  %v4015_v3 = vor.u32 %v4014_v23, %v4010_v45  ;;  %v4026_v29 = vshll.u32 %v3848_v16, 16  ;;  %v4032_v52 = vshll.u32 %v3849_v17, 16  ;;  %v14944_v22 = vpop.f32.mrb[47].mxu0 }
 0x1f2   : > { %16850 = vst [vmem:[#allocation38_spill] sm:$0xff] %v14928_v57  ;;  %v11645_v47 = vcombine.low %v3987_v15, %v3997_v19  ;;  %v4011_v0 = vsel %vm14031_vm10, %v4006_v21, %v4010_v45  ;;  %v14940_v4 = vadd.f32 %v12378_v10, %v12266_v13  ;;  %v4025_v55 = vrot.slane %v4023_v9, 4  ;;  %v3854_v9 = vld [vmem:[#allocation2 + $0xd0] sm:$0xf] }
 0x1f3   : > { %v4016_v11 = vrot.slane %v4015_v3, 4  ;;  %v4028_v56 = vrot.slane %v4026_v29, 5  ;;  %v4036_v1 = vshrl.u32 %v3849_v17, 16  ;;  %v4034_v16 = vrot.slane %v4032_v52, 5 }
 0x1f4   : > { %16851 = vst [vmem:[#allocation39_spill] sm:$0xff] %v14940_v4  ;;  %13165 = vmatprep.mubr.bf16.mxu0 %v11645_v47  ;;  %v4042_v8 = vshll.u32 %v3850_v32, 16  ;;  %v4047_v50 = vshrl.u32 %v3851_v20, 16  ;;  %v4050_v7 = vshll.u32 %v3851_v20, 16  ;;  %v4056_v15 = vshll.u32 %v3852_v58, 16 }
 0x1f5   : > { %v4021_v45 = vsel %vm14031_vm10, %v4016_v11, %v4020_v53  ;;  %v4029_v23 = vor.u32 %v4028_v56, %v4025_v55  ;;  %v4038_v13 = vrot.slane %v4036_v1, 4  ;;  %v4060_v57 = vshrl.u32 %v3852_v58, 16  ;;  %v3855_v47 = vld [vmem:[#allocation2 + $0xd4] sm:$0xf]  ;;  %v3856_v1 = vld [vmem:[#allocation2 + $0xd8] sm:$0x1] }
 0x1f6   : > { %v11646_v21 = vcombine.low %v4011_v0, %v4021_v45  ;;  %v4044_v10 = vrot.slane %v4042_v8, 5  ;;  %v4049_v19 = vrot.slane %v4047_v50, 4  ;;  %v4052_v3 = vrot.slane %v4050_v7, 5  ;;  %v14952_v11 = vpop.f32.mrb[44].mxu1  ;;  %v3857_v8 = vld [vmem:[#allocation2 + $0xe4] sm:$0xf] }
 0x1f7   : > { %v4030_v17 = vrot.slane %v4029_v23, 4  ;;  %v4039_v29 = vor.u32 %v4038_v13, %v4034_v16  ;;  %v4058_v4 = vrot.slane %v4056_v15, 5  ;;  %v4066_v52 = vshll.u32 %v3853_v60, 16  ;;  %v14958_v50 = vpop.f32.mrb[45].mxu1 }
 0x1f8   : > { %13166 = vmatmul.mubr.bf16.gmra.mrb[136].mxu0 %v11646_v21  ;;  %v4053_v32 = vor.u32 %v4052_v3, %v4049_v19  ;;  %v12269_v20 = vadd.f32 %v14838_v26, %v14836_v43  ;;  %v12381_v53 = vadd.f32 %v14872_v18, %v14870_v41  ;;  %v4062_v56 = vrot.slane %v4060_v57, 4  ;;  %v3858_v41 = vld [vmem:[#allocation2 + $0xe8] sm:$0xf]  ;;  %v14964_v18 = vpop.f32.mrb[46].mxu1 }
 0x1f9   : > { %v4035_v0 = vsel %vm14031_vm10, %v4030_v17, %v4034_v16  ;;  %v4040_v55 = vrot.slane %v4039_v29, 4  ;;  %v12272_v58 = vadd.f32 %v14844_v62, %v14842_v44  ;;  %v4068_v7 = vrot.slane %v4066_v52, 5  ;;  %v13437_v16 = vld [vmem:[#allocation10 + $0x58] sm:$0xff]   ;;  %v14968_v23 = vpop.f32.mrb[47].mxu1 }
 0x1fa   : > { %v4054_v60 = vrot.slane %v4053_v32, 4  ;;  %v14960_v43 = vadd.f32 %v12381_v53, %v12269_v20  ;;  %v12384_v26 = vadd.f32 %v14876_v38, %v14874_v33  ;;  %v4063_v45 = vor.u32 %v4062_v56, %v4058_v4  ;;  %12675 = vmatprep.subr.bf16.mxu1 %v13437_v16  ;;  %v3859_v29 = vld [vmem:[#allocation2 + $0xec] sm:$0x1] }
 0x1fb   : > { %v4045_v57 = vsel %vm14031_vm10, %v4040_v55, %v4044_v10  ;;  %v4071_v44 = vshrl.u32 %v3854_v9, 16  ;;  %v4074_v62 = vshll.u32 %v3854_v9, 16  ;;  %v4080_v19 = vshll.u32 %v3855_v47, 16 }
 0x1fc   : > { %v11647_v13 = vcombine.low %v4035_v0, %v4045_v57  ;;  %v4059_v15 = vsel %vm14031_vm10, %v4054_v60, %v4058_v4  ;;  %v14972_v21 = vadd.f32 %v12384_v26, %v12272_v58  ;;  %v4064_v33 = vrot.slane %v4063_v45, 4  ;;  %v14974_v32 = vpop.f32.mrb[48].mxu0  ;;  %v13438_v0 = vld [vmem:[#allocation10 + $0x18] sm:$0xff]   ;;  %v3860_v45 = vld [vmem:[#allocation2 + $0xf8] sm:$0xf] }
 0x1fd   : > { %v4073_v38 = vrot.slane %v4071_v44, 4  ;;  %v4076_v3 = vrot.slane %v4074_v62, 5  ;;  %v4084_v17 = vshrl.u32 %v3855_v47, 16  ;;  %v4082_v10 = vrot.slane %v4080_v19, 5  ;;  %v14976_v53 = vpop.f32.mrb[49].mxu0  ;;  %12676 = vmatpush3.bf16.msra.mxu1 %v13438_v0 }
 0x1fe   : > { %13169 = vmatprep.mubr.bf16.mxu0 %v11647_v13  ;;  %v4090_v9 = vshll.u32 %v3856_v1, 16  ;;  %v4095_v52 = vshrl.u32 %v3857_v8, 16  ;;  %v4098_v20 = vshll.u32 %v3857_v8, 16  ;;  %v4069_v4 = vsel %vm14031_vm10, %v4064_v33, %v4068_v7  ;;  %v14980_v60 = vpop.f32.mrb[50].mxu0  ;;  %v3861_v19 = vld [vmem:[#allocation2 + $0xfc] sm:$0xf] }
 0x1ff   : > { %v4077_v55 = vor.u32 %v4076_v3, %v4073_v38  ;;  %v4086_v56 = vrot.slane %v4084_v17, 4  ;;  %v4104_v58 = vshll.u32 %v3858_v41, 16  ;;  %v11648_v47 = vcombine.low %v4059_v15, %v4069_v4  ;;  %v14982_v44 = vpop.f32.mrb[51].mxu0 }
 0x200   : > { %v4092_v26 = vrot.slane %v4090_v9, 5  ;;  %v4097_v16 = vrot.slane %v4095_v52, 4  ;;  %v4100_v57 = vrot.slane %v4098_v20, 5  ;;  %v4108_v13 = vshrl.u32 %v3858_v41, 16  ;;  %v3862_v20 = vld [vmem:[#allocation2 + $0x100] sm:$0x1] }
 0x201   : > { %v4078_v1 = vrot.slane %v4077_v55, 4  ;;  %v4087_v8 = vor.u32 %v4086_v56, %v4082_v10  ;;  %v4106_v62 = vrot.slane %v4104_v58, 5  ;;  %13170 = vmatmul.mubr.bf16.gmra.mrb[140].mxu0 %v11648_v47  ;;  %v4114_v33 = vshll.u32 %v3859_v29, 16  ;;  %v3863_v41 = vld [vmem:[#allocation2 + $0x10c] sm:$0xf] }
 0x202   : > { %v4101_v7 = vor.u32 %v4100_v57, %v4097_v16  ;;  %v12275_v38 = vadd.f32 %v14886_v39, %v14880_v14  ;;  %v12387_v15 = vadd.f32 %v14914_v59, %v14912_v5  ;;  %v4110_v9 = vrot.slane %v4108_v13, 4  ;;  %v3864_v39 = vld [vmem:[#allocation2 + $0x110] sm:$0xf] }
 0x203   : > { %v4083_v3 = vsel %vm14031_vm10, %v4078_v1, %v4082_v10  ;;  %v4088_v17 = vrot.slane %v4087_v8, 4  ;;  %v12278_v52 = vadd.f32 %v14902_v46, %v14892_v42  ;;  %v4116_v4 = vrot.slane %v4114_v33, 5 }
 0x204   : > { %v4102_v0 = vrot.slane %v4101_v7, 4  ;;  %v14992_v55 = vadd.f32 %v12387_v15, %v12275_v38  ;;  %v12390_v14 = vadd.f32 %v14924_v51, %v14920_v48  ;;  %v4111_v59 = vor.u32 %v4110_v9, %v4106_v62  ;;  %v3865_v51 = vld [vmem:[#allocation2 + $0x114] sm:$0x1] }
 0x205   : > { %v4093_v5 = vsel %vm14031_vm10, %v4088_v17, %v4092_v26  ;;  %v4119_v29 = vshrl.u32 %v3860_v45, 16  ;;  %v4122_v10 = vshll.u32 %v3860_v45, 16  ;;  %v4128_v58 = vshll.u32 %v3861_v19, 16  ;;  %v15002_v47 = vpop.f32.mrb[48].mxu1 }
 0x206   : > { %v11649_v56 = vcombine.low %v4083_v3, %v4093_v5  ;;  %v4107_v42 = vsel %vm14031_vm10, %v4102_v0, %v4106_v62  ;;  %v15000_v46 = vadd.f32 %v12390_v14, %v12278_v52  ;;  %v4112_v16 = vrot.slane %v4111_v59, 4  ;;  %v15004_v8 = vpop.f32.mrb[49].mxu1  ;;  %v3866_v14 = vld [vmem:[#allocation2 + $0x120] sm:$0xf]  ;;  %v13439_v5 = vld [vmem:[#allocation10 + $0x60] sm:$0xff]  }
 0x207   : > { %v4121_v57 = vrot.slane %v4119_v29, 4  ;;  %v4124_v1 = vrot.slane %v4122_v10, 5  ;;  %v4132_v48 = vshrl.u32 %v3861_v19, 16  ;;  %v4130_v26 = vrot.slane %v4128_v58, 5  ;;  %v15006_v33 = vpop.f32.mrb[50].mxu1  ;;  %12677 = vmatprep.subr.bf16.mxu1 %v13439_v5 }
 0x208   : > { %13173 = vmatprep.mubr.bf16.mxu0 %v11649_v56  ;;  %v4138_v13 = vshll.u32 %v3862_v20, 16  ;;  %v4143_v45 = vshrl.u32 %v3863_v41, 16  ;;  %v4146_v7 = vshll.u32 %v3863_v41, 16  ;;  %v4117_v62 = vsel %vm14031_vm10, %v4112_v16, %v4116_v4  ;;  %v15010_v17 = vpop.f32.mrb[51].mxu1  ;;  %v3867_v10 = vld [vmem:[#allocation2 + $0x124] sm:$0xf] }
 0x209   : > { %v4125_v38 = vor.u32 %v4124_v1, %v4121_v57  ;;  %v4134_v15 = vrot.slane %v4132_v48, 4  ;;  %v4152_v3 = vshll.u32 %v3864_v39, 16  ;;  %v11650_v9 = vcombine.low %v4107_v42, %v4117_v62 }
 0x20a   : > { %v4140_v19 = vrot.slane %v4138_v13, 5  ;;  %v4145_v52 = vrot.slane %v4143_v45, 4  ;;  %v4148_v0 = vrot.slane %v4146_v7, 5  ;;  %v4156_v41 = vshrl.u32 %v3864_v39, 16  ;;  %v15012_v56 = vpop.f32.mrb[52].mxu0 }
 0x20b   : > { %v4126_v59 = vrot.slane %v4125_v38, 4  ;;  %v4135_v20 = vor.u32 %v4134_v15, %v4130_v26  ;;  %v4154_v29 = vrot.slane %v4152_v3, 5  ;;  %13174 = vmatmul.mubr.bf16.gmra.mrb[144].mxu0 %v11650_v9  ;;  %v4162_v58 = vshll.u32 %v3865_v51, 16  ;;  %v15018_v57 = vpop.f32.mrb[53].mxu0  ;;  %v3868_v45 = vld [vmem:[#allocation2 + $0x128] sm:$0x1] }
 0x20c   : > { %v4149_v4 = vor.u32 %v4148_v0, %v4145_v52  ;;  %v12281_v16 = vadd.f32 %v14936_v37, %v14932_v35  ;;  %v12393_v42 = vadd.f32 %v14958_v50, %v14952_v11  ;;  %v4158_v39 = vrot.slane %v4156_v41, 4  ;;  %v3869_v7 = vld [vmem:[#allocation2 + $0x134] sm:$0xf]  ;;  %v15024_v51 = vpop.f32.mrb[54].mxu0  ;;  %v3870_v50 = vld [vmem:[#allocation2 + $0x138] sm:$0xf] }
 0x20d   : > { %v4131_v1 = vsel %vm14031_vm10, %v4126_v59, %v4130_v26  ;;  %v4136_v48 = vrot.slane %v4135_v20, 4  ;;  %v12284_v13 = vadd.f32 %v14944_v22, %v14942_v27  ;;  %v4164_v35 = vrot.slane %v4162_v58, 5  ;;  %v15030_v38 = vpop.f32.mrb[55].mxu0  ;;  %v13440_v26 = vld [vmem:[#allocation10 + $0x20] sm:$0xff]   ;;  %v3871_v41 = vld [vmem:[#allocation2 + $0x13c] sm:$0x1] }
 0x20e   : > { %v4150_v62 = vrot.slane %v4149_v4, 4  ;;  %v15026_v37 = vadd.f32 %v12393_v42, %v12281_v16  ;;  %v12396_v11 = vadd.f32 %v14968_v23, %v14964_v18  ;;  %v4159_v3 = vor.u32 %v4158_v39, %v4154_v29  ;;  %12678 = vmatpush3.bf16.msra.mxu1 %v13440_v26 }
 0x20f   : > { %v4141_v15 = vsel %vm14031_vm10, %v4136_v48, %v4140_v19  ;;  %v4167_v27 = vshrl.u32 %v3866_v14, 16  ;;  %v4170_v22 = vshll.u32 %v3866_v14, 16  ;;  %v4176_v5 = vshll.u32 %v3867_v10, 16 }
 0x210   : > { %v11651_v9 = vcombine.low %v4131_v1, %v4141_v15  ;;  %v4155_v52 = vsel %vm14031_vm10, %v4150_v62, %v4154_v29  ;;  %v15036_v0 = vadd.f32 %v12396_v11, %v12284_v13  ;;  %v4160_v59 = vrot.slane %v4159_v3, 4  ;;  %v15038_v4 = vpop.f32.mrb[52].mxu1  ;;  %v3872_v15 = vld [vmem:[#allocation2 + $0x148] sm:$0xf] }
 0x211   : > { %v4169_v18 = vrot.slane %v4167_v27, 4  ;;  %v4172_v23 = vrot.slane %v4170_v22, 5  ;;  %v4180_v20 = vshrl.u32 %v3867_v10, 16  ;;  %v4178_v19 = vrot.slane %v4176_v5, 5  ;;  %v15040_v42 = vpop.f32.mrb[53].mxu1 }
 0x212   : > { %13177 = vmatprep.mubr.bf16.mxu0 %v11651_v9  ;;  %v4186_v58 = vshll.u32 %v3868_v45, 16  ;;  %v4191_v16 = vshrl.u32 %v3869_v7, 16  ;;  %v4194_v14 = vshll.u32 %v3869_v7, 16  ;;  %v4165_v29 = vsel %vm14031_vm10, %v4160_v59, %v4164_v35  ;;  %v15044_v13 = vpop.f32.mrb[54].mxu1  ;;  %v3873_v9 = vld [vmem:[#allocation2 + $0x14c] sm:$0xf] }
 0x213   : > { %v4173_v1 = vor.u32 %v4172_v23, %v4169_v18  ;;  %v4182_v48 = vrot.slane %v4180_v20, 4  ;;  %v4200_v39 = vshll.u32 %v3870_v50, 16  ;;  %v11652_v62 = vcombine.low %v4155_v52, %v4165_v29  ;;  %v15046_v3 = vpop.f32.mrb[55].mxu1 }
 0x214   : > { %v4188_v10 = vrot.slane %v4186_v58, 5  ;;  %v4193_v11 = vrot.slane %v4191_v16, 4  ;;  %v4196_v26 = vrot.slane %v4194_v14, 5  ;;  %v4204_v22 = vshrl.u32 %v3870_v50, 16  ;;  %v3874_v16 = vld [vmem:[#allocation2 + $0x150] sm:$0x1] }
 0x215   : > { %v4174_v45 = vrot.slane %v4173_v1, 4  ;;  %v4183_v27 = vor.u32 %v4182_v48, %v4178_v19  ;;  %v4202_v7 = vrot.slane %v4200_v39, 5  ;;  %13178 = vmatmul.mubr.bf16.gmra.mrb[148].mxu0 %v11652_v62  ;;  %v4210_v35 = vshll.u32 %v3871_v41, 16  ;;  %v530_v50 = vld [vmem:[#allocation2 + $0x164] sm:$0x1] }
 0x216   : > { %v4197_v5 = vor.u32 %v4196_v26, %v4193_v11  ;;  %v12287_v59 = vadd.f32 %v14976_v53, %v14974_v32  ;;  %v12399_v52 = vadd.f32 %v15004_v8, %v15002_v47  ;;  %v4206_v20 = vrot.slane %v4204_v22, 4  ;;  %v3875_v14 = vld [vmem:[#allocation2 + $0x15c] sm:$0xf]  ;;  %v3876_v39 = vld [vmem:[#allocation2 + $0x160] sm:$0xf] }
 0x217   : > { %v4179_v18 = vsel %vm14031_vm10, %v4174_v45, %v4178_v19  ;;  %v4184_v23 = vrot.slane %v4183_v27, 4  ;;  %v12290_v58 = vadd.f32 %v14982_v44, %v14980_v60  ;;  %v4212_v1 = vrot.slane %v4210_v35, 5  ;;  %v12297_v53 = vpop.f32.mrb[56].mxu0  ;;  %v13441_v27 = vld [vmem:[#allocation10 + $0x68] sm:$0xff]  }
 0x218   : > { %v4198_v29 = vrot.slane %v4197_v5, 4  ;;  %v15056_v41 = vadd.f32 %v12399_v52, %v12287_v59  ;;  %v12402_v32 = vadd.f32 %v15010_v17, %v15006_v33  ;;  %v4207_v8 = vor.u32 %v4206_v20, %v4202_v7  ;;  %v12298_v62 = vpop.f32.mrb[57].mxu0  ;;  %12679 = vmatprep.subr.bf16.mxu1 %v13441_v27 }
 0x219   : > { %v4189_v47 = vsel %vm14031_vm10, %v4184_v23, %v4188_v10  ;;  %v4215_v19 = vshrl.u32 %v3872_v15, 16  ;;  %v4218_v48 = vshll.u32 %v3872_v15, 16  ;;  %v4224_v26 = vshll.u32 %v3873_v9, 16  ;;  %v12300_v45 = vpop.f32.mrb[58].mxu0 }
 0x21a   : > { %v11653_v60 = vcombine.low %v4179_v18, %v4189_v47  ;;  %v4203_v44 = vsel %vm14031_vm10, %v4198_v29, %v4202_v7  ;;  %v15064_v11 = vadd.f32 %v12402_v32, %v12290_v58  ;;  %v4208_v22 = vrot.slane %v4207_v8, 4  ;;  %v12301_v35 = vpop.f32.mrb[59].mxu0  ;;  %v13442_v47 = vld [vmem:[#allocation10 + $0x28] sm:$0xff]  }
 0x21b   : > { %v4217_v33 = vrot.slane %v4215_v19, 4  ;;  %v4220_v17 = vrot.slane %v4218_v48, 5  ;;  %v4228_v5 = vshrl.u32 %v3873_v9, 16  ;;  %v4226_v10 = vrot.slane %v4224_v26, 5  ;;  %12680 = vmatpush3.bf16.msra.mxu1 %v13442_v47  ;;  %v16853_v47 = vld [vmem:[#allocation22_spill] sm:$0xff] }
 0x21c   : > { %13181 = vmatprep.mubr.bf16.mxu0 %v11653_v60  ;;  %v4234_v59 = vshll.u32 %v3874_v16, 16  ;;  %v531_v15 = vsel %vm13978_vm5, 0, %v530_v50  ;;  %v4239_v52 = vshrl.u32 %v3875_v14, 16  ;;  %v4213_v7 = vsel %vm14031_vm10, %v4208_v22, %v4212_v1 }
 0x21d   : > { %v4221_v18 = vor.u32 %v4220_v17, %v4217_v33  ;;  %v4230_v23 = vrot.slane %v4228_v5, 4  ;;  %532 = vst [vmem:[#allocation2 + $0x164] sm:$0x1] %v531_v15  ;;  %v4242_v20 = vshll.u32 %v3875_v14, 16  ;;  %v11654_v58 = vcombine.low %v4203_v44, %v4213_v7 }
 0x21e   : > { %v4236_v29 = vrot.slane %v4234_v59, 5  ;;  %v4241_v32 = vrot.slane %v4239_v52, 4  ;;  %v4248_v9 = vshll.u32 %v3876_v39, 16  ;;  %v4252_v48 = vshrl.u32 %v3876_v39, 16 }
 0x21f   : > { %v4222_v8 = vrot.slane %v4221_v18, 4  ;;  %v4231_v19 = vor.u32 %v4230_v23, %v4226_v10  ;;  %v4244_v16 = vrot.slane %v4242_v20, 5  ;;  %13182 = vmatmul.mubr.bf16.gmra.mrb[152].mxu0 %v11654_v58  ;;  %v12293_v60 = vadd.f32 %v15018_v57, %v15012_v56  ;;  %v12409_v44 = vpop.f32.mrb[56].mxu1 }
 0x220   : > { %v4250_v50 = vrot.slane %v4248_v9, 5  ;;  %v12405_v1 = vadd.f32 %v15040_v42, %v15038_v4  ;;  %v12296_v14 = vadd.f32 %v15030_v38, %v15024_v51  ;;  %v4254_v33 = vrot.slane %v4252_v48, 4  ;;  %v12410_v39 = vpop.f32.mrb[57].mxu1  ;;  %v16856_v48 = vld [vmem:[#allocation25_spill] sm:$0xff] }
 0x221   : > { %v4227_v26 = vsel %vm14031_vm10, %v4222_v8, %v4226_v10  ;;  %v4232_v27 = vrot.slane %v4231_v19, 4  ;;  %v4245_v22 = vor.u32 %v4244_v16, %v4241_v32  ;;  %v12408_v56 = vadd.f32 %v15046_v3, %v15044_v13  ;;  %v12412_v4 = vpop.f32.mrb[58].mxu1  ;;  %v16854_v8 = vld [vmem:[#allocation23_spill] sm:$0xff]  ;;  %v16855_v16 = vld [vmem:[#allocation24_spill] sm:$0xff] }
 0x222   : > { %v15078_v17 = vadd.f32 %v12405_v1, %v12293_v60  ;;  %v12299_v57 = vadd.f32 %v12298_v62, %v12297_v53  ;;  %v12411_v5 = vadd.f32 %v12410_v39, %v12409_v44  ;;  %v4255_v42 = vor.u32 %v4254_v33, %v4250_v50  ;;  %v12413_v15 = vpop.f32.mrb[59].mxu1  ;;  %v12303_v10 = vpop.f32.mrb[60].mxu0  ;;  %v16858_v44 = vld [vmem:[#allocation27_spill] sm:$0xff]  ;;  %v16861_v39 = vld [vmem:[#allocation30_spill] sm:$0xff] }
 0x223   : > { %v4237_v51 = vsel %vm14031_vm10, %v4232_v27, %v4236_v29  ;;  %v4246_v38 = vrot.slane %v4245_v22, 4  ;;  %v12302_v59 = vadd.f32 %v12301_v35, %v12300_v45  ;;  %v15084_v18 = vadd.f32 %v12408_v56, %v12296_v14  ;;  %v12304_v58 = vpop.f32.mrb[61].mxu0  ;;  %v16852_v35 = vld [vmem:[#allocation21_spill] sm:$0xff]  ;;  %v16859_v27 = vld [vmem:[#allocation28_spill] sm:$0xff]  ;;  %v16862_v56 = vld [vmem:[#allocation31_spill] sm:$0xff] }
 0x224   : > { %v11655_v52 = vcombine.low %v4227_v26, %v4237_v51  ;;  %v3877_v7 = vld [vmem:[#allocation2 + $0x164] sm:$0x1]  ;;  %v15086_v23 = vadd.f32 %v12411_v5, %v12299_v57  ;;  %v12414_v20 = vadd.f32 %v12413_v15, %v12412_v4  ;;  %v4256_v3 = vrot.slane %v4255_v42, 4  ;;  %v12306_v29 = vpop.f32.mrb[62].mxu0  ;;  %v16860_v22 = vld [vmem:[#allocation29_spill] sm:$0xff]  ;;  %v16863_v4 = vld [vmem:[#allocation20_spill] sm:$0xff] }
 0x225   : > { %v4251_v13 = vsel %vm14031_vm10, %v4246_v38, %v4250_v50  ;;  %v4258_v53 = vshll.u32 %v3877_v7, 16  ;;  %v12305_v62 = vadd.f32 %v12304_v58, %v12303_v10  ;;  %v12307_v45 = vpop.f32.mrb[63].mxu0  ;;  %v5258_v9 = vadd.f32 %v16852_v35, %v14618_v30  ;;  %v16857_v50 = vld [vmem:[#allocation26_spill] sm:$0xff]  ;;  %v16864_v51 = vld [vmem:[#allocation32_spill] sm:$0xff]  ;;  %v16868_v7 = vld [vmem:[#allocation35_spill] sm:$0xff] }
 0x226   : > { %13185 = vmatprep.mubr.bf16.mxu0 %v11655_v52  ;;  %v15090_v32 = vadd.f32 %v12414_v20, %v12302_v59  ;;  %v5261_v19 = vadd.f32 %v16854_v8, %v16853_v47  ;;  %v5266_v60 = vadd.f32 %v16856_v48, %v16855_v16  ;;  %v12308_v14 = vadd.f32 %v12307_v45, %v12306_v29  ;;  %v16865_v59 = vld [vmem:[#allocation33_spill] sm:$0xff]  ;;  %v16866_v15 = vld [vmem:[#allocation34_spill] sm:$0xff]  ;;  %v13443_v8 = vld [vmem:[#allocation10 + $0x70] sm:$0xff]  }
 0x227   : > { %v4260_v1 = vrot.slane %v4258_v53, 5  ;;  %v5269_v26 = vadd.f32 %v16858_v44, %v16857_v50  ;;  %v15102_v33 = vadd.f32 %v16860_v22, %v16859_v27  ;;  %v15106_v57 = vadd.f32 %v16862_v56, %v16861_v39  ;;  %v16867_v52 = vld [vmem:[#allocation18_spill] sm:$0xff]  ;;  %12681 = vmatprep.subr.bf16.mxu1 %v13443_v8 }
 0x228   : > { %v15110_v30 = vadd.f32 %v14742_v6, %v14738_v63  ;;  %v15114_v5 = vadd.f32 %v14752_v61, %v14746_v31  ;;  %v15118_v38 = vadd.f32 %v16864_v51, %v16863_v4  ;;  %v15124_v10 = vadd.f32 %v16866_v15, %v16865_v59  ;;  %v16869_v63 = vld [vmem:[#allocation36_spill] sm:$0xff]  ;;  %v16870_v6 = vld [vmem:[#allocation37_spill] sm:$0xff] }
 0x229   : > { %v4261_v42 = vsel %vm14031_vm10, %v4256_v3, %v4260_v1  ;;  %v15128_v20 = vadd.f32 %v16868_v7, %v16867_v52  ;;  %v15132_v58 = vadd.f32 %v16870_v6, %v16869_v63  ;;  %v15136_v61 = vadd.f32 %v14858_v28, %v14852_v25  ;;  %v13444_v1 = vld [vmem:[#allocation10 + $0x30] sm:$0xff]  }
 0x22a   : > { %v11656_v31 = vcombine.low %v4251_v13, %v4261_v42  ;;  %v15140_v3 = vadd.f32 %v14866_v12, %v14862_v34  ;;  %v15144_v53 = vadd.f32 %v14890_v49, %v14884_v54  ;;  %v15148_v29 = vadd.f32 %v14900_v36, %v14896_v2  ;;  %12682 = vmatpush3.bf16.msra.mxu1 %v13444_v1 }
 0x22c   : > { %13186 = vmatmul.mubr.bf16.gmra.mrb[156].mxu0 %v11656_v31  ;;  %v12415_v45 = vpop.f32.mrb[60].mxu1 }
 0x22d   : > { %v12416_v35 = vpop.f32.mrb[61].mxu1 }
 0x22e   : > { %v12417_v13 = vadd.f32 %v12416_v35, %v12415_v45  ;;  %v12418_v47 = vpop.f32.mrb[62].mxu1 }
 0x22f   : > { %v12419_v25 = vpop.f32.mrb[63].mxu1 }
 0x230   : > { %v15150_v28 = vadd.f32 %v12417_v13, %v12305_v62  ;;  %v12420_v16 = vadd.f32 %v12419_v25, %v12418_v47  ;;  %v12437_v34 = vpop.f32.mrb[64].mxu0 }
 0x231   : > { %v12438_v12 = vpop.f32.mrb[65].mxu0 }
 0x232   : > { %v15152_v48 = vadd.f32 %v12420_v16, %v12308_v14  ;;  %v12439_v54 = vadd.f32 %v12438_v12, %v12437_v34  ;;  %v12440_v49 = vpop.f32.mrb[66].mxu0 }
 0x233   : > { %v12441_v2 = vpop.f32.mrb[67].mxu0 }
 0x234   : > { %v5419_v36 = vadd.f32 %v12439_v54, %v5258_v9  ;;  %v12549_v50 = vpop.f32.mrb[64].mxu1  ;;  %v12442_v44 = vadd.f32 %v12441_v2, %v12440_v49  ;;  %v13445_v2 = vld [vmem:[#allocation10 + $0xc0] sm:$0xff]  }
 0x235   : > { %v12550_v27 = vpop.f32.mrb[65].mxu1  ;;  %12781 = vmatprep.subr.bf16.mxu0 %v13445_v2 }
 0x236   : > { %v5422_v22 = vadd.f32 %v12442_v44, %v5261_v19  ;;  %v12551_v39 = vadd.f32 %v12550_v27, %v12549_v50  ;;  %v12552_v56 = vpop.f32.mrb[66].mxu1 }
 0x237   : > { %v12553_v62 = vpop.f32.mrb[67].mxu1 }
 0x238   : > { %v12554_v4 = vadd.f32 %v12553_v62, %v12552_v56  ;;  %v12443_v51 = vpop.f32.mrb[68].mxu0  ;;  %v15154_v42 = vadd.f32 %v12551_v39, %v5419_v36  ;;  %v13448_v62 = vld [vmem:[#allocation10 + $0x88] sm:$0xff]  }
 0x239   : > { %v12444_v59 = vpop.f32.mrb[69].mxu0 }
 0x23a   : > { %v12445_v14 = vadd.f32 %v12444_v59, %v12443_v51  ;;  %v12446_v15 = vpop.f32.mrb[70].mxu0  ;;  %v15156_v52 = vadd.f32 %v12554_v4, %v5422_v22  ;;  %v13447_v22 = vld [vmem:[#allocation10 + $0xc8] sm:$0xff]  }
 0x23b   : > { %v12447_v7 = vpop.f32.mrb[71].mxu0 }
 0x23c   : > { %v5427_v63 = vadd.f32 %v12445_v14, %v5266_v60  ;;  %v12555_v9 = vpop.f32.mrb[68].mxu1  ;;  %v12448_v6 = vadd.f32 %v12447_v7, %v12446_v15  ;;  %v13449_v14 = vld [vmem:[#allocation10 + $0x78] sm:$0xff]  }
 0x23d   : > { %v12556_v31 = vpop.f32.mrb[69].mxu1  ;;  %12683 = vmatprep.subr.bf16.mxu1 %v13449_v14 }
 0x23e   : > { %v5430_v45 = vadd.f32 %v12448_v6, %v5269_v26  ;;  %v12557_v35 = vadd.f32 %v12556_v31, %v12555_v9  ;;  %v12558_v19 = vpop.f32.mrb[70].mxu1  ;;  %v13446_v26 = vld [vmem:[#allocation10 + $0x80] sm:$0xff]  }
 0x23f   : > { %v12559_v13 = vpop.f32.mrb[71].mxu1  ;;  %12782 = vmatpush3.bf16.msra.mxu0 %v13446_v26 }
 0x240   : > { %v12560_v47 = vadd.f32 %v12559_v13, %v12558_v19  ;;  %v15158_v8 = vadd.f32 %v12557_v35, %v5427_v63  ;;  %12783 = vmatprep.subr.bf16.mxu0 %v13447_v22 }
 0x241   : > { %v12449_v25 = vpop.f32.mrb[72].mxu0 }
 0x242   : > { %v12450_v16 = vpop.f32.mrb[73].mxu0  ;;  %v15160_v34 = vadd.f32 %v12560_v47, %v5430_v45 }
 0x243   : > { %v12451_v12 = vadd.f32 %v12450_v16, %v12449_v25  ;;  %v12452_v54 = vpop.f32.mrb[74].mxu0  ;;  %12784 = vmatpush3.bf16.msra.mxu0 %v13448_v62  ;;  %v13452_v62 = vld [vmem:[#allocation10 + $0x90] sm:$0xff]  }
 0x244   : > { %v12561_v49 = vpop.f32.mrb[72].mxu1  ;;  %v12453_v1 = vpop.f32.mrb[75].mxu0 }
 0x245   : > { %v5435_v60 = vadd.f32 %v12451_v12, %v15102_v33  ;;  %v12454_v36 = vadd.f32 %v12453_v1, %v12452_v54  ;;  %v12562_v50 = vpop.f32.mrb[73].mxu1 }
 0x246   : > { %v12563_v44 = vadd.f32 %v12562_v50, %v12561_v49  ;;  %v12564_v27 = vpop.f32.mrb[74].mxu1 }
 0x247   : > { %v5438_v39 = vadd.f32 %v12454_v36, %v15106_v57  ;;  %v12565_v56 = vpop.f32.mrb[75].mxu1 }
 0x248   : > { %v12566_v4 = vadd.f32 %v12565_v56, %v12564_v27  ;;  %v15164_v51 = vadd.f32 %v12563_v44, %v5435_v60  ;;  %v13451_v56 = vld [vmem:[#allocation10 + $0xd0] sm:$0xff]  }
 0x249   : > { %v12455_v59 = vpop.f32.mrb[76].mxu0  ;;  %12785 = vmatprep.subr.bf16.mxu0 %v13451_v56 }
 0x24a   : > { %v12456_v15 = vpop.f32.mrb[77].mxu0  ;;  %v15166_v33 = vadd.f32 %v12566_v4, %v5438_v39  ;;  %v13450_v39 = vld [vmem:[#allocation10 + $0x38] sm:$0xff]   ;;  %12786 = vmatpush3.bf16.msra.mxu0 %v13452_v62 }
 0x24b   : > { %v12457_v7 = vadd.f32 %v12456_v15, %v12455_v59  ;;  %v12458_v63 = vpop.f32.mrb[78].mxu0  ;;  %12684 = vmatpush3.bf16.msra.mxu1 %v13450_v39  ;;  %v13453_v15 = vld [vmem:[#allocation10 + $0xd8] sm:$0xff]  }
 0x24c   : > { %v12567_v9 = vpop.f32.mrb[76].mxu1  ;;  %v12459_v6 = vpop.f32.mrb[79].mxu0  ;;  %12787 = vmatprep.subr.bf16.mxu0 %v13453_v15 }
 0x24d   : > { %v5443_v57 = vadd.f32 %v12457_v7, %v15110_v30  ;;  %v12460_v31 = vadd.f32 %v12459_v6, %v12458_v63  ;;  %v12568_v45 = vpop.f32.mrb[77].mxu1 }
 0x24e   : > { %v12569_v35 = vadd.f32 %v12568_v45, %v12567_v9  ;;  %v12570_v19 = vpop.f32.mrb[78].mxu1  ;;  %v13457_v9 = vld [vmem:[#allocation3 + $0x8] sm:$0xff]  }
 0x24f   : > { %v5446_v13 = vadd.f32 %v12460_v31, %v15114_v5  ;;  %v12571_v47 = vpop.f32.mrb[79].mxu1  ;;  %v544_v31 = vld [vmem:[#allocation3 + $0x4] sm:$0x8]  ;;  %v6207_v45 = vld [vmem:[#allocation3 + $0x8] sm:$0xf]  ;;  %10367 = vmatprep.mubr.bf16.mxu1 %v13457_v9 }
 0x250   : > { %v12572_v25 = vadd.f32 %v12571_v47, %v12570_v19  ;;  %v15170_v16 = vadd.f32 %v12569_v35, %v5443_v57  ;;  %v545_v47 = vsel %vm13973_vm3, 0, %v544_v31 }
 0x251   : > { %v12461_v12 = vpop.f32.mrb[80].mxu0  ;;  %546 = vst [vmem:[#allocation3 + $0x4] sm:$0x8] %v545_v47 }
 0x252   : > { %v12462_v54 = vpop.f32.mrb[81].mxu0  ;;  %v15172_v49 = vadd.f32 %v12572_v25, %v5446_v13  ;;  %v6208_v25 = vld [vmem:[#allocation3 + $0xc] sm:$0xf] }
 0x253   : > { %v12463_v1 = vadd.f32 %v12462_v54, %v12461_v12  ;;  %v12464_v2 = vpop.f32.mrb[82].mxu0  ;;  %v6260_v12 = vshrl.u32 %v6207_v45, 16  ;;  %v6272_v56 = vshll.u32 %v6208_v25, 16 }
 0x254   : > { %v12573_v60 = vpop.f32.mrb[80].mxu1  ;;  %v12465_v36 = vpop.f32.mrb[83].mxu0 }
 0x255   : > { %v5451_v30 = vadd.f32 %v12463_v1, %v15118_v38  ;;  %v12466_v50 = vadd.f32 %v12465_v36, %v12464_v2  ;;  %v12574_v26 = vpop.f32.mrb[81].mxu1  ;;  %v13454_v38 = vld [vmem:[#allocation10 + $0x98] sm:$0xff]  }
 0x256   : > { %v12575_v44 = vadd.f32 %v12574_v26, %v12573_v60  ;;  %v12576_v27 = vpop.f32.mrb[82].mxu1  ;;  %v6269_v60 = vshrl.u32 %v6208_v25, 16  ;;  %12788 = vmatpush3.bf16.msra.mxu0 %v13454_v38  ;;  %v13460_v26 = vld [vmem:[#allocation10 + $0x140] sm:$0xff]   ;;  %v13459_v38 = vld [vmem:[#allocation10 + $0xa8] sm:$0xff]  }
 0x257   : > { %v5454_v5 = vadd.f32 %v12466_v50, %v15124_v10  ;;  %v12577_v22 = vpop.f32.mrb[83].mxu1  ;;  %v13455_v10 = vld [vmem:[#allocation10 + $0xe0] sm:$0xff]   ;;  %12893 = vmatprep.subr.bf16.mxu1 %v13460_v26 }
 0x258   : > { %v12578_v4 = vadd.f32 %v12577_v22, %v12576_v27  ;;  %v15176_v59 = vadd.f32 %v12575_v44, %v5451_v30  ;;  %v13456_v50 = vld [vmem:[#allocation10 + $0xa0] sm:$0xff]   ;;  %12789 = vmatprep.subr.bf16.mxu0 %v13455_v10  ;;  %v6262_v22 = vrot.slane %v6260_v12, 7  ;;  %v6271_v39 = vrot.slane %v6269_v60, 7  ;;  %v13462_v10 = vld [vmem:[#allocation10 + $0xf0] sm:$0xff]  }
 0x259   : > { %v12467_v14 = vpop.f32.mrb[84].mxu0  ;;  %v13464_v60 = vld [vmem:[#allocation10 + $0xb0] sm:$0xff]  }
 0x25a   : > { %v12468_v7 = vpop.f32.mrb[85].mxu0  ;;  %v15178_v63 = vadd.f32 %v12578_v4, %v5454_v5  ;;  %v13458_v5 = vld [vmem:[#allocation10 + $0xe8] sm:$0xff]   ;;  %12790 = vmatpush3.bf16.msra.mxu0 %v13456_v50 }
 0x25b   : > { %v12469_v6 = vadd.f32 %v12468_v7, %v12467_v14  ;;  %v12470_v57 = vpop.f32.mrb[86].mxu0  ;;  %v6263_v14 = vshll.u32 %v6207_v45, 16  ;;  %12791 = vmatprep.subr.bf16.mxu0 %v13458_v5 }
 0x25c   : > { %v12579_v35 = vpop.f32.mrb[84].mxu1  ;;  %v12471_v19 = vpop.f32.mrb[87].mxu0 }
 0x25d   : > { %v5459_v54 = vadd.f32 %v12469_v6, %v15128_v20  ;;  %v12472_v1 = vadd.f32 %v12471_v19, %v12470_v57  ;;  %v12580_v2 = vpop.f32.mrb[85].mxu1  ;;  %v6274_v57 = vor.u32 %v6272_v56, %v6271_v39  ;;  %v6206_v19 = vld [vmem:[#allocation3 + $0x4] sm:$0x8]  ;;  %v6265_v45 = vor.u32 %v6263_v14, %v6262_v22 }
 0x25e   : > { %v12581_v36 = vadd.f32 %v12580_v2, %v12579_v35  ;;  %v12582_v30 = vpop.f32.mrb[86].mxu1  ;;  %12792 = vmatpush3.bf16.msra.mxu0 %v13459_v38  ;;  %v13466_v38 = vld [vmem:[#allocation10 + $0xb8] sm:$0xff]  }
 0x25f   : > { %v5462_v44 = vadd.f32 %v12472_v1, %v15132_v58  ;;  %v12583_v27 = vpop.f32.mrb[87].mxu1  ;;  %v6267_v58 = vrot.slane %v6262_v22, 4  ;;  %12793 = vmatprep.subr.bf16.mxu0 %v13462_v10  ;;  %v598_v10 = vld [vmem:[#allocation3 + $0x10] sm:$0x1] }
 0x260   : > { %v12584_v62 = vadd.f32 %v12583_v27, %v12582_v30  ;;  %v15184_v4 = vadd.f32 %v12581_v36, %v5459_v54  ;;  %v6255_v54 = vshrl.u32 %v6206_v19, 16  ;;  %v13465_v27 = vld [vmem:[#allocation10 + $0xf8] sm:$0xff]  }
 0x261   : > { %v12473_v20 = vpop.f32.mrb[88].mxu0 }
 0x262   : > { %v12474_v15 = vpop.f32.mrb[89].mxu0  ;;  %v15186_v7 = vadd.f32 %v12584_v62, %v5462_v44  ;;  %v11764_v50 = vrot.slane %v6255_v54, 11  ;;  %v6275_v44 = vsel %vm14006_vm9, %v6267_v58, %v6274_v57  ;;  %v13463_v62 = vld [vmem:[#allocation10 + $0x100] sm:$0xff]   ;;  %12794 = vmatpush3.bf16.msra.mxu0 %v13464_v60 }
 0x263   : > { %v12475_v9 = vadd.f32 %v12474_v15, %v12473_v20  ;;  %v12476_v6 = vpop.f32.mrb[90].mxu0  ;;  %12795 = vmatprep.subr.bf16.mxu0 %v13465_v27  ;;  %v550_v54 = vld [vmem:[#allocation3 + $0x2c] sm:$0x8] }
 0x264   : > { %v12585_v31 = vpop.f32.mrb[88].mxu1  ;;  %v12477_v35 = vpop.f32.mrb[91].mxu0  ;;  %v6266_v22 = vsel %vm14006_vm9, %v11764_v50, %v6265_v45 }
 0x265   : > { %v5467_v47 = vadd.f32 %v12475_v9, %v15136_v61  ;;  %v12478_v25 = vadd.f32 %v12477_v35, %v12476_v6  ;;  %v12586_v12 = vpop.f32.mrb[89].mxu1  ;;  %v547_v61 = vld [vmem:[#allocation3 + $0x18] sm:$0x8]  ;;  %v11780_v14 = vcombine.low %v6266_v22, %v6275_v44 }
 0x266   : > { %v12587_v1 = vadd.f32 %v12586_v12, %v12585_v31  ;;  %v12588_v2 = vpop.f32.mrb[90].mxu1  ;;  %v548_v20 = vsel %vm13973_vm3, 0, %v547_v61  ;;  %12796 = vmatpush3.bf16.msra.mxu0 %v13466_v38  ;;  %v16874_v38 = vld [vmem:[#allocation39_spill] sm:$0xff] }
 0x267   : > { %v5470_v36 = vadd.f32 %v12478_v25, %v15140_v3  ;;  %v12589_v30 = vpop.f32.mrb[91].mxu1  ;;  %549 = vst [vmem:[#allocation3 + $0x18] sm:$0x8] %v548_v20  ;;  %10368 = vmatmul.mubr.bf16.vlgmr.msra.gmra.mrb[128].mxu1 %v11780_v14  ;;  %v13468_v20 = vld [vmem:[#allocation10 + $0x148] sm:$0xff]  }
 0x268   : > { %v12590_v5 = vadd.f32 %v12589_v30, %v12588_v2  ;;  %v15192_v39 = vadd.f32 %v12587_v1, %v5467_v47  ;;  %12894 = vmatpush3.bf16.msra.mxu1 %v13463_v62  ;;  %v599_v47 = vsel %vm13978_vm5, 0, %v598_v10  ;;  %v551_v2 = vsel %vm13973_vm3, 0, %v550_v54 }
 0x269   : > { %v12479_v56 = vpop.f32.mrb[92].mxu0  ;;  %600 = vst [vmem:[#allocation3 + $0x10] sm:$0x1] %v599_v47  ;;  %552 = vst [vmem:[#allocation3 + $0x2c] sm:$0x8] %v551_v2  ;;  %12895 = vmatprep.subr.bf16.mxu1 %v13468_v20 }
 0x26a   : > { %v12480_v3 = vpop.f32.mrb[93].mxu0  ;;  %v15198_v15 = vadd.f32 %v12590_v5, %v5470_v36  ;;  %v553_v2 = vld [vmem:[#allocation3 + $0x40] sm:$0x8] }
 0x26b   : > { %v12481_v9 = vadd.f32 %v12480_v3, %v12479_v56  ;;  %v12482_v6 = vpop.f32.mrb[94].mxu0  ;;  %v16873_v56 = vld [vmem:[#allocation38_spill] sm:$0xff] }
 0x26c   : > { %v12591_v58 = vpop.f32.mrb[92].mxu1  ;;  %v12483_v57 = vpop.f32.mrb[95].mxu0 }
 0x26d   : > { %v5475_v31 = vadd.f32 %v12481_v9, %v15144_v53  ;;  %v12484_v35 = vadd.f32 %v12483_v57, %v12482_v6  ;;  %v12592_v19 = vpop.f32.mrb[93].mxu1 }
 0x26e   : > { %v12593_v25 = vadd.f32 %v12592_v19, %v12591_v58  ;;  %v12594_v12 = vpop.f32.mrb[94].mxu1 }
 0x26f   : > { %v5478_v45 = vadd.f32 %v12484_v35, %v15148_v29  ;;  %v12595_v1 = vpop.f32.mrb[95].mxu1 }
 0x270   : > { %v12596_v60 = vadd.f32 %v12595_v1, %v12594_v12  ;;  %v15206_v36 = vadd.f32 %v12593_v25, %v5475_v31  ;;  %v601_v31 = vld [vmem:[#allocation3 + $0x24] sm:$0x1]  ;;  %v13470_v1 = vld [vmem:[#allocation10 + $0x108] sm:$0xff]  }
 0x271   : > { %v12485_v53 = vpop.f32.mrb[96].mxu0  ;;  %v602_v47 = vsel %vm13978_vm5, 0, %v601_v31  ;;  %12896 = vmatpush3.bf16.msra.mxu1 %v13470_v1 }
 0x272   : > { %v12486_v30 = vpop.f32.mrb[97].mxu0  ;;  %v15208_v50 = vadd.f32 %v12596_v60, %v5478_v45  ;;  %603 = vst [vmem:[#allocation3 + $0x24] sm:$0x1] %v602_v47 }
 0x273   : > { %v12487_v44 = vadd.f32 %v12486_v30, %v12485_v53  ;;  %v12488_v27 = vpop.f32.mrb[98].mxu0 }
 0x274   : > { %v12597_v5 = vpop.f32.mrb[96].mxu1  ;;  %v12489_v61 = vpop.f32.mrb[99].mxu0 }
 0x275   : > { %v5483_v22 = vadd.f32 %v12487_v44, %v16873_v56  ;;  %v12490_v62 = vadd.f32 %v12489_v61, %v12488_v27  ;;  %v12598_v29 = vpop.f32.mrb[97].mxu1  ;;  %v554_v44 = vsel %vm13973_vm3, 0, %v553_v2 }
 0x276   : > { %v12599_v3 = vadd.f32 %v12598_v29, %v12597_v5  ;;  %v12600_v14 = vpop.f32.mrb[98].mxu1  ;;  %555 = vst [vmem:[#allocation3 + $0x40] sm:$0x8] %v554_v44 }
 0x277   : > { %v5486_v9 = vadd.f32 %v12490_v62, %v16874_v38  ;;  %v12601_v6 = vpop.f32.mrb[99].mxu1 }
 0x278   : > { %v12602_v58 = vadd.f32 %v12601_v6, %v12600_v14  ;;  %v15212_v57 = vadd.f32 %v12599_v3, %v5483_v22 }
 0x279   : > { %v12491_v10 = vpop.f32.mrb[100].mxu0 }
 0x27a   : > { %v12492_v35 = vpop.f32.mrb[101].mxu0  ;;  %v15214_v19 = vadd.f32 %v12602_v58, %v5486_v9 }
 0x27b   : > { %v12493_v25 = vadd.f32 %v12492_v35, %v12491_v10  ;;  %v12494_v12 = vpop.f32.mrb[102].mxu0 }
 0x27c   : > { %v12603_v54 = vpop.f32.mrb[100].mxu1  ;;  %v12495_v45 = vpop.f32.mrb[103].mxu0 }
 0x27d   : > { %v5491_v60 = vadd.f32 %v12493_v25, %v14960_v43  ;;  %v12496_v53 = vadd.f32 %v12495_v45, %v12494_v12  ;;  %v12604_v30 = vpop.f32.mrb[101].mxu1  ;;  %v604_v25 = vld [vmem:[#allocation3 + $0x38] sm:$0x1] }
 0x27e   : > { %v12605_v27 = vadd.f32 %v12604_v30, %v12603_v54  ;;  %v12606_v5 = vpop.f32.mrb[102].mxu1  ;;  %v605_v1 = vsel %vm13978_vm5, 0, %v604_v25 }
 0x27f   : > { %v5494_v61 = vadd.f32 %v12496_v53, %v14972_v21  ;;  %v12607_v56 = vpop.f32.mrb[103].mxu1  ;;  %606 = vst [vmem:[#allocation3 + $0x38] sm:$0x1] %v605_v1 }
 0x280   : > { %v12608_v22 = vadd.f32 %v12607_v56, %v12606_v5  ;;  %v15222_v62 = vadd.f32 %v12605_v27, %v5491_v60 }
 0x281   : > { %v12497_v29 = vpop.f32.mrb[104].mxu0 }
 0x282   : > { %v12498_v20 = vpop.f32.mrb[105].mxu0  ;;  %v15224_v3 = vadd.f32 %v12608_v22, %v5494_v61 }
 0x283   : > { %v12499_v43 = vadd.f32 %v12498_v20, %v12497_v29  ;;  %v12500_v14 = vpop.f32.mrb[106].mxu0  ;;  %v556_v20 = vld [vmem:[#allocation3 + $0x54] sm:$0x8] }
 0x284   : > { %v12609_v38 = vpop.f32.mrb[104].mxu1  ;;  %v12501_v9 = vpop.f32.mrb[107].mxu0 }
 0x285   : > { %v5499_v6 = vadd.f32 %v12499_v43, %v14992_v55  ;;  %v12502_v58 = vadd.f32 %v12501_v9, %v12500_v14  ;;  %v12610_v10 = vpop.f32.mrb[105].mxu1 }
 0x286   : > { %v12611_v31 = vadd.f32 %v12610_v10, %v12609_v38  ;;  %v12612_v35 = vpop.f32.mrb[106].mxu1  ;;  %v557_v38 = vsel %vm13973_vm3, 0, %v556_v20 }
 0x287   : > { %v5502_v21 = vadd.f32 %v12502_v58, %v15000_v46  ;;  %v12613_v47 = vpop.f32.mrb[107].mxu1  ;;  %558 = vst [vmem:[#allocation3 + $0x54] sm:$0x8] %v557_v38  ;;  %v559_v38 = vld [vmem:[#allocation3 + $0x68] sm:$0x8] }
 0x288   : > { %v12614_v12 = vadd.f32 %v12613_v47, %v12612_v35  ;;  %v15228_v54 = vadd.f32 %v12611_v31, %v5499_v6 }
 0x289   : > { %v12503_v45 = vpop.f32.mrb[108].mxu0 }
 0x28a   : > { %v12504_v2 = vpop.f32.mrb[109].mxu0  ;;  %v15232_v60 = vadd.f32 %v12614_v12, %v5502_v21 }
 0x28b   : > { %v12505_v55 = vadd.f32 %v12504_v2, %v12503_v45  ;;  %v12506_v53 = vpop.f32.mrb[110].mxu0  ;;  %v13472_v2 = vld [vmem:[#allocation10 + $0x150] sm:$0xff]  }
 0x28c   : > { %v12615_v30 = vpop.f32.mrb[108].mxu1  ;;  %v12507_v44 = vpop.f32.mrb[111].mxu0  ;;  %12897 = vmatprep.subr.bf16.mxu1 %v13472_v2 }
 0x28d   : > { %v5507_v27 = vadd.f32 %v12505_v55, %v15026_v37  ;;  %v12508_v46 = vadd.f32 %v12507_v44, %v12506_v53  ;;  %v12616_v5 = vpop.f32.mrb[109].mxu1 }
 0x28e   : > { %v12617_v61 = vadd.f32 %v12616_v5, %v12615_v30  ;;  %v12618_v56 = vpop.f32.mrb[110].mxu1 }
 0x28f   : > { %v5510_v22 = vadd.f32 %v12508_v46, %v15036_v0  ;;  %v12619_v29 = vpop.f32.mrb[111].mxu1  ;;  %v607_v46 = vld [vmem:[#allocation3 + $0x4c] sm:$0x1] }
 0x290   : > { %v12620_v43 = vadd.f32 %v12619_v29, %v12618_v56  ;;  %v15236_v14 = vadd.f32 %v12617_v61, %v5507_v27 }
 0x291   : > { %v12509_v9 = vpop.f32.mrb[112].mxu0 }
 0x292   : > { %v12510_v6 = vpop.f32.mrb[113].mxu0  ;;  %v15240_v58 = vadd.f32 %v12620_v43, %v5510_v22  ;;  %v13474_v43 = vld [vmem:[#allocation10 + $0x110] sm:$0xff]  }
 0x293   : > { %v12511_v37 = vadd.f32 %v12510_v6, %v12509_v9  ;;  %v12512_v10 = vpop.f32.mrb[114].mxu0  ;;  %12898 = vmatpush3.bf16.msra.mxu1 %v13474_v43  ;;  %v610_v43 = vld [vmem:[#allocation3 + $0x60] sm:$0x1] }
 0x294   : > { %v12621_v31 = vpop.f32.mrb[112].mxu1  ;;  %v12513_v35 = vpop.f32.mrb[115].mxu0 }
 0x295   : > { %v5515_v21 = vadd.f32 %v12511_v37, %v15056_v41  ;;  %v12514_v0 = vadd.f32 %v12513_v35, %v12512_v10  ;;  %v12622_v47 = vpop.f32.mrb[113].mxu1  ;;  %v608_v41 = vsel %vm13978_vm5, 0, %v607_v46  ;;  %v560_v37 = vsel %vm13973_vm3, 0, %v559_v38 }
 0x296   : > { %v12623_v25 = vadd.f32 %v12622_v47, %v12621_v31  ;;  %v12624_v12 = vpop.f32.mrb[114].mxu1  ;;  %609 = vst [vmem:[#allocation3 + $0x4c] sm:$0x1] %v608_v41  ;;  %561 = vst [vmem:[#allocation3 + $0x68] sm:$0x8] %v560_v37 }
 0x297   : > { %v5518_v45 = vadd.f32 %v12514_v0, %v15064_v11  ;;  %v12625_v1 = vpop.f32.mrb[115].mxu1 }
 0x298   : > { %v12626_v55 = vadd.f32 %v12625_v1, %v12624_v12  ;;  %v15244_v53 = vadd.f32 %v12623_v25, %v5515_v21  ;;  %v6830_v21 = vld [vmem:[#allocation3 + $0x8] sm:$0xf] }
 0x299   : > { %v12515_v30 = vpop.f32.mrb[116].mxu0  ;;  %v6882_v1 = vshll.u32 %v6830_v21, 16 }
 0x29a   : > { %v12516_v44 = vpop.f32.mrb[117].mxu0  ;;  %v15246_v27 = vadd.f32 %v12626_v55, %v5518_v45  ;;  %v6879_v45 = vshrl.u32 %v6830_v21, 16 }
 0x29b   : > { %v12517_v5 = vadd.f32 %v12516_v44, %v12515_v30  ;;  %v12518_v61 = vpop.f32.mrb[118].mxu0 }
 0x29c   : > { %16875 = vst [vmem:[#allocation21_spill] sm:$0xff] %v15246_v27  ;;  %v12627_v56 = vpop.f32.mrb[116].mxu1  ;;  %v12519_v22 = vpop.f32.mrb[119].mxu0  ;;  %v15322_v27 = vld [vmem:[%s16786_s6] ss:$0 sm:$0xff] }
 0x29d   : > { %v5523_v11 = vadd.f32 %v12517_v5, %v15078_v17  ;;  %v12520_v29 = vadd.f32 %v12519_v22, %v12518_v61  ;;  %v12628_v20 = vpop.f32.mrb[117].mxu1  ;;  %v6831_v17 = vld [vmem:[#allocation3 + $0xc] sm:$0xf] }
 0x29e   : > { %v12629_v9 = vadd.f32 %v12628_v20, %v12627_v56  ;;  %v12630_v6 = vpop.f32.mrb[118].mxu1  ;;  %v6892_v22 = vshrl.u32 %v6831_v17, 16  ;;  %v6884_v20 = vrot.slane %v6882_v1, 5 }
 0x29f   : > { %v5526_v10 = vadd.f32 %v12520_v29, %v15084_v18  ;;  %v12631_v31 = vpop.f32.mrb[119].mxu1  ;;  %v6888_v18 = vshll.u32 %v6831_v17, 16  ;;  %v6881_v29 = vrot.slane %v6879_v45, 4  ;;  %v6832_v17 = vld [vmem:[#allocation3 + $0x10] sm:$0x1] }
 0x2a0   : > { %v12632_v35 = vadd.f32 %v12631_v31, %v12630_v6  ;;  %v15254_v0 = vadd.f32 %v12629_v9, %v5523_v11  ;;  %v6209_v6 = vld [vmem:[#allocation3 + $0x18] sm:$0x8] }
 0x2a1   : > { %v7342_v31 = vld [vmem:[#allocation3 + $0x18] sm:$0x8]  ;;  %v6885_v1 = vor.u32 %v6884_v20, %v6881_v29 }
 0x2a2   : > { %v12521_v47 = vpop.f32.mrb[120].mxu0  ;;  %v15256_v25 = vadd.f32 %v12632_v35, %v5526_v10  ;;  %v611_v10 = vsel %vm13978_vm5, 0, %v610_v43  ;;  %v6894_v35 = vrot.slane %v6892_v22, 4  ;;  %v7391_v45 = vshrl.u32 %v7342_v31, 16  ;;  %v7348_v31 = vld [vmem:[#allocation3 + $0x40] sm:$0x8] }
 0x2a3   : > { %v12522_v12 = vpop.f32.mrb[121].mxu0  ;;  %612 = vst [vmem:[#allocation3 + $0x60] sm:$0x1] %v611_v10  ;;  %v15275_v20 = vrot.slane %v6885_v1, 4 }
 0x2a4   : > { %16876 = vst [vmem:[#allocation22_spill] sm:$0xff] %v15256_v25  ;;  %v12523_v2 = vadd.f32 %v12522_v12, %v12521_v47  ;;  %v12524_v55 = vpop.f32.mrb[122].mxu0  ;;  %v12633_v30 = vpop.f32.mrb[120].mxu1  ;;  %v6277_v47 = vshrl.u32 %v6209_v6, 16  ;;  %v562_v12 = vld [vmem:[#allocation3 + $0x7c] sm:$0x8] }
 0x2a5   : > { %v12525_v44 = vpop.f32.mrb[123].mxu0  ;;  %v12634_v46 = vpop.f32.mrb[121].mxu1  ;;  %v15273_v29 = vrot.slane %v7391_v45, 11 }
 0x2a6   : > { %v5531_v5 = vadd.f32 %v12523_v2, %v15086_v23  ;;  %v12526_v61 = vadd.f32 %v12525_v44, %v12524_v55  ;;  %v12635_v41 = vadd.f32 %v12634_v46, %v12633_v30  ;;  %v12636_v56 = vpop.f32.mrb[122].mxu1  ;;  %v15264_v23 = vrot.slane %v6888_v18, 5  ;;  %v6212_v2 = vld [vmem:[#allocation3 + $0x2c] sm:$0x8]  ;;  %v6835_v30 = vld [vmem:[#allocation3 + $0x24] sm:$0x1] }
 0x2a7   : > { %v12637_v11 = vpop.f32.mrb[123].mxu1  ;;  %v563_v55 = vsel %vm13973_vm3, 0, %v562_v12  ;;  %v613_v12 = vld [vmem:[#allocation3 + $0x74] sm:$0x1] }
 0x2a8   : > { %v5534_v38 = vadd.f32 %v12526_v61, %v15090_v32  ;;  %v12638_v9 = vadd.f32 %v12637_v11, %v12636_v56  ;;  %v15260_v37 = vadd.f32 %v12635_v41, %v5531_v5  ;;  %v7345_v32 = vld [vmem:[#allocation3 + $0x2c] sm:$0x8]  ;;  %564 = vst [vmem:[#allocation3 + $0x7c] sm:$0x8] %v563_v55  ;;  %v6895_v46 = vor.u32 %v6894_v35, %v15264_v23 }
 0x2a9   : > { %v15271_v5 = vrot.slane %v6277_v47, 11  ;;  %v6898_v61 = vshll.u32 %v6832_v17, 16  ;;  %v7413_v41 = vshrl.u32 %v7345_v32, 16  ;;  %v6299_v56 = vshrl.u32 %v6212_v2, 16  ;;  %v6215_v32 = vld [vmem:[#allocation3 + $0x40] sm:$0x8] }
 0x2aa   : > { %16877 = vst [vmem:[#allocation23_spill] sm:$0xff] %v15260_v37  ;;  %v15266_v21 = vadd.f32 %v12638_v9, %v5534_v38  ;;  %v6922_v38 = vshll.u32 %v6835_v30, 16  ;;  %v13476_v9 = vld [vmem:[#allocation10 + $0x158] sm:$0xff]   ;;  %v614_v2 = vsel %vm13978_vm5, 0, %v613_v12  ;;  %v565_v12 = vld [vmem:[#allocation3 + $0x90] sm:$0x8] }
 0x2ab   : > { %12899 = vmatprep.subr.bf16.mxu1 %v13476_v9  ;;  %v15282_v1 = vrot.slane %v6898_v61, 5  ;;  %v15284_v30 = vrot.slane %v7413_v41, 11  ;;  %615 = vst [vmem:[#allocation3 + $0x74] sm:$0x1] %v614_v2  ;;  %v6321_v61 = vshrl.u32 %v6215_v32, 16  ;;  %v13478_v41 = vld [vmem:[#allocation10 + $0x118] sm:$0xff]  }
 0x2ac   : > { %16878 = vst [vmem:[#allocation24_spill] sm:$0xff] %v15266_v21  ;;  %v6841_v2 = vld [vmem:[#allocation3 + $0x4c] sm:$0x1]  ;;  %v6844_v32 = vld [vmem:[#allocation3 + $0x60] sm:$0x1]  ;;  %12900 = vmatpush3.bf16.msra.mxu1 %v13478_v41 }
 0x2ae   : > { %v12527_v44 = vpop.f32.mrb[124].mxu0 }
 0x2af   : > { %v12528_v18 = vpop.f32.mrb[125].mxu0 }
 0x2b0   : > { %v12529_v22 = vadd.f32 %v12528_v18, %v12527_v44  ;;  %v12530_v11 = vpop.f32.mrb[126].mxu0  ;;  %v15280_v44 = vrot.slane %v6895_v46, 4  ;;  %v15286_v18 = vrot.slane %v6299_v56, 11  ;;  %v15294_v46 = vld [vmem:[%s16784_s4] ss:$0 sm:$0xff]  ;;  %v15296_v56 = vrot.slane %v6922_v38, 5 }
 0x2b1   : > { %v12639_v43 = vpop.f32.mrb[124].mxu1  ;;  %v12531_v6 = vpop.f32.mrb[127].mxu0 }
 0x2b2   : > { %v12640_v10 = vpop.f32.mrb[125].mxu1  ;;  %v5539_v35 = vadd.f32 %v12529_v22, %v15150_v28  ;;  %v12532_v47 = vadd.f32 %v12531_v6, %v12530_v11  ;;  %v7435_v11 = vshrl.u32 %v7348_v31, 16  ;;  %v7351_v6 = vld [vmem:[#allocation3 + $0x54] sm:$0x8]  ;;  %v566_v31 = vsel %vm13973_vm3, 0, %v565_v12 }
 0x2b3   : > { %v12641_v55 = vadd.f32 %v12640_v10, %v12639_v43  ;;  %v12642_v17 = vpop.f32.mrb[126].mxu1  ;;  %v6838_v43 = vld [vmem:[#allocation3 + $0x38] sm:$0x1]  ;;  %v6218_v10 = vld [vmem:[#allocation3 + $0x54] sm:$0x8] }
 0x2b4   : > { %v12643_v45 = vpop.f32.mrb[127].mxu1  ;;  %v5542_v28 = vadd.f32 %v12532_v47, %v15152_v48  ;;  %v7354_v48 = vld [vmem:[#allocation3 + $0x68] sm:$0x8]  ;;  %567 = vst [vmem:[#allocation3 + $0x90] sm:$0x8] %v566_v31 }
 0x2b5   : > { %v12644_v22 = vadd.f32 %v12643_v45, %v12642_v17  ;;  %v15289_v9 = vadd.f32 %v12641_v55, %v5539_v35  ;;  %v6946_v55 = vshll.u32 %v6838_v43, 16  ;;  %v6221_v17 = vld [vmem:[#allocation3 + $0x68] sm:$0x8]  ;;  %v15312_v12 = vld [vmem:[%s16785_s5] ss:$0 sm:$0xff]  ;;  %v15315_v43 = vrot.slane %v6321_v61, 11 }
 0x2b6   : > { %v7479_v41 = vshrl.u32 %v7354_v48, 16 }
 0x2b7   : > { %16879 = vst [vmem:[#allocation25_spill] sm:$0xff] %v15289_v9  ;;  %v15298_v21 = vadd.f32 %v12644_v22, %v5542_v28  ;;  %v13159_v35 = vpop.f32.mrb[128].mxu0  ;;  %v15307_v28 = vrot.slane %v7435_v11, 11  ;;  %v7457_v22 = vshrl.u32 %v7351_v6, 16  ;;  %16881 = vst [vmem:[#allocation27_spill] sm:$0xff] %v15315_v43  ;;  %v6970_v9 = vshll.u32 %v6841_v2, 16 }
 0x2b8   : > { %v5749_v38 = vadd.f32 %v13159_v35, %v15158_v8  ;;  %v5740_v45 = vpop.f32.mrb[129].mxu0  ;;  %v6365_v35 = vshrl.u32 %v6221_v17, 16  ;;  %v6994_v6 = vshll.u32 %v6844_v32, 16 }
 0x2b9   : > { %16880 = vst [vmem:[#allocation26_spill] sm:$0xff] %v15298_v21  ;;  %v6343_v21 = vshrl.u32 %v6218_v10, 16  ;;  %v5741_v37 = vadd.f32 %v5740_v45, %v15154_v42  ;;  %v13160_v47 = vpop.f32.mrb[130].mxu0  ;;  %v616_v10 = vld [vmem:[#allocation3 + $0x88] sm:$0x1]  ;;  %v15326_v45 = vrot.slane %v6946_v55, 5 }
 0x2ba   : > { %v5875_v31 = vmul.f32 %v15294_v46, %v5749_v38  ;;  %v5752_v8 = vadd.f32 %v13160_v47, %v15160_v34  ;;  %v5743_v11 = vpop.f32.mrb[131].mxu0  ;;  %v617_v2 = vsel %vm13978_vm5, 0, %v616_v10  ;;  %v15332_v47 = vrot.slane %v7457_v22, 11  ;;  %v7357_v55 = vld [vmem:[#allocation3 + $0x7c] sm:$0x8] }
 0x2bb   : > { %v5873_v42 = vmul.f32 %v15294_v46, %v5741_v37  ;;  %v5744_v61 = vadd.f32 %v5743_v11, %v15156_v52  ;;  %16882 = vst [vmem:[#allocation28_spill] sm:$0xff] %v15326_v45  ;;  %v15334_v17 = vrot.slane %v6343_v21, 11  ;;  %618 = vst [vmem:[#allocation3 + $0x88] sm:$0x1] %v617_v2  ;;  %v15338_v38 = vrot.slane %v6970_v9, 5 }
 0x2bc   : > { %v5913_v34 = vadd.f32 %v15312_v12, %v5875_v31  ;;  %v5876_v48 = vmul.f32 %v15294_v46, %v5752_v8  ;;  %16883 = vst [vmem:[#allocation29_spill] sm:$0xff] %v15332_v47  ;;  %v15340_v52 = vrot.slane %v7479_v41, 11  ;;  %v6224_v11 = vld [vmem:[#allocation3 + $0x7c] sm:$0x8]  ;;  %v15344_v8 = vrot.slane %v6365_v35, 11 }
 0x2bd   : > { %16884 = vst [vmem:[#allocation30_spill] sm:$0xff] %v15334_v17  ;;  %v5911_v32 = vadd.f32 %v15312_v12, %v5873_v42  ;;  %v5874_v37 = vmul.f32 %v15294_v46, %v5744_v61  ;;  %16885 = vst [vmem:[#allocation31_spill] sm:$0xff] %v15338_v38  ;;  %v15346_v22 = vrot.slane %v6994_v6, 5  ;;  %v7501_v61 = vshrl.u32 %v7357_v55, 16  ;;  %v568_v47 = vld [vmem:[#allocation3 + $0xa4] sm:$0x8] }
 0x2be   : > { %16886 = vst [vmem:[#allocation20_spill] sm:$0xff] %v15340_v52  ;;  %v5983_v10 = vmul.f32 %v15322_v27, %v5913_v34  ;;  %v5914_v31 = vadd.f32 %v15312_v12, %v5876_v48  ;;  %16887 = vst [vmem:[#allocation32_spill] sm:$0xff] %v15344_v8  ;;  %vm5945_vm11 = vcmp.ge.f32.partialorder %v5913_v34, 0.0  ;;  %v6387_v2 = vshrl.u32 %v6224_v11, 16  ;;  %v13480_v52 = vld [vmem:[#allocation10 + $0x1c0] sm:$0xff]  }
 0x2bf   : > { %16888 = vst [vmem:[#allocation33_spill] sm:$0xff] %v15346_v22  ;;  %vm5943_vm12 = vcmp.ge.f32.partialorder %v5911_v32, 0.0  ;;  %v5981_v21 = vmul.f32 %v15322_v27, %v5911_v32  ;;  %v5912_v42 = vadd.f32 %v15312_v12, %v5874_v37  ;;  %13005 = vmatprep.subr.bf16.mxu0 %v13480_v52  ;;  %v13482_v52 = vld [vmem:[#allocation10 + $0x160] sm:$0xff]  }
 0x2c0   : > { %vm5946_vm13 = vcmp.ge.f32.partialorder %v5914_v31, 0.0  ;;  %v5984_v9 = vmul.f32 %v15322_v27, %v5914_v31  ;;  %v6015_v22 = vsel %vm5945_vm11, %v5913_v34, %v5983_v10  ;;  %v15360_v10 = vrot.slane %v7501_v61, 11  ;;  %12901 = vmatprep.subr.bf16.mxu1 %v13482_v52 }
 0x2c1   : > { %v13163_v41 = vpop.f32.mrb[132].mxu0  ;;  %v6013_v38 = vsel %vm5943_vm12, %v5911_v32, %v5981_v21  ;;  %vm5944_vm14 = vcmp.ge.f32.partialorder %v5912_v42, 0.0  ;;  %v5982_v35 = vmul.f32 %v15322_v27, %v5912_v42  ;;  %v15356_v21 = vld [vmem:[#allocation3 + $0x74] sm:$0x1] }
 0x2c2   : > { %v5765_v6 = vadd.f32 %v13163_v41, %v15170_v16  ;;  %v5756_v48 = vpop.f32.mrb[133].mxu0  ;;  %v12068_v8 = vpack.c.bf16 %v6013_v38, %v6013_v38  ;;  %v6016_v17 = vsel %vm5946_vm13, %v5914_v31, %v5984_v9 }
 0x2c3   : > { %v5757_v45 = vadd.f32 %v5756_v48, %v15164_v51  ;;  %v13164_v37 = vpop.f32.mrb[134].mxu0  ;;  %v12144_v25 = vpack.c.bf16 %v6016_v17, %v6015_v22  ;;  %v6014_v43 = vsel %vm5944_vm14, %v5912_v42, %v5982_v35  ;;  %v15362_v51 = vld [vmem:[#allocation3 + $0x90] sm:$0x8]  ;;  %v7018_v42 = vshll.u32 %v15356_v21, 16 }
 0x2c4   : > { %v5879_v55 = vmul.f32 %v15294_v46, %v5765_v6  ;;  %v5768_v32 = vadd.f32 %v13164_v37, %v15172_v49  ;;  %v5759_v11 = vpop.f32.mrb[135].mxu0  ;;  %6174 = vst [vmem:[#allocation3 + $0x1c] sm:$0xf] %v12068_v8  ;;  %v12069_v16 = vpack.c.bf16 %v6014_v43, %v6014_v43  ;;  %v15366_v49 = vrot.slane %v6387_v2, 11  ;;  %v15368_v22 = vld [vmem:[#allocation3 + $0x90] sm:$0x8] }
 0x2c5   : > { %v5877_v34 = vmul.f32 %v15294_v46, %v5757_v45  ;;  %v5760_v38 = vadd.f32 %v5759_v11, %v15166_v33  ;;  %12189 = vst [vmem:[#allocation3 + $0x30] sm:$0xff] %v12144_v25   ;;  %v569_v43 = vsel %vm13973_vm3, 0, %v568_v47  ;;  %v619_v45 = vld [vmem:[#allocation3 + $0x9c] sm:$0x1]  ;;  %v7523_v47 = vshrl.u32 %v15362_v51, 16 }
 0x2c6   : > { %v5917_v17 = vadd.f32 %v15312_v12, %v5879_v55  ;;  %v5880_v31 = vmul.f32 %v15294_v46, %v5768_v32  ;;  %6175 = vst [vmem:[#allocation3 + $0x20] sm:$0xf] %v12069_v16  ;;  %570 = vst [vmem:[#allocation3 + $0xa4] sm:$0x8] %v569_v43  ;;  %v620_v25 = vsel %vm13978_vm5, 0, %v619_v45  ;;  %v6409_v35 = vshrl.u32 %v15368_v22, 16 }
 0x2c7   : > { %v5915_v33 = vadd.f32 %v15312_v12, %v5877_v34  ;;  %v5878_v8 = vmul.f32 %v15294_v46, %v5760_v38  ;;  %621 = vst [vmem:[#allocation3 + $0x9c] sm:$0x1] %v620_v25  ;;  %v6901_v37 = vsel %vm14031_vm10, %v15280_v44, %v15282_v1  ;;  %v13484_v55 = vld [vmem:[#allocation10 + $0x120] sm:$0xff]   ;;  %v571_v32 = vld [vmem:[#allocation3 + $0xb8] sm:$0x8] }
 0x2c8   : > { %vm5949_vm15 = vcmp.ge.f32.partialorder %v5917_v17, 0.0  ;;  %v5987_v9 = vmul.f32 %v15322_v27, %v5917_v17  ;;  %v5918_v41 = vadd.f32 %v15312_v12, %v5880_v31  ;;  %v622_v11 = vld [vmem:[#allocation3 + $0xb0] sm:$0x1]  ;;  %v572_v38 = vsel %vm13973_vm3, 0, %v571_v32  ;;  %12902 = vmatpush3.bf16.msra.mxu1 %v13484_v55 }
 0x2c9   : > { %vm5947_vm0 = vcmp.ge.f32.partialorder %v5915_v33, 0.0  ;;  %v5985_v61 = vmul.f32 %v15322_v27, %v5915_v33  ;;  %v5916_v2 = vadd.f32 %v15312_v12, %v5878_v8  ;;  %573 = vst [vmem:[#allocation3 + $0xb8] sm:$0x8] %v572_v38  ;;  %v623_v44 = vsel %vm13978_vm5, 0, %v622_v11 }
 0x2ca   : > { %v6019_v6 = vsel %vm5949_vm15, %v5917_v17, %v5987_v9  ;;  %vm5950_vm1 = vcmp.ge.f32.partialorder %v5918_v41, 0.0  ;;  %v5988_v48 = vmul.f32 %v15322_v27, %v5918_v41  ;;  %624 = vst [vmem:[#allocation3 + $0xb0] sm:$0x1] %v623_v44  ;;  %v15406_v32 = vrot.slane %v7018_v42, 5 }
 0x2cb   : > { %v6017_v21 = vsel %vm5947_vm0, %v5915_v33, %v5985_v61  ;;  %vm5948_vm2 = vcmp.ge.f32.partialorder %v5916_v2, 0.0  ;;  %v5986_v16 = vmul.f32 %v15322_v27, %v5916_v2  ;;  %v13167_v34 = vpop.f32.mrb[136].mxu0  ;;  %v6210_v22 = vld [vmem:[#allocation3 + $0x1c] sm:$0xf]  ;;  %v15408_v11 = vrot.slane %v7523_v47, 11 }
 0x2cc   : > { %v12072_v51 = vpack.c.bf16 %v6017_v21, %v6017_v21  ;;  %v6020_v52 = vsel %vm5950_vm1, %v5918_v41, %v5988_v48  ;;  %v5781_v17 = vadd.f32 %v13167_v34, %v15184_v4  ;;  %v5772_v31 = vpop.f32.mrb[137].mxu0  ;;  %v6282_v8 = vshrl.u32 %v6210_v22, 16 }
 0x2cd   : > { %v12149_v1 = vpack.c.bf16 %v6020_v52, %v6019_v6  ;;  %v6018_v43 = vsel %vm5948_vm2, %v5916_v2, %v5986_v16  ;;  %v5773_v45 = vadd.f32 %v5772_v31, %v15176_v59  ;;  %v13168_v33 = vpop.f32.mrb[138].mxu0  ;;  %v13461_v61 = vld [vmem:[#allocation3 + $0x1c] sm:$0xff]   ;;  %v16889_v6 = vsel %vm14031_vm10, %v15275_v20, %v15264_v23  ;;  %v6850_v23 = vld [vmem:[#allocation3 + $0x88] sm:$0x1] }
 0x2ce   : > { %6178 = vst [vmem:[#allocation3 + $0x44] sm:$0xf] %v12072_v51  ;;  %v12073_v25 = vpack.c.bf16 %v6018_v43, %v6018_v43  ;;  %v5883_v9 = vmul.f32 %v15294_v46, %v5781_v17  ;;  %v5784_v4 = vadd.f32 %v13168_v33, %v15186_v7  ;;  %v5775_v41 = vpop.f32.mrb[139].mxu0  ;;  %v6211_v48 = vld [vmem:[#allocation3 + $0x20] sm:$0xf]  ;;  %v15402_v2 = vcombine.low %v16889_v6, %v6901_v37 }
 0x2cf   : > { %12190 = vst [vmem:[#allocation3 + $0x58] sm:$0xff] %v12149_v1   ;;  %v5881_v59 = vmul.f32 %v15294_v46, %v5773_v45  ;;  %v5776_v55 = vadd.f32 %v5775_v41, %v15178_v63  ;;  %10375 = vmatprep.mubr.bf16.mxu1 %v13461_v61  ;;  %v6284_v16 = vrot.slane %v6282_v8, 7  ;;  %v6291_v34 = vshrl.u32 %v6211_v48, 16 }
 0x2d0   : > { %6179 = vst [vmem:[#allocation3 + $0x48] sm:$0xf] %v12073_v25  ;;  %v5921_v7 = vadd.f32 %v15312_v12, %v5883_v9  ;;  %v5884_v21 = vmul.f32 %v15294_v46, %v5784_v4  ;;  %v6285_v38 = vshll.u32 %v6210_v22, 16  ;;  %v15414_v51 = vrot.slane %v6409_v35, 11  ;;  %v7343_v25 = vld [vmem:[#allocation3 + $0x1c] sm:$0xf] }
 0x2d1   : > { %v5919_v20 = vadd.f32 %v15312_v12, %v5881_v59  ;;  %v5882_v37 = vmul.f32 %v15294_v46, %v5776_v55  ;;  %v6293_v47 = vrot.slane %v6291_v34, 7  ;;  %v7042_v31 = vshll.u32 %v6850_v23, 16 }
 0x2d2   : > { %vm5953_vm4 = vcmp.ge.f32.partialorder %v5921_v7, 0.0  ;;  %v5991_v63 = vmul.f32 %v15322_v27, %v5921_v7  ;;  %v5922_v42 = vadd.f32 %v15312_v12, %v5884_v21  ;;  %v6287_v1 = vor.u32 %v6285_v38, %v6284_v16 }
 0x2d3   : > { %vm5951_vm6 = vcmp.ge.f32.partialorder %v5919_v20, 0.0  ;;  %v5989_v52 = vmul.f32 %v15322_v27, %v5919_v20  ;;  %v5920_v17 = vadd.f32 %v15312_v12, %v5882_v37  ;;  %v6294_v43 = vshll.u32 %v6211_v48, 16 }
 0x2d4   : > { %vm5954_vm7 = vcmp.ge.f32.partialorder %v5922_v42, 0.0  ;;  %v5992_v44 = vmul.f32 %v15322_v27, %v5922_v42  ;;  %v6023_v35 = vsel %vm5953_vm4, %v5921_v7, %v5991_v63  ;;  %v13171_v8 = vpop.f32.mrb[140].mxu0  ;;  %v6288_v23 = vsel %vm14006_vm9, %v15271_v5, %v6287_v1 }
 0x2d5   : > { %v15421_v22 = vld [vmem:[#allocation3 + $0x44] sm:$0xf]  ;;  %v6021_v45 = vsel %vm5951_vm6, %v5919_v20, %v5989_v52  ;;  %vm5952_vm8 = vcmp.ge.f32.partialorder %v5920_v17, 0.0  ;;  %v5990_v33 = vmul.f32 %v15322_v27, %v5920_v17  ;;  %v5788_v61 = vpop.f32.mrb[141].mxu0  ;;  %v6296_v6 = vor.u32 %v6294_v43, %v6293_v47 }
 0x2d6   : > { %v9176_v9 = vshrl.u32 %v15421_v22, 16  ;;  %v12076_v4 = vpack.c.bf16 %v6021_v45, %v6021_v45  ;;  %v6024_v41 = vsel %vm5954_vm7, %v5922_v42, %v5992_v44  ;;  %v5797_v21 = vadd.f32 %v13171_v8, %v15206_v36  ;;  %v13172_v34 = vpop.f32.mrb[142].mxu0  ;;  %v13467_v8 = vld [vmem:[#allocation3 + $0x30] sm:$0xff]  }
 0x2d7   : > { %v12154_v59 = vpack.c.bf16 %v6024_v41, %v6023_v35  ;;  %v6022_v55 = vsel %vm5952_vm8, %v5920_v17, %v5990_v33  ;;  %v5789_v48 = vadd.f32 %v5788_v61, %v15192_v39  ;;  %v5791_v7 = vpop.f32.mrb[143].mxu0  ;;  %v6289_v20 = vrot.slane %v6284_v16, 4  ;;  %v7344_v39 = vld [vmem:[#allocation3 + $0x20] sm:$0xf] }
 0x2d8   : > { %6182 = vst [vmem:[#allocation3 + $0x6c] sm:$0xf] %v12076_v4  ;;  %v7396_v37 = vshrl.u32 %v7343_v25, 16  ;;  %v15430_v38 = vrot.slane %v7042_v31, 5  ;;  %v12077_v63 = vpack.c.bf16 %v6022_v55, %v6022_v55  ;;  %v5887_v42 = vmul.f32 %v15294_v46, %v5797_v21 }
 0x2d9   : > { %12191 = vst [vmem:[#allocation3 + $0x80] sm:$0xff] %v12154_v59   ;;  %v5885_v47 = vmul.f32 %v15294_v46, %v5789_v48  ;;  %v5800_v36 = vadd.f32 %v13172_v34, %v15208_v50  ;;  %v15435_v52 = vrot.slane %v9176_v9, 4  ;;  %v9179_v17 = vshll.u32 %v15421_v22, 16  ;;  %v7346_v59 = vld [vmem:[#allocation3 + $0x30] sm:$0xf] }
 0x2da   : > { %v5792_v44 = vadd.f32 %v5791_v7, %v15198_v15  ;;  %v6297_v5 = vsel %vm14006_vm9, %v6289_v20, %v6296_v6  ;;  %6183 = vst [vmem:[#allocation3 + $0x70] sm:$0xf] %v12077_v63  ;;  %v5925_v16 = vadd.f32 %v15312_v12, %v5887_v42  ;;  %v7398_v35 = vrot.slane %v7396_v37, 7  ;;  %v13488_v7 = vld [vmem:[#allocation10 + $0x168] sm:$0xff]  }
 0x2db   : > { %16890 = vst [vmem:[#allocation34_spill] sm:$0xff] %v15435_v52  ;;  %v5923_v31 = vadd.f32 %v15312_v12, %v5885_v47  ;;  %v5888_v1 = vmul.f32 %v15294_v46, %v5800_v36  ;;  %v11781_v43 = vcombine.low %v6288_v23, %v6297_v5  ;;  %v7399_v45 = vshll.u32 %v7343_v25, 16  ;;  %12903 = vmatprep.subr.bf16.mxu1 %v13488_v7 }
 0x2dc   : > { %v5886_v50 = vmul.f32 %v15294_v46, %v5792_v44  ;;  %v7405_v33 = vshrl.u32 %v7344_v39, 16  ;;  %vm5957_vm11 = vcmp.ge.f32.partialorder %v5925_v16, 0.0  ;;  %v5995_v15 = vmul.f32 %v15322_v27, %v5925_v16 }
 0x2dd   : > { %vm5955_vm12 = vcmp.ge.f32.partialorder %v5923_v31, 0.0  ;;  %v5993_v9 = vmul.f32 %v15322_v27, %v5923_v31  ;;  %10376 = vmatmul.mubr.bf16.gmra.mrb[132].mxu1 %v11781_v43  ;;  %v5926_v4 = vadd.f32 %v15312_v12, %v5888_v1  ;;  %v7401_v61 = vor.u32 %v7399_v45, %v7398_v35 }
 0x2de   : > { %v5924_v41 = vadd.f32 %v15312_v12, %v5886_v50  ;;  %v7403_v6 = vrot.slane %v7398_v35, 4  ;;  %10383 = vmatprep.mubr.bf16.mxu1 %v13467_v8  ;;  %v6027_v55 = vsel %vm5957_vm11, %v5925_v16, %v5995_v15  ;;  %v13175_v25 = vpop.f32.mrb[144].mxu0  ;;  %v7407_v48 = vrot.slane %v7405_v33, 7 }
 0x2df   : > { %v6025_v21 = vsel %vm5955_vm12, %v5923_v31, %v5993_v9  ;;  %v7408_v34 = vshll.u32 %v7344_v39, 16  ;;  %vm5958_vm13 = vcmp.ge.f32.partialorder %v5926_v4, 0.0  ;;  %v5996_v20 = vmul.f32 %v15322_v27, %v5926_v4  ;;  %v5804_v37 = vpop.f32.mrb[145].mxu0  ;;  %v7347_v31 = vld [vmem:[#allocation3 + $0x34] sm:$0xf] }
 0x2e0   : > { %v12080_v23 = vpack.c.bf16 %v6025_v21, %v6025_v21  ;;  %vm5956_vm14 = vcmp.ge.f32.partialorder %v5924_v41, 0.0  ;;  %v5994_v63 = vmul.f32 %v15322_v27, %v5924_v41  ;;  %v5813_v42 = vadd.f32 %v13175_v25, %v15222_v62  ;;  %v13176_v44 = vpop.f32.mrb[146].mxu0 }
 0x2e1   : > { %v7402_v47 = vsel %vm14006_vm9, %v15273_v29, %v7401_v61  ;;  %v7410_v36 = vor.u32 %v7408_v34, %v7407_v48  ;;  %v6028_v39 = vsel %vm5958_vm13, %v5926_v4, %v5996_v20  ;;  %v5805_v5 = vadd.f32 %v5804_v37, %v15212_v57  ;;  %v5807_v43 = vpop.f32.mrb[147].mxu0  ;;  %v13481_v57 = vld [vmem:[#allocation10 + $0x180] sm:$0xff]  }
 0x2e2   : > { %6186 = vst [vmem:[#allocation3 + $0x94] sm:$0xf] %v12080_v23  ;;  %v5816_v16 = vadd.f32 %v13176_v44, %v15224_v3  ;;  %v7418_v1 = vshrl.u32 %v7346_v59, 16  ;;  %v12159_v50 = vpack.c.bf16 %v6028_v39, %v6027_v55  ;;  %v6026_v35 = vsel %vm5956_vm14, %v5924_v41, %v5994_v63  ;;  %v13486_v55 = vld [vmem:[#allocation10 + $0x1c8] sm:$0xff]  }
 0x2e3   : > { %v5891_v62 = vmul.f32 %v15294_v46, %v5813_v42  ;;  %v7411_v29 = vsel %vm14006_vm9, %v7403_v6, %v7410_v36  ;;  %v12081_v45 = vpack.c.bf16 %v6026_v35, %v6026_v35  ;;  %v5889_v8 = vmul.f32 %v15294_v46, %v5805_v5  ;;  %v13490_v41 = vld [vmem:[#allocation10 + $0x128] sm:$0xff]  }
 0x2e4   : > { %v11844_v33 = vcombine.low %v7402_v47, %v7411_v29  ;;  %v5892_v15 = vmul.f32 %v15294_v46, %v5816_v16  ;;  %12192 = vst [vmem:[#allocation3 + $0xa8] sm:$0xff] %v12159_v50   ;;  %v7420_v9 = vrot.slane %v7418_v1, 7  ;;  %v7421_v4 = vshll.u32 %v7346_v59, 16  ;;  %v6213_v59 = vld [vmem:[#allocation3 + $0x30] sm:$0xf]  ;;  %12904 = vmatpush3.bf16.msra.mxu1 %v13490_v41 }
 0x2e5   : > { %v5929_v3 = vadd.f32 %v15312_v12, %v5891_v62  ;;  %v7427_v61 = vshrl.u32 %v7347_v31, 16  ;;  %6187 = vst [vmem:[#allocation3 + $0x98] sm:$0xf] %v12081_v45  ;;  %v5927_v21 = vadd.f32 %v15312_v12, %v5889_v8  ;;  %v7430_v25 = vshll.u32 %v7347_v31, 16  ;;  %v13487_v63 = vld [vmem:[#allocation10 + $0x188] sm:$0xff]  }
 0x2e6   : > { %10528 = vmatprep.mubr.bf16.mxu0 %v11844_v33  ;;  %v5930_v6 = vadd.f32 %v15312_v12, %v5892_v15  ;;  %v5808_v48 = vadd.f32 %v5807_v43, %v15214_v19  ;;  %v7423_v7 = vor.u32 %v7421_v4, %v7420_v9  ;;  %v7425_v23 = vrot.slane %v7420_v9, 4  ;;  %v6214_v44 = vld [vmem:[#allocation3 + $0x34] sm:$0xf]  ;;  %v6833_v29 = vld [vmem:[#allocation3 + $0x1c] sm:$0xf] }
 0x2e7   : > { %vm5961_vm15 = vcmp.ge.f32.partialorder %v5929_v3, 0.0  ;;  %v5999_v34 = vmul.f32 %v15322_v27, %v5929_v3  ;;  %10529 = vmatmul.mubr.bf16.vlgmr.msra.gmra.mrb[160].mxu0 %v15402_v2  ;;  %vm5959_vm0 = vcmp.ge.f32.partialorder %v5927_v21, 0.0  ;;  %v5997_v20 = vmul.f32 %v15322_v27, %v5927_v21 }
 0x2e8   : > { %vm5962_vm1 = vcmp.ge.f32.partialorder %v5930_v6, 0.0  ;;  %v6000_v37 = vmul.f32 %v15322_v27, %v5930_v6  ;;  %13006 = vmatpush3.bf16.msra.mxu0 %v13481_v57  ;;  %v7424_v19 = vsel %vm14006_vm9, %v15284_v30, %v7423_v7  ;;  %v7429_v47 = vrot.slane %v7427_v61, 7  ;;  %v13179_v36 = vpop.f32.mrb[148].mxu0 }
 0x2e9   : > { %v6031_v42 = vsel %vm5961_vm15, %v5929_v3, %v5999_v34  ;;  %v5890_v2 = vmul.f32 %v15294_v46, %v5808_v48  ;;  %13007 = vmatprep.subr.bf16.mxu0 %v13486_v55  ;;  %v6029_v39 = vsel %vm5959_vm0, %v5927_v21, %v5997_v20  ;;  %v5829_v16 = vadd.f32 %v13179_v36, %v15236_v14  ;;  %v5820_v1 = vpop.f32.mrb[149].mxu0  ;;  %v6834_v48 = vld [vmem:[#allocation3 + $0x20] sm:$0xf]  ;;  %v7349_v20 = vld [vmem:[#allocation3 + $0x44] sm:$0xf] }
 0x2ea   : > { %v6032_v5 = vsel %vm5962_vm1, %v5930_v6, %v6000_v37  ;;  %v6304_v31 = vshrl.u32 %v6213_v59, 16  ;;  %v12084_v43 = vpack.c.bf16 %v6029_v39, %v6029_v39  ;;  %v7432_v35 = vor.u32 %v7430_v25, %v7429_v47  ;;  %v13180_v45 = vpop.f32.mrb[150].mxu0 }
 0x2eb   : > { %v12164_v50 = vpack.c.bf16 %v6032_v5, %v6031_v42  ;;  %v5928_v62 = vadd.f32 %v15312_v12, %v5890_v2  ;;  %v5895_v30 = vmul.f32 %v15294_v46, %v5829_v16  ;;  %v6307_v8 = vshll.u32 %v6213_v59, 16  ;;  %v15478_v57 = vpop.f32.mrb[151].mxu0 }
 0x2ec   : > { %v6306_v33 = vrot.slane %v6304_v31, 7  ;;  %v6313_v15 = vshrl.u32 %v6214_v44, 16  ;;  %13008 = vmatpush3.bf16.msra.mxu0 %v13487_v63  ;;  %6190 = vst [vmem:[#allocation3 + $0xbc] sm:$0xf] %v12084_v43  ;;  %v7433_v14 = vsel %vm14006_vm9, %v7425_v23, %v7432_v35  ;;  %v6316_v9 = vshll.u32 %v6214_v44, 16 }
 0x2ed   : > { %12193 = vst [vmem:[#allocation3 + $0xd0] sm:$0xff] %v12164_v50   ;;  %vm5960_vm2 = vcmp.ge.f32.partialorder %v5928_v62, 0.0  ;;  %v5998_v3 = vmul.f32 %v15322_v27, %v5928_v62  ;;  %v11845_v4 = vcombine.low %v7424_v19, %v7433_v14  ;;  %v5933_v61 = vadd.f32 %v15312_v12, %v5895_v30 }
 0x2ee   : > { %v6309_v55 = vor.u32 %v6307_v8, %v6306_v33  ;;  %v6311_v41 = vrot.slane %v6306_v33, 4  ;;  %v6315_v6 = vrot.slane %v6313_v15, 7  ;;  %v5821_v25 = vadd.f32 %v5820_v1, %v15228_v54  ;;  %v13492_v1 = vld [vmem:[#allocation10 + $0x1d0] sm:$0xff]  }
 0x2ef   : > { %v6030_v21 = vsel %vm5960_vm2, %v5928_v62, %v5998_v3  ;;  %v6903_v34 = vshrl.u32 %v6833_v29, 16  ;;  %10536 = vmatprep.mubr.bf16.mxu0 %v11845_v4  ;;  %vm5965_vm4 = vcmp.ge.f32.partialorder %v5933_v61, 0.0  ;;  %v6003_v23 = vmul.f32 %v15322_v27, %v5933_v61  ;;  %13009 = vmatprep.subr.bf16.mxu0 %v13492_v1  ;;  %v13493_v15 = vld [vmem:[#allocation10 + $0x190] sm:$0xff]  }
 0x2f0   : > { %v12085_v7 = vpack.c.bf16 %v6030_v21, %v6030_v21  ;;  %v6310_v59 = vsel %vm14006_vm9, %v15286_v18, %v6309_v55  ;;  %v6318_v37 = vor.u32 %v6316_v9, %v6315_v6  ;;  %v5893_v63 = vmul.f32 %v15294_v46, %v5821_v25  ;;  %v7350_v18 = vld [vmem:[#allocation3 + $0x48] sm:$0xf]  ;;  %13010 = vmatpush3.bf16.msra.mxu0 %v13493_v15 }
 0x2f1   : > { %v6905_v42 = vrot.slane %v6903_v34, 4  ;;  %v6906_v19 = vshll.u32 %v6833_v29, 16  ;;  %v15490_v47 = vsel %vm5965_vm4, %v5933_v61, %v6003_v23  ;;  %v6912_v54 = vshll.u32 %v6834_v48, 16  ;;  %v6216_v61 = vld [vmem:[#allocation3 + $0x44] sm:$0xf] }
 0x2f2   : > { %6191 = vst [vmem:[#allocation3 + $0xc0] sm:$0xf] %v12085_v7  ;;  %v6916_v2 = vshrl.u32 %v6834_v48, 16  ;;  %v5832_v36 = vadd.f32 %v13180_v45, %v15240_v58  ;;  %v6319_v44 = vsel %vm14006_vm9, %v6311_v41, %v6318_v37  ;;  %v5931_v39 = vadd.f32 %v15312_v12, %v5893_v63  ;;  %v13183_v31 = vpop.f32.mrb[152].mxu0  ;;  %v13469_v58 = vld [vmem:[#allocation3 + $0x44] sm:$0xff]   ;;  %v13494_v41 = vld [vmem:[#allocation10 + $0x170] sm:$0xff]  }
 0x2f3   : > { %v6908_v5 = vrot.slane %v6906_v19, 5  ;;  %v7440_v16 = vshrl.u32 %v7349_v20, 16  ;;  %v11782_v43 = vcombine.low %v6310_v59, %v6319_v44  ;;  %v6914_v50 = vrot.slane %v6912_v54, 5  ;;  %v5836_v29 = vpop.f32.mrb[153].mxu0  ;;  %12905 = vmatprep.subr.bf16.mxu1 %v13494_v41 }
 0x2f4   : > { %v6918_v35 = vrot.slane %v6916_v2, 4  ;;  %v5896_v62 = vmul.f32 %v15294_v46, %v5832_v36  ;;  %vm5963_vm6 = vcmp.ge.f32.partialorder %v5931_v39, 0.0  ;;  %v6001_v30 = vmul.f32 %v15322_v27, %v5931_v39  ;;  %v15498_v8 = vpop.f32.mrb[154].mxu0  ;;  %v6217_v2 = vld [vmem:[#allocation3 + $0x48] sm:$0xf] }
 0x2f5   : > { %v6909_v45 = vor.u32 %v6908_v5, %v6905_v42  ;;  %v7442_v33 = vrot.slane %v7440_v16, 7  ;;  %10384 = vmatmul.mubr.bf16.gmra.mrb[136].mxu1 %v11782_v43  ;;  %v7443_v9 = vshll.u32 %v7349_v20, 16  ;;  %v7449_v4 = vshrl.u32 %v7350_v18, 16  ;;  %v15501_v55 = vpop.f32.mrb[155].mxu0 }
 0x2f6   : > { %v6919_v14 = vor.u32 %v6918_v35, %v6914_v50  ;;  %v5934_v3 = vadd.f32 %v15312_v12, %v5896_v62  ;;  %v6033_v21 = vsel %vm5963_vm6, %v5931_v39, %v6001_v30  ;;  %10391 = vmatprep.mubr.bf16.mxu1 %v13469_v58  ;;  %v7452_v48 = vshll.u32 %v7350_v18, 16 }
 0x2f7   : > { %v6910_v6 = vrot.slane %v6909_v45, 4  ;;  %v7447_v25 = vrot.slane %v7442_v33, 4  ;;  %v12088_v34 = vpack.c.bf16 %v6033_v21, %v6033_v21  ;;  %v7445_v20 = vor.u32 %v7443_v9, %v7442_v33  ;;  %v6837_v33 = vld [vmem:[#allocation3 + $0x34] sm:$0xf]  ;;  %v13496_v9 = vld [vmem:[#allocation10 + $0x130] sm:$0xff]  }
 0x2f8   : > { %v6920_v7 = vrot.slane %v6919_v14, 4  ;;  %vm5966_vm7 = vcmp.ge.f32.partialorder %v5934_v3, 0.0  ;;  %v6004_v23 = vmul.f32 %v15322_v27, %v5934_v3  ;;  %v7451_v37 = vrot.slane %v7449_v4, 7  ;;  %v16891_v4 = vld [vmem:[#allocation27_spill] sm:$0xff]  ;;  %12906 = vmatpush3.bf16.msra.mxu1 %v13496_v9 }
 0x2f9   : > { %v6915_v59 = vsel %vm14031_vm10, %v6910_v6, %v6914_v50  ;;  %v5824_v63 = vadd.f32 %v15478_v57, %v15232_v60  ;;  %6194 = vst [vmem:[#allocation3 + $0xe4] sm:$0xf] %v12088_v34  ;;  %v5845_v54 = vadd.f32 %v13183_v31, %v15254_v0  ;;  %v6326_v36 = vshrl.u32 %v6216_v61, 16  ;;  %v6219_v9 = vld [vmem:[#allocation3 + $0x58] sm:$0xf] }
 0x2fa   : > { %v6925_v42 = vsel %vm14031_vm10, %v6920_v7, %v15296_v56  ;;  %v6036_v19 = vsel %vm5966_vm7, %v5934_v3, %v6004_v23  ;;  %v7446_v5 = vsel %vm14006_vm9, %v15307_v28, %v7445_v20  ;;  %v7454_v18 = vor.u32 %v7452_v48, %v7451_v37  ;;  %v6836_v56 = vld [vmem:[#allocation3 + $0x30] sm:$0xf] }
 0x2fb   : > { %v11813_v44 = vcombine.low %v6915_v59, %v6925_v42  ;;  %v12169_v39 = vpack.c.bf16 %v6036_v19, %v15490_v47  ;;  %v5894_v60 = vmul.f32 %v15294_v46, %v5824_v63  ;;  %v5899_v57 = vmul.f32 %v15294_v46, %v5845_v54  ;;  %v7352_v59 = vld [vmem:[#allocation3 + $0x58] sm:$0xf]  ;;  %v7353_v19 = vld [vmem:[#allocation3 + $0x5c] sm:$0xf] }
 0x2fc   : > { %v6328_v16 = vrot.slane %v6326_v36, 7  ;;  %v6329_v1 = vshll.u32 %v6216_v61, 16  ;;  %v7455_v0 = vsel %vm14006_vm9, %v7447_v25, %v7454_v18  ;;  %v6335_v31 = vshrl.u32 %v6217_v2, 16  ;;  %v16892_v18 = vld [vmem:[#allocation22_spill] sm:$0xff] }
 0x2fd   : > { %10537 = vmatmul.mubr.bf16.gmra.mrb[164].mxu0 %v11813_v44  ;;  %12194 = vst [vmem:[#allocation3 + $0xf8] sm:$0xff] %v12169_v39   ;;  %v6338_v43 = vshll.u32 %v6217_v2, 16  ;;  %v5837_v47 = vadd.f32 %v5836_v29, %v15244_v53  ;;  %v11846_v50 = vcombine.low %v7446_v5, %v7455_v0  ;;  %v5932_v28 = vadd.f32 %v15312_v12, %v5894_v60  ;;  %v13471_v5 = vld [vmem:[#allocation3 + $0x58] sm:$0xff]  }
 0x2fe   : > { %v5937_v35 = vadd.f32 %v15312_v12, %v5899_v57  ;;  %v6331_v62 = vor.u32 %v6329_v1, %v6328_v16  ;;  %v6333_v30 = vrot.slane %v6328_v16, 4  ;;  %v6337_v58 = vrot.slane %v6335_v31, 7 }
 0x2ff   : > { %v5897_v45 = vmul.f32 %v15294_v46, %v5837_v47  ;;  %v6927_v15 = vshrl.u32 %v6836_v56, 16  ;;  %v13187_v14 = vpop.f32.mrb[156].mxu0  ;;  %10544 = vmatprep.mubr.bf16.mxu0 %v11846_v50  ;;  %vm5964_vm8 = vcmp.ge.f32.partialorder %v5932_v28, 0.0  ;;  %v6002_v3 = vmul.f32 %v15322_v27, %v5932_v28 }
 0x300   : > { %vm5969_vm11 = vcmp.ge.f32.partialorder %v5937_v35, 0.0  ;;  %v6007_v53 = vmul.f32 %v15322_v27, %v5937_v35  ;;  %v15527_v29 = vpop.f32.mrb[157].mxu0  ;;  %v6332_v61 = vsel %vm14006_vm9, %v16891_v4, %v6331_v62  ;;  %v6340_v41 = vor.u32 %v6338_v43, %v6337_v58 }
 0x301   : > { %v5935_v21 = vadd.f32 %v15312_v12, %v5897_v45  ;;  %v6929_v6 = vrot.slane %v6927_v15, 4  ;;  %v15533_v25 = vpop.f32.mrb[158].mxu0  ;;  %v6034_v48 = vsel %vm5964_vm8, %v5932_v28, %v6002_v3  ;;  %v6930_v7 = vshll.u32 %v6836_v56, 16  ;;  %v16893_v28 = vld [vmem:[#allocation21_spill] sm:$0xff] }
 0x302   : > { %v15535_v34 = vsel %vm5969_vm11, %v5937_v35, %v6007_v53  ;;  %v6936_v23 = vshll.u32 %v6837_v33, 16  ;;  %v15537_v20 = vpop.f32.mrb[159].mxu0  ;;  %v12089_v37 = vpack.c.bf16 %v6034_v48, %v6034_v48  ;;  %v6341_v63 = vsel %vm14006_vm9, %v6333_v30, %v6340_v41 }
 0x303   : > { %vm5967_vm12 = vcmp.ge.f32.partialorder %v5935_v21, 0.0  ;;  %v6005_v42 = vmul.f32 %v15322_v27, %v5935_v21  ;;  %v11783_v54 = vcombine.low %v6332_v61, %v6341_v63  ;;  %v6932_v2 = vrot.slane %v6930_v7, 5  ;;  %v13498_v7 = vld [vmem:[#allocation10 + $0x1d8] sm:$0xff]  }
 0x304   : > { %v6938_v36 = vrot.slane %v6936_v23, 5  ;;  %v6940_v44 = vshrl.u32 %v6837_v33, 16  ;;  %6195 = vst [vmem:[#allocation3 + $0xe8] sm:$0xf] %v12089_v37  ;;  %v5848_v60 = vadd.f32 %v15498_v8, %v16892_v18  ;;  %v7462_v57 = vshrl.u32 %v7352_v59, 16  ;;  %v16894_v8 = vld [vmem:[#allocation25_spill] sm:$0xff]  ;;  %13011 = vmatprep.subr.bf16.mxu0 %v13498_v7 }
 0x305   : > { %v6037_v39 = vsel %vm5967_vm12, %v5935_v21, %v6005_v42  ;;  %v7465_v16 = vshll.u32 %v7352_v59, 16  ;;  %10392 = vmatmul.mubr.bf16.gmra.mrb[140].mxu1 %v11783_v54  ;;  %v6933_v56 = vor.u32 %v6932_v2, %v6929_v6  ;;  %v7471_v31 = vshrl.u32 %v7353_v19, 16  ;;  %v16895_v6 = vld [vmem:[#allocation29_spill] sm:$0xff]  ;;  %v13499_v23 = vld [vmem:[#allocation10 + $0x198] sm:$0xff]  }
 0x306   : > { %v12092_v1 = vpack.c.bf16 %v6037_v39, %v6037_v39  ;;  %v6942_v0 = vrot.slane %v6940_v44, 4  ;;  %10399 = vmatprep.mubr.bf16.mxu1 %v13471_v5  ;;  %v5900_v43 = vmul.f32 %v15294_v46, %v5848_v60  ;;  %v7464_v47 = vrot.slane %v7462_v57, 7  ;;  %v13500_v59 = vld [vmem:[#allocation10 + $0x178] sm:$0xff]   ;;  %v6840_v57 = vld [vmem:[#allocation3 + $0x48] sm:$0xf]  ;;  %13012 = vmatpush3.bf16.msra.mxu0 %v13499_v23 }
 0x307   : > { %v7474_v50 = vshll.u32 %v7353_v19, 16  ;;  %v5840_v35 = vadd.f32 %v15501_v55, %v16893_v28  ;;  %v6934_v62 = vrot.slane %v6933_v56, 4  ;;  %v7473_v58 = vrot.slane %v7471_v31, 7  ;;  %v16896_v37 = vld [vmem:[#allocation28_spill] sm:$0xff]  ;;  %v6220_v19 = vld [vmem:[#allocation3 + $0x5c] sm:$0xf]  ;;  %12907 = vmatprep.subr.bf16.mxu1 %v13500_v59 }
 0x308   : > { %6198 = vst [vmem:[#allocation3 + $0x10c] sm:$0xf] %v12092_v1  ;;  %v6943_v30 = vor.u32 %v6942_v0, %v6938_v36  ;;  %v5861_v45 = vadd.f32 %v13187_v14, %v16894_v8  ;;  %v5938_v33 = vadd.f32 %v15312_v12, %v5900_v43  ;;  %v7467_v15 = vor.u32 %v7465_v16, %v7464_v47  ;;  %v6839_v39 = vld [vmem:[#allocation3 + $0x44] sm:$0xf]  ;;  %v16897_v43 = vld [vmem:[#allocation23_spill] sm:$0xff] }
 0x309   : > { %v7469_v3 = vrot.slane %v7464_v47, 4  ;;  %v5898_v53 = vmul.f32 %v15294_v46, %v5840_v35  ;;  %v6939_v4 = vsel %vm14031_vm10, %v6934_v62, %v6938_v36  ;;  %v7476_v41 = vor.u32 %v7474_v50, %v7473_v58  ;;  %v7355_v62 = vld [vmem:[#allocation3 + $0x6c] sm:$0xf] }
 0x30a   : > { %v6944_v61 = vrot.slane %v6943_v30, 4  ;;  %v5903_v55 = vmul.f32 %v15294_v46, %v5861_v45  ;;  %vm5970_vm13 = vcmp.ge.f32.partialorder %v5938_v33, 0.0  ;;  %v6008_v21 = vmul.f32 %v15322_v27, %v5938_v33  ;;  %v13556_v30 = vld [vmem:[%s16784_s4] ss:$0 sm:$0xff] }
 0x30b   : > { %v7468_v14 = vsel %vm14006_vm9, %v16895_v6, %v7467_v15  ;;  %v5936_v48 = vadd.f32 %v15312_v12, %v5898_v53  ;;  %v7477_v42 = vsel %vm14006_vm9, %v7469_v3, %v7476_v41  ;;  %v6348_v54 = vshrl.u32 %v6219_v9, 16  ;;  %v7356_v15 = vld [vmem:[#allocation3 + $0x70] sm:$0xf]  ;;  %v13557_v41 = vld [vmem:[%s16785_s5] ss:$0 sm:$0xff] }
 0x30c   : > { %v6949_v63 = vsel %vm14031_vm10, %v6944_v61, %v16896_v37  ;;  %v5941_v46 = vadd.f32 %v15312_v12, %v5903_v55  ;;  %v6040_v36 = vsel %vm5970_vm13, %v5938_v33, %v6008_v21  ;;  %v11847_v44 = vcombine.low %v7468_v14, %v7477_v42  ;;  %v16898_v3 = vld [vmem:[#allocation30_spill] sm:$0xff] }
 0x30d   : > { %v11814_v2 = vcombine.low %v6939_v4, %v6949_v63  ;;  %vm5968_vm14 = vcmp.ge.f32.partialorder %v5936_v48, 0.0  ;;  %v12174_v5 = vpack.c.bf16 %v6040_v36, %v15535_v34  ;;  %v6006_v18 = vmul.f32 %v15322_v27, %v5936_v48  ;;  %v16899_v4 = vld [vmem:[#allocation26_spill] sm:$0xff] }
 0x30e   : > { %vm5973_vm15 = vcmp.ge.f32.partialorder %v5941_v46, 0.0  ;;  %v6011_v60 = vmul.f32 %v15322_v27, %v5941_v46  ;;  %v6350_v12 = vrot.slane %v6348_v54, 7  ;;  %v6351_v16 = vshll.u32 %v6219_v9, 16 }
 0x30f   : > { %10545 = vmatmul.mubr.bf16.gmra.mrb[168].mxu0 %v11814_v2  ;;  %v6357_v1 = vshrl.u32 %v6220_v19, 16  ;;  %v6360_v56 = vshll.u32 %v6220_v19, 16  ;;  %12195 = vst [vmem:[#allocation3 + $0x120] sm:$0xff] %v12174_v5   ;;  %v6038_v0 = vsel %vm5968_vm14, %v5936_v48, %v6006_v18  ;;  %v5853_v34 = vadd.f32 %v15527_v29, %v16897_v43  ;;  %v13502_v48 = vld [vmem:[#allocation10 + $0x138] sm:$0xff]  }
 0x310   : > { %10552 = vmatprep.mubr.bf16.mxu0 %v11847_v44  ;;  %v15568_v31 = vsel %vm5973_vm15, %v5941_v46, %v6011_v60  ;;  %v6951_v47 = vshrl.u32 %v6839_v39, 16  ;;  %v12093_v50 = vpack.c.bf16 %v6038_v0, %v6038_v0  ;;  %v6353_v28 = vor.u32 %v6351_v16, %v6350_v12  ;;  %v13473_v46 = vld [vmem:[#allocation3 + $0x6c] sm:$0xff]   ;;  %12908 = vmatpush3.bf16.msra.mxu1 %v13502_v48  ;;  %v16900_v60 = vld [vmem:[#allocation24_spill] sm:$0xff] }
 0x311   : > { %v6355_v27 = vrot.slane %v6350_v12, 4  ;;  %v6359_v35 = vrot.slane %v6357_v1, 7  ;;  %v5901_v58 = vmul.f32 %v13556_v30, %v5853_v34  ;;  %v6954_v45 = vshll.u32 %v6839_v39, 16  ;;  %v6222_v12 = vld [vmem:[#allocation3 + $0x6c] sm:$0xf] }
 0x312   : > { %v6953_v8 = vrot.slane %v6951_v47, 4  ;;  %v6960_v33 = vshll.u32 %v6840_v57, 16  ;;  %6199 = vst [vmem:[#allocation3 + $0x110] sm:$0xf] %v12093_v50  ;;  %v6354_v29 = vsel %vm14006_vm9, %v16898_v3, %v6353_v28  ;;  %v6964_v9 = vshrl.u32 %v6840_v57, 16  ;;  %v16901_v28 = vld [vmem:[#allocation31_spill] sm:$0xff] }
 0x313   : > { %v6362_v53 = vor.u32 %v6360_v56, %v6359_v35  ;;  %v5864_v61 = vadd.f32 %v15533_v25, %v16899_v4  ;;  %v5939_v55 = vadd.f32 %v13557_v41, %v5901_v58  ;;  %v6956_v21 = vrot.slane %v6954_v45, 5  ;;  %v13558_v25 = vld [vmem:[%s16786_s6] ss:$0 sm:$0xff]  ;;  %v6223_v50 = vld [vmem:[#allocation3 + $0x70] sm:$0xf] }
 0x314   : > { %v6962_v6 = vrot.slane %v6960_v33, 5  ;;  %v7484_v14 = vshrl.u32 %v7355_v62, 16  ;;  %v6966_v23 = vrot.slane %v6964_v9, 4  ;;  %v7487_v37 = vshll.u32 %v7355_v62, 16  ;;  %v6842_v58 = vld [vmem:[#allocation3 + $0x58] sm:$0xf] }
 0x315   : > { %v6363_v7 = vsel %vm14006_vm9, %v6355_v27, %v6362_v53  ;;  %v5904_v59 = vmul.f32 %v13556_v30, %v5864_v61  ;;  %vm5971_vm0 = vcmp.ge.f32.partialorder %v5939_v55, 0.0  ;;  %v6009_v42 = vmul.f32 %v13558_v25, %v5939_v55  ;;  %v16902_v33 = vld [vmem:[#allocation20_spill] sm:$0xff]  ;;  %v6843_v61 = vld [vmem:[#allocation3 + $0x5c] sm:$0xf] }
 0x316   : > { %v11784_v63 = vcombine.low %v6354_v29, %v6363_v7  ;;  %v6957_v19 = vor.u32 %v6956_v21, %v6953_v8  ;;  %v6967_v54 = vor.u32 %v6966_v23, %v6962_v6  ;;  %v7486_v36 = vrot.slane %v7484_v14, 7  ;;  %v7358_v14 = vld [vmem:[#allocation3 + $0x80] sm:$0xf]  ;;  %v7359_v23 = vld [vmem:[#allocation3 + $0x84] sm:$0xf] }
 0x317   : > { %v5942_v2 = vadd.f32 %v13557_v41, %v5904_v59  ;;  %v7493_v44 = vshrl.u32 %v7356_v15, 16  ;;  %v6041_v39 = vsel %vm5971_vm0, %v5939_v55, %v6009_v42  ;;  %v7496_v18 = vshll.u32 %v7356_v15, 16  ;;  %v13503_v42 = vld [vmem:[#allocation10 + $0x1e0] sm:$0xff]  }
 0x318   : > { %10400 = vmatmul.mubr.bf16.gmra.mrb[144].mxu1 %v11784_v63  ;;  %v6958_v5 = vrot.slane %v6957_v19, 4  ;;  %v5856_v57 = vadd.f32 %v15537_v20, %v16900_v60  ;;  %v12096_v16 = vpack.c.bf16 %v6041_v39, %v6041_v39  ;;  %v6968_v1 = vrot.slane %v6967_v54, 4  ;;  %v16903_v19 = vld [vmem:[#allocation32_spill] sm:$0xff]  ;;  %13013 = vmatprep.subr.bf16.mxu0 %v13503_v42 }
 0x319   : > { %10407 = vmatprep.mubr.bf16.mxu1 %v13473_v46  ;;  %vm5974_vm1 = vcmp.ge.f32.partialorder %v5942_v2, 0.0  ;;  %v6012_v56 = vmul.f32 %v13558_v25, %v5942_v2  ;;  %v7489_v43 = vor.u32 %v7487_v37, %v7486_v36  ;;  %v7491_v34 = vrot.slane %v7486_v36, 4 }
 0x31a   : > { %v6963_v0 = vsel %vm14031_vm10, %v6958_v5, %v6962_v6  ;;  %v7495_v47 = vrot.slane %v7493_v44, 7  ;;  %6202 = vst [vmem:[#allocation3 + $0x134] sm:$0xf] %v12096_v16  ;;  %v6973_v27 = vsel %vm14031_vm10, %v6968_v1, %v16901_v28  ;;  %v5902_v20 = vmul.f32 %v13556_v30, %v5856_v57 }
 0x31b   : > { %v6044_v35 = vsel %vm5974_vm1, %v5942_v2, %v6012_v56  ;;  %v6370_v62 = vshrl.u32 %v6222_v12, 16  ;;  %v11815_v8 = vcombine.low %v6963_v0, %v6973_v27  ;;  %v7490_v15 = vsel %vm14006_vm9, %v16902_v33, %v7489_v43  ;;  %v6846_v33 = vld [vmem:[#allocation3 + $0x70] sm:$0xf] }
 0x31c   : > { %v12179_v45 = vpack.c.bf16 %v6044_v35, %v15568_v31  ;;  %v7498_v3 = vor.u32 %v7496_v18, %v7495_v47  ;;  %v5940_v29 = vadd.f32 %v13557_v41, %v5902_v20  ;;  %v6373_v9 = vshll.u32 %v6222_v12, 16  ;;  %v6845_v35 = vld [vmem:[#allocation3 + $0x6c] sm:$0xf]  ;;  %v13475_v20 = vld [vmem:[#allocation3 + $0x80] sm:$0xff]  }
 0x31d   : > { %v6372_v53 = vrot.slane %v6370_v62, 7  ;;  %v6379_v4 = vshrl.u32 %v6223_v50, 16  ;;  %10553 = vmatmul.mubr.bf16.gmra.mrb[172].mxu0 %v11815_v8  ;;  %v6382_v55 = vshll.u32 %v6223_v50, 16  ;;  %v6975_v21 = vshrl.u32 %v6842_v58, 16 }
 0x31e   : > { %12196 = vst [vmem:[#allocation3 + $0x148] sm:$0xff] %v12179_v45   ;;  %v7499_v30 = vsel %vm14006_vm9, %v7491_v34, %v7498_v3  ;;  %v6978_v6 = vshll.u32 %v6842_v58, 16  ;;  %vm5972_vm2 = vcmp.ge.f32.partialorder %v5940_v29, 0.0  ;;  %v6010_v48 = vmul.f32 %v13558_v25, %v5940_v29  ;;  %v6225_v25 = vld [vmem:[#allocation3 + $0x80] sm:$0xf] }
 0x31f   : > { %v11848_v31 = vcombine.low %v7490_v15, %v7499_v30  ;;  %v6375_v7 = vor.u32 %v6373_v9, %v6372_v53  ;;  %v6377_v59 = vrot.slane %v6372_v53, 4  ;;  %v6381_v41 = vrot.slane %v6379_v4, 7  ;;  %v6226_v34 = vld [vmem:[#allocation3 + $0x84] sm:$0xf]  ;;  %v7361_v9 = vld [vmem:[#allocation3 + $0x94] sm:$0xf] }
 0x320   : > { %v6977_v37 = vrot.slane %v6975_v21, 4  ;;  %v6980_v63 = vrot.slane %v6978_v6, 5  ;;  %v6042_v46 = vsel %vm5972_vm2, %v5940_v29, %v6010_v48  ;;  %v6984_v2 = vshll.u32 %v6843_v61, 16  ;;  %v13504_v21 = vld [vmem:[#allocation10 + $0x1a0] sm:$0xff]   ;;  %v13505_v6 = vld [vmem:[#allocation10 + $0x1e8] sm:$0xff]  }
 0x321   : > { %10560 = vmatprep.mubr.bf16.mxu0 %v11848_v31  ;;  %v6376_v54 = vsel %vm14006_vm9, %v16903_v19, %v6375_v7  ;;  %v6988_v36 = vshrl.u32 %v6843_v61, 16  ;;  %v12097_v44 = vpack.c.bf16 %v6042_v46, %v6042_v46  ;;  %v6384_v39 = vor.u32 %v6382_v55, %v6381_v41  ;;  %v6228_v41 = vld [vmem:[#allocation3 + $0x94] sm:$0xf]  ;;  %13014 = vmatpush3.bf16.msra.mxu0 %v13504_v21 }
 0x322   : > { %v6981_v5 = vor.u32 %v6980_v63, %v6977_v37  ;;  %v7506_v18 = vshrl.u32 %v7358_v14, 16  ;;  %v6986_v60 = vrot.slane %v6984_v2, 5  ;;  %v7509_v12 = vshll.u32 %v7358_v14, 16  ;;  %v16904_v14 = vld [vmem:[#allocation33_spill] sm:$0xff]  ;;  %v13506_v19 = vld [vmem:[#allocation10 + $0x1a8] sm:$0xff]   ;;  %13015 = vmatprep.subr.bf16.mxu0 %v13505_v6 }
 0x323   : > { %v6990_v57 = vrot.slane %v6988_v36, 4  ;;  %v7515_v16 = vshrl.u32 %v7359_v23, 16  ;;  %6203 = vst [vmem:[#allocation3 + $0x138] sm:$0xf] %v12097_v44  ;;  %v6385_v1 = vsel %vm14006_vm9, %v6377_v59, %v6384_v39  ;;  %v7518_v43 = vshll.u32 %v7359_v23, 16  ;;  %v13508_v37 = vld [vmem:[#allocation10 + $0x200] sm:$0xff]  }
 0x324   : > { %v6982_v56 = vrot.slane %v6981_v5, 4  ;;  %v7508_v0 = vrot.slane %v7506_v18, 7  ;;  %v11785_v47 = vcombine.low %v6376_v54, %v6385_v1  ;;  %v6392_v27 = vshrl.u32 %v6225_v25, 16  ;;  %v7362_v59 = vld [vmem:[#allocation3 + $0x98] sm:$0xf]  ;;  %13189 = vmatprep.subr.bf16.mxu1 %v13508_v37 }
 0x325   : > { %v6991_v50 = vor.u32 %v6990_v57, %v6986_v60  ;;  %v7517_v28 = vrot.slane %v7515_v16, 7  ;;  %v6395_v45 = vshll.u32 %v6225_v25, 16  ;;  %v6401_v53 = vshrl.u32 %v6226_v34, 16  ;;  %13016 = vmatpush3.bf16.msra.mxu0 %v13506_v19  ;;  %v7363_v6 = vld [vmem:[#allocation3 + $0xa4] sm:$0x8] }
 0x326   : > { %v6987_v62 = vsel %vm14031_vm10, %v6982_v56, %v6986_v60  ;;  %v7511_v58 = vor.u32 %v7509_v12, %v7508_v0  ;;  %v7513_v8 = vrot.slane %v7508_v0, 4  ;;  %10408 = vmatmul.mubr.bf16.gmra.mrb[148].mxu1 %v11785_v47  ;;  %v6394_v29 = vrot.slane %v6392_v27, 7  ;;  %v13509_v60 = vld [vmem:[#allocation10 + $0x1f0] sm:$0xff]   ;;  %v6848_v47 = vld [vmem:[#allocation3 + $0x80] sm:$0xf] }
 0x327   : > { %v6992_v15 = vrot.slane %v6991_v50, 4  ;;  %v7520_v3 = vor.u32 %v7518_v43, %v7517_v28  ;;  %10415 = vmatprep.mubr.bf16.mxu1 %v13475_v20  ;;  %v6404_v61 = vshll.u32 %v6226_v34, 16  ;;  %v6999_v30 = vshrl.u32 %v6845_v35, 16  ;;  %v6229_v43 = vld [vmem:[#allocation3 + $0x98] sm:$0xf]  ;;  %13017 = vmatprep.subr.bf16.mxu0 %v13509_v60 }
 0x328   : > { %v7512_v4 = vsel %vm14006_vm9, %v15360_v10, %v7511_v58  ;;  %v7002_v55 = vshll.u32 %v6845_v35, 16  ;;  %v6397_v7 = vor.u32 %v6395_v45, %v6394_v29  ;;  %v6399_v23 = vrot.slane %v6394_v29, 4  ;;  %v13510_v50 = vld [vmem:[#allocation10 + $0x1b0] sm:$0xff]   ;;  %v6849_v58 = vld [vmem:[#allocation3 + $0x84] sm:$0xf] }
 0x329   : > { %v6997_v31 = vsel %vm14031_vm10, %v6992_v15, %v16904_v14  ;;  %v7521_v48 = vsel %vm14006_vm9, %v7513_v8, %v7520_v3  ;;  %v6403_v10 = vrot.slane %v6401_v53, 7  ;;  %v7001_v46 = vrot.slane %v6999_v30, 4  ;;  %v13477_v27 = vld [vmem:[#allocation3 + $0x94] sm:$0xff]   ;;  %v13512_v8 = vld [vmem:[#allocation10 + $0x1f8] sm:$0xff]   ;;  %13018 = vmatpush3.bf16.msra.mxu0 %v13510_v50 }
 0x32a   : > { %v11816_v63 = vcombine.low %v6987_v62, %v6997_v31  ;;  %v11849_v42 = vcombine.low %v7512_v4, %v7521_v48  ;;  %v6398_v54 = vsel %vm14006_vm9, %v15366_v49, %v6397_v7  ;;  %v7004_v2 = vrot.slane %v7002_v55, 5  ;;  %13019 = vmatprep.subr.bf16.mxu0 %v13512_v8 }
 0x32b   : > { %v7008_v36 = vshll.u32 %v6846_v33, 16  ;;  %v7012_v44 = vshrl.u32 %v6846_v33, 16  ;;  %v6406_v39 = vor.u32 %v6404_v61, %v6403_v10  ;;  %v7528_v5 = vshrl.u32 %v7361_v9, 16 }
 0x32c   : > { %10561 = vmatmul.mubr.bf16.gmra.mrb[176].mxu0 %v11816_v63  ;;  %v7531_v18 = vshll.u32 %v7361_v9, 16  ;;  %v7537_v25 = vshrl.u32 %v7362_v59, 16  ;;  %v7005_v57 = vor.u32 %v7004_v2, %v7001_v46  ;;  %v7540_v1 = vshll.u32 %v7362_v59, 16  ;;  %v13513_v59 = vld [vmem:[#allocation10 + $0x1b8] sm:$0xff]  }
 0x32d   : > { %10568 = vmatprep.mubr.bf16.mxu0 %v11849_v42  ;;  %v7010_v12 = vrot.slane %v7008_v36, 5  ;;  %v7014_v16 = vrot.slane %v7012_v44, 4  ;;  %v6407_v56 = vsel %vm14006_vm9, %v6399_v23, %v6406_v39  ;;  %v7530_v49 = vrot.slane %v7528_v5, 7  ;;  %v7364_v23 = vld [vmem:[#allocation3 + $0xa8] sm:$0xf]  ;;  %13020 = vmatpush3.bf16.msra.mxu0 %v13513_v59 }
 0x32e   : > { %v7539_v0 = vrot.slane %v7537_v25, 7  ;;  %v6414_v34 = vshrl.u32 %v6228_v41, 16  ;;  %v11786_v28 = vcombine.low %v6398_v54, %v6407_v56  ;;  %v7006_v35 = vrot.slane %v7005_v57, 4  ;;  %v7365_v42 = vld [vmem:[#allocation3 + $0xac] sm:$0xf] }
 0x32f   : > { %v7015_v20 = vor.u32 %v7014_v16, %v7010_v12  ;;  %v6417_v62 = vshll.u32 %v6228_v41, 16  ;;  %v7533_v45 = vor.u32 %v7531_v18, %v7530_v49  ;;  %v7535_v33 = vrot.slane %v7530_v49, 4  ;;  %v6230_v2 = vld [vmem:[#allocation3 + $0xa4] sm:$0x8]  ;;  %v6231_v5 = vld [vmem:[#allocation3 + $0xa8] sm:$0xf] }
 0x330   : > { %v7542_v15 = vor.u32 %v7540_v1, %v7539_v0  ;;  %v6416_v3 = vrot.slane %v6414_v34, 7  ;;  %10416 = vmatmul.mubr.bf16.gmra.mrb[152].mxu1 %v11786_v28  ;;  %v7011_v29 = vsel %vm14031_vm10, %v7006_v35, %v7010_v12  ;;  %v6423_v9 = vshrl.u32 %v6229_v43, 16  ;;  %v13479_v56 = vld [vmem:[#allocation3 + $0xa8] sm:$0xff]  }
 0x331   : > { %v7016_v53 = vrot.slane %v7015_v20, 4  ;;  %v6426_v4 = vshll.u32 %v6229_v43, 16  ;;  %10423 = vmatprep.mubr.bf16.mxu1 %v13477_v27  ;;  %v7534_v61 = vsel %vm14006_vm9, %v15408_v11, %v7533_v45  ;;  %v7023_v7 = vshrl.u32 %v6848_v47, 16  ;;  %v6232_v43 = vld [vmem:[#allocation3 + $0xac] sm:$0xf] }
 0x332   : > { %v7543_v30 = vsel %vm14006_vm9, %v7535_v33, %v7542_v15  ;;  %v6419_v55 = vor.u32 %v6417_v62, %v6416_v3  ;;  %v6421_v21 = vrot.slane %v6416_v3, 4  ;;  %v6425_v48 = vrot.slane %v6423_v9, 7  ;;  %v6851_v20 = vld [vmem:[#allocation3 + $0x94] sm:$0xf]  ;;  %v6853_v33 = vld [vmem:[#allocation3 + $0x9c] sm:$0x1] }
 0x333   : > { %v7021_v14 = vsel %vm14031_vm10, %v7016_v53, %v15406_v32  ;;  %v11850_v31 = vcombine.low %v7534_v61, %v7543_v30  ;;  %v7026_v37 = vshll.u32 %v6848_v47, 16  ;;  %v7032_v63 = vshll.u32 %v6849_v58, 16  ;;  %v6852_v9 = vld [vmem:[#allocation3 + $0x98] sm:$0xf] }
 0x334   : > { %v11817_v41 = vcombine.low %v7011_v29, %v7021_v14  ;;  %v6420_v11 = vsel %vm14006_vm9, %v15414_v51, %v6419_v55  ;;  %v6428_v10 = vor.u32 %v6426_v4, %v6425_v48  ;;  %v7025_v46 = vrot.slane %v7023_v7, 4  ;;  %v7366_v4 = vld [vmem:[#allocation3 + $0xb8] sm:$0x8]  ;;  %v7367_v7 = vld [vmem:[#allocation3 + $0xbc] sm:$0xf] }
 0x335   : > { %v7036_v19 = vshrl.u32 %v6849_v58, 16  ;;  %v7545_v54 = vshrl.u32 %v7363_v6, 16  ;;  %v7028_v32 = vrot.slane %v7026_v37, 5  ;;  %v7034_v36 = vrot.slane %v7032_v63, 5  ;;  %v7368_v37 = vld [vmem:[#allocation3 + $0xc0] sm:$0xf] }
 0x336   : > { %10569 = vmatmul.mubr.bf16.gmra.mrb[180].mxu0 %v11817_v41  ;;  %v7550_v44 = vshrl.u32 %v7364_v23, 16  ;;  %v7553_v39 = vshll.u32 %v7364_v23, 16  ;;  %v6429_v18 = vsel %vm14006_vm9, %v6421_v21, %v6428_v10  ;;  %v7559_v60 = vshrl.u32 %v7365_v42, 16  ;;  %v6233_v63 = vld [vmem:[#allocation3 + $0xb8] sm:$0x8] }
 0x337   : > { %10576 = vmatprep.mubr.bf16.mxu0 %v11850_v31  ;;  %v7038_v25 = vrot.slane %v7036_v19, 4  ;;  %v11835_v51 = vrot.slane %v7545_v54, 11  ;;  %v11787_v57 = vcombine.low %v6420_v11, %v6429_v18  ;;  %v7029_v12 = vor.u32 %v7028_v32, %v7025_v46 }
 0x338   : > { %v7552_v16 = vrot.slane %v7550_v44, 7  ;;  %v7562_v1 = vshll.u32 %v7365_v42, 16  ;;  %v7561_v0 = vrot.slane %v7559_v60, 7  ;;  %v6431_v34 = vshrl.u32 %v6230_v2, 16  ;;  %v6234_v42 = vld [vmem:[#allocation3 + $0xbc] sm:$0xf] }
 0x339   : > { %v7039_v49 = vor.u32 %v7038_v25, %v7034_v36  ;;  %v6436_v47 = vshrl.u32 %v6231_v5, 16  ;;  %10424 = vmatmul.mubr.bf16.gmra.mrb[156].mxu1 %v11787_v57  ;;  %v7030_v50 = vrot.slane %v7029_v12, 4  ;;  %v6439_v35 = vshll.u32 %v6231_v5, 16 }
 0x33a   : > { %v7555_v28 = vor.u32 %v7553_v39, %v7552_v16  ;;  %v7557_v27 = vrot.slane %v7552_v16, 4  ;;  %10431 = vmatprep.mubr.bf16.mxu1 %v13479_v56  ;;  %v7564_v58 = vor.u32 %v7562_v1, %v7561_v0  ;;  %v11772_v8 = vrot.slane %v6431_v34, 11  ;;  %v6235_v56 = vld [vmem:[#allocation3 + $0xc0] sm:$0xf] }
 0x33b   : > { %v7040_v62 = vrot.slane %v7039_v49, 4  ;;  %v6438_v45 = vrot.slane %v6436_v47, 7  ;;  %v7035_v15 = vsel %vm14031_vm10, %v7030_v50, %v7034_v36  ;;  %v6445_v29 = vshrl.u32 %v6232_v43, 16 }
 0x33c   : > { %v7556_v3 = vsel %vm14006_vm9, %v11835_v51, %v7555_v28  ;;  %v6448_v53 = vshll.u32 %v6232_v43, 16  ;;  %v7565_v30 = vsel %vm14006_vm9, %v7557_v27, %v7564_v58  ;;  %v7047_v48 = vshrl.u32 %v6851_v20, 16  ;;  %v13483_v51 = vld [vmem:[#allocation3 + $0xbc] sm:$0xff]  }
 0x33d   : > { %v7045_v61 = vsel %vm14031_vm10, %v7040_v62, %v15430_v38  ;;  %v6441_v55 = vor.u32 %v6439_v35, %v6438_v45  ;;  %v6443_v21 = vrot.slane %v6438_v45, 4  ;;  %v11851_v14 = vcombine.low %v7556_v3, %v7565_v30  ;;  %v6854_v62 = vld [vmem:[#allocation3 + $0xa8] sm:$0xf]  ;;  %v6856_v3 = vld [vmem:[#allocation3 + $0xb0] sm:$0x1] }
 0x33e   : > { %v11818_v6 = vcombine.low %v7035_v15, %v7045_v61  ;;  %v6447_v31 = vrot.slane %v6445_v29, 7  ;;  %v7050_v59 = vshll.u32 %v6851_v20, 16  ;;  %v7056_v41 = vshll.u32 %v6852_v9, 16  ;;  %v6855_v15 = vld [vmem:[#allocation3 + $0xac] sm:$0xf] }
 0x33f   : > { %v6442_v23 = vsel %vm14006_vm9, %v11772_v8, %v6441_v55  ;;  %v7060_v11 = vshrl.u32 %v6852_v9, 16  ;;  %v7049_v10 = vrot.slane %v7047_v48, 4  ;;  %v7066_v46 = vshll.u32 %v6853_v33, 16 }
 0x340   : > { %10577 = vmatmul.mubr.bf16.gmra.mrb[184].mxu0 %v11818_v6  ;;  %v6450_v38 = vor.u32 %v6448_v53, %v6447_v31  ;;  %v7567_v19 = vshrl.u32 %v7366_v4, 16  ;;  %v7052_v54 = vrot.slane %v7050_v59, 5  ;;  %v7058_v2 = vrot.slane %v7056_v41, 5  ;;  %v574_v6 = vld [vmem:[#allocation3 + $0xcc] sm:$0x8] }
 0x341   : > { %10584 = vmatprep.mubr.bf16.mxu0 %v11851_v14  ;;  %v7062_v32 = vrot.slane %v7060_v11, 4  ;;  %v7572_v36 = vshrl.u32 %v7367_v7, 16  ;;  %v7068_v39 = vrot.slane %v7066_v46, 5  ;;  %v7575_v18 = vshll.u32 %v7367_v7, 16  ;;  %v7371_v59 = vld [vmem:[#allocation3 + $0xd4] sm:$0xf] }
 0x342   : > { %v6451_v44 = vsel %vm14006_vm9, %v6443_v21, %v6450_v38  ;;  %v11836_v5 = vrot.slane %v7567_v19, 11  ;;  %v7053_v60 = vor.u32 %v7052_v54, %v7049_v10  ;;  %v7581_v16 = vshrl.u32 %v7368_v37, 16  ;;  %v6238_v54 = vld [vmem:[#allocation3 + $0xd4] sm:$0xf] }
 0x343   : > { %v11788_v25 = vcombine.low %v6442_v23, %v6451_v44  ;;  %v7063_v57 = vor.u32 %v7062_v32, %v7058_v2  ;;  %v7574_v12 = vrot.slane %v7572_v36, 7  ;;  %v7584_v1 = vshll.u32 %v7368_v37, 16  ;;  %v7370_v23 = vld [vmem:[#allocation3 + $0xd0] sm:$0xf] }
 0x344   : > { %v6453_v49 = vshrl.u32 %v6233_v63, 16  ;;  %v6458_v0 = vshrl.u32 %v6234_v42, 16  ;;  %v7054_v43 = vrot.slane %v7053_v60, 4  ;;  %v7583_v28 = vrot.slane %v7581_v16, 7  ;;  %v13485_v32 = vld [vmem:[#allocation3 + $0xd0] sm:$0xff]  }
 0x345   : > { %10432 = vmatmul.mubr.bf16.gmra.mrb[160].mxu1 %v11788_v25  ;;  %v7064_v34 = vrot.slane %v7063_v57, 4  ;;  %v7577_v47 = vor.u32 %v7575_v18, %v7574_v12  ;;  %v7579_v50 = vrot.slane %v7574_v12, 4  ;;  %v6461_v20 = vshll.u32 %v6234_v42, 16  ;;  %v6237_v42 = vld [vmem:[#allocation3 + $0xd0] sm:$0xf] }
 0x346   : > { %10439 = vmatprep.mubr.bf16.mxu1 %v13483_v51  ;;  %v11773_v27 = vrot.slane %v6453_v49, 11  ;;  %v6460_v35 = vrot.slane %v6458_v0, 7  ;;  %v7059_v58 = vsel %vm14031_vm10, %v7054_v43, %v7058_v2  ;;  %v6467_v33 = vshrl.u32 %v6235_v56, 16  ;;  %v625_v60 = vld [vmem:[#allocation3 + $0xc4] sm:$0x1] }
 0x347   : > { %v7069_v8 = vsel %vm14031_vm10, %v7064_v34, %v7068_v39  ;;  %v7578_v45 = vsel %vm14006_vm9, %v11836_v5, %v7577_v47  ;;  %v7586_v53 = vor.u32 %v7584_v1, %v7583_v28  ;;  %v6470_v30 = vshll.u32 %v6235_v56, 16  ;;  %v6857_v56 = vld [vmem:[#allocation3 + $0xbc] sm:$0xf] }
 0x348   : > { %v11819_v29 = vcombine.low %v7059_v58, %v7069_v8  ;;  %v6463_v9 = vor.u32 %v6461_v20, %v6460_v35  ;;  %v6465_v4 = vrot.slane %v6460_v35, 4  ;;  %v6469_v61 = vrot.slane %v6467_v33, 7  ;;  %v6858_v8 = vld [vmem:[#allocation3 + $0xc0] sm:$0xf] }
 0x349   : > { %v7071_v55 = vshrl.u32 %v6854_v62, 16  ;;  %v7074_v21 = vshll.u32 %v6854_v62, 16  ;;  %v7587_v14 = vsel %vm14006_vm9, %v7579_v50, %v7586_v53  ;;  %v7080_v48 = vshll.u32 %v6855_v15, 16  ;;  %v7373_v53 = vld [vmem:[#allocation3 + $0xe4] sm:$0xf] }
 0x34a   : > { %10585 = vmatmul.mubr.bf16.gmra.mrb[188].mxu0 %v11819_v29  ;;  %v6464_v31 = vsel %vm14006_vm9, %v11773_v27, %v6463_v9  ;;  %v7084_v7 = vshrl.u32 %v6855_v15, 16  ;;  %v11852_v41 = vcombine.low %v7578_v45, %v7587_v14  ;;  %v6472_v11 = vor.u32 %v6470_v30, %v6469_v61  ;;  %v577_v29 = vld [vmem:[#allocation3 + $0xe0] sm:$0x8] }
 0x34b   : > { %v7073_v37 = vrot.slane %v7071_v55, 4  ;;  %v7076_v63 = vrot.slane %v7074_v21, 5  ;;  %v7082_v38 = vrot.slane %v7080_v48, 5  ;;  %v7090_v46 = vshll.u32 %v6856_v3, 16 }
 0x34c   : > { %v7086_v10 = vrot.slane %v7084_v7, 4  ;;  %v575_v19 = vsel %vm13973_vm3, 0, %v574_v6  ;;  %10592 = vmatprep.mubr.bf16.mxu0 %v11852_v41  ;;  %v6473_v2 = vsel %vm14006_vm9, %v6465_v4, %v6472_v11  ;;  %v7594_v44 = vshrl.u32 %v7370_v23, 16  ;;  %v7374_v7 = vld [vmem:[#allocation3 + $0xe8] sm:$0xf] }
 0x34d   : > { %v7077_v36 = vor.u32 %v7076_v63, %v7073_v37  ;;  %576 = vst [vmem:[#allocation3 + $0xcc] sm:$0x8] %v575_v19  ;;  %v7597_v39 = vshll.u32 %v7370_v23, 16  ;;  %v11789_v5 = vcombine.low %v6464_v31, %v6473_v2  ;;  %v7092_v25 = vrot.slane %v7090_v46, 5  ;;  %v15671_v23 = vld [vmem:[#allocation3 + $0x48] sm:$0xf] }
 0x34e   : > { %v7087_v18 = vor.u32 %v7086_v10, %v7082_v38  ;;  %v7603_v51 = vshrl.u32 %v7371_v59, 16  ;;  %v7596_v12 = vrot.slane %v7594_v44, 7  ;;  %v7606_v16 = vshll.u32 %v7371_v59, 16 }
 0x34f   : > { %v7078_v57 = vrot.slane %v7077_v36, 4  ;;  %v6480_v1 = vshrl.u32 %v6237_v42, 16  ;;  %10440 = vmatmul.mubr.bf16.gmra.mrb[164].mxu1 %v11789_v5  ;;  %v6483_v43 = vshll.u32 %v6237_v42, 16  ;;  %v6489_v34 = vshrl.u32 %v6238_v54, 16 }
 0x350   : > { %v7088_v49 = vrot.slane %v7087_v18, 4  ;;  %v7605_v0 = vrot.slane %v7603_v51, 7  ;;  %10447 = vmatprep.mubr.bf16.mxu1 %v13485_v32  ;;  %v7599_v50 = vor.u32 %v7597_v39, %v7596_v12  ;;  %v7601_v28 = vrot.slane %v7596_v12, 4  ;;  %v6240_v32 = vld [vmem:[#allocation3 + $0xe4] sm:$0xf] }
 0x351   : > { %v7083_v47 = vsel %vm14031_vm10, %v7078_v57, %v7082_v38  ;;  %v6482_v27 = vrot.slane %v6480_v1, 7  ;;  %v6491_v62 = vrot.slane %v6489_v34, 7  ;;  %v6492_v58 = vshll.u32 %v6238_v54, 16  ;;  %v628_v18 = vld [vmem:[#allocation3 + $0xd8] sm:$0x1] }
 0x352   : > { %v7093_v35 = vsel %vm14031_vm10, %v7088_v49, %v7092_v25  ;;  %v7608_v20 = vor.u32 %v7606_v16, %v7605_v0  ;;  %v626_v3 = vsel %vm13978_vm5, 0, %v625_v60  ;;  %v7095_v55 = vshrl.u32 %v6857_v56, 16  ;;  %v13489_v60 = vld [vmem:[#allocation3 + $0xe4] sm:$0xff]   ;;  %v6860_v0 = vld [vmem:[#allocation3 + $0xd0] sm:$0xf] }
 0x353   : > { %v11820_v45 = vcombine.low %v7083_v47, %v7093_v35  ;;  %v6485_v33 = vor.u32 %v6483_v43, %v6482_v27  ;;  %v6487_v15 = vrot.slane %v6482_v27, 4  ;;  %v6494_v30 = vor.u32 %v6492_v58, %v6491_v62  ;;  %627 = vst [vmem:[#allocation3 + $0xc4] sm:$0x1] %v626_v3  ;;  %v6241_v57 = vld [vmem:[#allocation3 + $0xe8] sm:$0xf] }
 0x354   : > { %v7369_v9 = vld [vmem:[#allocation3 + $0xcc] sm:$0x8]  ;;  %v7609_v4 = vsel %vm14006_vm9, %v7601_v28, %v7608_v20  ;;  %v7098_v21 = vshll.u32 %v6857_v56, 16  ;;  %v7104_v31 = vshll.u32 %v6858_v8, 16  ;;  %v7108_v48 = vshrl.u32 %v6858_v8, 16 }
 0x355   : > { %v6236_v61 = vld [vmem:[#allocation3 + $0xcc] sm:$0x8]  ;;  %10593 = vmatmul.mubr.bf16.gmra.mrb[192].mxu0 %v11820_v45  ;;  %v7589_v6 = vshrl.u32 %v7369_v9, 16  ;;  %v6495_v59 = vsel %vm14006_vm9, %v6487_v15, %v6494_v30  ;;  %v7097_v41 = vrot.slane %v7095_v55, 4  ;;  %v578_v37 = vsel %vm13973_vm3, 0, %v577_v29 }
 0x356   : > { %v6475_v14 = vshrl.u32 %v6236_v61, 16  ;;  %v7100_v11 = vrot.slane %v7098_v21, 5  ;;  %v7106_v38 = vrot.slane %v7104_v31, 5  ;;  %v7110_v10 = vrot.slane %v7108_v48, 4  ;;  %579 = vst [vmem:[#allocation3 + $0xe0] sm:$0x8] %v578_v37 }
 0x357   : > { %v11837_v63 = vrot.slane %v7589_v6, 11  ;;  %v15679_v46 = vrot.slane %v9179_v17, 5  ;;  %v7616_v54 = vshrl.u32 %v7373_v53, 16  ;;  %v7625_v2 = vshrl.u32 %v7374_v7, 16  ;;  %v6861_v62 = vld [vmem:[#allocation3 + $0xd4] sm:$0xf] }
 0x358   : > { %v11774_v42 = vrot.slane %v6475_v14, 11  ;;  %v7101_v19 = vor.u32 %v7100_v11, %v7097_v41  ;;  %v9185_v36 = vshll.u32 %v15671_v23, 16  ;;  %v7111_v5 = vor.u32 %v7110_v10, %v7106_v38  ;;  %v580_v61 = vld [vmem:[#allocation3 + $0xf4] sm:$0x8] }
 0x359   : > { %16905 = vst [vmem:[#allocation18_spill] sm:$0xff] %v15679_v46  ;;  %v7600_v44 = vsel %vm14006_vm9, %v11837_v63, %v7599_v50  ;;  %v7618_v17 = vrot.slane %v7616_v54, 7  ;;  %v7619_v16 = vshll.u32 %v7373_v53, 16  ;;  %v7627_v1 = vrot.slane %v7625_v2, 7  ;;  %v7376_v63 = vld [vmem:[#allocation3 + $0xf8] sm:$0xf] }
 0x35a   : > { %v6486_v39 = vsel %vm14006_vm9, %v11774_v42, %v6485_v33  ;;  %v11853_v25 = vcombine.low %v7600_v44, %v7609_v4  ;;  %v7102_v22 = vrot.slane %v7101_v19, 4  ;;  %v6859_v12 = vld [vmem:[#allocation3 + $0xc4] sm:$0x1]  ;;  %v7628_v56 = vshll.u32 %v7374_v7, 16  ;;  %v7377_v54 = vld [vmem:[#allocation3 + $0xfc] sm:$0xf] }
 0x35b   : > { %v11790_v51 = vcombine.low %v6486_v39, %v6495_v59  ;;  %v6502_v49 = vshrl.u32 %v6240_v32, 16  ;;  %v7112_v43 = vrot.slane %v7111_v5, 4  ;;  %v7114_v34 = vshll.u32 %v6859_v12, 16  ;;  %v6243_v2 = vld [vmem:[#allocation3 + $0xf8] sm:$0xf] }
 0x35c   : > { %10600 = vmatprep.mubr.bf16.mxu0 %v11853_v25  ;;  %v7623_v47 = vrot.slane %v7618_v17, 4  ;;  %v6505_v50 = vshll.u32 %v6240_v32, 16  ;;  %v7630_v28 = vor.u32 %v7628_v56, %v7627_v1  ;;  %v6511_v35 = vshrl.u32 %v6241_v57, 16 }
 0x35d   : > { %10448 = vmatmul.mubr.bf16.gmra.mrb[168].mxu1 %v11790_v51  ;;  %v6504_v27 = vrot.slane %v6502_v49, 7  ;;  %v6514_v20 = vshll.u32 %v6241_v57, 16  ;;  %v7107_v58 = vsel %vm14031_vm10, %v7102_v22, %v7106_v38  ;;  %v7116_v8 = vrot.slane %v7114_v34, 5  ;;  %v7372_v45 = vld [vmem:[#allocation3 + $0xe0] sm:$0x8] }
 0x35e   : > { %10455 = vmatprep.mubr.bf16.mxu1 %v13489_v60  ;;  %v7621_v33 = vor.u32 %v7619_v16, %v7618_v17  ;;  %v6239_v15 = vld [vmem:[#allocation3 + $0xe0] sm:$0x8]  ;;  %v629_v3 = vsel %vm13978_vm5, 0, %v628_v18  ;;  %v7611_v29 = vshrl.u32 %v7372_v45, 16  ;;  %v7631_v53 = vsel %vm14006_vm9, %v7623_v47, %v7630_v28  ;;  %v6244_v18 = vld [vmem:[#allocation3 + $0xfc] sm:$0xf] }
 0x35f   : > { %v6497_v9 = vshrl.u32 %v6239_v15, 16  ;;  %v6507_v4 = vor.u32 %v6505_v50, %v6504_v27  ;;  %630 = vst [vmem:[#allocation3 + $0xd8] sm:$0x1] %v629_v3  ;;  %v7117_v30 = vsel %vm14031_vm10, %v7112_v43, %v7116_v8  ;;  %v6509_v55 = vrot.slane %v6504_v27, 4  ;;  %v13491_v17 = vld [vmem:[#allocation3 + $0xf8] sm:$0xff]  }
 0x360   : > { %v6513_v21 = vrot.slane %v6511_v35, 7  ;;  %v7119_v6 = vshrl.u32 %v6860_v0, 16  ;;  %v11821_v14 = vcombine.low %v7107_v58, %v7117_v30  ;;  %v11838_v31 = vrot.slane %v7611_v29, 11  ;;  %v631_v47 = vld [vmem:[#allocation3 + $0xec] sm:$0x1] }
 0x361   : > { %v11775_v48 = vrot.slane %v6497_v9, 11  ;;  %v7122_v7 = vshll.u32 %v6860_v0, 16  ;;  %v7128_v11 = vshll.u32 %v6861_v62, 16  ;;  %v7132_v37 = vshrl.u32 %v6861_v62, 16  ;;  %v6863_v45 = vld [vmem:[#allocation3 + $0xe4] sm:$0xf] }
 0x362   : > { %v6516_v59 = vor.u32 %v6514_v20, %v6513_v21  ;;  %v7121_v41 = vrot.slane %v7119_v6, 4  ;;  %10601 = vmatmul.mubr.bf16.gmra.mrb[196].mxu0 %v11821_v14  ;;  %v7622_v42 = vsel %vm14006_vm9, %v11838_v31, %v7621_v33  ;;  %v581_v19 = vsel %vm13973_vm3, 0, %v580_v61  ;;  %v583_v9 = vld [vmem:[#allocation3 + $0x108] sm:$0x8] }
 0x363   : > { %v6508_v38 = vsel %vm14006_vm9, %v11775_v48, %v6507_v4  ;;  %v7124_v10 = vrot.slane %v7122_v7, 5  ;;  %v11854_v32 = vcombine.low %v7622_v42, %v7631_v53  ;;  %v7130_v39 = vrot.slane %v7128_v11, 5  ;;  %582 = vst [vmem:[#allocation3 + $0xf4] sm:$0x8] %v581_v19  ;;  %v6864_v53 = vld [vmem:[#allocation3 + $0xe8] sm:$0xf] }
 0x364   : > { %v6517_v44 = vsel %vm14006_vm9, %v6509_v55, %v6516_v59  ;;  %v7134_v5 = vrot.slane %v7132_v37, 4  ;;  %v9189_v25 = vshrl.u32 %v15671_v23, 16  ;;  %v7638_v22 = vshrl.u32 %v7376_v63, 16  ;;  %v7379_v59 = vld [vmem:[#allocation3 + $0x10c] sm:$0xf] }
 0x365   : > { %v11791_v51 = vcombine.low %v6508_v38, %v6517_v44  ;;  %v7125_v60 = vor.u32 %v7124_v10, %v7121_v41  ;;  %10608 = vmatprep.mubr.bf16.mxu0 %v11854_v32  ;;  %v7641_v16 = vshll.u32 %v7376_v63, 16  ;;  %v7647_v1 = vshrl.u32 %v7377_v54, 16  ;;  %v7380_v42 = vld [vmem:[#allocation3 + $0x110] sm:$0xf] }
 0x366   : > { %v6862_v57 = vld [vmem:[#allocation3 + $0xd8] sm:$0x1]  ;;  %v7135_v12 = vor.u32 %v7134_v5, %v7130_v39  ;;  %v6524_v56 = vshrl.u32 %v6243_v2, 16  ;;  %v7640_v43 = vrot.slane %v7638_v22, 7  ;;  %v7650_v34 = vshll.u32 %v7377_v54, 16 }
 0x367   : > { %10456 = vmatmul.mubr.bf16.gmra.mrb[172].mxu1 %v11791_v51  ;;  %v7126_v49 = vrot.slane %v7125_v60, 4  ;;  %v7138_v0 = vshll.u32 %v6862_v57, 16  ;;  %v7649_v28 = vrot.slane %v7647_v1, 7  ;;  %v6533_v35 = vshrl.u32 %v6244_v18, 16 }
 0x368   : > { %10463 = vmatprep.mubr.bf16.mxu1 %v13491_v17  ;;  %v7136_v50 = vrot.slane %v7135_v12, 4  ;;  %v6526_v27 = vrot.slane %v6524_v56, 7  ;;  %v7645_v58 = vrot.slane %v7640_v43, 4  ;;  %v6527_v8 = vshll.u32 %v6243_v2, 16  ;;  %v6246_v2 = vld [vmem:[#allocation3 + $0x10c] sm:$0xf] }
 0x369   : > { %v7131_v20 = vsel %vm14031_vm10, %v7126_v49, %v7130_v39  ;;  %v7140_v62 = vrot.slane %v7138_v0, 5  ;;  %v7643_v33 = vor.u32 %v7641_v16, %v7640_v43  ;;  %v7652_v15 = vor.u32 %v7650_v34, %v7649_v28  ;;  %v6247_v17 = vld [vmem:[#allocation3 + $0x110] sm:$0xf] }
 0x36a   : > { %v6531_v3 = vrot.slane %v6526_v27, 4  ;;  %v6535_v29 = vrot.slane %v6533_v35, 7  ;;  %v7375_v61 = vld [vmem:[#allocation3 + $0xf4] sm:$0x8]  ;;  %v6529_v55 = vor.u32 %v6527_v8, %v6526_v27  ;;  %v6536_v21 = vshll.u32 %v6244_v18, 16  ;;  %v13495_v49 = vld [vmem:[#allocation3 + $0x10c] sm:$0xff]  }
 0x36b   : > { %v7141_v4 = vsel %vm14031_vm10, %v7136_v50, %v7140_v62  ;;  %v6242_v30 = vld [vmem:[#allocation3 + $0xf4] sm:$0x8]  ;;  %v632_v6 = vsel %vm13978_vm5, 0, %v631_v47  ;;  %v7633_v31 = vshrl.u32 %v7375_v61, 16  ;;  %v7653_v48 = vsel %vm14006_vm9, %v7645_v58, %v7652_v15  ;;  %v634_v8 = vld [vmem:[#allocation3 + $0x100] sm:$0x1] }
 0x36c   : > { %v11822_v14 = vcombine.low %v7131_v20, %v7141_v4  ;;  %v6519_v7 = vshrl.u32 %v6242_v30, 16  ;;  %633 = vst [vmem:[#allocation3 + $0xec] sm:$0x1] %v632_v6  ;;  %v6538_v41 = vor.u32 %v6536_v21, %v6535_v29  ;;  %v7143_v11 = vshrl.u32 %v6863_v45, 16  ;;  %v6866_v15 = vld [vmem:[#allocation3 + $0xf8] sm:$0xf] }
 0x36d   : > { %v7146_v37 = vshll.u32 %v6863_v45, 16  ;;  %v7152_v63 = vshll.u32 %v6864_v53, 16  ;;  %v11839_v38 = vrot.slane %v7633_v31, 11  ;;  %v7156_v19 = vshrl.u32 %v6864_v53, 16  ;;  %v586_v31 = vld [vmem:[#allocation3 + $0x11c] sm:$0x8] }
 0x36e   : > { %10609 = vmatmul.mubr.bf16.gmra.mrb[200].mxu0 %v11822_v14  ;;  %v11776_v10 = vrot.slane %v6519_v7, 11  ;;  %v584_v54 = vsel %vm13973_vm3, 0, %v583_v9  ;;  %v6539_v32 = vsel %vm14006_vm9, %v6531_v3, %v6538_v41  ;;  %v7145_v44 = vrot.slane %v7143_v11, 4  ;;  %v6867_v3 = vld [vmem:[#allocation3 + $0xfc] sm:$0xf] }
 0x36f   : > { %v7148_v39 = vrot.slane %v7146_v37, 5  ;;  %v7154_v5 = vrot.slane %v7152_v63, 5  ;;  %585 = vst [vmem:[#allocation3 + $0x108] sm:$0x8] %v584_v54  ;;  %v7644_v18 = vsel %vm14006_vm9, %v11839_v38, %v7643_v33  ;;  %v7158_v60 = vrot.slane %v7156_v19, 4 }
 0x370   : > { %v6530_v51 = vsel %vm14006_vm9, %v11776_v10, %v6529_v55  ;;  %v7660_v22 = vshrl.u32 %v7379_v59, 16  ;;  %v15721_v57 = vrot.slane %v9185_v36, 5  ;;  %v11855_v12 = vcombine.low %v7644_v18, %v7653_v48  ;;  %v15729_v48 = vpop.f32.mrb[128].mxu1 }
 0x371   : > { %v11792_v16 = vcombine.low %v6530_v51, %v6539_v32  ;;  %v7149_v1 = vor.u32 %v7148_v39, %v7145_v44  ;;  %v15725_v56 = vrot.slane %v9189_v25, 4  ;;  %v7159_v0 = vor.u32 %v7158_v60, %v7154_v5  ;;  %v7382_v32 = vld [vmem:[#allocation3 + $0x120] sm:$0xf]  ;;  %v7383_v51 = vld [vmem:[#allocation3 + $0x124] sm:$0xf] }
 0x372   : > { %16906 = vst [vmem:[#allocation35_spill] sm:$0xff] %v15721_v57  ;;  %v7662_v43 = vrot.slane %v7660_v22, 7  ;;  %v7669_v34 = vshrl.u32 %v7380_v42, 16  ;;  %10616 = vmatprep.mubr.bf16.mxu0 %v11855_v12  ;;  %v7663_v28 = vshll.u32 %v7379_v59, 16  ;;  %v6546_v27 = vshrl.u32 %v6246_v2, 16 }
 0x373   : > { %16907 = vst [vmem:[#allocation36_spill] sm:$0xff] %v15725_v56  ;;  %10464 = vmatmul.mubr.bf16.gmra.mrb[176].mxu1 %v11792_v16  ;;  %v6865_v47 = vld [vmem:[#allocation3 + $0xec] sm:$0x1]  ;;  %v7150_v50 = vrot.slane %v7149_v1, 4  ;;  %v6555_v35 = vshrl.u32 %v6247_v17, 16  ;;  %v7160_v36 = vrot.slane %v7159_v0, 4 }
 0x374   : > { %10471 = vmatprep.mubr.bf16.mxu1 %v13495_v49  ;;  %v7162_v20 = vshll.u32 %v6865_v47, 16  ;;  %v7672_v62 = vshll.u32 %v7380_v42, 16  ;;  %v6549_v58 = vshll.u32 %v6246_v2, 16  ;;  %v7667_v23 = vrot.slane %v7662_v43, 4  ;;  %v6249_v60 = vld [vmem:[#allocation3 + $0x120] sm:$0xf] }
 0x375   : > { %v7671_v25 = vrot.slane %v7669_v34, 7  ;;  %v6548_v45 = vrot.slane %v6546_v27, 7  ;;  %v6557_v33 = vrot.slane %v6555_v35, 7  ;;  %v7155_v29 = vsel %vm14031_vm10, %v7150_v50, %v7154_v5  ;;  %v6250_v1 = vld [vmem:[#allocation3 + $0x124] sm:$0xf]  ;;  %v12686_v50 = vpop.f32.mrb[129].mxu1 }
 0x376   : > { %v7164_v53 = vrot.slane %v7162_v20, 5  ;;  %v7378_v9 = vld [vmem:[#allocation3 + $0x108] sm:$0x8]  ;;  %v7665_v4 = vor.u32 %v7663_v28, %v7662_v43  ;;  %v6558_v30 = vshll.u32 %v6247_v17, 16  ;;  %v635_v11 = vsel %vm13978_vm5, 0, %v634_v8  ;;  %v13497_v49 = vld [vmem:[#allocation3 + $0x120] sm:$0xff]  }
 0x377   : > { %v6245_v61 = vld [vmem:[#allocation3 + $0x108] sm:$0x8]  ;;  %v7655_v55 = vshrl.u32 %v7378_v9, 16  ;;  %v7674_v21 = vor.u32 %v7672_v62, %v7671_v25  ;;  %v6551_v14 = vor.u32 %v6549_v58, %v6548_v45  ;;  %v6553_v59 = vrot.slane %v6548_v45, 4  ;;  %636 = vst [vmem:[#allocation3 + $0x100] sm:$0x1] %v635_v11 }
 0x378   : > { %v6541_v6 = vshrl.u32 %v6245_v61, 16  ;;  %v7165_v7 = vsel %vm14031_vm10, %v7160_v36, %v7164_v53  ;;  %v6560_v41 = vor.u32 %v6558_v30, %v6557_v33  ;;  %v7167_v19 = vshrl.u32 %v6866_v15, 16  ;;  %v12688_v20 = vpop.f32.mrb[130].mxu1  ;;  %v637_v25 = vld [vmem:[#allocation3 + $0x114] sm:$0x1] }
 0x379   : > { %v11823_v37 = vcombine.low %v7155_v29, %v7165_v7  ;;  %v11840_v63 = vrot.slane %v7655_v55, 11  ;;  %v7675_v42 = vsel %vm14006_vm9, %v7667_v23, %v7674_v21  ;;  %v7170_v54 = vshll.u32 %v6866_v15, 16  ;;  %v12689_v45 = vpop.f32.mrb[131].mxu1  ;;  %v6869_v9 = vld [vmem:[#allocation3 + $0x10c] sm:$0xf] }
 0x37a   : > { %v11777_v38 = vrot.slane %v6541_v6, 11  ;;  %v6561_v10 = vsel %vm14006_vm9, %v6553_v59, %v6560_v41  ;;  %v7176_v2 = vshll.u32 %v6867_v3, 16  ;;  %v7180_v5 = vshrl.u32 %v6867_v3, 16  ;;  %v6870_v21 = vld [vmem:[#allocation3 + $0x110] sm:$0xf] }
 0x37b   : > { %10617 = vmatmul.mubr.bf16.gmra.mrb[204].mxu0 %v11823_v37  ;;  %v7666_v44 = vsel %vm14006_vm9, %v11840_v63, %v7665_v4  ;;  %v587_v18 = vsel %vm13973_vm3, 0, %v586_v31  ;;  %v7169_v12 = vrot.slane %v7167_v19, 4  ;;  %v7172_v16 = vrot.slane %v7170_v54, 5  ;;  %v8002_v56 = vld [vmem:[#allocation3 + $0x10c] sm:$0xf] }
 0x37c   : > { %v6552_v39 = vsel %vm14006_vm9, %v11777_v38, %v6551_v14  ;;  %v11856_v22 = vcombine.low %v7666_v44, %v7675_v42  ;;  %588 = vst [vmem:[#allocation3 + $0x11c] sm:$0x8] %v587_v18  ;;  %v7178_v0 = vrot.slane %v7176_v2, 5  ;;  %v7182_v43 = vrot.slane %v7180_v5, 4  ;;  %v589_v5 = vld [vmem:[#allocation3 + $0x130] sm:$0x8] }
 0x37d   : > { %v11793_v17 = vcombine.low %v6552_v39, %v6561_v10  ;;  %v7682_v34 = vshrl.u32 %v7382_v32, 16  ;;  %v7685_v47 = vshll.u32 %v7382_v32, 16  ;;  %v7173_v28 = vor.u32 %v7172_v16, %v7169_v12  ;;  %v6252_v12 = vld [vmem:[#allocation3 + $0x134] sm:$0xf] }
 0x37e   : > { %10624 = vmatprep.mubr.bf16.mxu0 %v11856_v22  ;;  %v7691_v27 = vshrl.u32 %v7383_v51, 16  ;;  %v7694_v35 = vshll.u32 %v7383_v51, 16  ;;  %v6568_v36 = vshrl.u32 %v6249_v60, 16  ;;  %v7183_v62 = vor.u32 %v7182_v43, %v7178_v0  ;;  %v6868_v33 = vld [vmem:[#allocation3 + $0x100] sm:$0x1] }
 0x37f   : > { %10472 = vmatmul.mubr.bf16.gmra.mrb[180].mxu1 %v11793_v17  ;;  %v7684_v58 = vrot.slane %v7682_v34, 7  ;;  %v6571_v8 = vshll.u32 %v6249_v60, 16  ;;  %v6577_v23 = vshrl.u32 %v6250_v1, 16  ;;  %v7174_v15 = vrot.slane %v7173_v28, 4  ;;  %v7386_v17 = vld [vmem:[#allocation3 + $0x138] sm:$0xf] }
 0x380   : > { %10479 = vmatprep.mubr.bf16.mxu1 %v13497_v49  ;;  %v7693_v3 = vrot.slane %v7691_v27, 7  ;;  %v6570_v29 = vrot.slane %v6568_v36, 7  ;;  %v6580_v53 = vshll.u32 %v6250_v1, 16  ;;  %v7184_v4 = vrot.slane %v7183_v62, 4  ;;  %v6253_v43 = vld [vmem:[#allocation3 + $0x138] sm:$0xf] }
 0x381   : > { %v7186_v61 = vshll.u32 %v6868_v33, 16  ;;  %v7687_v30 = vor.u32 %v7685_v47, %v7684_v58  ;;  %v7689_v55 = vrot.slane %v7684_v58, 4  ;;  %v7179_v6 = vsel %vm14031_vm10, %v7174_v15, %v7178_v0  ;;  %v13501_v62 = vld [vmem:[#allocation3 + $0x134] sm:$0xff]  }
 0x382   : > { %v7696_v14 = vor.u32 %v7694_v35, %v7693_v3  ;;  %v6573_v31 = vor.u32 %v6571_v8, %v6570_v29  ;;  %v6575_v7 = vrot.slane %v6570_v29, 4  ;;  %v6579_v37 = vrot.slane %v6577_v23, 7  ;;  %v640_v29 = vld [vmem:[#allocation3 + $0x128] sm:$0x1] }
 0x383   : > { %v7188_v59 = vrot.slane %v7186_v61, 5  ;;  %v7381_v41 = vld [vmem:[#allocation3 + $0x11c] sm:$0x8]  ;;  %v15748_v63 = vadd.f32 %v12686_v50, %v15729_v48  ;;  %v15750_v42 = vadd.f32 %v12689_v45, %v12688_v20  ;;  %v638_v54 = vsel %vm13978_vm5, 0, %v637_v25  ;;  %v7385_v48 = vld [vmem:[#allocation3 + $0x134] sm:$0xf] }
 0x384   : > { %v6248_v11 = vld [vmem:[#allocation3 + $0x11c] sm:$0x8]  ;;  %v7677_v38 = vshrl.u32 %v7381_v41, 16  ;;  %v7697_v10 = vsel %vm14006_vm9, %v7689_v55, %v7696_v14  ;;  %v6582_v32 = vor.u32 %v6580_v53, %v6579_v37  ;;  %639 = vst [vmem:[#allocation3 + $0x114] sm:$0x1] %v638_v54  ;;  %v7191_v44 = vshrl.u32 %v6869_v9, 16 }
 0x385   : > { %v6563_v19 = vshrl.u32 %v6248_v11, 16  ;;  %v7189_v2 = vsel %vm14031_vm10, %v7184_v4, %v7188_v59  ;;  %v7194_v39 = vshll.u32 %v6869_v9, 16  ;;  %v7200_v22 = vshll.u32 %v6870_v21, 16  ;;  %v6873_v37 = vld [vmem:[#allocation3 + $0x124] sm:$0xf] }
 0x386   : > { %v11824_v18 = vcombine.low %v7179_v6, %v7189_v2  ;;  %v11841_v51 = vrot.slane %v7677_v38, 11  ;;  %v6583_v16 = vsel %vm14006_vm9, %v6575_v7, %v6582_v32  ;;  %v7193_v1 = vrot.slane %v7191_v44, 4  ;;  %v7966_v2 = vld [vmem:[#allocation3 + $0x1c] sm:$0xf]  ;;  %v7967_v32 = vld [vmem:[#allocation3 + $0x20] sm:$0xf] }
 0x387   : > { %v11778_v60 = vrot.slane %v6563_v19, 11  ;;  %v7196_v49 = vrot.slane %v7194_v39, 5  ;;  %v7204_v0 = vshrl.u32 %v6870_v21, 16  ;;  %v7202_v50 = vrot.slane %v7200_v22, 5 }
 0x388   : > { %10625 = vmatmul.mubr.bf16.gmra.mrb[208].mxu0 %v11824_v18  ;;  %v7688_v34 = vsel %vm14006_vm9, %v11841_v51, %v7687_v30  ;;  %v590_v28 = vsel %vm13973_vm3, 0, %v589_v5  ;;  %v7704_v58 = vshrl.u32 %v7385_v48, 16  ;;  %v7707_v8 = vshll.u32 %v7385_v48, 16 }
 0x389   : > { %v6574_v47 = vsel %vm14006_vm9, %v11778_v60, %v6573_v31  ;;  %v11857_v27 = vcombine.low %v7688_v34, %v7697_v10  ;;  %v7197_v36 = vor.u32 %v7196_v49, %v7193_v1  ;;  %v7206_v20 = vrot.slane %v7204_v0, 4  ;;  %591 = vst [vmem:[#allocation3 + $0x130] sm:$0x8] %v590_v28  ;;  %v6872_v31 = vld [vmem:[#allocation3 + $0x120] sm:$0xf] }
 0x38a   : > { %v11794_v35 = vcombine.low %v6574_v47, %v6583_v16  ;;  %v7713_v23 = vshrl.u32 %v7386_v17, 16  ;;  %v7716_v25 = vshll.u32 %v7386_v17, 16  ;;  %v6590_v15 = vshrl.u32 %v6252_v12, 16 }
 0x38b   : > { %10632 = vmatprep.mubr.bf16.mxu0 %v11857_v27  ;;  %v7198_v45 = vrot.slane %v7197_v36, 4  ;;  %v7207_v33 = vor.u32 %v7206_v20, %v7202_v50  ;;  %v6593_v3 = vshll.u32 %v6252_v12, 16  ;;  %v6871_v53 = vld [vmem:[#allocation3 + $0x114] sm:$0x1]  ;;  %v7706_v9 = vrot.slane %v7704_v58, 7 }
 0x38c   : > { %10480 = vmatmul.mubr.bf16.gmra.mrb[184].mxu1 %v11794_v35  ;;  %v7715_v4 = vrot.slane %v7713_v23, 7  ;;  %v6599_v61 = vshrl.u32 %v6253_v43, 16  ;;  %v6602_v30 = vshll.u32 %v6253_v43, 16  ;;  %v7210_v6 = vshll.u32 %v6871_v53, 16  ;;  %v7389_v53 = vld [vmem:[#allocation3 + $0x14c] sm:$0xf] }
 0x38d   : > { %10487 = vmatprep.mubr.bf16.mxu1 %v13501_v62  ;;  %v7203_v55 = vsel %vm14031_vm10, %v7198_v45, %v7202_v50  ;;  %v7208_v21 = vrot.slane %v7207_v33, 4  ;;  %v6592_v14 = vrot.slane %v6590_v15, 7  ;;  %v7709_v7 = vor.u32 %v7707_v8, %v7706_v9  ;;  %v7968_v8 = vld [vmem:[#allocation3 + $0x24] sm:$0x1] }
 0x38e   : > { %v7711_v59 = vrot.slane %v7706_v9, 4  ;;  %v7718_v41 = vor.u32 %v7716_v25, %v7715_v4  ;;  %v6601_v11 = vrot.slane %v6599_v61, 7  ;;  %v7212_v38 = vrot.slane %v7210_v6, 5  ;;  %v592_v25 = vld [vmem:[#allocation3 + $0x144] sm:$0x8] }
 0x38f   : > { %v6595_v10 = vor.u32 %v6593_v3, %v6592_v14  ;;  %v6597_v19 = vrot.slane %v6592_v14, 4  ;;  %v641_v54 = vsel %vm13978_vm5, 0, %v640_v29  ;;  %v7215_v18 = vshrl.u32 %v6872_v31, 16  ;;  %v7388_v29 = vld [vmem:[#allocation3 + $0x148] sm:$0xf] }
 0x390   : > { %v7384_v44 = vld [vmem:[#allocation3 + $0x130] sm:$0x8]  ;;  %v7719_v39 = vsel %vm14006_vm9, %v7711_v59, %v7718_v41  ;;  %v6604_v48 = vor.u32 %v6602_v30, %v6601_v11  ;;  %642 = vst [vmem:[#allocation3 + $0x128] sm:$0x1] %v641_v54  ;;  %v7218_v51 = vshll.u32 %v6872_v31, 16  ;;  %v7213_v60 = vsel %vm14031_vm10, %v7208_v21, %v7212_v38 }
 0x391   : > { %v6251_v5 = vld [vmem:[#allocation3 + $0x130] sm:$0x8]  ;;  %v7699_v22 = vshrl.u32 %v7384_v44, 16  ;;  %v7224_v12 = vshll.u32 %v6873_v37, 16  ;;  %v11825_v16 = vcombine.low %v7203_v55, %v7213_v60  ;;  %v7217_v49 = vrot.slane %v7215_v18, 4 }
 0x392   : > { %v6585_v17 = vshrl.u32 %v6251_v5, 16  ;;  %v6605_v1 = vsel %vm14006_vm9, %v6597_v19, %v6604_v48  ;;  %v7220_v0 = vrot.slane %v7218_v51, 5  ;;  %v7228_v50 = vshrl.u32 %v6873_v37, 16  ;;  %v643_v37 = vld [vmem:[#allocation3 + $0x13c] sm:$0x1] }
 0x393   : > { %v11842_v43 = vrot.slane %v7699_v22, 11  ;;  %v7226_v47 = vrot.slane %v7224_v12, 5  ;;  %10633 = vmatmul.mubr.bf16.gmra.mrb[212].mxu0 %v11825_v16  ;;  %v8015_v27 = vshrl.u32 %v7966_v2, 16  ;;  %v8018_v35 = vshll.u32 %v7966_v2, 16  ;;  %v6875_v38 = vld [vmem:[#allocation3 + $0x134] sm:$0xf] }
 0x394   : > { %v11779_v34 = vrot.slane %v6585_v17, 11  ;;  %v7221_v28 = vor.u32 %v7220_v0, %v7217_v49  ;;  %v8024_v36 = vshll.u32 %v7967_v32, 16  ;;  %v7230_v58 = vrot.slane %v7228_v50, 4  ;;  %v7969_v44 = vld [vmem:[#allocation3 + $0x30] sm:$0xf] }
 0x395   : > { %v7710_v20 = vsel %vm14006_vm9, %v11842_v43, %v7709_v7  ;;  %v8028_v23 = vshrl.u32 %v7967_v32, 16  ;;  %v8017_v3 = vrot.slane %v8015_v27, 4  ;;  %v8020_v61 = vrot.slane %v8018_v35, 5  ;;  %v6876_v32 = vld [vmem:[#allocation3 + $0x138] sm:$0xf]  ;;  %v13507_v27 = vld [vmem:[#allocation3 + $0x1c] sm:$0xff]  }
 0x396   : > { %v6596_v62 = vsel %vm14006_vm9, %v11779_v34, %v6595_v10  ;;  %v11858_v45 = vcombine.low %v7710_v20, %v7719_v39  ;;  %v7222_v15 = vrot.slane %v7221_v28, 4  ;;  %v7231_v4 = vor.u32 %v7230_v58, %v7226_v47  ;;  %v7970_v0 = vld [vmem:[#allocation3 + $0x34] sm:$0xf]  ;;  %v7971_v28 = vld [vmem:[#allocation3 + $0x38] sm:$0x1] }
 0x397   : > { %v11795_v33 = vcombine.low %v6596_v62, %v6605_v1  ;;  %v6874_v9 = vld [vmem:[#allocation3 + $0x128] sm:$0x1]  ;;  %v8026_v30 = vrot.slane %v8024_v36, 5  ;;  %v8030_v55 = vrot.slane %v8028_v23, 4  ;;  %v8034_v14 = vshll.u32 %v7968_v8, 16  ;;  %v13517_v58 = vld [vmem:[#allocation10 + $0x208] sm:$0xff]  }
 0x398   : > { %10640 = vmatprep.mubr.bf16.mxu0 %v11858_v45  ;;  %v7227_v21 = vsel %vm14031_vm10, %v7222_v15, %v7226_v47  ;;  %v7234_v6 = vshll.u32 %v6874_v9, 16  ;;  %v593_v31 = vsel %vm13973_vm3, 0, %v592_v25  ;;  %v7232_v7 = vrot.slane %v7231_v4, 4  ;;  %v7972_v9 = vld [vmem:[#allocation3 + $0x44] sm:$0xf] }
 0x399   : > { %10488 = vmatmul.mubr.bf16.gmra.mrb[188].mxu1 %v11795_v33  ;;  %v8021_v59 = vor.u32 %v8020_v61, %v8017_v3  ;;  %v8031_v41 = vor.u32 %v8030_v55, %v8026_v30  ;;  %594 = vst [vmem:[#allocation3 + $0x144] sm:$0x8] %v593_v31  ;;  %v7726_v11 = vshrl.u32 %v7388_v29, 16  ;;  %v8036_v19 = vrot.slane %v8034_v14, 5 }
 0x39a   : > { %v7236_v10 = vrot.slane %v7234_v6, 5  ;;  %v7729_v54 = vshll.u32 %v7388_v29, 16  ;;  %v7735_v2 = vshrl.u32 %v7389_v53, 16  ;;  %v7738_v18 = vshll.u32 %v7389_v53, 16 }
 0x39b   : > { %v8022_v39 = vrot.slane %v8021_v59, 4  ;;  %v8032_v5 = vrot.slane %v8031_v41, 4  ;;  %v7728_v48 = vrot.slane %v7726_v11, 7  ;;  %v644_v22 = vsel %vm13978_vm5, 0, %v643_v37  ;;  %v13522_v59 = vld [vmem:[#allocation10 + $0x210] sm:$0xff]  }
 0x39c   : > { %v7237_v51 = vsel %vm14031_vm10, %v7232_v7, %v7236_v10  ;;  %v7737_v60 = vrot.slane %v7735_v2, 7  ;;  %v7239_v17 = vshrl.u32 %v6875_v38, 16  ;;  %645 = vst [vmem:[#allocation3 + $0x13c] sm:$0x1] %v644_v22  ;;  %v7242_v35 = vshll.u32 %v6875_v38, 16 }
 0x39d   : > { %v11826_v12 = vcombine.low %v7227_v21, %v7237_v51  ;;  %v8027_v16 = vsel %vm14031_vm10, %v8022_v39, %v8026_v30  ;;  %v8037_v1 = vsel %vm14031_vm10, %v8032_v5, %v8036_v19  ;;  %v7731_v49 = vor.u32 %v7729_v54, %v7728_v48  ;;  %v13559_v21 = vld [vmem:[#allocation10 + $0x200] sm:$0xff]  }
 0x39e   : > { %v11876_v43 = vcombine.low %v8027_v16, %v8037_v1  ;;  %v7733_v34 = vrot.slane %v7728_v48, 4  ;;  %v7740_v47 = vor.u32 %v7738_v18, %v7737_v60  ;;  %v7241_v50 = vrot.slane %v7239_v17, 4  ;;  %v7974_v51 = vld [vmem:[#allocation3 + $0x4c] sm:$0x1]  ;;  %v8479_v16 = vld [vmem:[#allocation3 + $0x2c] sm:$0x8] }
 0x39f   : > { %10641 = vmatmul.mubr.bf16.gmra.mrb[216].mxu0 %v11826_v12  ;;  %v7248_v36 = vshll.u32 %v6876_v32, 16  ;;  %v7252_v20 = vshrl.u32 %v6876_v32, 16  ;;  %v8039_v62 = vshrl.u32 %v7969_v44, 16  ;;  %v8042_v25 = vshll.u32 %v7969_v44, 16  ;;  %v7973_v44 = vld [vmem:[#allocation3 + $0x48] sm:$0xf] }
 0x3a0   : > { %10689 = vmatprep.mubr.bf16.mxu1 %v11876_v43  ;;  %v7387_v8 = vld [vmem:[#allocation3 + $0x144] sm:$0x8]  ;;  %v7741_v23 = vsel %vm14006_vm9, %v7733_v34, %v7740_v47  ;;  %v8048_v45 = vshll.u32 %v7970_v0, 16  ;;  %v8052_v33 = vshrl.u32 %v7970_v0, 16  ;;  %v7244_v3 = vrot.slane %v7242_v35, 5 }
 0x3a1   : > { %v7721_v15 = vshrl.u32 %v7387_v8, 16  ;;  %10690 = vmatmul.mubr.bf16.vlgmr.msra.gmra.mrb[192].mxu1 %v13507_v27  ;;  %v7250_v29 = vrot.slane %v7248_v36, 5  ;;  %v7254_v53 = vrot.slane %v7252_v20, 4  ;;  %v8041_v4 = vrot.slane %v8039_v62, 4  ;;  %v13527_v1 = vld [vmem:[#allocation10 + $0x218] sm:$0xff]  }
 0x3a2   : > { %v8044_v61 = vrot.slane %v8042_v25, 5  ;;  %v8050_v30 = vrot.slane %v8048_v45, 5  ;;  %v8054_v55 = vrot.slane %v8052_v33, 4  ;;  %13190 = vmatpush3.bf16.msra.mxu1 %v13559_v21  ;;  %v7245_v14 = vor.u32 %v7244_v3, %v7241_v50  ;;  %v8480_v47 = vld [vmem:[#allocation3 + $0x30] sm:$0xf] }
 0x3a3   : > { %v11843_v6 = vrot.slane %v7721_v15, 11  ;;  %v7255_v31 = vor.u32 %v7254_v53, %v7250_v29  ;;  %v8058_v7 = vshll.u32 %v7971_v28, 16  ;;  %13191 = vmatprep.subr.bf16.mxu1 %v13517_v58  ;;  %v6877_v41 = vld [vmem:[#allocation3 + $0x13c] sm:$0x1]  ;;  %v8063_v38 = vshrl.u32 %v7972_v9, 16  ;;  %v13511_v33 = vld [vmem:[#allocation3 + $0x30] sm:$0xff]  }
 0x3a4   : > { %v8045_v11 = vor.u32 %v8044_v61, %v8041_v4  ;;  %v8055_v37 = vor.u32 %v8054_v55, %v8050_v30  ;;  %v8066_v10 = vshll.u32 %v7972_v9, 16  ;;  %v7246_v54 = vrot.slane %v7245_v14, 4  ;;  %v8481_v36 = vld [vmem:[#allocation3 + $0x34] sm:$0xf]  ;;  %v7975_v20 = vld [vmem:[#allocation3 + $0x58] sm:$0xf] }
 0x3a5   : > { %v7732_v19 = vsel %vm14006_vm9, %v11843_v6, %v7731_v49  ;;  %v7256_v2 = vrot.slane %v7255_v31, 4  ;;  %v7258_v32 = vshll.u32 %v6877_v41, 16  ;;  %v8060_v18 = vrot.slane %v8058_v7, 5  ;;  %v7976_v45 = vld [vmem:[#allocation3 + $0x5c] sm:$0xf]  ;;  %v13532_v9 = vld [vmem:[#allocation10 + $0x220] sm:$0xff]  }
 0x3a6   : > { %v11859_v39 = vcombine.low %v7732_v19, %v7741_v23  ;;  %v8046_v5 = vrot.slane %v8045_v11, 4  ;;  %v8056_v48 = vrot.slane %v8055_v37, 4  ;;  %13192 = vmatpush3.bf16.msra.mxu1 %v13517_v58  ;;  %v7251_v60 = vsel %vm14031_vm10, %v7246_v54, %v7250_v29  ;;  %v13514_v58 = vld [vmem:[#allocation3 + $0x30] sm:$0xff]   ;;  %v8483_v7 = vld [vmem:[#allocation3 + $0x44] sm:$0xf] }
 0x3a7   : > { %v7260_v22 = vrot.slane %v7258_v32, 5  ;;  %v8065_v17 = vrot.slane %v8063_v38, 4  ;;  %v8068_v12 = vrot.slane %v8066_v10, 5  ;;  %13193 = vmatprep.subr.bf16.mxu1 %v13522_v59  ;;  %v8072_v43 = vshll.u32 %v7973_v44, 16  ;;  %v7977_v11 = vld [vmem:[#allocation3 + $0x60] sm:$0x1] }
 0x3a8   : > { %10648 = vmatprep.mubr.bf16.mxu0 %v11859_v39  ;;  %v8051_v49 = vsel %vm14031_vm10, %v8046_v5, %v8050_v30  ;;  %v8061_v0 = vsel %vm14031_vm10, %v8056_v48, %v8060_v18  ;;  %v8076_v34 = vshrl.u32 %v7973_v44, 16  ;;  %v8082_v35 = vshll.u32 %v7974_v51, 16  ;;  %v8482_v32 = vld [vmem:[#allocation3 + $0x40] sm:$0x8]  ;;  %v13537_v44 = vld [vmem:[#allocation10 + $0x228] sm:$0xff]  }
 0x3a9   : > { %v7261_v50 = vsel %vm14031_vm10, %v7256_v2, %v7260_v22  ;;  %v11877_v28 = vcombine.low %v8051_v49, %v8061_v0  ;;  %v8069_v27 = vor.u32 %v8068_v12, %v8065_v17  ;;  %v8074_v8 = vrot.slane %v8072_v43, 5  ;;  %v13516_v0 = vld [vmem:[#allocation3 + $0x44] sm:$0xff]  }
 0x3aa   : > { %v11827_v62 = vcombine.low %v7251_v60, %v7261_v50  ;;  %v8078_v23 = vrot.slane %v8076_v34, 4  ;;  %v8528_v25 = vshrl.u32 %v8479_v16, 16  ;;  %13194 = vmatpush3.bf16.msra.mxu1 %v13522_v59  ;;  %v8084_v3 = vrot.slane %v8082_v35, 5  ;;  %v8484_v16 = vld [vmem:[#allocation3 + $0x48] sm:$0xf] }
 0x3ab   : > { %10697 = vmatprep.mubr.bf16.mxu1 %v11877_v28  ;;  %v8070_v15 = vrot.slane %v8069_v27, 4  ;;  %v8533_v29 = vshrl.u32 %v8480_v47, 16  ;;  %v8536_v53 = vshll.u32 %v8480_v47, 16  ;;  %13195 = vmatprep.subr.bf16.mxu1 %v13527_v1  ;;  %v8542_v30 = vshrl.u32 %v8481_v36, 16  ;;  %v7978_v50 = vld [vmem:[#allocation3 + $0x6c] sm:$0xf] }
 0x3ac   : > { %10649 = vmatmul.mubr.bf16.gmra.mrb[220].mxu0 %v11827_v62  ;;  %10698 = vmatmul.mubr.bf16.gmra.mrb[196].mxu1 %v13514_v58  ;;  %v8079_v4 = vor.u32 %v8078_v23, %v8074_v8  ;;  %v11892_v61 = vrot.slane %v8528_v25, 11  ;;  %v8545_v55 = vshll.u32 %v8481_v36, 16  ;;  %v8087_v14 = vshrl.u32 %v7975_v20, 16  ;;  %v13515_v35 = vld [vmem:[#allocation3 + $0x44] sm:$0xff]  }
 0x3ad   : > { %10850 = vmatprep.mubr.bf16.mxu0 %v13511_v33  ;;  %v8075_v21 = vsel %vm14031_vm10, %v8070_v15, %v8074_v8  ;;  %v8535_v6 = vrot.slane %v8533_v29, 7  ;;  %v8090_v31 = vshll.u32 %v7975_v20, 16  ;;  %v8544_v41 = vrot.slane %v8542_v30, 7  ;;  %v13542_v8 = vld [vmem:[#allocation10 + $0x230] sm:$0xff]   ;;  %v7979_v15 = vld [vmem:[#allocation3 + $0x70] sm:$0xf] }
 0x3ae   : > { %v8080_v59 = vrot.slane %v8079_v4, 4  ;;  %v8096_v37 = vshll.u32 %v7976_v45, 16  ;;  %v8100_v38 = vshrl.u32 %v7976_v45, 16  ;;  %13196 = vmatpush3.bf16.msra.mxu1 %v13527_v1  ;;  %v8089_v54 = vrot.slane %v8087_v14, 4  ;;  %v8486_v14 = vld [vmem:[#allocation3 + $0x58] sm:$0xf] }
 0x3af   : > { %v8538_v10 = vor.u32 %v8536_v53, %v8535_v6  ;;  %v8540_v19 = vrot.slane %v8535_v6, 4  ;;  %v8092_v2 = vrot.slane %v8090_v31, 5  ;;  %13197 = vmatprep.subr.bf16.mxu1 %v13532_v9  ;;  %v8547_v5 = vor.u32 %v8545_v55, %v8544_v41  ;;  %v7980_v53 = vld [vmem:[#allocation3 + $0x74] sm:$0x1]  ;;  %v8485_v6 = vld [vmem:[#allocation3 + $0x54] sm:$0x8] }
 0x3b0   : > { %v8085_v39 = vsel %vm14031_vm10, %v8080_v59, %v8084_v3  ;;  %v8098_v48 = vrot.slane %v8096_v37, 5  ;;  %v8102_v18 = vrot.slane %v8100_v38, 4  ;;  %v15808_v51 = vpop.f32.mrb[132].mxu1  ;;  %v8106_v12 = vshll.u32 %v7977_v11, 16  ;;  %v13547_v11 = vld [vmem:[#allocation10 + $0x238] sm:$0xff]  }
 0x3b1   : > { %v11878_v60 = vcombine.low %v8075_v21, %v8085_v39  ;;  %v8539_v22 = vsel %vm14006_vm9, %v11892_v61, %v8538_v10  ;;  %v8093_v17 = vor.u32 %v8092_v2, %v8089_v54  ;;  %v15812_v1 = vpop.f32.mrb[133].mxu1  ;;  %v8548_v49 = vsel %vm14006_vm9, %v8540_v19, %v8547_v5  ;;  %v8487_v54 = vld [vmem:[#allocation3 + $0x5c] sm:$0xf] }
 0x3b2   : > { %v8103_v43 = vor.u32 %v8102_v18, %v8098_v48  ;;  %v8550_v34 = vshrl.u32 %v8482_v32, 16  ;;  %v8555_v47 = vshrl.u32 %v8483_v7, 16  ;;  %13198 = vmatpush3.bf16.msra.mxu1 %v13532_v9  ;;  %v15816_v28 = vpop.f32.mrb[134].mxu1  ;;  %v11908_v27 = vcombine.low %v8539_v22, %v8548_v49  ;;  %v13518_v18 = vld [vmem:[#allocation3 + $0x58] sm:$0xff]  }
 0x3b3   : > { %10705 = vmatprep.mubr.bf16.mxu1 %v11878_v60  ;;  %v8094_v36 = vrot.slane %v8093_v17, 4  ;;  %v8108_v20 = vrot.slane %v8106_v12, 5  ;;  %v8558_v62 = vshll.u32 %v8483_v7, 16  ;;  %13199 = vmatprep.subr.bf16.mxu1 %v13537_v44  ;;  %v15818_v58 = vpop.f32.mrb[135].mxu1  ;;  %v8564_v33 = vshrl.u32 %v8484_v16, 16  ;;  %v13519_v60 = vld [vmem:[#allocation3 + $0x58] sm:$0xff]  }
 0x3b4   : > { %10706 = vmatmul.mubr.bf16.gmra.mrb[200].mxu1 %v13516_v0  ;;  %v8104_v23 = vrot.slane %v8103_v43, 4  ;;  %v11893_v25 = vrot.slane %v8550_v34, 11  ;;  %v8557_v45 = vrot.slane %v8555_v47, 7  ;;  %10851 = vmatmul.mubr.bf16.vlgmr.msra.gmra.mrb[224].mxu0 %v11908_v27  ;;  %v8567_v29 = vshll.u32 %v8484_v16, 16  ;;  %v7982_v47 = vld [vmem:[#allocation3 + $0x84] sm:$0xf] }
 0x3b5   : > { %v8099_v3 = vsel %vm14031_vm10, %v8094_v36, %v8098_v48  ;;  %v8111_v9 = vshrl.u32 %v7978_v50, 16  ;;  %v8114_v4 = vshll.u32 %v7978_v50, 16  ;;  %10858 = vmatprep.mubr.bf16.mxu0 %v13515_v35  ;;  %v8566_v21 = vrot.slane %v8564_v33, 7  ;;  %v7981_v48 = vld [vmem:[#allocation3 + $0x80] sm:$0xf] }
 0x3b6   : > { %v8109_v61 = vsel %vm14031_vm10, %v8104_v23, %v8108_v20  ;;  %v8560_v30 = vor.u32 %v8558_v62, %v8557_v45  ;;  %v8562_v55 = vrot.slane %v8557_v45, 4  ;;  %13200 = vmatpush3.bf16.msra.mxu1 %v13537_v44  ;;  %v8120_v41 = vshll.u32 %v7979_v15, 16  ;;  %v7983_v20 = vld [vmem:[#allocation3 + $0x88] sm:$0x1] }
 0x3b7   : > { %v11879_v31 = vcombine.low %v8099_v3, %v8109_v61  ;;  %v8113_v7 = vrot.slane %v8111_v9, 4  ;;  %v8116_v59 = vrot.slane %v8114_v4, 5  ;;  %13201 = vmatprep.subr.bf16.mxu1 %v13542_v8  ;;  %v8569_v38 = vor.u32 %v8567_v29, %v8566_v21 }
 0x3b8   : > { %v8561_v37 = vsel %vm14006_vm9, %v11893_v25, %v8560_v30  ;;  %v8124_v10 = vshrl.u32 %v7979_v15, 16  ;;  %v8130_v19 = vshll.u32 %v7980_v53, 16  ;;  %v8122_v32 = vrot.slane %v8120_v41, 5  ;;  %v8488_v15 = vld [vmem:[#allocation3 + $0x68] sm:$0x8] }
 0x3b9   : > { %10713 = vmatprep.mubr.bf16.mxu1 %v11879_v31  ;;  %v8117_v2 = vor.u32 %v8116_v59, %v8113_v7  ;;  %v8572_v39 = vshrl.u32 %v8485_v6, 16  ;;  %v8577_v5 = vshrl.u32 %v8486_v14, 16  ;;  %v8570_v44 = vsel %vm14006_vm9, %v8562_v55, %v8569_v38  ;;  %v8489_v6 = vld [vmem:[#allocation3 + $0x6c] sm:$0xf]  ;;  %v8490_v59 = vld [vmem:[#allocation3 + $0x70] sm:$0xf] }
 0x3ba   : > { %v8126_v22 = vrot.slane %v8124_v10, 4  ;;  %v8132_v17 = vrot.slane %v8130_v19, 5  ;;  %v8580_v12 = vshll.u32 %v8486_v14, 16  ;;  %v15828_v16 = vpop.f32.mrb[160].mxu0  ;;  %13202 = vmatpush3.bf16.msra.mxu1 %v13542_v8  ;;  %v11909_v49 = vcombine.low %v8561_v37, %v8570_v44 }
 0x3bb   : > { %v8118_v0 = vrot.slane %v8117_v2, 4  ;;  %v11894_v43 = vrot.slane %v8572_v39, 11  ;;  %v8579_v34 = vrot.slane %v8577_v5, 7  ;;  %v15830_v50 = vpop.f32.mrb[161].mxu0  ;;  %13203 = vmatprep.subr.bf16.mxu1 %v13547_v11  ;;  %v8586_v35 = vshrl.u32 %v8487_v54, 16  ;;  %v13521_v2 = vld [vmem:[#allocation3 + $0x6c] sm:$0xff]  }
 0x3bc   : > { %10714 = vmatmul.mubr.bf16.gmra.mrb[204].mxu1 %v13519_v60  ;;  %v8127_v27 = vor.u32 %v8126_v22, %v8122_v32  ;;  %v8589_v36 = vshll.u32 %v8487_v54, 16  ;;  %v8135_v62 = vshrl.u32 %v7981_v48, 16  ;;  %v15832_v23 = vpop.f32.mrb[162].mxu0  ;;  %10859 = vmatmul.mubr.bf16.gmra.mrb[228].mxu0 %v11909_v49  ;;  %v8138_v33 = vshll.u32 %v7981_v48, 16  ;;  %v7984_v54 = vld [vmem:[#allocation3 + $0x94] sm:$0xf] }
 0x3bd   : > { %v8123_v8 = vsel %vm14031_vm10, %v8118_v0, %v8122_v32  ;;  %v8582_v25 = vor.u32 %v8580_v12, %v8579_v34  ;;  %v8584_v45 = vrot.slane %v8579_v34, 4  ;;  %v15836_v3 = vpop.f32.mrb[163].mxu0  ;;  %10866 = vmatprep.mubr.bf16.mxu0 %v13518_v18  ;;  %v8588_v53 = vrot.slane %v8586_v35, 7  ;;  %v7985_v48 = vld [vmem:[#allocation3 + $0x98] sm:$0xf]  ;;  %v13520_v18 = vld [vmem:[#allocation3 + $0x6c] sm:$0xff]  }
 0x3be   : > { %v8128_v29 = vrot.slane %v8127_v27, 4  ;;  %v8137_v9 = vrot.slane %v8135_v62, 4  ;;  %v8144_v4 = vshll.u32 %v7982_v47, 16  ;;  %13204 = vmatpush3.bf16.msra.mxu1 %v13547_v11  ;;  %v8140_v30 = vrot.slane %v8138_v33, 5  ;;  %v8491_v34 = vld [vmem:[#allocation3 + $0x7c] sm:$0x8] }
 0x3bf   : > { %v8583_v61 = vsel %vm14006_vm9, %v11894_v43, %v8582_v25  ;;  %v8148_v55 = vshrl.u32 %v7982_v47, 16  ;;  %v8154_v21 = vshll.u32 %v7983_v20, 16  ;;  %v8591_v31 = vor.u32 %v8589_v36, %v8588_v53  ;;  %v7986_v36 = vld [vmem:[#allocation3 + $0x9c] sm:$0x1]  ;;  %v8492_v33 = vld [vmem:[#allocation3 + $0x80] sm:$0xf] }
 0x3c0   : > { %v8133_v14 = vsel %vm14031_vm10, %v8128_v29, %v8132_v17  ;;  %v8146_v7 = vrot.slane %v8144_v4, 5  ;;  %v8594_v41 = vshrl.u32 %v8488_v15, 16  ;;  %v8141_v38 = vor.u32 %v8140_v30, %v8137_v9 }
 0x3c1   : > { %v11880_v37 = vcombine.low %v8123_v8, %v8133_v14  ;;  %v8150_v10 = vrot.slane %v8148_v55, 4  ;;  %v8156_v19 = vrot.slane %v8154_v21, 5  ;;  %v8592_v11 = vsel %vm14006_vm9, %v8584_v45, %v8591_v31  ;;  %v8493_v21 = vld [vmem:[#allocation3 + $0x84] sm:$0xf] }
 0x3c2   : > { %v11895_v32 = vrot.slane %v8594_v41, 11  ;;  %v8599_v39 = vshrl.u32 %v8489_v6, 16  ;;  %v8602_v5 = vshll.u32 %v8489_v6, 16  ;;  %v11910_v44 = vcombine.low %v8583_v61, %v8592_v11 }
 0x3c3   : > { %10721 = vmatprep.mubr.bf16.mxu1 %v11880_v37  ;;  %v8142_v60 = vrot.slane %v8141_v38, 4  ;;  %v8151_v22 = vor.u32 %v8150_v10, %v8146_v7  ;;  %v8608_v17 = vshrl.u32 %v8490_v59, 16  ;;  %v8611_v49 = vshll.u32 %v8490_v59, 16  ;;  %v7987_v59 = vld [vmem:[#allocation3 + $0xa8] sm:$0xf]  ;;  %v13523_v38 = vld [vmem:[#allocation3 + $0x80] sm:$0xff]  }
 0x3c4   : > { %10722 = vmatmul.mubr.bf16.gmra.mrb[208].mxu1 %v13521_v2  ;;  %v8601_v12 = vrot.slane %v8599_v39, 7  ;;  %v8159_v0 = vshrl.u32 %v7984_v54, 16  ;;  %v8162_v43 = vshll.u32 %v7984_v54, 16  ;;  %10867 = vmatmul.mubr.bf16.gmra.mrb[232].mxu0 %v11910_v44  ;;  %v8168_v20 = vshll.u32 %v7985_v48, 16  ;;  %v13524_v10 = vld [vmem:[#allocation3 + $0x80] sm:$0xff]  }
 0x3c5   : > { %v8147_v47 = vsel %vm14031_vm10, %v8142_v60, %v8146_v7  ;;  %v8152_v27 = vrot.slane %v8151_v22, 4  ;;  %v8610_v35 = vrot.slane %v8608_v17, 7  ;;  %10874 = vmatprep.mubr.bf16.mxu0 %v13520_v18  ;;  %v8172_v9 = vshrl.u32 %v7985_v48, 16  ;;  %v7988_v44 = vld [vmem:[#allocation3 + $0xac] sm:$0xf] }
 0x3c6   : > { %v8604_v62 = vor.u32 %v8602_v5, %v8601_v12  ;;  %v8606_v8 = vrot.slane %v8601_v12, 4  ;;  %v8161_v25 = vrot.slane %v8159_v0, 4  ;;  %v8164_v45 = vrot.slane %v8162_v43, 5  ;;  %v7989_v17 = vld [vmem:[#allocation3 + $0xb0] sm:$0x1] }
 0x3c7   : > { %v8157_v15 = vsel %vm14031_vm10, %v8152_v27, %v8156_v19  ;;  %v8613_v29 = vor.u32 %v8611_v49, %v8610_v35  ;;  %v8170_v53 = vrot.slane %v8168_v20, 5  ;;  %v8178_v55 = vshll.u32 %v7986_v36, 16  ;;  %v8495_v35 = vld [vmem:[#allocation3 + $0x94] sm:$0xf] }
 0x3c8   : > { %v11881_v4 = vcombine.low %v8147_v47, %v8157_v15  ;;  %v8605_v61 = vsel %vm14006_vm9, %v11895_v32, %v8604_v62  ;;  %v8165_v30 = vor.u32 %v8164_v45, %v8161_v25  ;;  %v8174_v14 = vrot.slane %v8172_v9, 4  ;;  %v15852_v41 = vpop.f32.mrb[136].mxu1  ;;  %v8494_v25 = vld [vmem:[#allocation3 + $0x90] sm:$0x8] }
 0x3c9   : > { %v8614_v6 = vsel %vm14006_vm9, %v8606_v8, %v8613_v29  ;;  %v8616_v31 = vshrl.u32 %v8491_v34, 16  ;;  %v8621_v7 = vshrl.u32 %v8492_v33, 16  ;;  %v8180_v54 = vrot.slane %v8178_v55, 5  ;;  %v15854_v2 = vpop.f32.mrb[137].mxu1 }
 0x3ca   : > { %10729 = vmatprep.mubr.bf16.mxu1 %v11881_v4  ;;  %v11911_v37 = vcombine.low %v8605_v61, %v8614_v6  ;;  %v8166_v19 = vrot.slane %v8165_v30, 4  ;;  %v8624_v11 = vshll.u32 %v8492_v33, 16  ;;  %v8175_v32 = vor.u32 %v8174_v14, %v8170_v53  ;;  %v15856_v18 = vpop.f32.mrb[138].mxu1  ;;  %v8496_v30 = vld [vmem:[#allocation3 + $0x98] sm:$0xf] }
 0x3cb   : > { %v11896_v39 = vrot.slane %v8616_v31, 11  ;;  %v8623_v5 = vrot.slane %v8621_v7, 7  ;;  %v8630_v48 = vshrl.u32 %v8493_v21, 16  ;;  %v8633_v22 = vshll.u32 %v8493_v21, 16  ;;  %v15860_v0 = vpop.f32.mrb[139].mxu1 }
 0x3cc   : > { %10730 = vmatmul.mubr.bf16.gmra.mrb[212].mxu1 %v13524_v10  ;;  %v8171_v60 = vsel %vm14031_vm10, %v8166_v19, %v8170_v53  ;;  %v8183_v12 = vshrl.u32 %v7987_v59, 16  ;;  %v8186_v49 = vshll.u32 %v7987_v59, 16  ;;  %10875 = vmatmul.mubr.bf16.gmra.mrb[236].mxu0 %v11911_v37  ;;  %v8176_v43 = vrot.slane %v8175_v32, 4  ;;  %v7990_v7 = vld [vmem:[#allocation3 + $0xbc] sm:$0xf] }
 0x3cd   : > { %v8626_v34 = vor.u32 %v8624_v11, %v8623_v5  ;;  %v8628_v47 = vrot.slane %v8623_v5, 4  ;;  %v8632_v27 = vrot.slane %v8630_v48, 7  ;;  %10882 = vmatprep.mubr.bf16.mxu0 %v13523_v38  ;;  %v8192_v62 = vshll.u32 %v7988_v44, 16  ;;  %v13526_v38 = vld [vmem:[#allocation3 + $0x94] sm:$0xff]   ;;  %v7991_v11 = vld [vmem:[#allocation3 + $0xc0] sm:$0xf] }
 0x3ce   : > { %v8185_v36 = vrot.slane %v8183_v12, 4  ;;  %v8188_v20 = vrot.slane %v8186_v49, 5  ;;  %v8196_v8 = vshrl.u32 %v7988_v44, 16  ;;  %v8181_v45 = vsel %vm14031_vm10, %v8176_v43, %v8180_v54 }
 0x3cf   : > { %v8627_v33 = vsel %vm14006_vm9, %v11896_v39, %v8626_v34  ;;  %v8635_v15 = vor.u32 %v8633_v22, %v8632_v27  ;;  %v8202_v29 = vshll.u32 %v7989_v17, 16  ;;  %v11882_v53 = vcombine.low %v8171_v60, %v8181_v45  ;;  %v8497_v60 = vld [vmem:[#allocation3 + $0xa4] sm:$0x8]  ;;  %v13525_v17 = vld [vmem:[#allocation3 + $0x94] sm:$0xff]  }
 0x3d0   : > { %v8189_v9 = vor.u32 %v8188_v20, %v8185_v36  ;;  %v8194_v4 = vrot.slane %v8192_v62, 5  ;;  %v8198_v61 = vrot.slane %v8196_v8, 4  ;;  %v15866_v55 = vpop.f32.mrb[164].mxu0  ;;  %v8638_v14 = vshrl.u32 %v8494_v25, 16  ;;  %v7992_v20 = vld [vmem:[#allocation3 + $0xc4] sm:$0x1] }
 0x3d1   : > { %v8636_v21 = vsel %vm14006_vm9, %v8628_v47, %v8635_v15  ;;  %v8204_v6 = vrot.slane %v8202_v29, 5  ;;  %v8643_v31 = vshrl.u32 %v8495_v35, 16  ;;  %v15870_v59 = vpop.f32.mrb[165].mxu0  ;;  %10737 = vmatprep.mubr.bf16.mxu1 %v11882_v53  ;;  %v8646_v54 = vshll.u32 %v8495_v35, 16  ;;  %v8498_v47 = vld [vmem:[#allocation3 + $0xa8] sm:$0xf] }
 0x3d2   : > { %v11912_v37 = vcombine.low %v8627_v33, %v8636_v21  ;;  %v8190_v10 = vrot.slane %v8189_v9, 4  ;;  %v8199_v19 = vor.u32 %v8198_v61, %v8194_v4  ;;  %v15872_v32 = vpop.f32.mrb[166].mxu0  ;;  %v11897_v39 = vrot.slane %v8638_v14, 11  ;;  %v8499_v15 = vld [vmem:[#allocation3 + $0xac] sm:$0xf] }
 0x3d3   : > { %v8645_v5 = vrot.slane %v8643_v31, 7  ;;  %v8652_v48 = vshrl.u32 %v8496_v30, 16  ;;  %v8655_v44 = vshll.u32 %v8496_v30, 16  ;;  %v15874_v22 = vpop.f32.mrb[167].mxu0  ;;  %v8207_v43 = vshrl.u32 %v7990_v7, 16 }
 0x3d4   : > { %10738 = vmatmul.mubr.bf16.gmra.mrb[216].mxu1 %v13526_v38  ;;  %v8195_v12 = vsel %vm14031_vm10, %v8190_v10, %v8194_v4  ;;  %v8200_v49 = vrot.slane %v8199_v19, 4  ;;  %v8210_v34 = vshll.u32 %v7990_v7, 16  ;;  %10883 = vmatmul.mubr.bf16.gmra.mrb[240].mxu0 %v11912_v37  ;;  %v8216_v62 = vshll.u32 %v7991_v11, 16  ;;  %v7993_v38 = vld [vmem:[#allocation3 + $0xd0] sm:$0xf] }
 0x3d5   : > { %v8648_v27 = vor.u32 %v8646_v54, %v8645_v5  ;;  %v8650_v35 = vrot.slane %v8645_v5, 4  ;;  %v8654_v36 = vrot.slane %v8652_v48, 7  ;;  %10890 = vmatprep.mubr.bf16.mxu0 %v13525_v17  ;;  %v8209_v25 = vrot.slane %v8207_v43, 4  ;;  %v13529_v54 = vld [vmem:[#allocation3 + $0xa8] sm:$0xff]   ;;  %v7994_v48 = vld [vmem:[#allocation3 + $0xd4] sm:$0xf] }
 0x3d6   : > { %v8205_v8 = vsel %vm14031_vm10, %v8200_v49, %v8204_v6  ;;  %v8212_v45 = vrot.slane %v8210_v34, 5  ;;  %v8220_v33 = vshrl.u32 %v7991_v11, 16  ;;  %v8218_v4 = vrot.slane %v8216_v62, 5  ;;  %v13528_v17 = vld [vmem:[#allocation3 + $0xa8] sm:$0xff]  }
 0x3d7   : > { %v11883_v29 = vcombine.low %v8195_v12, %v8205_v8  ;;  %v8649_v53 = vsel %vm14006_vm9, %v11897_v39, %v8648_v27  ;;  %v8657_v9 = vor.u32 %v8655_v44, %v8654_v36  ;;  %v8226_v21 = vshll.u32 %v7992_v20, 16  ;;  %v8501_v20 = vld [vmem:[#allocation3 + $0xbc] sm:$0xf] }
 0x3d8   : > { %v8213_v61 = vor.u32 %v8212_v45, %v8209_v25  ;;  %v8222_v30 = vrot.slane %v8220_v33, 4  ;;  %v8660_v14 = vshrl.u32 %v8497_v60, 16  ;;  %v8665_v7 = vshrl.u32 %v8498_v47, 16  ;;  %v15884_v10 = vpop.f32.mrb[140].mxu1  ;;  %v7995_v33 = vld [vmem:[#allocation3 + $0xd8] sm:$0x1] }
 0x3d9   : > { %10745 = vmatprep.mubr.bf16.mxu1 %v11883_v29  ;;  %v8658_v31 = vsel %vm14006_vm9, %v8650_v35, %v8657_v9  ;;  %v8668_v6 = vshll.u32 %v8498_v47, 16  ;;  %v8674_v37 = vshrl.u32 %v8499_v15, 16  ;;  %v8228_v5 = vrot.slane %v8226_v21, 5  ;;  %v15886_v44 = vpop.f32.mrb[141].mxu1 }
 0x3da   : > { %v11913_v19 = vcombine.low %v8649_v53, %v8658_v31  ;;  %v8214_v11 = vrot.slane %v8213_v61, 4  ;;  %v8223_v39 = vor.u32 %v8222_v30, %v8218_v4  ;;  %v11898_v60 = vrot.slane %v8660_v14, 11  ;;  %v15888_v34 = vpop.f32.mrb[142].mxu1  ;;  %v8500_v53 = vld [vmem:[#allocation3 + $0xb8] sm:$0x8] }
 0x3db   : > { %v8667_v12 = vrot.slane %v8665_v7, 7  ;;  %v8676_v49 = vrot.slane %v8674_v37, 7  ;;  %v8677_v43 = vshll.u32 %v8499_v15, 16  ;;  %v8231_v35 = vshrl.u32 %v7993_v38, 16  ;;  %v15892_v62 = vpop.f32.mrb[143].mxu1 }
 0x3dc   : > { %10746 = vmatmul.mubr.bf16.gmra.mrb[220].mxu1 %v13529_v54  ;;  %v8219_v47 = vsel %vm14031_vm10, %v8214_v11, %v8218_v4  ;;  %v8224_v27 = vrot.slane %v8223_v39, 4  ;;  %v8234_v36 = vshll.u32 %v7993_v38, 16  ;;  %10891 = vmatmul.mubr.bf16.gmra.mrb[244].mxu0 %v11913_v19  ;;  %v8240_v29 = vshll.u32 %v7994_v48, 16  ;;  %v8502_v30 = vld [vmem:[#allocation3 + $0xc0] sm:$0xf] }
 0x3dd   : > { %v8670_v8 = vor.u32 %v8668_v6, %v8667_v12  ;;  %v8672_v25 = vrot.slane %v8667_v12, 4  ;;  %v8679_v45 = vor.u32 %v8677_v43, %v8676_v49  ;;  %10898 = vmatprep.mubr.bf16.mxu0 %v13528_v17  ;;  %v8233_v9 = vrot.slane %v8231_v35, 4  ;;  %v7996_v54 = vld [vmem:[#allocation3 + $0xe4] sm:$0xf]  ;;  %v13531_v12 = vld [vmem:[#allocation3 + $0xbc] sm:$0xff]  }
 0x3de   : > { %v8229_v15 = vsel %vm14031_vm10, %v8224_v27, %v8228_v5  ;;  %v8236_v61 = vrot.slane %v8234_v36, 5  ;;  %v8244_v4 = vshrl.u32 %v7994_v48, 16  ;;  %v8242_v7 = vrot.slane %v8240_v29, 5  ;;  %v7997_v48 = vld [vmem:[#allocation3 + $0xe8] sm:$0xf]  ;;  %v13530_v35 = vld [vmem:[#allocation3 + $0xbc] sm:$0xff]  }
 0x3df   : > { %v11884_v21 = vcombine.low %v8219_v47, %v8229_v15  ;;  %v8671_v14 = vsel %vm14006_vm9, %v11898_v60, %v8670_v8  ;;  %v8680_v31 = vsel %vm14006_vm9, %v8672_v25, %v8679_v45  ;;  %v8250_v19 = vshll.u32 %v7995_v33, 16  ;;  %v8503_v33 = vld [vmem:[#allocation3 + $0xcc] sm:$0x8]  ;;  %v7998_v15 = vld [vmem:[#allocation3 + $0xec] sm:$0x1] }
 0x3e0   : > { %v11914_v6 = vcombine.low %v8671_v14, %v8680_v31  ;;  %v8237_v37 = vor.u32 %v8236_v61, %v8233_v9  ;;  %v8246_v38 = vrot.slane %v8244_v4, 4  ;;  %v8682_v11 = vshrl.u32 %v8500_v53, 16 }
 0x3e1   : > { %10753 = vmatprep.mubr.bf16.mxu1 %v11884_v21  ;;  %v8687_v39 = vshrl.u32 %v8501_v20, 16  ;;  %v8690_v5 = vshll.u32 %v8501_v20, 16  ;;  %v8696_v17 = vshrl.u32 %v8502_v30, 16  ;;  %v8252_v47 = vrot.slane %v8250_v19, 5 }
 0x3e2   : > { %v8238_v49 = vrot.slane %v8237_v37, 4  ;;  %v8247_v43 = vor.u32 %v8246_v38, %v8242_v7  ;;  %v8699_v60 = vshll.u32 %v8502_v30, 16  ;;  %v15900_v27 = vpop.f32.mrb[168].mxu0  ;;  %v11899_v36 = vrot.slane %v8682_v11, 11  ;;  %v8504_v37 = vld [vmem:[#allocation3 + $0xd0] sm:$0xf] }
 0x3e3   : > { %v8689_v8 = vrot.slane %v8687_v39, 7  ;;  %v8698_v25 = vrot.slane %v8696_v17, 7  ;;  %v8255_v45 = vshrl.u32 %v7996_v54, 16  ;;  %v15902_v29 = vpop.f32.mrb[169].mxu0  ;;  %v8258_v9 = vshll.u32 %v7996_v54, 16 }
 0x3e4   : > { %10754 = vmatmul.mubr.bf16.gmra.mrb[224].mxu1 %v13531_v12  ;;  %v8243_v20 = vsel %vm14031_vm10, %v8238_v49, %v8242_v7  ;;  %v8248_v53 = vrot.slane %v8247_v43, 4  ;;  %v8264_v61 = vshll.u32 %v7997_v48, 16  ;;  %v15906_v4 = vpop.f32.mrb[170].mxu0  ;;  %10899 = vmatmul.mubr.bf16.gmra.mrb[248].mxu0 %v11914_v6  ;;  %v8268_v39 = vshrl.u32 %v7997_v48, 16  ;;  %v8505_v17 = vld [vmem:[#allocation3 + $0xd4] sm:$0xf] }
 0x3e5   : > { %v8692_v30 = vor.u32 %v8690_v5, %v8689_v8  ;;  %v8694_v21 = vrot.slane %v8689_v8, 4  ;;  %v8701_v14 = vor.u32 %v8699_v60, %v8698_v25  ;;  %v8257_v31 = vrot.slane %v8255_v45, 4  ;;  %v15908_v38 = vpop.f32.mrb[171].mxu0  ;;  %10906 = vmatprep.mubr.bf16.mxu0 %v13530_v35  ;;  %v7999_v35 = vld [vmem:[#allocation3 + $0xf8] sm:$0xf] }
 0x3e6   : > { %v8253_v19 = vsel %vm14031_vm10, %v8248_v53, %v8252_v47  ;;  %v8260_v11 = vrot.slane %v8258_v9, 5  ;;  %v8266_v7 = vrot.slane %v8264_v61, 5  ;;  %v8274_v5 = vshll.u32 %v7998_v15, 16  ;;  %v8000_v48 = vld [vmem:[#allocation3 + $0xfc] sm:$0xf]  ;;  %v13534_v9 = vld [vmem:[#allocation3 + $0xd0] sm:$0xff]  }
 0x3e7   : > { %v11885_v54 = vcombine.low %v8243_v20, %v8253_v19  ;;  %v8693_v12 = vsel %vm14006_vm9, %v11899_v36, %v8692_v30  ;;  %v8702_v6 = vsel %vm14006_vm9, %v8694_v21, %v8701_v14  ;;  %v8270_v60 = vrot.slane %v8268_v39, 4  ;;  %v13533_v30 = vld [vmem:[#allocation3 + $0xd0] sm:$0xff]  }
 0x3e8   : > { %v11915_v49 = vcombine.low %v8693_v12, %v8702_v6  ;;  %v8261_v43 = vor.u32 %v8260_v11, %v8257_v31  ;;  %v8704_v8 = vshrl.u32 %v8503_v33, 16  ;;  %v8276_v25 = vrot.slane %v8274_v5, 5  ;;  %v8507_v12 = vld [vmem:[#allocation3 + $0xe4] sm:$0xf] }
 0x3e9   : > { %10761 = vmatprep.mubr.bf16.mxu1 %v11885_v54  ;;  %v8709_v47 = vshrl.u32 %v8504_v37, 16  ;;  %v8712_v45 = vshll.u32 %v8504_v37, 16  ;;  %v8718_v53 = vshrl.u32 %v8505_v17, 16  ;;  %v8271_v61 = vor.u32 %v8270_v60, %v8266_v7  ;;  %v8001_v37 = vld [vmem:[#allocation3 + $0x100] sm:$0x1] }
 0x3ea   : > { %v8262_v20 = vrot.slane %v8261_v43, 4  ;;  %v11900_v19 = vrot.slane %v8704_v8, 11  ;;  %v8721_v36 = vshll.u32 %v8505_v17, 16  ;;  %v8279_v15 = vshrl.u32 %v7999_v35, 16  ;;  %v8506_v8 = vld [vmem:[#allocation3 + $0xe0] sm:$0x8] }
 0x3eb   : > { %v8711_v13 = vrot.slane %v8709_v47, 7  ;;  %v8720_v21 = vrot.slane %v8718_v53, 7  ;;  %v8282_v14 = vshll.u32 %v7999_v35, 16  ;;  %v15916_v31 = vpop.f32.mrb[144].mxu1  ;;  %v8272_v11 = vrot.slane %v8271_v61, 4 }
 0x3ec   : > { %10762 = vmatmul.mubr.bf16.gmra.mrb[228].mxu1 %v13534_v9  ;;  %v8267_v33 = vsel %vm14031_vm10, %v8262_v20, %v8266_v7  ;;  %v8288_v39 = vshll.u32 %v8000_v48, 16  ;;  %v8292_v54 = vshrl.u32 %v8000_v48, 16  ;;  %v15920_v6 = vpop.f32.mrb[145].mxu1  ;;  %10907 = vmatmul.mubr.bf16.gmra.mrb[252].mxu0 %v11915_v49  ;;  %v8281_v60 = vrot.slane %v8279_v15, 4  ;;  %v8508_v20 = vld [vmem:[#allocation3 + $0xe8] sm:$0xf] }
 0x3ed   : > { %v8714_v17 = vor.u32 %v8712_v45, %v8711_v13  ;;  %v8716_v5 = vrot.slane %v8711_v13, 4  ;;  %v8723_v43 = vor.u32 %v8721_v36, %v8720_v21  ;;  %v15922_v35 = vpop.f32.mrb[146].mxu1  ;;  %10914 = vmatprep.mubr.bf16.mxu0 %v13533_v30  ;;  %v8277_v47 = vsel %vm14031_vm10, %v8272_v11, %v8276_v25  ;;  %v8003_v25 = vld [vmem:[#allocation3 + $0x110] sm:$0xf] }
 0x3ee   : > { %v8284_v7 = vrot.slane %v8282_v14, 5  ;;  %v8290_v53 = vrot.slane %v8288_v39, 5  ;;  %v8294_v9 = vrot.slane %v8292_v54, 4  ;;  %v15926_v48 = vpop.f32.mrb[147].mxu1  ;;  %v11886_v61 = vcombine.low %v8267_v33, %v8277_v47  ;;  %v13536_v33 = vld [vmem:[#allocation3 + $0xe4] sm:$0xff]  }
 0x3ef   : > { %16908 = vst [vmem:[#allocation37_spill] sm:$0xff] %v15926_v48  ;;  %v8715_v49 = vsel %vm14006_vm9, %v11900_v19, %v8714_v17  ;;  %v8724_v13 = vsel %vm14006_vm9, %v8716_v5, %v8723_v43  ;;  %v8298_v45 = vshll.u32 %v8001_v37, 16  ;;  %v8726_v15 = vshrl.u32 %v8506_v8, 16  ;;  %v8509_v5 = vld [vmem:[#allocation3 + $0xf4] sm:$0x8] }
 0x3f0   : > { %v11916_v36 = vcombine.low %v8715_v49, %v8724_v13  ;;  %v8285_v21 = vor.u32 %v8284_v7, %v8281_v60  ;;  %v8295_v30 = vor.u32 %v8294_v9, %v8290_v53  ;;  %10769 = vmatprep.mubr.bf16.mxu1 %v11886_v61  ;;  %v8731_v11 = vshrl.u32 %v8507_v12, 16  ;;  %v15932_v57 = vpop.f32.mrb[172].mxu0  ;;  %v13535_v61 = vld [vmem:[#allocation3 + $0xe4] sm:$0xff]   ;;  %v8004_v13 = vld [vmem:[#allocation3 + $0x114] sm:$0x1] }
 0x3f1   : > { %v8300_v14 = vrot.slane %v8298_v45, 5  ;;  %v8734_v39 = vshll.u32 %v8507_v12, 16  ;;  %v8740_v54 = vshrl.u32 %v8508_v20, 16  ;;  %v11901_v17 = vrot.slane %v8726_v15, 11  ;;  %v15934_v37 = vpop.f32.mrb[173].mxu0 }
 0x3f2   : > { %v8286_v47 = vrot.slane %v8285_v21, 4  ;;  %v8296_v19 = vrot.slane %v8295_v30, 4  ;;  %v8743_v46 = vshll.u32 %v8508_v20, 16  ;;  %v8733_v43 = vrot.slane %v8731_v11, 7  ;;  %v15936_v9 = vpop.f32.mrb[174].mxu0 }
 0x3f3   : > { %v8742_v60 = vrot.slane %v8740_v54, 7  ;;  %v8303_v8 = vshrl.u32 %v8002_v56, 16  ;;  %v8306_v7 = vshll.u32 %v8002_v56, 16  ;;  %16909 = vst [vmem:[#allocation19_spill] sm:$0xff] %v15936_v9  ;;  %v8312_v45 = vshll.u32 %v8003_v25, 16  ;;  %v15942_v21 = vpop.f32.mrb[175].mxu0 }
 0x3f4   : > { %10770 = vmatmul.mubr.bf16.gmra.mrb[232].mxu1 %v13536_v33  ;;  %v8291_v12 = vsel %vm14031_vm10, %v8286_v47, %v8290_v53  ;;  %v8301_v49 = vsel %vm14031_vm10, %v8296_v19, %v8300_v14  ;;  %v8316_v20 = vshrl.u32 %v8003_v25, 16  ;;  %16910 = vst [vmem:[#allocation38_spill] sm:$0xff] %v15942_v21  ;;  %10915 = vmatmul.mubr.bf16.gmra.mrb[0].mxu0 %v11916_v36  ;;  %v8738_v11 = vrot.slane %v8733_v43, 4  ;;  %v8510_v54 = vld [vmem:[#allocation3 + $0xf8] sm:$0xf] }
 0x3f5   : > { %v11887_v30 = vcombine.low %v8291_v12, %v8301_v49  ;;  %v8736_v15 = vor.u32 %v8734_v39, %v8733_v43  ;;  %v8745_v56 = vor.u32 %v8743_v46, %v8742_v60  ;;  %10922 = vmatprep.mubr.bf16.mxu0 %v13535_v61  ;;  %v8305_v52 = vrot.slane %v8303_v8, 4  ;;  %v8511_v53 = vld [vmem:[#allocation3 + $0xfc] sm:$0xf] }
 0x3f6   : > { %v8308_v33 = vrot.slane %v8306_v7, 5  ;;  %v8314_v9 = vrot.slane %v8312_v45, 5  ;;  %v8318_v48 = vrot.slane %v8316_v20, 4  ;;  %v8322_v47 = vshll.u32 %v8004_v13, 16  ;;  %v13539_v12 = vld [vmem:[#allocation3 + $0xf8] sm:$0xff]  }
 0x3f7   : > { %10777 = vmatprep.mubr.bf16.mxu1 %v11887_v30  ;;  %v8737_v14 = vsel %vm14006_vm9, %v11901_v17, %v8736_v15  ;;  %v8746_v25 = vsel %vm14006_vm9, %v8738_v11, %v8745_v56  ;;  %v8748_v36 = vshrl.u32 %v8509_v5, 16  ;;  %v8753_v46 = vshrl.u32 %v8510_v54, 16  ;;  %v8005_v5 = vld [vmem:[#allocation3 + $0x120] sm:$0xf]  ;;  %v8006_v15 = vld [vmem:[#allocation3 + $0x124] sm:$0xf] }
 0x3f8   : > { %v11917_v19 = vcombine.low %v8737_v14, %v8746_v25  ;;  %v8309_v39 = vor.u32 %v8308_v33, %v8305_v52  ;;  %v8319_v43 = vor.u32 %v8318_v48, %v8314_v9  ;;  %v8324_v60 = vrot.slane %v8322_v47, 5  ;;  %v13538_v56 = vld [vmem:[#allocation3 + $0xf8] sm:$0xff]   ;;  %v8512_v25 = vld [vmem:[#allocation3 + $0x108] sm:$0x8] }
 0x3f9   : > { %v11902_v61 = vrot.slane %v8748_v36, 11  ;;  %v8756_v8 = vshll.u32 %v8510_v54, 16  ;;  %v8762_v7 = vshrl.u32 %v8511_v53, 16  ;;  %v8755_v20 = vrot.slane %v8753_v46, 7  ;;  %v15948_v21 = vpop.f32.mrb[148].mxu1 }
 0x3fa   : > { %v8310_v49 = vrot.slane %v8309_v39, 4  ;;  %v8320_v45 = vrot.slane %v8319_v43, 4  ;;  %v8765_v30 = vshll.u32 %v8511_v53, 16  ;;  %v15952_v13 = vadd.f32 %v15812_v1, %v15808_v51  ;;  %v15960_v11 = vpop.f32.mrb[149].mxu1  ;;  %v8007_v53 = vld [vmem:[#allocation3 + $0x128] sm:$0x1] }
 0x3fb   : > { %v8764_v17 = vrot.slane %v8762_v7, 7  ;;  %v12799_v52 = vadd.f32 %v15830_v50, %v15828_v16  ;;  %v15958_v48 = vadd.f32 %v15818_v58, %v15816_v28  ;;  %v8758_v1 = vor.u32 %v8756_v8, %v8755_v20  ;;  %v15966_v16 = vpop.f32.mrb[150].mxu1  ;;  %v8513_v46 = vld [vmem:[#allocation3 + $0x10c] sm:$0xf] }
 0x3fc   : > { %10778 = vmatmul.mubr.bf16.gmra.mrb[236].mxu1 %v13539_v12  ;;  %v8315_v54 = vsel %vm14031_vm10, %v8310_v49, %v8314_v9  ;;  %v8325_v51 = vsel %vm14031_vm10, %v8320_v45, %v8324_v60  ;;  %v8760_v33 = vrot.slane %v8755_v20, 4  ;;  %10923 = vmatmul.mubr.bf16.gmra.mrb[4].mxu0 %v11917_v19  ;;  %v12802_v14 = vadd.f32 %v15836_v3, %v15832_v23  ;;  %v15973_v47 = vpop.f32.mrb[151].mxu1  ;;  %v8514_v3 = vld [vmem:[#allocation3 + $0x110] sm:$0xf] }
 0x3fd   : > { %v11888_v28 = vcombine.low %v8315_v54, %v8325_v51  ;;  %v8767_v58 = vor.u32 %v8765_v30, %v8764_v17  ;;  %v15969_v50 = vadd.f32 %v12799_v52, %v15748_v63  ;;  %10930 = vmatprep.mubr.bf16.mxu0 %v13538_v56  ;;  %v8759_v9 = vsel %vm14006_vm9, %v11902_v61, %v8758_v1  ;;  %v13541_v56 = vld [vmem:[#allocation3 + $0x10c] sm:$0xff]  }
 0x3fe   : > { %v8327_v36 = vshrl.u32 %v8005_v5, 16  ;;  %v8330_v39 = vshll.u32 %v8005_v5, 16  ;;  %v8336_v43 = vshll.u32 %v8006_v15, 16  ;;  %v15980_v63 = vadd.f32 %v12802_v14, %v15750_v42  ;;  %v8008_v14 = vld [vmem:[#allocation3 + $0x134] sm:$0xf] }
 0x3ff   : > { %16911 = vst [vmem:[#allocation39_spill] sm:$0xff] %v15969_v50  ;;  %10785 = vmatprep.mubr.bf16.mxu1 %v11888_v28  ;;  %v8768_v19 = vsel %vm14006_vm9, %v8760_v33, %v8767_v58  ;;  %v8340_v60 = vshrl.u32 %v8006_v15, 16  ;;  %v8346_v23 = vshll.u32 %v8007_v53, 16  ;;  %v15982_v8 = vpop.f32.mrb[176].mxu0  ;;  %v8770_v17 = vshrl.u32 %v8512_v25, 16 }
 0x400   : > { %16912 = vst [vmem:[#allocation27_spill] sm:$0xff] %v15980_v63  ;;  %v11918_v7 = vcombine.low %v8759_v9, %v8768_v19  ;;  %v8329_v12 = vrot.slane %v8327_v36, 4  ;;  %v8332_v49 = vrot.slane %v8330_v39, 5  ;;  %v8338_v61 = vrot.slane %v8336_v43, 5  ;;  %v15984_v45 = vpop.f32.mrb[177].mxu0  ;;  %v13540_v9 = vld [vmem:[#allocation3 + $0x10c] sm:$0xff]  }
 0x401   : > { %v8342_v20 = vrot.slane %v8340_v60, 4  ;;  %v8348_v30 = vrot.slane %v8346_v23, 5  ;;  %v8775_v52 = vshrl.u32 %v8513_v46, 16  ;;  %v15986_v5 = vpop.f32.mrb[178].mxu0  ;;  %v8778_v54 = vshll.u32 %v8513_v46, 16 }
 0x402   : > { %v8333_v42 = vor.u32 %v8332_v49, %v8329_v12  ;;  %v8784_v15 = vshrl.u32 %v8514_v3, 16  ;;  %v8787_v51 = vshll.u32 %v8514_v3, 16  ;;  %v15988_v1 = vpop.f32.mrb[179].mxu0  ;;  %v11903_v53 = vrot.slane %v8770_v17, 11  ;;  %v8515_v17 = vld [vmem:[#allocation3 + $0x11c] sm:$0x8] }
 0x403   : > { %v8343_v33 = vor.u32 %v8342_v20, %v8338_v61  ;;  %v8777_v28 = vrot.slane %v8775_v52, 7  ;;  %v15992_v58 = vadd.f32 %v15854_v2, %v15852_v41  ;;  %v12805_v39 = vadd.f32 %v15870_v59, %v15866_v55  ;;  %v16000_v46 = vpop.f32.mrb[152].mxu1  ;;  %v8009_v2 = vld [vmem:[#allocation3 + $0x138] sm:$0xf] }
 0x404   : > { %10786 = vmatmul.mubr.bf16.gmra.mrb[240].mxu1 %v13541_v56  ;;  %v8334_v25 = vrot.slane %v8333_v42, 4  ;;  %v8786_v36 = vrot.slane %v8784_v15, 7  ;;  %v15998_v43 = vadd.f32 %v15860_v0, %v15856_v18  ;;  %10931 = vmatmul.mubr.bf16.gmra.mrb[8].mxu0 %v11918_v7  ;;  %v12808_v41 = vadd.f32 %v15874_v22, %v15872_v32  ;;  %v16004_v3 = vpop.f32.mrb[153].mxu1  ;;  %v8010_v0 = vld [vmem:[#allocation3 + $0x13c] sm:$0x1] }
 0x405   : > { %v8344_v19 = vrot.slane %v8343_v33, 4  ;;  %v8780_v60 = vor.u32 %v8778_v54, %v8777_v28  ;;  %v8782_v23 = vrot.slane %v8777_v28, 4  ;;  %10938 = vmatprep.mubr.bf16.mxu0 %v13540_v9  ;;  %v16009_v18 = vadd.f32 %v12805_v39, %v15952_v13  ;;  %v16011_v7 = vpop.f32.mrb[154].mxu1  ;;  %v8517_v15 = vld [vmem:[#allocation3 + $0x124] sm:$0xf] }
 0x406   : > { %v8339_v55 = vsel %vm14031_vm10, %v8334_v25, %v8338_v61  ;;  %v8789_v59 = vor.u32 %v8787_v51, %v8786_v36  ;;  %v8351_v12 = vshrl.u32 %v8008_v14, 16  ;;  %v16018_v22 = vadd.f32 %v12808_v41, %v15958_v48  ;;  %v8516_v61 = vld [vmem:[#allocation3 + $0x120] sm:$0xf]  ;;  %v16020_v52 = vpop.f32.mrb[155].mxu1 }
 0x407   : > { %16913 = vst [vmem:[#allocation22_spill] sm:$0xff] %v16009_v18  ;;  %v8349_v49 = vsel %vm14031_vm10, %v8344_v19, %v8348_v30  ;;  %v8781_v32 = vsel %vm14006_vm9, %v11903_v53, %v8780_v60  ;;  %v8354_v20 = vshll.u32 %v8008_v14, 16  ;;  %v8360_v54 = vshll.u32 %v8009_v2, 16  ;;  %v13544_v48 = vld [vmem:[#allocation3 + $0x120] sm:$0xff]  }
 0x408   : > { %16914 = vst [vmem:[#allocation21_spill] sm:$0xff] %v16018_v22  ;;  %v11889_v13 = vcombine.low %v8339_v55, %v8349_v49  ;;  %v8790_v56 = vsel %vm14006_vm9, %v8782_v23, %v8789_v59  ;;  %v8353_v42 = vrot.slane %v8351_v12, 4  ;;  %v8364_v33 = vshrl.u32 %v8009_v2, 16  ;;  %v13543_v19 = vld [vmem:[#allocation3 + $0x120] sm:$0xff]  }
 0x409   : > { %v11919_v51 = vcombine.low %v8781_v32, %v8790_v56  ;;  %v8356_v30 = vrot.slane %v8354_v20, 5  ;;  %v8370_v28 = vshll.u32 %v8010_v0, 16  ;;  %v16024_v53 = vpop.f32.mrb[180].mxu0  ;;  %v8362_v14 = vrot.slane %v8360_v54, 5  ;;  %v646_v32 = vld [vmem:[#allocation3 + $0x150] sm:$0x1] }
 0x40a   : > { %10793 = vmatprep.mubr.bf16.mxu1 %v11889_v13  ;;  %v8792_v9 = vshrl.u32 %v8515_v17, 16  ;;  %v8797_v25 = vshrl.u32 %v8516_v61, 16  ;;  %v8800_v36 = vshll.u32 %v8516_v61, 16  ;;  %v16026_v39 = vpop.f32.mrb[181].mxu0  ;;  %v8366_v23 = vrot.slane %v8364_v33, 4 }
 0x40b   : > { %v8357_v60 = vor.u32 %v8356_v30, %v8353_v42  ;;  %v8372_v41 = vrot.slane %v8370_v28, 5  ;;  %v8806_v55 = vshrl.u32 %v8517_v15, 16  ;;  %v16028_v59 = vpop.f32.mrb[182].mxu0  ;;  %v8809_v12 = vshll.u32 %v8517_v15, 16  ;;  %v8011_v42 = vld [vmem:[#allocation3 + $0x148] sm:$0xf] }
 0x40c   : > { %10794 = vmatmul.mubr.bf16.gmra.mrb[244].mxu1 %v13544_v48  ;;  %v11904_v2 = vrot.slane %v8792_v9, 11  ;;  %v8799_v0 = vrot.slane %v8797_v25, 7  ;;  %v16032_v49 = vadd.f32 %v15886_v44, %v15884_v10  ;;  %v16034_v20 = vpop.f32.mrb[183].mxu0  ;;  %10939 = vmatmul.mubr.bf16.gmra.mrb[12].mxu0 %v11919_v51  ;;  %v8367_v61 = vor.u32 %v8366_v23, %v8362_v14  ;;  %v16038_v54 = vpop.f32.mrb[156].mxu1  ;;  %v8012_v51 = vld [vmem:[#allocation3 + $0x14c] sm:$0xf] }
 0x40d   : > { %v8358_v17 = vrot.slane %v8357_v60, 4  ;;  %v8808_v13 = vrot.slane %v8806_v55, 7  ;;  %v12811_v56 = vadd.f32 %v15902_v29, %v15900_v27  ;;  %10946 = vmatprep.mubr.bf16.mxu0 %v13543_v19  ;;  %v16042_v10 = vadd.f32 %v15892_v62, %v15888_v34  ;;  %v16046_v33 = vpop.f32.mrb[157].mxu1  ;;  %v8518_v9 = vld [vmem:[#allocation3 + $0x130] sm:$0x8] }
 0x40e   : > { %v8802_v30 = vor.u32 %v8800_v36, %v8799_v0  ;;  %v8804_v15 = vrot.slane %v8799_v0, 4  ;;  %v12814_v44 = vadd.f32 %v15908_v38, %v15906_v4  ;;  %v8368_v27 = vrot.slane %v8367_v61, 4  ;;  %v16053_v25 = vpop.f32.mrb[158].mxu1  ;;  %v8519_v36 = vld [vmem:[#allocation3 + $0x134] sm:$0xf] }
 0x40f   : > { %v8363_v28 = vsel %vm14031_vm10, %v8358_v17, %v8362_v14  ;;  %v8811_v29 = vor.u32 %v8809_v12, %v8808_v13  ;;  %v16051_v48 = vadd.f32 %v12811_v56, %v15992_v58  ;;  %v647_v4 = vsel %vm13978_vm5, 0, %v646_v32  ;;  %v16062_v14 = vpop.f32.mrb[159].mxu1  ;;  %v8520_v55 = vld [vmem:[#allocation3 + $0x138] sm:$0xf] }
 0x410   : > { %v8803_v34 = vsel %vm14006_vm9, %v11904_v2, %v8802_v30  ;;  %v16058_v62 = vadd.f32 %v12814_v44, %v15998_v43  ;;  %v8375_v38 = vshrl.u32 %v8011_v42, 16  ;;  %v8373_v58 = vsel %vm14031_vm10, %v8368_v27, %v8372_v41  ;;  %648 = vst [vmem:[#allocation3 + $0x150] sm:$0x1] %v647_v4  ;;  %v13546_v17 = vld [vmem:[#allocation3 + $0x134] sm:$0xff]  }
 0x411   : > { %16915 = vst [vmem:[#allocation25_spill] sm:$0xff] %v16051_v48  ;;  %v8812_v19 = vsel %vm14006_vm9, %v8804_v15, %v8811_v29  ;;  %v8378_v60 = vshll.u32 %v8011_v42, 16  ;;  %v8384_v23 = vshll.u32 %v8012_v51, 16  ;;  %v11890_v2 = vcombine.low %v8363_v28, %v8373_v58  ;;  %v13545_v41 = vld [vmem:[#allocation3 + $0x134] sm:$0xff]  }
 0x412   : > { %16916 = vst [vmem:[#allocation29_spill] sm:$0xff] %v16058_v62  ;;  %v11920_v43 = vcombine.low %v8803_v34, %v8812_v19  ;;  %v8377_v0 = vrot.slane %v8375_v38, 4  ;;  %v8388_v12 = vshrl.u32 %v8012_v51, 16  ;;  %v8814_v13 = vshrl.u32 %v8518_v9, 16  ;;  %v8521_v9 = vld [vmem:[#allocation3 + $0x144] sm:$0x8] }
 0x413   : > { %v8380_v32 = vrot.slane %v8378_v60, 5  ;;  %v16068_v61 = vrot.slane %v8384_v23, 5  ;;  %v8819_v56 = vshrl.u32 %v8519_v36, 16  ;;  %v16070_v30 = vpop.f32.mrb[184].mxu0  ;;  %10801 = vmatprep.mubr.bf16.mxu1 %v11890_v2  ;;  %v8822_v15 = vshll.u32 %v8519_v36, 16  ;;  %v16917_v60 = vld [vmem:[#allocation37_spill] sm:$0xff] }
 0x414   : > { %v8390_v44 = vrot.slane %v8388_v12, 4  ;;  %v8828_v27 = vshrl.u32 %v8520_v55, 16  ;;  %v8831_v42 = vshll.u32 %v8520_v55, 16  ;;  %v16072_v29 = vpop.f32.mrb[185].mxu0  ;;  %10947 = vmatmul.mubr.bf16.gmra.mrb[16].mxu0 %v11920_v43  ;;  %10802 = vmatmul.mubr.bf16.gmra.mrb[248].mxu1 %v13546_v17  ;;  %v11905_v51 = vrot.slane %v8814_v13, 11 }
 0x415   : > { %v8381_v28 = vor.u32 %v8380_v32, %v8377_v0  ;;  %v8821_v34 = vrot.slane %v8819_v56, 7  ;;  %v16076_v4 = vadd.f32 %v15920_v6, %v15916_v31  ;;  %v16078_v38 = vpop.f32.mrb[186].mxu0  ;;  %10954 = vmatprep.mubr.bf16.mxu0 %v13545_v41  ;;  %v12817_v19 = vadd.f32 %v15934_v37, %v15932_v57  ;;  %v16918_v6 = vld [vmem:[#allocation19_spill] sm:$0xff]  ;;  %v16919_v0 = vld [vmem:[#allocation38_spill] sm:$0xff]  ;;  %v8522_v17 = vld [vmem:[#allocation3 + $0x148] sm:$0xf] }
 0x416   : > { %v8391_v58 = vor.u32 %v8390_v44, %v16068_v61  ;;  %v8830_v36 = vrot.slane %v8828_v27, 7  ;;  %v16085_v23 = vadd.f32 %v16917_v60, %v15922_v35  ;;  %v16087_v55 = vpop.f32.mrb[187].mxu0  ;;  %v12820_v12 = vadd.f32 %v16919_v0, %v16918_v6  ;;  %v8523_v32 = vld [vmem:[#allocation3 + $0x14c] sm:$0xf]  ;;  %v9105_v60 = vld [vmem:[#allocation3 + $0x38] sm:$0x1] }
 0x417   : > { %v8382_v2 = vrot.slane %v8381_v28, 4  ;;  %v8824_v43 = vor.u32 %v8822_v15, %v8821_v34  ;;  %v8826_v31 = vrot.slane %v8821_v34, 4  ;;  %v8013_v13 = vld [vmem:[#allocation3 + $0x150] sm:$0x1]  ;;  %v16092_v44 = vadd.f32 %v12817_v19, %v16032_v49 }
 0x418   : > { %v8392_v56 = vrot.slane %v8391_v58, 4  ;;  %v8833_v41 = vor.u32 %v8831_v42, %v8830_v36  ;;  %v8836_v57 = vshrl.u32 %v8521_v9, 16  ;;  %v16094_v37 = vpop.f32.mrb[160].mxu1  ;;  %v8394_v15 = vshll.u32 %v8013_v13, 16  ;;  %v9103_v34 = vld [vmem:[#allocation3 + $0x30] sm:$0xf] }
 0x419   : > { %16920 = vst [vmem:[#allocation28_spill] sm:$0xff] %v16092_v44  ;;  %v8387_v35 = vsel %vm14031_vm10, %v8382_v2, %v16068_v61  ;;  %v8825_v27 = vsel %vm14006_vm9, %v11905_v51, %v8824_v43  ;;  %v16102_v28 = vadd.f32 %v12820_v12, %v16042_v10  ;;  %v9104_v58 = vld [vmem:[#allocation3 + $0x34] sm:$0xf]  ;;  %v16104_v42 = vpop.f32.mrb[161].mxu1  ;;  %v8841_v36 = vshrl.u32 %v8522_v17, 16  ;;  %v13548_v10 = vld [vmem:[#allocation3 + $0x148] sm:$0xff]  }
 0x41a   : > { %v8834_v49 = vsel %vm14006_vm9, %v8826_v31, %v8833_v41  ;;  %v11906_v9 = vrot.slane %v8836_v57, 11  ;;  %v8844_v19 = vshll.u32 %v8522_v17, 16  ;;  %v16108_v6 = vpop.f32.mrb[162].mxu1  ;;  %v8396_v61 = vrot.slane %v8394_v15, 5 }
 0x41b   : > { %16921 = vst [vmem:[#allocation23_spill] sm:$0xff] %v16102_v28  ;;  %v11921_v2 = vcombine.low %v8825_v27, %v8834_v49  ;;  %v8850_v0 = vshrl.u32 %v8523_v32, 16  ;;  %v8853_v51 = vshll.u32 %v8523_v32, 16  ;;  %v16110_v43 = vpop.f32.mrb[163].mxu1  ;;  %v8843_v12 = vrot.slane %v8841_v36, 7  ;;  %v13549_v36 = vld [vmem:[#allocation3 + $0x148] sm:$0xff]  }
 0x41c   : > { %v9152_v13 = vshrl.u32 %v9103_v34, 16  ;;  %v9155_v28 = vshll.u32 %v9103_v34, 16  ;;  %v9161_v44 = vshll.u32 %v9104_v58, 16  ;;  %v8397_v31 = vsel %vm14031_vm10, %v8392_v56, %v8396_v61 }
 0x41d   : > { %10955 = vmatmul.mubr.bf16.gmra.mrb[20].mxu0 %v11921_v2  ;;  %v8852_v41 = vrot.slane %v8850_v0, 7  ;;  %v9165_v17 = vshrl.u32 %v9104_v58, 16  ;;  %v9171_v57 = vshll.u32 %v9105_v60, 16  ;;  %v16114_v62 = vpop.f32.mrb[188].mxu0  ;;  %v11891_v15 = vcombine.low %v8387_v35, %v8397_v31  ;;  %v9108_v60 = vld [vmem:[#allocation3 + $0x4c] sm:$0x1] }
 0x41e   : > { %10962 = vmatprep.mubr.bf16.mxu0 %v13548_v10  ;;  %v8846_v27 = vor.u32 %v8844_v19, %v8843_v12  ;;  %v8848_v32 = vrot.slane %v8843_v12, 4  ;;  %v9154_v49 = vrot.slane %v9152_v13, 4  ;;  %v16116_v48 = vpop.f32.mrb[189].mxu0  ;;  %v9157_v34 = vrot.slane %v9155_v28, 5  ;;  %v595_v0 = vld [vmem:[#allocation3 + $0x158] sm:$0x8] }
 0x41f   : > { %v8855_v22 = vor.u32 %v8853_v51, %v8852_v41  ;;  %v9163_v18 = vrot.slane %v9161_v44, 5  ;;  %v9167_v63 = vrot.slane %v9165_v17, 4  ;;  %v16118_v50 = vpop.f32.mrb[190].mxu0  ;;  %10809 = vmatprep.mubr.bf16.mxu1 %v11891_v15  ;;  %v9173_v58 = vrot.slane %v9171_v57, 5  ;;  %v8525_v51 = vld [vmem:[#allocation3 + $0x15c] sm:$0xf] }
 0x420   : > { %v8847_v56 = vsel %vm14006_vm9, %v11906_v9, %v8846_v27  ;;  %v16124_v35 = vadd.f32 %v15960_v11, %v15948_v21  ;;  %v12823_v19 = vadd.f32 %v15984_v45, %v15982_v8  ;;  %v16128_v61 = vpop.f32.mrb[191].mxu0  ;;  %10810 = vmatmul.mubr.bf16.gmra.mrb[252].mxu1 %v13549_v36  ;;  %v9158_v28 = vor.u32 %v9157_v34, %v9154_v49  ;;  %v13550_v45 = vld [vmem:[#allocation3 + $0x15c] sm:$0xff]   ;;  %v16922_v10 = vld [vmem:[#allocation34_spill] sm:$0xff] }
 0x421   : > { %v8856_v44 = vsel %vm14006_vm9, %v8848_v32, %v8855_v22  ;;  %v9168_v2 = vor.u32 %v9167_v63, %v9163_v18  ;;  %v16134_v9 = vadd.f32 %v15973_v47, %v15966_v16  ;;  %v12826_v8 = vadd.f32 %v15988_v1, %v15986_v5  ;;  %v16923_v12 = vld [vmem:[#allocation18_spill] sm:$0xff]  ;;  %v16924_v63 = vld [vmem:[#allocation35_spill] sm:$0xff]  ;;  %v16925_v41 = vld [vmem:[#allocation36_spill] sm:$0xff] }
 0x422   : > { %v11922_v21 = vcombine.low %v8847_v56, %v8856_v44  ;;  %v16137_v11 = vadd.f32 %v12823_v19, %v16076_v4  ;;  %v9182_v13 = vor.u32 %v16923_v12, %v16922_v10  ;;  %v9159_v22 = vrot.slane %v9158_v28, 4  ;;  %v9109_v47 = vld [vmem:[#allocation3 + $0x58] sm:$0xf]  ;;  %v16145_v57 = vpop.f32.mrb[164].mxu1  ;;  %v8526_v1 = vld [vmem:[#allocation3 + $0x160] sm:$0xf] }
 0x423   : > { %v9169_v31 = vrot.slane %v9168_v2, 4  ;;  %v9192_v17 = vor.u32 %v16925_v41, %v16924_v63  ;;  %v9195_v16 = vshll.u32 %v9108_v60, 16  ;;  %v16148_v15 = vadd.f32 %v12826_v8, %v16085_v23  ;;  %v16152_v49 = vpop.f32.mrb[165].mxu1  ;;  %v9111_v10 = vld [vmem:[#allocation3 + $0x60] sm:$0x1] }
 0x424   : > { %v9183_v4 = vrot.slane %v9182_v13, 4  ;;  %v596_v5 = vsel %vm13973_vm3, 0, %v595_v0  ;;  %v8863_v32 = vshrl.u32 %v8525_v51, 16  ;;  %v9164_v36 = vsel %vm14031_vm10, %v9159_v22, %v9163_v18  ;;  %v16158_v23 = vpop.f32.mrb[166].mxu1  ;;  %v9110_v0 = vld [vmem:[#allocation3 + $0x5c] sm:$0xf] }
 0x425   : > { %10963 = vmatmul.mubr.bf16.gmra.mrb[24].mxu0 %v11922_v21  ;;  %v9174_v34 = vsel %vm14031_vm10, %v9169_v31, %v9173_v58  ;;  %v9193_v56 = vrot.slane %v9192_v17, 4  ;;  %v9197_v19 = vrot.slane %v9195_v16, 5  ;;  %597 = vst [vmem:[#allocation3 + $0x158] sm:$0x8] %v596_v5  ;;  %v8866_v2 = vshll.u32 %v8525_v51, 16  ;;  %v16163_v21 = vpop.f32.mrb[167].mxu1 }
 0x426   : > { %v11940_v60 = vcombine.low %v9164_v36, %v9174_v34  ;;  %10970 = vmatprep.mubr.bf16.mxu0 %v13550_v45  ;;  %v9188_v44 = vsel %vm14031_vm10, %v9183_v4, %v16924_v63  ;;  %v8865_v28 = vrot.slane %v8863_v32, 7  ;;  %v8872_v58 = vshrl.u32 %v8526_v1, 16  ;;  %v9112_v36 = vld [vmem:[#allocation3 + $0x6c] sm:$0xf] }
 0x427   : > { %v9198_v18 = vsel %vm14031_vm10, %v9193_v56, %v9197_v19  ;;  %v8875_v8 = vshll.u32 %v8526_v1, 16  ;;  %v9200_v12 = vshrl.u32 %v9109_v47, 16  ;;  %v9203_v31 = vshll.u32 %v9109_v47, 16 }
 0x428   : > { %13205 = vmatprep.mubr.bf16.mxu1 %v11940_v60  ;;  %v11941_v13 = vcombine.low %v9188_v44, %v9198_v18  ;;  %v8868_v22 = vor.u32 %v8866_v2, %v8865_v28  ;;  %v8870_v45 = vrot.slane %v8865_v28, 4  ;;  %v16167_v41 = vpop.f32.mrb[192].mxu0  ;;  %v8874_v63 = vrot.slane %v8872_v58, 7  ;;  %v9113_v44 = vld [vmem:[#allocation3 + $0x70] sm:$0xf] }
 0x429   : > { %v9202_v17 = vrot.slane %v9200_v12, 4  ;;  %v9209_v51 = vshll.u32 %v9110_v0, 16  ;;  %v9213_v16 = vshrl.u32 %v9110_v0, 16  ;;  %v16169_v4 = vpop.f32.mrb[193].mxu0  ;;  %v9205_v27 = vrot.slane %v9203_v31, 5 }
 0x42a   : > { %13206 = vmatmul.mubr.bf16.vlgmr.msra.gmra.mrb[0].mxu1 %v11941_v13  ;;  %v9219_v5 = vshll.u32 %v9111_v10, 16  ;;  %v16173_v1 = vadd.f32 %v16004_v3, %v16000_v46  ;;  %v12829_v32 = vadd.f32 %v16026_v39, %v16024_v53  ;;  %v16177_v47 = vpop.f32.mrb[194].mxu0  ;;  %v8877_v34 = vor.u32 %v8875_v8, %v8874_v63  ;;  %v9114_v8 = vld [vmem:[#allocation3 + $0x74] sm:$0x1]  ;;  %v9115_v31 = vld [vmem:[#allocation3 + $0x80] sm:$0xf] }
 0x42b   : > { %v9211_v56 = vrot.slane %v9209_v51, 5  ;;  %v9215_v19 = vrot.slane %v9213_v16, 4  ;;  %v16181_v60 = vadd.f32 %v16020_v52, %v16011_v7  ;;  %v16183_v28 = vpop.f32.mrb[195].mxu0  ;;  %v9206_v0 = vor.u32 %v9205_v27, %v9202_v17 }
 0x42c   : > { %v8524_v2 = vld [vmem:[#allocation3 + $0x158] sm:$0x8]  ;;  %v9221_v46 = vrot.slane %v9219_v5, 5  ;;  %v16186_v3 = vadd.f32 %v12829_v32, %v16124_v35  ;;  %v12832_v53 = vadd.f32 %v16034_v20, %v16028_v59  ;;  %v8878_v18 = vsel %vm14006_vm9, %v8870_v45, %v8877_v34  ;;  %v9116_v5 = vld [vmem:[#allocation3 + $0x84] sm:$0xf] }
 0x42d   : > { %v8858_v39 = vshrl.u32 %v8524_v2, 16  ;;  %v9216_v58 = vor.u32 %v9215_v19, %v9211_v56  ;;  %v9224_v7 = vshrl.u32 %v9112_v36, 16  ;;  %v9207_v52 = vrot.slane %v9206_v0, 4  ;;  %v9117_v19 = vld [vmem:[#allocation3 + $0x88] sm:$0x1] }
 0x42e   : > { %v16193_v10 = vadd.f32 %v12832_v53, %v16134_v9  ;;  %v9227_v12 = vshll.u32 %v9112_v36, 16  ;;  %v9233_v13 = vshll.u32 %v9113_v44, 16  ;;  %v9237_v51 = vshrl.u32 %v9113_v44, 16 }
 0x42f   : > { %v11907_v63 = vrot.slane %v8858_v39, 11  ;;  %v9217_v35 = vrot.slane %v9216_v58, 4  ;;  %v9226_v17 = vrot.slane %v9224_v7, 4  ;;  %v9212_v59 = vsel %vm14031_vm10, %v9207_v52, %v9211_v56 }
 0x430   : > { %v16195_v16 = vpop.f32.mrb[168].mxu1  ;;  %v9229_v20 = vrot.slane %v9227_v12, 5  ;;  %v9235_v45 = vrot.slane %v9233_v13, 5  ;;  %v9243_v27 = vshll.u32 %v9114_v8, 16  ;;  %v9239_v34 = vrot.slane %v9237_v51, 4 }
 0x431   : > { %v16199_v32 = vpop.f32.mrb[169].mxu1  ;;  %v8869_v9 = vsel %vm14006_vm9, %v11907_v63, %v8868_v22  ;;  %v9222_v36 = vsel %vm14031_vm10, %v9217_v35, %v9221_v46  ;;  %v9248_v44 = vshrl.u32 %v9115_v31, 16  ;;  %v9251_v52 = vshll.u32 %v9115_v31, 16  ;;  %v9118_v51 = vld [vmem:[#allocation3 + $0x94] sm:$0xf] }
 0x432   : > { %v16205_v2 = vpop.f32.mrb[170].mxu1  ;;  %v11923_v0 = vcombine.low %v8869_v9, %v8878_v18  ;;  %v11942_v53 = vcombine.low %v9212_v59, %v9222_v36  ;;  %v9230_v56 = vor.u32 %v9229_v20, %v9226_v17  ;;  %v9245_v39 = vrot.slane %v9243_v27, 5 }
 0x433   : > { %v16207_v58 = vpop.f32.mrb[171].mxu1  ;;  %v9240_v8 = vor.u32 %v9239_v34, %v9235_v45  ;;  %v9250_v7 = vrot.slane %v9248_v44, 4  ;;  %v9257_v12 = vshll.u32 %v9116_v5, 16  ;;  %v9261_v22 = vshrl.u32 %v9116_v5, 16  ;;  %v9119_v5 = vld [vmem:[#allocation3 + $0x98] sm:$0xf] }
 0x434   : > { %10971 = vmatmul.mubr.bf16.gmra.mrb[28].mxu0 %v11923_v0  ;;  %13209 = vmatprep.mubr.bf16.mxu1 %v11942_v53  ;;  %v9231_v26 = vrot.slane %v9230_v56, 4  ;;  %v9267_v46 = vshll.u32 %v9117_v19, 16  ;;  %v16211_v13 = vadd.f32 %v16046_v33, %v16038_v54  ;;  %v9253_v18 = vrot.slane %v9251_v52, 5  ;;  %v9121_v44 = vld [vmem:[#allocation3 + $0xa8] sm:$0xf] }
 0x435   : > { %v9241_v63 = vrot.slane %v9240_v8, 4  ;;  %v9259_v35 = vrot.slane %v9257_v12, 5  ;;  %v12835_v17 = vadd.f32 %v16072_v29, %v16070_v30  ;;  %v9263_v59 = vrot.slane %v9261_v22, 4  ;;  %v16221_v9 = vpop.f32.mrb[196].mxu0  ;;  %v9120_v29 = vld [vmem:[#allocation3 + $0x9c] sm:$0x1] }
 0x436   : > { %v9236_v31 = vsel %vm14031_vm10, %v9231_v26, %v9235_v45  ;;  %v9269_v20 = vrot.slane %v9267_v46, 5  ;;  %v16219_v27 = vadd.f32 %v16062_v14, %v16053_v25  ;;  %v9254_v33 = vor.u32 %v9253_v18, %v9250_v7  ;;  %v16230_v45 = vpop.f32.mrb[197].mxu0  ;;  %v9122_v8 = vld [vmem:[#allocation3 + $0xac] sm:$0xf]  ;;  %v9123_v18 = vld [vmem:[#allocation3 + $0xb0] sm:$0x1] }
 0x437   : > { %v9246_v54 = vsel %vm14031_vm10, %v9241_v63, %v9245_v39  ;;  %v16226_v36 = vadd.f32 %v12835_v17, %v16173_v1  ;;  %v12838_v30 = vadd.f32 %v16087_v55, %v16078_v38  ;;  %v9264_v19 = vor.u32 %v9263_v59, %v9259_v35  ;;  %v16232_v0 = vpop.f32.mrb[198].mxu0 }
 0x438   : > { %v11943_v34 = vcombine.low %v9236_v31, %v9246_v54  ;;  %v9272_v25 = vshrl.u32 %v9118_v51, 16  ;;  %v9275_v14 = vshll.u32 %v9118_v51, 16  ;;  %v9255_v53 = vrot.slane %v9254_v33, 4  ;;  %v16237_v7 = vpop.f32.mrb[199].mxu0 }
 0x439   : > { %v16235_v56 = vadd.f32 %v12838_v30, %v16181_v60  ;;  %v9281_v39 = vshll.u32 %v9119_v5, 16  ;;  %v9285_v1 = vshrl.u32 %v9119_v5, 16  ;;  %v9265_v38 = vrot.slane %v9264_v19, 4 }
 0x43a   : > { %13210 = vmatmul.mubr.bf16.gmra.mrb[4].mxu1 %v11943_v34  ;;  %v9274_v55 = vrot.slane %v9272_v25, 4  ;;  %v9277_v52 = vrot.slane %v9275_v14, 5  ;;  %v9291_v12 = vshll.u32 %v9120_v29, 16  ;;  %v16239_v26 = vpop.f32.mrb[172].mxu1  ;;  %v9260_v22 = vsel %vm14031_vm10, %v9255_v53, %v9259_v35 }
 0x43b   : > { %v9283_v46 = vrot.slane %v9281_v39, 5  ;;  %v9287_v63 = vrot.slane %v9285_v1, 4  ;;  %v9296_v60 = vshrl.u32 %v9121_v44, 16  ;;  %v16243_v17 = vpop.f32.mrb[173].mxu1  ;;  %v9270_v51 = vsel %vm14031_vm10, %v9265_v38, %v9269_v20  ;;  %v9124_v38 = vld [vmem:[#allocation3 + $0xbc] sm:$0xf] }
 0x43c   : > { %v9278_v31 = vor.u32 %v9277_v52, %v9274_v55  ;;  %v9293_v59 = vrot.slane %v9291_v12, 5  ;;  %v9299_v5 = vshll.u32 %v9121_v44, 16  ;;  %v16247_v54 = vpop.f32.mrb[174].mxu1  ;;  %v11944_v33 = vcombine.low %v9260_v22, %v9270_v51 }
 0x43d   : > { %v9288_v30 = vor.u32 %v9287_v63, %v9283_v46  ;;  %v9298_v29 = vrot.slane %v9296_v60, 4  ;;  %v9305_v34 = vshll.u32 %v9122_v8, 16  ;;  %v16249_v19 = vpop.f32.mrb[175].mxu1  ;;  %v9309_v14 = vshrl.u32 %v9122_v8, 16  ;;  %v9125_v63 = vld [vmem:[#allocation3 + $0xc0] sm:$0xf] }
 0x43e   : > { %v9279_v35 = vrot.slane %v9278_v31, 4  ;;  %v9301_v25 = vrot.slane %v9299_v5, 5  ;;  %v9315_v53 = vshll.u32 %v9123_v18, 16  ;;  %13213 = vmatprep.mubr.bf16.mxu1 %v11944_v33  ;;  %v16253_v20 = vadd.f32 %v16104_v42, %v16094_v37  ;;  %v9127_v5 = vld [vmem:[#allocation3 + $0xd0] sm:$0xf] }
 0x43f   : > { %v9289_v39 = vrot.slane %v9288_v30, 4  ;;  %v9307_v1 = vrot.slane %v9305_v34, 5  ;;  %v12841_v44 = vadd.f32 %v16116_v48, %v16114_v62  ;;  %v9311_v12 = vrot.slane %v9309_v14, 4  ;;  %v9126_v62 = vld [vmem:[#allocation3 + $0xc4] sm:$0x1] }
 0x440   : > { %v9284_v55 = vsel %vm14031_vm10, %v9279_v35, %v9283_v46  ;;  %v9302_v52 = vor.u32 %v9301_v25, %v9298_v29  ;;  %v9317_v22 = vrot.slane %v9315_v53, 5  ;;  %v16266_v37 = vadd.f32 %v16110_v43, %v16108_v6  ;;  %v9128_v43 = vld [vmem:[#allocation3 + $0xd4] sm:$0xf] }
 0x441   : > { %v9294_v8 = vsel %vm14031_vm10, %v9289_v39, %v9293_v59  ;;  %v16262_v18 = vadd.f32 %v12841_v44, %v16211_v13  ;;  %v12844_v48 = vadd.f32 %v16128_v61, %v16118_v50  ;;  %v16270_v42 = vpop.f32.mrb[200].mxu0  ;;  %v9312_v51 = vor.u32 %v9311_v12, %v9307_v1 }
 0x442   : > { %v11945_v46 = vcombine.low %v9284_v55, %v9294_v8  ;;  %v9303_v60 = vrot.slane %v9302_v52, 4  ;;  %v9320_v31 = vshrl.u32 %v9124_v38, 16  ;;  %v16272_v33 = vpop.f32.mrb[201].mxu0  ;;  %v9323_v59 = vshll.u32 %v9124_v38, 16 }
 0x443   : > { %v16275_v13 = vadd.f32 %v12844_v48, %v16219_v27  ;;  %v9329_v30 = vshll.u32 %v9125_v63, 16  ;;  %v9333_v6 = vshrl.u32 %v9125_v63, 16  ;;  %v16277_v29 = vpop.f32.mrb[202].mxu0  ;;  %v9313_v61 = vrot.slane %v9312_v51, 4  ;;  %v9129_v27 = vld [vmem:[#allocation3 + $0xd8] sm:$0x1] }
 0x444   : > { %13214 = vmatmul.mubr.bf16.gmra.mrb[8].mxu1 %v11945_v46  ;;  %v9308_v50 = vsel %vm14031_vm10, %v9303_v60, %v9307_v1  ;;  %v9322_v34 = vrot.slane %v9320_v31, 4  ;;  %v9339_v35 = vshll.u32 %v9126_v62, 16  ;;  %v16281_v25 = vpop.f32.mrb[203].mxu0  ;;  %v9325_v14 = vrot.slane %v9323_v59, 5 }
 0x445   : > { %v9331_v53 = vrot.slane %v9329_v30, 5  ;;  %v9335_v39 = vrot.slane %v9333_v6, 4  ;;  %v9344_v44 = vshrl.u32 %v9127_v5, 16  ;;  %v9318_v38 = vsel %vm14031_vm10, %v9313_v61, %v9317_v22  ;;  %v9130_v61 = vld [vmem:[#allocation3 + $0xe4] sm:$0xf] }
 0x446   : > { %v9341_v55 = vrot.slane %v9339_v35, 5  ;;  %v9347_v52 = vshll.u32 %v9127_v5, 16  ;;  %v9353_v12 = vshll.u32 %v9128_v43, 16  ;;  %v16285_v63 = vpop.f32.mrb[176].mxu1  ;;  %v11946_v8 = vcombine.low %v9308_v50, %v9318_v38 }
 0x447   : > { %v9326_v1 = vor.u32 %v9325_v14, %v9322_v34  ;;  %v9336_v48 = vor.u32 %v9335_v39, %v9331_v53  ;;  %v9346_v46 = vrot.slane %v9344_v44, 4  ;;  %v16287_v62 = vpop.f32.mrb[177].mxu1  ;;  %v9357_v31 = vshrl.u32 %v9128_v43, 16 }
 0x448   : > { %v9349_v60 = vrot.slane %v9347_v52, 5  ;;  %v9355_v51 = vrot.slane %v9353_v12, 5  ;;  %v9363_v59 = vshll.u32 %v9129_v27, 16  ;;  %v16289_v30 = vpop.f32.mrb[178].mxu1  ;;  %13217 = vmatprep.mubr.bf16.mxu1 %v11946_v8  ;;  %v16293_v5 = vadd.f32 %v16152_v49, %v16145_v57  ;;  %v9131_v27 = vld [vmem:[#allocation3 + $0xe8] sm:$0xf] }
 0x449   : > { %v9327_v6 = vrot.slane %v9326_v1, 4  ;;  %v9337_v22 = vrot.slane %v9336_v48, 4  ;;  %v12847_v50 = vadd.f32 %v16169_v4, %v16167_v41  ;;  %v16297_v34 = vpop.f32.mrb[179].mxu1  ;;  %v9359_v14 = vrot.slane %v9357_v31, 4  ;;  %v9132_v4 = vld [vmem:[#allocation3 + $0xec] sm:$0x1] }
 0x44a   : > { %v9350_v35 = vor.u32 %v9349_v60, %v9346_v46  ;;  %v9365_v39 = vrot.slane %v9363_v59, 5  ;;  %v16301_v43 = vadd.f32 %v16163_v21, %v16158_v23  ;;  %v12850_v41 = vadd.f32 %v16183_v28, %v16177_v47  ;;  %v9133_v23 = vld [vmem:[#allocation3 + $0xf8] sm:$0xf]  ;;  %v9134_v46 = vld [vmem:[#allocation3 + $0xfc] sm:$0xf] }
 0x44b   : > { %v9332_v44 = vsel %vm14031_vm10, %v9327_v6, %v9331_v53  ;;  %v9342_v57 = vsel %vm14031_vm10, %v9337_v22, %v9341_v55  ;;  %v16308_v49 = vadd.f32 %v12847_v50, %v16253_v20  ;;  %v9360_v12 = vor.u32 %v9359_v14, %v9355_v51  ;;  %v9135_v28 = vld [vmem:[#allocation3 + $0x100] sm:$0x1] }
 0x44c   : > { %v11947_v38 = vcombine.low %v9332_v44, %v9342_v57  ;;  %v9351_v52 = vrot.slane %v9350_v35, 4  ;;  %v9368_v8 = vshrl.u32 %v9130_v61, 16  ;;  %v16313_v21 = vadd.f32 %v12850_v41, %v16266_v37 }
 0x44d   : > { %v9371_v1 = vshll.u32 %v9130_v61, 16  ;;  %v9377_v53 = vshll.u32 %v9131_v27, 16  ;;  %v9381_v48 = vshrl.u32 %v9131_v27, 16  ;;  %v9361_v55 = vrot.slane %v9360_v12, 4 }
 0x44e   : > { %13218 = vmatmul.mubr.bf16.gmra.mrb[12].mxu1 %v11947_v38  ;;  %v9356_v20 = vsel %vm14031_vm10, %v9351_v52, %v9355_v51  ;;  %v9370_v60 = vrot.slane %v9368_v8, 4  ;;  %v9387_v47 = vshll.u32 %v9132_v4, 16  ;;  %v16317_v31 = vpop.f32.mrb[204].mxu0  ;;  %v9392_v50 = vshrl.u32 %v9133_v23, 16 }
 0x44f   : > { %v9373_v59 = vrot.slane %v9371_v1, 5  ;;  %v9379_v6 = vrot.slane %v9377_v53, 5  ;;  %v9383_v22 = vrot.slane %v9381_v48, 4  ;;  %v16319_v37 = vpop.f32.mrb[205].mxu0  ;;  %v9366_v61 = vsel %vm14031_vm10, %v9361_v55, %v9365_v39 }
 0x450   : > { %v9389_v35 = vrot.slane %v9387_v47, 5  ;;  %v9395_v14 = vshll.u32 %v9133_v23, 16  ;;  %v9401_v27 = vshll.u32 %v9134_v46, 16  ;;  %v16323_v44 = vpop.f32.mrb[206].mxu0  ;;  %v11948_v51 = vcombine.low %v9356_v20, %v9366_v61 }
 0x451   : > { %v9374_v57 = vor.u32 %v9373_v59, %v9370_v60  ;;  %v9384_v41 = vor.u32 %v9383_v22, %v9379_v6  ;;  %v9394_v4 = vrot.slane %v9392_v50, 4  ;;  %v16325_v38 = vpop.f32.mrb[207].mxu0  ;;  %v9405_v1 = vshrl.u32 %v9134_v46, 16  ;;  %v9136_v60 = vld [vmem:[#allocation3 + $0x10c] sm:$0xf] }
 0x452   : > { %v16327_v52 = vpop.f32.mrb[180].mxu1  ;;  %v9397_v12 = vrot.slane %v9395_v14, 5  ;;  %v9403_v8 = vrot.slane %v9401_v27, 5  ;;  %v9411_v53 = vshll.u32 %v9135_v28, 16  ;;  %13221 = vmatprep.mubr.bf16.mxu1 %v11948_v51  ;;  %v16333_v55 = vadd.f32 %v16199_v32, %v16195_v16  ;;  %v9137_v28 = vld [vmem:[#allocation3 + $0x110] sm:$0xf] }
 0x453   : > { %v16329_v48 = vpop.f32.mrb[181].mxu1  ;;  %v9375_v39 = vrot.slane %v9374_v57, 4  ;;  %v9385_v23 = vrot.slane %v9384_v41, 4  ;;  %v12853_v20 = vadd.f32 %v16230_v45, %v16221_v9  ;;  %v9407_v22 = vrot.slane %v9405_v1, 4  ;;  %v9138_v14 = vld [vmem:[#allocation3 + $0x114] sm:$0x1] }
 0x454   : > { %v16337_v47 = vpop.f32.mrb[182].mxu1  ;;  %v9398_v59 = vor.u32 %v9397_v12, %v9394_v4  ;;  %v9413_v50 = vrot.slane %v9411_v53, 5  ;;  %v16341_v46 = vadd.f32 %v16207_v58, %v16205_v2  ;;  %v12856_v45 = vadd.f32 %v16237_v7, %v16232_v0  ;;  %v9139_v57 = vld [vmem:[#allocation3 + $0x120] sm:$0xf]  ;;  %v9140_v1 = vld [vmem:[#allocation3 + $0x124] sm:$0xf] }
 0x455   : > { %v16343_v61 = vpop.f32.mrb[183].mxu1  ;;  %v9380_v16 = vsel %vm14031_vm10, %v9375_v39, %v9379_v6  ;;  %v9390_v32 = vsel %vm14031_vm10, %v9385_v23, %v9389_v35  ;;  %v16350_v9 = vadd.f32 %v12853_v20, %v16293_v5  ;;  %v9408_v2 = vor.u32 %v9407_v22, %v9403_v8  ;;  %v9141_v20 = vld [vmem:[#allocation3 + $0x128] sm:$0x1] }
 0x456   : > { %v11949_v27 = vcombine.low %v9380_v16, %v9390_v32  ;;  %v9399_v51 = vrot.slane %v9398_v59, 4  ;;  %v9416_v58 = vshrl.u32 %v9136_v60, 16  ;;  %v16355_v41 = vadd.f32 %v12856_v45, %v16301_v43 }
 0x457   : > { %v9419_v4 = vshll.u32 %v9136_v60, 16  ;;  %v9425_v6 = vshll.u32 %v9137_v28, 16  ;;  %v9429_v12 = vshrl.u32 %v9137_v28, 16  ;;  %v9409_v35 = vrot.slane %v9408_v2, 4 }
 0x458   : > { %16927 = vst [vmem:[#allocation30_spill] sm:$0xff] %v16355_v41  ;;  %13222 = vmatmul.mubr.bf16.gmra.mrb[16].mxu1 %v11949_v27  ;;  %v9404_v5 = vsel %vm14031_vm10, %v9399_v51, %v9403_v8  ;;  %v9418_v53 = vrot.slane %v9416_v58, 4  ;;  %v9435_v0 = vshll.u32 %v9138_v14, 16  ;;  %v9440_v59 = vshrl.u32 %v9139_v57, 16 }
 0x459   : > { %v9421_v7 = vrot.slane %v9419_v4, 5  ;;  %v9427_v39 = vrot.slane %v9425_v6, 5  ;;  %v9431_v23 = vrot.slane %v9429_v12, 4  ;;  %v9414_v43 = vsel %vm14031_vm10, %v9409_v35, %v9413_v50  ;;  %v9142_v12 = vld [vmem:[#allocation3 + $0x134] sm:$0xf] }
 0x45a   : > { %v9437_v22 = vrot.slane %v9435_v0, 5  ;;  %v9443_v60 = vshll.u32 %v9139_v57, 16  ;;  %v9449_v16 = vshll.u32 %v9140_v1, 16  ;;  %v11950_v28 = vcombine.low %v9404_v5, %v9414_v43 }
 0x45b   : > { %v9422_v32 = vor.u32 %v9421_v7, %v9418_v53  ;;  %v9432_v45 = vor.u32 %v9431_v23, %v9427_v39  ;;  %v9442_v27 = vrot.slane %v9440_v59, 4  ;;  %v16361_v41 = vpop.f32.mrb[208].mxu0  ;;  %v9453_v14 = vshrl.u32 %v9140_v1, 16  ;;  %v9143_v7 = vld [vmem:[#allocation3 + $0x138] sm:$0xf] }
 0x45c   : > { %v9445_v8 = vrot.slane %v9443_v60, 5  ;;  %v9451_v51 = vrot.slane %v9449_v16, 5  ;;  %v9459_v2 = vshll.u32 %v9141_v20, 16  ;;  %v16363_v58 = vpop.f32.mrb[209].mxu0  ;;  %13225 = vmatprep.mubr.bf16.mxu1 %v11950_v28  ;;  %v16367_v50 = vadd.f32 %v16243_v17, %v16239_v26  ;;  %v9144_v59 = vld [vmem:[#allocation3 + $0x13c] sm:$0x1] }
 0x45d   : > { %v9423_v4 = vrot.slane %v9422_v32, 4  ;;  %v9433_v6 = vrot.slane %v9432_v45, 4  ;;  %v12859_v57 = vadd.f32 %v16272_v33, %v16270_v42  ;;  %v16371_v5 = vpop.f32.mrb[210].mxu0  ;;  %v9455_v53 = vrot.slane %v9453_v14, 4  ;;  %v9145_v28 = vld [vmem:[#allocation3 + $0x148] sm:$0xf] }
 0x45e   : > { %v9446_v35 = vor.u32 %v9445_v8, %v9442_v27  ;;  %v9461_v0 = vrot.slane %v9459_v2, 5  ;;  %v16375_v1 = vadd.f32 %v16249_v19, %v16247_v54  ;;  %v16377_v23 = vpop.f32.mrb[211].mxu0  ;;  %v12862_v33 = vadd.f32 %v16281_v25, %v16277_v29  ;;  %v9146_v27 = vld [vmem:[#allocation3 + $0x14c] sm:$0xf] }
 0x45f   : > { %v16379_v20 = vpop.f32.mrb[184].mxu1  ;;  %v9428_v26 = vsel %vm14031_vm10, %v9423_v4, %v9427_v39  ;;  %v9438_v17 = vsel %vm14031_vm10, %v9433_v6, %v9437_v22  ;;  %v16386_v42 = vadd.f32 %v12859_v57, %v16333_v55  ;;  %v9456_v60 = vor.u32 %v9455_v53, %v9451_v51 }
 0x460   : > { %v16390_v54 = vpop.f32.mrb[185].mxu1  ;;  %v11951_v19 = vcombine.low %v9428_v26, %v9438_v17  ;;  %v9447_v43 = vrot.slane %v9446_v35, 4  ;;  %v9464_v16 = vshrl.u32 %v9142_v12, 16  ;;  %v16395_v39 = vadd.f32 %v12862_v33, %v16341_v46  ;;  %v9147_v35 = vld [vmem:[#allocation3 + $0x150] sm:$0x1] }
 0x461   : > { %16928 = vst [vmem:[#allocation26_spill] sm:$0xff] %v16386_v42  ;;  %v16392_v32 = vpop.f32.mrb[186].mxu1  ;;  %v9467_v22 = vshll.u32 %v9142_v12, 16  ;;  %v9473_v45 = vshll.u32 %v9143_v7, 16  ;;  %v9477_v55 = vshrl.u32 %v9143_v7, 16  ;;  %v9457_v25 = vrot.slane %v9456_v60, 4 }
 0x462   : > { %16929 = vst [vmem:[#allocation24_spill] sm:$0xff] %v16395_v39  ;;  %v16397_v8 = vpop.f32.mrb[187].mxu1  ;;  %13226 = vmatmul.mubr.bf16.gmra.mrb[20].mxu1 %v11951_v19  ;;  %v9452_v29 = vsel %vm14031_vm10, %v9447_v43, %v9451_v51  ;;  %v9466_v14 = vrot.slane %v9464_v16, 4  ;;  %v9483_v2 = vshll.u32 %v9144_v59, 16  ;;  %v9488_v53 = vshrl.u32 %v9145_v28, 16 }
 0x463   : > { %v9469_v4 = vrot.slane %v9467_v22, 5  ;;  %v9475_v6 = vrot.slane %v9473_v45, 5  ;;  %v9479_v57 = vrot.slane %v9477_v55, 4  ;;  %v9462_v46 = vsel %vm14031_vm10, %v9457_v25, %v9461_v0  ;;  %v649_v59 = vld [vmem:[#allocation3 + $0x164] sm:$0x1] }
 0x464   : > { %v9485_v12 = vrot.slane %v9483_v2, 5  ;;  %v9491_v7 = vshll.u32 %v9145_v28, 16  ;;  %v9497_v26 = vshll.u32 %v9146_v27, 16  ;;  %v11952_v17 = vcombine.low %v9452_v29, %v9462_v46  ;;  %v9148_v28 = vld [vmem:[#allocation3 + $0x15c] sm:$0xf] }
 0x465   : > { %v9470_v33 = vor.u32 %v9469_v4, %v9466_v14  ;;  %v9480_v19 = vor.u32 %v9479_v57, %v9475_v6  ;;  %v9490_v39 = vrot.slane %v9488_v53, 4  ;;  %v9501_v43 = vshrl.u32 %v9146_v27, 16  ;;  %v9149_v27 = vld [vmem:[#allocation3 + $0x160] sm:$0xf] }
 0x466   : > { %v9493_v42 = vrot.slane %v9491_v7, 5  ;;  %v9499_v51 = vrot.slane %v9497_v26, 5  ;;  %v9507_v60 = vshll.u32 %v9147_v35, 16  ;;  %13229 = vmatprep.mubr.bf16.mxu1 %v11952_v17  ;;  %v12759_v45 = vadd.f32 %v16287_v62, %v16285_v63  ;;  %v12875_v55 = vpop.f32.mrb[212].mxu0 }
 0x467   : > { %v9471_v16 = vrot.slane %v9470_v33, 4  ;;  %v9481_v22 = vrot.slane %v9480_v19, 4  ;;  %v12865_v0 = vadd.f32 %v16319_v37, %v16317_v31  ;;  %v9503_v25 = vrot.slane %v9501_v43, 4  ;;  %v12876_v4 = vpop.f32.mrb[213].mxu0 }
 0x468   : > { %v9494_v29 = vor.u32 %v9493_v42, %v9490_v39  ;;  %v9509_v14 = vrot.slane %v9507_v60, 5  ;;  %v12762_v2 = vadd.f32 %v16297_v34, %v16289_v30  ;;  %v12868_v62 = vadd.f32 %v16325_v38, %v16323_v44  ;;  %v12878_v31 = vpop.f32.mrb[214].mxu0 }
 0x469   : > { %v9476_v57 = vsel %vm14031_vm10, %v9471_v16, %v9475_v6  ;;  %v9486_v35 = vsel %vm14031_vm10, %v9481_v22, %v9485_v12  ;;  %v16414_v63 = vadd.f32 %v12865_v0, %v16367_v50  ;;  %v9504_v39 = vor.u32 %v9503_v25, %v9499_v51  ;;  %v12879_v34 = vpop.f32.mrb[215].mxu0 }
 0x46a   : > { %v11953_v37 = vcombine.low %v9476_v57, %v9486_v35  ;;  %v9495_v42 = vrot.slane %v9494_v29, 4  ;;  %v650_v30 = vsel %vm13978_vm5, 0, %v649_v59  ;;  %v16421_v53 = vadd.f32 %v12868_v62, %v16375_v1 }
 0x46b   : > { %651 = vst [vmem:[#allocation3 + $0x164] sm:$0x1] %v650_v30  ;;  %v9512_v6 = vshrl.u32 %v9148_v28, 16  ;;  %v9515_v46 = vshll.u32 %v9148_v28, 16  ;;  %v9521_v12 = vshll.u32 %v9149_v27, 16  ;;  %v9505_v38 = vrot.slane %v9504_v39, 4 }
 0x46c   : > { %v12775_v50 = vpop.f32.mrb[188].mxu1  ;;  %13230 = vmatmul.mubr.bf16.gmra.mrb[24].mxu1 %v11953_v37  ;;  %v9500_v44 = vsel %vm14031_vm10, %v9495_v42, %v9499_v51  ;;  %v9525_v7 = vshrl.u32 %v9149_v27, 16  ;;  %v12765_v26 = vadd.f32 %v16329_v48, %v16327_v52  ;;  %v12871_v1 = vadd.f32 %v16363_v58, %v16361_v41 }
 0x46d   : > { %v12776_v24 = vpop.f32.mrb[189].mxu1  ;;  %v9514_v17 = vrot.slane %v9512_v6, 4  ;;  %v9517_v33 = vrot.slane %v9515_v46, 5  ;;  %v9523_v19 = vrot.slane %v9521_v12, 5  ;;  %v9510_v60 = vsel %vm14031_vm10, %v9505_v38, %v9509_v14 }
 0x46e   : > { %v12778_v43 = vpop.f32.mrb[190].mxu1  ;;  %v9527_v59 = vrot.slane %v9525_v7, 4  ;;  %v12768_v51 = vadd.f32 %v16343_v61, %v16337_v47  ;;  %v12874_v16 = vadd.f32 %v16377_v23, %v16371_v5  ;;  %v11954_v52 = vcombine.low %v9500_v44, %v9510_v60  ;;  %v16931_v7 = vld [vmem:[#allocation27_spill] sm:$0xff] }
 0x46f   : > { %v12779_v22 = vpop.f32.mrb[191].mxu1  ;;  %v9518_v48 = vor.u32 %v9517_v33, %v9514_v17  ;;  %v16435_v0 = vadd.f32 %v12871_v1, %v12759_v45  ;;  %v12771_v28 = vadd.f32 %v16390_v54, %v16379_v20  ;;  %v12877_v29 = vadd.f32 %v12876_v4, %v12875_v55 }
 0x470   : > { %v9528_v41 = vor.u32 %v9527_v59, %v9523_v19  ;;  %v16439_v58 = vadd.f32 %v12874_v16, %v12762_v2  ;;  %v12774_v25 = vadd.f32 %v16397_v8, %v16392_v32  ;;  %13233 = vmatprep.mubr.bf16.mxu1 %v11954_v52  ;;  %v12880_v61 = vadd.f32 %v12879_v34, %v12878_v31  ;;  %v16932_v52 = vld [vmem:[#allocation22_spill] sm:$0xff] }
 0x471   : > { %v9519_v47 = vrot.slane %v9518_v48, 4  ;;  %v12777_v14 = vadd.f32 %v12776_v24, %v12775_v50  ;;  %v12780_v5 = vadd.f32 %v12779_v22, %v12778_v43  ;;  %v16443_v27 = vadd.f32 %v12877_v29, %v12765_v26  ;;  %v16930_v50 = vld [vmem:[#allocation39_spill] sm:$0xff]  ;;  %v16933_v29 = vld [vmem:[#allocation21_spill] sm:$0xff] }
 0x472   : > { %v9150_v23 = vld [vmem:[#allocation3 + $0x164] sm:$0x1]  ;;  %v12881_v45 = vpop.f32.mrb[216].mxu0  ;;  %v9529_v57 = vrot.slane %v9528_v41, 4  ;;  %v16445_v62 = vadd.f32 %v12880_v61, %v12768_v51 }
 0x473   : > { %v9531_v35 = vshll.u32 %v9150_v23, 16  ;;  %v12882_v20 = vpop.f32.mrb[217].mxu0  ;;  %v9524_v32 = vsel %vm14031_vm10, %v9519_v47, %v9523_v19 }
 0x474   : > { %v12883_v54 = vadd.f32 %v12882_v20, %v12881_v45  ;;  %v12884_v2 = vpop.f32.mrb[218].mxu0  ;;  %v12909_v55 = vpop.f32.mrb[192].mxu1 }
 0x475   : > { %v9533_v8 = vrot.slane %v9531_v35, 5  ;;  %v12885_v4 = vpop.f32.mrb[219].mxu0  ;;  %v12910_v31 = vpop.f32.mrb[193].mxu1 }
 0x476   : > { %v16449_v37 = vadd.f32 %v12883_v54, %v12771_v28  ;;  %v12886_v42 = vadd.f32 %v12885_v4, %v12884_v2  ;;  %v12911_v39 = vadd.f32 %v12910_v31, %v12909_v55  ;;  %v12912_v30 = vpop.f32.mrb[194].mxu1 }
 0x477   : > { %v9534_v34 = vsel %vm14031_vm10, %v9529_v57, %v9533_v8  ;;  %v12913_v6 = vpop.f32.mrb[195].mxu1 }
 0x478   : > { %v11955_v46 = vcombine.low %v9524_v32, %v9534_v34  ;;  %v16453_v12 = vadd.f32 %v12886_v42, %v12774_v25  ;;  %v10692_v44 = vadd.f32 %v12911_v39, %v16930_v50  ;;  %v12914_v38 = vadd.f32 %v12913_v6, %v12912_v30 }
 0x47a   : > { %13234 = vmatmul.mubr.bf16.gmra.mrb[28].mxu1 %v11955_v46  ;;  %v10695_v26 = vadd.f32 %v12914_v38, %v16931_v7 }
 0x47f   : > { %v12887_v24 = vpop.f32.mrb[220].mxu0  ;;  %v12915_v17 = vpop.f32.mrb[196].mxu1 }
 0x480   : > { %v12888_v33 = vpop.f32.mrb[221].mxu0  ;;  %v12916_v19 = vpop.f32.mrb[197].mxu1 }
 0x481   : > { %v12889_v1 = vadd.f32 %v12888_v33, %v12887_v24  ;;  %v12890_v43 = vpop.f32.mrb[222].mxu0  ;;  %v12917_v60 = vadd.f32 %v12916_v19, %v12915_v17  ;;  %v12918_v59 = vpop.f32.mrb[198].mxu1  ;;  %v16936_v19 = vld [vmem:[#allocation28_spill] sm:$0xff] }
 0x482   : > { %v12891_v40 = vpop.f32.mrb[223].mxu0  ;;  %v12919_v51 = vpop.f32.mrb[199].mxu1 }
 0x483   : > { %v16457_v16 = vadd.f32 %v12889_v1, %v12777_v14  ;;  %v12892_v22 = vadd.f32 %v12891_v40, %v12890_v43  ;;  %v10700_v48 = vadd.f32 %v12917_v60, %v16932_v52  ;;  %v12920_v28 = vadd.f32 %v12919_v51, %v12918_v59  ;;  %v16934_v14 = vld [vmem:[#allocation25_spill] sm:$0xff]  ;;  %v16937_v59 = vld [vmem:[#allocation23_spill] sm:$0xff] }
 0x485   : > { %v16460_v41 = vadd.f32 %v12892_v22, %v12780_v5  ;;  %v10703_v25 = vadd.f32 %v12920_v28, %v16933_v29  ;;  %v16935_v5 = vld [vmem:[#allocation29_spill] sm:$0xff] }
 0x487   : > { %v12921_v47 = vpop.f32.mrb[200].mxu1  ;;  %v13021_v61 = vpop.f32.mrb[224].mxu0 }
 0x488   : > { %v12922_v23 = vpop.f32.mrb[201].mxu1  ;;  %v13022_v45 = vpop.f32.mrb[225].mxu0 }
 0x489   : > { %v12923_v57 = vadd.f32 %v12922_v23, %v12921_v47  ;;  %v12924_v35 = vpop.f32.mrb[202].mxu1  ;;  %v13023_v20 = vadd.f32 %v13022_v45, %v13021_v61  ;;  %v13024_v54 = vpop.f32.mrb[226].mxu0 }
 0x48a   : > { %v12925_v2 = vpop.f32.mrb[203].mxu1  ;;  %v13025_v55 = vpop.f32.mrb[227].mxu0 }
 0x48b   : > { %v10708_v32 = vadd.f32 %v12923_v57, %v16934_v14  ;;  %v12926_v8 = vadd.f32 %v12925_v2, %v12924_v35  ;;  %v13026_v4 = vadd.f32 %v13025_v55, %v13024_v54  ;;  %v16464_v31 = vadd.f32 %v13023_v20, %v10692_v44 }
 0x48d   : > { %v10711_v42 = vadd.f32 %v12926_v8, %v16935_v5  ;;  %v16467_v39 = vadd.f32 %v13026_v4, %v10695_v26 }
 0x48f   : > { %v12927_v30 = vpop.f32.mrb[204].mxu1  ;;  %v13027_v34 = vpop.f32.mrb[228].mxu0 }
 0x490   : > { %v12928_v6 = vpop.f32.mrb[205].mxu1  ;;  %v13028_v46 = vpop.f32.mrb[229].mxu0 }
 0x491   : > { %v12929_v50 = vadd.f32 %v12928_v6, %v12927_v30  ;;  %v12930_v38 = vpop.f32.mrb[206].mxu1  ;;  %v13029_v7 = vadd.f32 %v13028_v46, %v13027_v34  ;;  %v13030_v24 = vpop.f32.mrb[230].mxu0 }
 0x492   : > { %v12931_v17 = vpop.f32.mrb[207].mxu1  ;;  %v13031_v33 = vpop.f32.mrb[231].mxu0 }
 0x493   : > { %v10716_v1 = vadd.f32 %v12929_v50, %v16936_v19  ;;  %v12932_v43 = vadd.f32 %v12931_v17, %v12930_v38  ;;  %v13032_v60 = vadd.f32 %v13031_v33, %v13030_v24  ;;  %v16470_v44 = vadd.f32 %v13029_v7, %v10700_v48 }
 0x495   : > { %v10719_v40 = vadd.f32 %v12932_v43, %v16937_v59  ;;  %v16473_v26 = vadd.f32 %v13032_v60, %v10703_v25 }
 0x497   : > { %v12933_v51 = vpop.f32.mrb[208].mxu1  ;;  %v13033_v22 = vpop.f32.mrb[232].mxu0 }
 0x498   : > { %v12934_v52 = vpop.f32.mrb[209].mxu1  ;;  %v13034_v28 = vpop.f32.mrb[233].mxu0 }
 0x499   : > { %v12935_v29 = vadd.f32 %v12934_v52, %v12933_v51  ;;  %v12936_v47 = vpop.f32.mrb[210].mxu1  ;;  %v13035_v61 = vadd.f32 %v13034_v28, %v13033_v22  ;;  %v13036_v23 = vpop.f32.mrb[234].mxu0 }
 0x49a   : > { %v12937_v45 = vpop.f32.mrb[211].mxu1  ;;  %v13037_v57 = vpop.f32.mrb[235].mxu0 }
 0x49b   : > { %v10724_v35 = vadd.f32 %v12935_v29, %v16137_v11  ;;  %v12938_v20 = vadd.f32 %v12937_v45, %v12936_v47  ;;  %v13038_v54 = vadd.f32 %v13037_v57, %v13036_v23  ;;  %v16476_v48 = vadd.f32 %v13035_v61, %v10708_v32 }
 0x49d   : > { %v10727_v2 = vadd.f32 %v12938_v20, %v16148_v15  ;;  %v16479_v25 = vadd.f32 %v13038_v54, %v10711_v42 }
 0x49f   : > { %v12939_v55 = vpop.f32.mrb[212].mxu1  ;;  %v13039_v14 = vpop.f32.mrb[236].mxu0 }
 0x4a0   : > { %v12940_v8 = vpop.f32.mrb[213].mxu1  ;;  %v13040_v4 = vpop.f32.mrb[237].mxu0 }
 0x4a1   : > { %v12941_v5 = vadd.f32 %v12940_v8, %v12939_v55  ;;  %v12942_v30 = vpop.f32.mrb[214].mxu1  ;;  %v13041_v34 = vadd.f32 %v13040_v4, %v13039_v14  ;;  %v13042_v6 = vpop.f32.mrb[238].mxu0 }
 0x4a2   : > { %v12943_v46 = vpop.f32.mrb[215].mxu1  ;;  %v13043_v50 = vpop.f32.mrb[239].mxu0 }
 0x4a3   : > { %v10732_v11 = vadd.f32 %v12941_v5, %v16186_v3  ;;  %v12944_v38 = vadd.f32 %v12943_v46, %v12942_v30  ;;  %v13044_v7 = vadd.f32 %v13043_v50, %v13042_v6  ;;  %v16482_v32 = vadd.f32 %v13041_v34, %v10716_v1 }
 0x4a5   : > { %v10735_v15 = vadd.f32 %v12944_v38, %v16193_v10  ;;  %v16485_v42 = vadd.f32 %v13044_v7, %v10719_v40 }
 0x4a7   : > { %v12945_v24 = vpop.f32.mrb[216].mxu1  ;;  %v13045_v17 = vpop.f32.mrb[240].mxu0 }
 0x4a8   : > { %v12946_v33 = vpop.f32.mrb[217].mxu1  ;;  %v13046_v19 = vpop.f32.mrb[241].mxu0 }
 0x4a9   : > { %v12947_v43 = vadd.f32 %v12946_v33, %v12945_v24  ;;  %v12948_v60 = vpop.f32.mrb[218].mxu1  ;;  %v13047_v59 = vadd.f32 %v13046_v19, %v13045_v17  ;;  %v13048_v51 = vpop.f32.mrb[242].mxu0 }
 0x4aa   : > { %v12949_v22 = vpop.f32.mrb[219].mxu1  ;;  %v13049_v52 = vpop.f32.mrb[243].mxu0 }
 0x4ab   : > { %v10740_v3 = vadd.f32 %v12947_v43, %v16226_v36  ;;  %v12950_v28 = vadd.f32 %v12949_v22, %v12948_v60  ;;  %v13050_v29 = vadd.f32 %v13049_v52, %v13048_v51  ;;  %v16488_v1 = vadd.f32 %v13047_v59, %v10724_v35 }
 0x4ad   : > { %v10743_v10 = vadd.f32 %v12950_v28, %v16235_v56  ;;  %v16491_v40 = vadd.f32 %v13050_v29, %v10727_v2 }
 0x4af   : > { %v12951_v47 = vpop.f32.mrb[220].mxu1  ;;  %v13051_v61 = vpop.f32.mrb[244].mxu0 }
 0x4b0   : > { %v12952_v23 = vpop.f32.mrb[221].mxu1  ;;  %v13052_v45 = vpop.f32.mrb[245].mxu0 }
 0x4b1   : > { %v12953_v57 = vadd.f32 %v12952_v23, %v12951_v47  ;;  %v12954_v20 = vpop.f32.mrb[222].mxu1  ;;  %v13053_v54 = vadd.f32 %v13052_v45, %v13051_v61  ;;  %v13054_v55 = vpop.f32.mrb[246].mxu0 }
 0x4b2   : > { %v12955_v14 = vpop.f32.mrb[223].mxu1  ;;  %v13055_v8 = vpop.f32.mrb[247].mxu0 }
 0x4b3   : > { %v10748_v36 = vadd.f32 %v12953_v57, %v16262_v18  ;;  %v12956_v4 = vadd.f32 %v12955_v14, %v12954_v20  ;;  %v13056_v5 = vadd.f32 %v13055_v8, %v13054_v55  ;;  %v16494_v35 = vadd.f32 %v13053_v54, %v10732_v11  ;;  %v16938_v20 = vld [vmem:[#allocation30_spill] sm:$0xff] }
 0x4b5   : > { %v10751_v56 = vadd.f32 %v12956_v4, %v16275_v13  ;;  %v16497_v2 = vadd.f32 %v13056_v5, %v10735_v15 }
 0x4b7   : > { %v12957_v30 = vpop.f32.mrb[224].mxu1  ;;  %v13057_v34 = vpop.f32.mrb[248].mxu0 }
 0x4b8   : > { %v12958_v6 = vpop.f32.mrb[225].mxu1  ;;  %v13058_v46 = vpop.f32.mrb[249].mxu0 }
 0x4b9   : > { %v12959_v50 = vadd.f32 %v12958_v6, %v12957_v30  ;;  %v12960_v38 = vpop.f32.mrb[226].mxu1  ;;  %v13059_v7 = vadd.f32 %v13058_v46, %v13057_v34  ;;  %v13060_v24 = vpop.f32.mrb[250].mxu0 }
 0x4ba   : > { %v12961_v17 = vpop.f32.mrb[227].mxu1  ;;  %v13061_v33 = vpop.f32.mrb[251].mxu0 }
 0x4bb   : > { %v10756_v18 = vadd.f32 %v12959_v50, %v16308_v49  ;;  %v12962_v19 = vadd.f32 %v12961_v17, %v12960_v38  ;;  %v13062_v43 = vadd.f32 %v13061_v33, %v13060_v24  ;;  %v16500_v11 = vadd.f32 %v13059_v7, %v10740_v3  ;;  %v16939_v50 = vld [vmem:[#allocation26_spill] sm:$0xff]  ;;  %v16940_v24 = vld [vmem:[#allocation24_spill] sm:$0xff] }
 0x4bd   : > { %v10759_v13 = vadd.f32 %v12962_v19, %v16313_v21  ;;  %v16503_v15 = vadd.f32 %v13062_v43, %v10743_v10 }
 0x4bf   : > { %v12963_v60 = vpop.f32.mrb[228].mxu1  ;;  %v13063_v59 = vpop.f32.mrb[252].mxu0 }
 0x4c0   : > { %v12964_v51 = vpop.f32.mrb[229].mxu1  ;;  %v13064_v22 = vpop.f32.mrb[253].mxu0 }
 0x4c1   : > { %v12965_v52 = vadd.f32 %v12964_v51, %v12963_v60  ;;  %v12966_v28 = vpop.f32.mrb[230].mxu1  ;;  %v13065_v29 = vadd.f32 %v13064_v22, %v13063_v59  ;;  %v13066_v47 = vpop.f32.mrb[254].mxu0 }
 0x4c2   : > { %v12967_v61 = vpop.f32.mrb[231].mxu1  ;;  %v13067_v23 = vpop.f32.mrb[255].mxu0 }
 0x4c3   : > { %v10764_v49 = vadd.f32 %v12965_v52, %v16350_v9  ;;  %v12968_v45 = vadd.f32 %v12967_v61, %v12966_v28  ;;  %v13068_v57 = vadd.f32 %v13067_v23, %v13066_v47  ;;  %v16506_v3 = vadd.f32 %v13065_v29, %v10748_v36 }
 0x4c5   : > { %v10767_v21 = vadd.f32 %v12968_v45, %v16938_v20  ;;  %v16509_v10 = vadd.f32 %v13068_v57, %v10751_v56 }
 0x4c7   : > { %v12969_v54 = vpop.f32.mrb[232].mxu1  ;;  %v13069_v55 = vpop.f32.mrb[0].mxu0 }
 0x4c8   : > { %v12970_v14 = vpop.f32.mrb[233].mxu1  ;;  %v13070_v8 = vpop.f32.mrb[1].mxu0 }
 0x4c9   : > { %v12971_v4 = vadd.f32 %v12970_v14, %v12969_v54  ;;  %v12972_v5 = vpop.f32.mrb[234].mxu1  ;;  %v13071_v30 = vadd.f32 %v13070_v8, %v13069_v55  ;;  %v13072_v34 = vpop.f32.mrb[2].mxu0 }
 0x4ca   : > { %v12973_v6 = vpop.f32.mrb[235].mxu1  ;;  %v13073_v46 = vpop.f32.mrb[3].mxu0 }
 0x4cb   : > { %v10772_v9 = vadd.f32 %v12971_v4, %v16939_v50  ;;  %v12974_v38 = vadd.f32 %v12973_v6, %v12972_v5  ;;  %v13074_v7 = vadd.f32 %v13073_v46, %v13072_v34  ;;  %v16512_v36 = vadd.f32 %v13071_v30, %v10756_v18 }
 0x4cd   : > { %v10775_v17 = vadd.f32 %v12974_v38, %v16940_v24  ;;  %v16515_v56 = vadd.f32 %v13074_v7, %v10759_v13 }
 0x4cf   : > { %v12975_v33 = vpop.f32.mrb[236].mxu1  ;;  %v13075_v19 = vpop.f32.mrb[4].mxu0 }
 0x4d0   : > { %v12976_v43 = vpop.f32.mrb[237].mxu1  ;;  %v13076_v60 = vpop.f32.mrb[5].mxu0 }
 0x4d1   : > { %v12977_v59 = vadd.f32 %v12976_v43, %v12975_v33  ;;  %v12978_v51 = vpop.f32.mrb[238].mxu1  ;;  %v13077_v22 = vadd.f32 %v13076_v60, %v13075_v19  ;;  %v13078_v52 = vpop.f32.mrb[6].mxu0 }
 0x4d2   : > { %v12979_v28 = vpop.f32.mrb[239].mxu1  ;;  %v13079_v29 = vpop.f32.mrb[7].mxu0 }
 0x4d3   : > { %v10780_v47 = vadd.f32 %v12977_v59, %v16414_v63  ;;  %v12980_v61 = vadd.f32 %v12979_v28, %v12978_v51  ;;  %v13080_v23 = vadd.f32 %v13079_v29, %v13078_v52  ;;  %v16518_v18 = vadd.f32 %v13077_v22, %v10764_v49 }
 0x4d5   : > { %v10783_v45 = vadd.f32 %v12980_v61, %v16421_v53  ;;  %v16521_v13 = vadd.f32 %v13080_v23, %v10767_v21 }
 0x4d7   : > { %v12981_v57 = vpop.f32.mrb[240].mxu1  ;;  %v13081_v20 = vpop.f32.mrb[8].mxu0 }
 0x4d8   : > { %v12982_v54 = vpop.f32.mrb[241].mxu1  ;;  %v13082_v55 = vpop.f32.mrb[9].mxu0 }
 0x4d9   : > { %v12983_v14 = vadd.f32 %v12982_v54, %v12981_v57  ;;  %v12984_v8 = vpop.f32.mrb[242].mxu1  ;;  %v13083_v4 = vadd.f32 %v13082_v55, %v13081_v20  ;;  %v13084_v5 = vpop.f32.mrb[10].mxu0 }
 0x4da   : > { %v12985_v30 = vpop.f32.mrb[243].mxu1  ;;  %v13085_v34 = vpop.f32.mrb[11].mxu0 }
 0x4db   : > { %v10788_v63 = vadd.f32 %v12983_v14, %v16435_v0  ;;  %v12986_v6 = vadd.f32 %v12985_v30, %v12984_v8  ;;  %v13086_v46 = vadd.f32 %v13085_v34, %v13084_v5  ;;  %v16524_v49 = vadd.f32 %v13083_v4, %v10772_v9 }
 0x4dd   : > { %v10791_v53 = vadd.f32 %v12986_v6, %v16439_v58  ;;  %v16527_v21 = vadd.f32 %v13086_v46, %v10775_v17 }
 0x4df   : > { %v12987_v50 = vpop.f32.mrb[244].mxu1  ;;  %v13087_v38 = vpop.f32.mrb[12].mxu0 }
 0x4e0   : > { %v12988_v7 = vpop.f32.mrb[245].mxu1  ;;  %v13088_v24 = vpop.f32.mrb[13].mxu0 }
 0x4e1   : > { %v12989_v33 = vadd.f32 %v12988_v7, %v12987_v50  ;;  %v12990_v19 = vpop.f32.mrb[246].mxu1  ;;  %v13089_v43 = vadd.f32 %v13088_v24, %v13087_v38  ;;  %v13090_v60 = vpop.f32.mrb[14].mxu0 }
 0x4e2   : > { %v12991_v59 = vpop.f32.mrb[247].mxu1  ;;  %v13091_v51 = vpop.f32.mrb[15].mxu0 }
 0x4e3   : > { %v10796_v0 = vadd.f32 %v12989_v33, %v16443_v27  ;;  %v12992_v22 = vadd.f32 %v12991_v59, %v12990_v19  ;;  %v13092_v52 = vadd.f32 %v13091_v51, %v13090_v60  ;;  %v16530_v9 = vadd.f32 %v13089_v43, %v10780_v47 }
 0x4e5   : > { %v10799_v58 = vadd.f32 %v12992_v22, %v16445_v62  ;;  %v16533_v17 = vadd.f32 %v13092_v52, %v10783_v45 }
 0x4e7   : > { %v13093_v28 = vpop.f32.mrb[16].mxu0  ;;  %v12993_v29 = vpop.f32.mrb[248].mxu1 }
 0x4e8   : > { %v13094_v61 = vpop.f32.mrb[17].mxu0  ;;  %v12994_v23 = vpop.f32.mrb[249].mxu1 }
 0x4e9   : > { %v13095_v57 = vadd.f32 %v13094_v61, %v13093_v28  ;;  %v13096_v20 = vpop.f32.mrb[18].mxu0  ;;  %v12995_v54 = vadd.f32 %v12994_v23, %v12993_v29  ;;  %v12996_v55 = vpop.f32.mrb[250].mxu1 }
 0x4ea   : > { %v13097_v14 = vpop.f32.mrb[19].mxu0  ;;  %v12997_v8 = vpop.f32.mrb[251].mxu1 }
 0x4eb   : > { %v13098_v4 = vadd.f32 %v13097_v14, %v13096_v20  ;;  %v10804_v27 = vadd.f32 %v12995_v54, %v16449_v37  ;;  %v12998_v5 = vadd.f32 %v12997_v8, %v12996_v55  ;;  %v16536_v47 = vadd.f32 %v13095_v57, %v10788_v63 }
 0x4ed   : > { %v10807_v62 = vadd.f32 %v12998_v5, %v16453_v12  ;;  %v16539_v45 = vadd.f32 %v13098_v4, %v10791_v53 }
 0x4f0   : > { %v13099_v30 = vpop.f32.mrb[20].mxu0 }
 0x4f1   : > { %v13100_v34 = vpop.f32.mrb[21].mxu0 }
 0x4f2   : > { %v13101_v6 = vadd.f32 %v13100_v34, %v13099_v30  ;;  %v13102_v46 = vpop.f32.mrb[22].mxu0  ;;  %v11219_v34 = vld [vmem:[%s13962_s26 + $0x18] sm:$0xff] }
 0x4f3   : > { %v13103_v50 = vpop.f32.mrb[23].mxu0  ;;  %v12999_v7 = vpop.f32.mrb[252].mxu1 }
 0x4f4   : > { %v13104_v38 = vadd.f32 %v13103_v50, %v13102_v46  ;;  %v16541_v24 = vadd.f32 %v13101_v6, %v10796_v0  ;;  %v13000_v33 = vpop.f32.mrb[253].mxu1  ;;  %v11217_v50 = vld [vmem:[%s13962_s26 + $0x8] sm:$0xff] }
 0x4f5   : > { %v13001_v19 = vadd.f32 %v13000_v33, %v12999_v7  ;;  %v13002_v43 = vpop.f32.mrb[254].mxu1 }
 0x4f6   : > { %v16543_v37 = vadd.f32 %v13104_v38, %v10799_v58  ;;  %v13003_v63 = vpop.f32.mrb[255].mxu1  ;;  %v16552_v58 = vld [vmem:[%s16788_s8] ss:$0 sm:$0xff] }
 0x4f7   : > { %v10812_v60 = vadd.f32 %v13001_v19, %v16457_v16  ;;  %v13004_v53 = vadd.f32 %v13003_v63, %v13002_v43 }
 0x4f8   : > { %v13105_v12 = vpop.f32.mrb[24].mxu0 }
 0x4f9   : > { %v13106_v59 = vpop.f32.mrb[25].mxu0  ;;  %v10815_v22 = vadd.f32 %v13004_v53, %v16460_v41  ;;  %v16560_v41 = vld [vmem:[%s16789_s9] ss:$0 sm:$0xff] }
 0x4fa   : > { %v13107_v51 = vadd.f32 %v13106_v59, %v13105_v12  ;;  %v13108_v52 = vpop.f32.mrb[26].mxu0 }
 0x4fb   : > { %v13109_v28 = vpop.f32.mrb[27].mxu0 }
 0x4fc   : > { %v13110_v29 = vadd.f32 %v13109_v28, %v13108_v52  ;;  %v16547_v0 = vadd.f32 %v13107_v51, %v10804_v27 }
 0x4fd   : > { %v13207_v61 = vpop.f32.mrb[0].mxu1 }
 0x4fe   : > { %v11022_v16 = vadd.f32 %v13207_v61, %v16470_v44  ;;  %v11013_v23 = vpop.f32.mrb[1].mxu1  ;;  %v16555_v57 = vadd.f32 %v13110_v29, %v10807_v62  ;;  %v11218_v44 = vld [vmem:[%s13962_s26 + $0x10] sm:$0xff]  ;;  %v11216_v62 = vld [vmem:[%s13962_s26] sm:$0xff] }
 0x4ff   : > { %v11014_v20 = vadd.f32 %v11013_v23, %v16464_v31  ;;  %v13208_v54 = vpop.f32.mrb[2].mxu1 }
 0x500   : > { %v11148_v55 = vmul.f32 %v16552_v58, %v11022_v16  ;;  %v11025_v14 = vadd.f32 %v13208_v54, %v16473_v26  ;;  %v11016_v8 = vpop.f32.mrb[3].mxu1 }
 0x501   : > { %v11146_v4 = vmul.f32 %v16552_v58, %v11014_v20  ;;  %v11017_v27 = vadd.f32 %v11016_v8, %v16467_v39 }
 0x502   : > { %v11186_v5 = vadd.f32 %v16560_v41, %v11148_v55  ;;  %v11149_v30 = vmul.f32 %v16552_v58, %v11025_v14  ;;  %v11222_v14 = vld [vmem:[%s13962_s26 + $0x30] sm:$0xff] }
 0x503   : > { %v11184_v31 = vadd.f32 %v16560_v41, %v11146_v4  ;;  %v11147_v6 = vmul.f32 %v16552_v58, %v11017_v27  ;;  %v11223_v4 = vld [vmem:[%s13962_s26 + $0x38] sm:$0xff] }
 0x504   : > { %v11250_v46 = vadd.f32 %v11218_v44, %v11186_v5  ;;  %v11187_v26 = vadd.f32 %v16560_v41, %v11149_v30 }
 0x505   : > { %v11248_v38 = vadd.f32 %v11216_v62, %v11184_v31  ;;  %v11185_v7 = vadd.f32 %v16560_v41, %v11147_v6  ;;  %v11221_v62 = vld [vmem:[%s13962_s26 + $0x28] sm:$0xff] }
 0x506   : > { %11282 = vst [vmem:[%s16579_s25 + $0x10] sm:$0xff] %v11250_v46  ;;  %v11251_v39 = vadd.f32 %v11219_v34, %v11187_v26 }
 0x507   : > { %v13111_v33 = vpop.f32.mrb[28].mxu0  ;;  %11280 = vst [vmem:[%s16579_s25] sm:$0xff] %v11248_v38  ;;  %v11249_v19 = vadd.f32 %v11217_v50, %v11185_v7 }
 0x508   : > { %v13112_v43 = vpop.f32.mrb[29].mxu0  ;;  %11283 = vst [vmem:[%s16579_s25 + $0x18] sm:$0xff] %v11251_v39 }
 0x509   : > { %v13113_v63 = vadd.f32 %v13112_v43, %v13111_v33  ;;  %v13114_v12 = vpop.f32.mrb[30].mxu0  ;;  %11281 = vst [vmem:[%s16579_s25 + $0x8] sm:$0xff] %v11249_v19  ;;  %v11226_v19 = vld [vmem:[%s13962_s26 + $0x50] sm:$0xff] }
 0x50a   : > { %v13115_v53 = vpop.f32.mrb[31].mxu0 }
 0x50b   : > { %v13116_v59 = vadd.f32 %v13115_v53, %v13114_v12  ;;  %v16585_v51 = vadd.f32 %v13113_v63, %v10812_v60  ;;  %v11224_v12 = vld [vmem:[%s13962_s26 + $0x40] sm:$0xff] }
 0x50d   : > { %v13211_v52 = vpop.f32.mrb[4].mxu1  ;;  %v16587_v28 = vadd.f32 %v13116_v59, %v10815_v22  ;;  %v11227_v59 = vld [vmem:[%s13962_s26 + $0x58] sm:$0xff] }
 0x50e   : > { %v11038_v29 = vadd.f32 %v13211_v52, %v16482_v32  ;;  %v11029_v61 = vpop.f32.mrb[5].mxu1  ;;  %v11220_v32 = vld [vmem:[%s13962_s26 + $0x20] sm:$0xff] }
 0x50f   : > { %v11030_v16 = vadd.f32 %v11029_v61, %v16476_v48  ;;  %v13212_v23 = vpop.f32.mrb[6].mxu1  ;;  %v11225_v61 = vld [vmem:[%s13962_s26 + $0x48] sm:$0xff] }
 0x510   : > { %v11152_v20 = vmul.f32 %v16552_v58, %v11038_v29  ;;  %v11041_v54 = vadd.f32 %v13212_v23, %v16485_v42  ;;  %v11032_v55 = vpop.f32.mrb[7].mxu1 }
 0x511   : > { %v11150_v60 = vmul.f32 %v16552_v58, %v11030_v16  ;;  %v11033_v22 = vadd.f32 %v11032_v55, %v16479_v25 }
 0x512   : > { %v11190_v8 = vadd.f32 %v16560_v41, %v11152_v20  ;;  %v11153_v48 = vmul.f32 %v16552_v58, %v11041_v54 }
 0x513   : > { %v11188_v44 = vadd.f32 %v16560_v41, %v11150_v60  ;;  %v11151_v42 = vmul.f32 %v16552_v58, %v11033_v22 }
 0x514   : > { %v11254_v27 = vadd.f32 %v11222_v14, %v11190_v8  ;;  %v11191_v5 = vadd.f32 %v16560_v41, %v11153_v48 }
 0x515   : > { %v11252_v30 = vadd.f32 %v11220_v32, %v11188_v44  ;;  %v11189_v25 = vadd.f32 %v16560_v41, %v11151_v42  ;;  %v11230_v44 = vld [vmem:[%s13962_s26 + $0x70] sm:$0xff] }
 0x516   : > { %11286 = vst [vmem:[%s16579_s25 + $0x30] sm:$0xff] %v11254_v27  ;;  %v11255_v31 = vadd.f32 %v11223_v4, %v11191_v5  ;;  %v11228_v27 = vld [vmem:[%s13962_s26 + $0x60] sm:$0xff] }
 0x517   : > { %11284 = vst [vmem:[%s16579_s25 + $0x20] sm:$0xff] %v11252_v30  ;;  %v11253_v34 = vadd.f32 %v11221_v62, %v11189_v25  ;;  %v13215_v6 = vpop.f32.mrb[8].mxu1  ;;  %v11231_v62 = vld [vmem:[%s13962_s26 + $0x78] sm:$0xff] }
 0x518   : > { %11287 = vst [vmem:[%s16579_s25 + $0x38] sm:$0xff] %v11255_v31  ;;  %v11054_v46 = vadd.f32 %v13215_v6, %v16494_v35  ;;  %v11045_v26 = vpop.f32.mrb[9].mxu1  ;;  %v11229_v31 = vld [vmem:[%s13962_s26 + $0x68] sm:$0xff] }
 0x519   : > { %11285 = vst [vmem:[%s16579_s25 + $0x28] sm:$0xff] %v11253_v34  ;;  %v11046_v50 = vadd.f32 %v11045_v26, %v16488_v1  ;;  %v13216_v38 = vpop.f32.mrb[10].mxu1 }
 0x51a   : > { %v11156_v7 = vmul.f32 %v16552_v58, %v11054_v46  ;;  %v11057_v39 = vadd.f32 %v13216_v38, %v16497_v2  ;;  %v11048_v33 = vpop.f32.mrb[11].mxu1 }
 0x51b   : > { %v11154_v43 = vmul.f32 %v16552_v58, %v11046_v50  ;;  %v11049_v63 = vadd.f32 %v11048_v33, %v16491_v40 }
 0x51c   : > { %v11194_v35 = vadd.f32 %v16560_v41, %v11156_v7  ;;  %v11157_v1 = vmul.f32 %v16552_v58, %v11057_v39 }
 0x51d   : > { %v11192_v53 = vadd.f32 %v16560_v41, %v11154_v43  ;;  %v11155_v2 = vmul.f32 %v16552_v58, %v11049_v63  ;;  %v11234_v63 = vld [vmem:[%s13962_s26 + $0x90] sm:$0xff] }
 0x51e   : > { %v11258_v52 = vadd.f32 %v11226_v19, %v11194_v35  ;;  %v11195_v29 = vadd.f32 %v16560_v41, %v11157_v1  ;;  %v11232_v1 = vld [vmem:[%s13962_s26 + $0x80] sm:$0xff] }
 0x51f   : > { %v11256_v16 = vadd.f32 %v11224_v12, %v11192_v53  ;;  %v11193_v40 = vadd.f32 %v16560_v41, %v11155_v2 }
 0x520   : > { %11290 = vst [vmem:[%s16579_s25 + $0x50] sm:$0xff] %v11258_v52  ;;  %v11259_v23 = vadd.f32 %v11227_v59, %v11195_v29  ;;  %v11235_v59 = vld [vmem:[%s13962_s26 + $0x98] sm:$0xff]  ;;  %v11233_v29 = vld [vmem:[%s13962_s26 + $0x88] sm:$0xff] }
 0x521   : > { %11288 = vst [vmem:[%s16579_s25 + $0x40] sm:$0xff] %v11256_v16  ;;  %v11257_v20 = vadd.f32 %v11225_v61, %v11193_v40  ;;  %v13219_v54 = vpop.f32.mrb[12].mxu1 }
 0x522   : > { %11291 = vst [vmem:[%s16579_s25 + $0x58] sm:$0xff] %v11259_v23  ;;  %v11070_v55 = vadd.f32 %v13219_v54, %v16506_v3  ;;  %v11061_v14 = vpop.f32.mrb[13].mxu1 }
 0x523   : > { %11289 = vst [vmem:[%s16579_s25 + $0x48] sm:$0xff] %v11257_v20  ;;  %v11062_v60 = vadd.f32 %v11061_v14, %v16500_v11  ;;  %v13220_v22 = vpop.f32.mrb[14].mxu1 }
 0x524   : > { %v11160_v8 = vmul.f32 %v16552_v58, %v11070_v55  ;;  %v11073_v32 = vadd.f32 %v13220_v22, %v16509_v10  ;;  %v11064_v48 = vpop.f32.mrb[15].mxu1 }
 0x525   : > { %v11158_v4 = vmul.f32 %v16552_v58, %v11062_v60  ;;  %v11065_v42 = vadd.f32 %v11064_v48, %v16503_v15 }
 0x526   : > { %v11198_v3 = vadd.f32 %v16560_v41, %v11160_v8  ;;  %v11161_v11 = vmul.f32 %v16552_v58, %v11073_v32  ;;  %v11238_v32 = vld [vmem:[%s13962_s26 + $0xb0] sm:$0xff] }
 0x527   : > { %v11196_v5 = vadd.f32 %v16560_v41, %v11158_v4  ;;  %v11159_v10 = vmul.f32 %v16552_v58, %v11065_v42  ;;  %v11236_v4 = vld [vmem:[%s13962_s26 + $0xa0] sm:$0xff] }
 0x528   : > { %v11262_v30 = vadd.f32 %v11230_v44, %v11198_v3  ;;  %v11199_v25 = vadd.f32 %v16560_v41, %v11161_v11  ;;  %v11239_v3 = vld [vmem:[%s13962_s26 + $0xb8] sm:$0xff] }
 0x529   : > { %v11260_v34 = vadd.f32 %v11228_v27, %v11196_v5  ;;  %v11197_v15 = vadd.f32 %v16560_v41, %v11159_v10  ;;  %v11237_v5 = vld [vmem:[%s13962_s26 + $0xa8] sm:$0xff] }
 0x52a   : > { %11294 = vst [vmem:[%s16579_s25 + $0x70] sm:$0xff] %v11262_v30  ;;  %v11263_v6 = vadd.f32 %v11231_v62, %v11199_v25 }
 0x52b   : > { %11292 = vst [vmem:[%s16579_s25 + $0x60] sm:$0xff] %v11260_v34  ;;  %v11261_v46 = vadd.f32 %v11229_v31, %v11197_v15  ;;  %v13223_v26 = vpop.f32.mrb[16].mxu1 }
 0x52c   : > { %11295 = vst [vmem:[%s16579_s25 + $0x78] sm:$0xff] %v11263_v6  ;;  %v11086_v50 = vadd.f32 %v13223_v26, %v16518_v18  ;;  %v11077_v38 = vpop.f32.mrb[17].mxu1 }
 0x52d   : > { %11293 = vst [vmem:[%s16579_s25 + $0x68] sm:$0xff] %v11261_v46  ;;  %v11078_v7 = vadd.f32 %v11077_v38, %v16512_v36  ;;  %v13224_v39 = vpop.f32.mrb[18].mxu1  ;;  %v11242_v38 = vld [vmem:[%s13962_s26 + $0xd0] sm:$0xff] }
 0x52e   : > { %v11164_v33 = vmul.f32 %v16552_v58, %v11086_v50  ;;  %v11089_v19 = vadd.f32 %v13224_v39, %v16521_v13  ;;  %v11080_v43 = vpop.f32.mrb[19].mxu1 }
 0x52f   : > { %v11162_v35 = vmul.f32 %v16552_v58, %v11078_v7  ;;  %v11081_v12 = vadd.f32 %v11080_v43, %v16515_v56  ;;  %v11243_v43 = vld [vmem:[%s13962_s26 + $0xd8] sm:$0xff] }
 0x530   : > { %v11202_v18 = vadd.f32 %v16560_v41, %v11164_v33  ;;  %v11165_v36 = vmul.f32 %v16552_v58, %v11089_v19  ;;  %v11240_v33 = vld [vmem:[%s13962_s26 + $0xc0] sm:$0xff] }
 0x531   : > { %v11200_v53 = vadd.f32 %v16560_v41, %v11162_v35  ;;  %v11163_v13 = vmul.f32 %v16552_v58, %v11081_v12  ;;  %v11241_v12 = vld [vmem:[%s13962_s26 + $0xc8] sm:$0xff] }
 0x532   : > { %v11266_v2 = vadd.f32 %v11234_v63, %v11202_v18  ;;  %v11203_v52 = vadd.f32 %v16560_v41, %v11165_v36 }
 0x533   : > { %v11264_v61 = vadd.f32 %v11232_v1, %v11200_v53  ;;  %v11201_v56 = vadd.f32 %v16560_v41, %v11163_v13 }
 0x534   : > { %11298 = vst [vmem:[%s16579_s25 + $0x90] sm:$0xff] %v11266_v2  ;;  %v11267_v16 = vadd.f32 %v11235_v59, %v11203_v52 }
 0x535   : > { %11296 = vst [vmem:[%s16579_s25 + $0x80] sm:$0xff] %v11264_v61  ;;  %v11265_v40 = vadd.f32 %v11233_v29, %v11201_v56  ;;  %v13227_v23 = vpop.f32.mrb[20].mxu1 }
 0x536   : > { %11299 = vst [vmem:[%s16579_s25 + $0x98] sm:$0xff] %v11267_v16  ;;  %v11102_v20 = vadd.f32 %v13227_v23, %v16530_v9  ;;  %v11093_v54 = vpop.f32.mrb[21].mxu1  ;;  %v11246_v16 = vld [vmem:[%s13962_s26 + $0xf0] sm:$0xff] }
 0x537   : > { %11297 = vst [vmem:[%s16579_s25 + $0x88] sm:$0xff] %v11265_v40  ;;  %v11094_v55 = vadd.f32 %v11093_v54, %v16524_v49  ;;  %v13228_v14 = vpop.f32.mrb[22].mxu1 }
 0x538   : > { %v11168_v60 = vmul.f32 %v16552_v58, %v11102_v20  ;;  %v11105_v22 = vadd.f32 %v13228_v14, %v16533_v17  ;;  %v11096_v8 = vpop.f32.mrb[23].mxu1  ;;  %v11244_v20 = vld [vmem:[%s13962_s26 + $0xe0] sm:$0xff] }
 0x539   : > { %v11166_v48 = vmul.f32 %v16552_v58, %v11094_v55  ;;  %v11097_v44 = vadd.f32 %v11096_v8, %v16527_v21  ;;  %v11247_v55 = vld [vmem:[%s13962_s26 + $0xf8] sm:$0xff] }
 0x53a   : > { %v11206_v9 = vadd.f32 %v16560_v41, %v11168_v60  ;;  %v11169_v49 = vmul.f32 %v16552_v58, %v11105_v22  ;;  %v11245_v60 = vld [vmem:[%s13962_s26 + $0xe8] sm:$0xff]  ;;  %s13646_s26 = scalar_lea.vmem %s16733_s18, 4096 }
 0x53b   : > { %v11204_v42 = vadd.f32 %v16560_v41, %v11166_v48  ;;  %v11167_v17 = vmul.f32 %v16552_v58, %v11097_v44  ;;  %p13647_p11 = scmp.ne.s32.totalorder %s16733_s18, %s13646_s26  ;;  %p13654_p9 = scmp.lt.s32.totalorder %s13652_s24, %s13646_s26 }
 0x53c   : > { %v11270_v27 = vadd.f32 %v11238_v32, %v11206_v9  ;;  %v11207_v11 = vadd.f32 %v16560_v41, %v11169_v49 }
 0x53d   : > { %v11268_v62 = vadd.f32 %v11236_v4, %v11204_v42  ;;  %v11205_v21 = vadd.f32 %v16560_v41, %v11167_v17  ;;  %p13648_p1 = pnand %p13647_p11, %p16941_p0  ;;  %p13655_p12 = por %p13654_p9, %p13653_p7 }
 0x53e   : > { %11302 = vst [vmem:[%s16579_s25 + $0xb0] sm:$0xff] %v11270_v27  ;;  %v11271_v10 = vadd.f32 %v11239_v3, %v11207_v11 }
 0x53f   : > { %11300 = vst [vmem:[%s16579_s25 + $0xa0] sm:$0xff] %v11268_v62  ;;  %v11269_v30 = vadd.f32 %v11237_v5, %v11205_v21  ;;  %v13231_v25 = vpop.f32.mrb[24].mxu1  ;;  %p13649_p3 = pneg %p13648_p1 }
 0x540   : > { %11303 = vst [vmem:[%s16579_s25 + $0xb8] sm:$0xff] %v11271_v10  ;;  %v11118_v31 = vadd.f32 %v13231_v25, %v16541_v24  ;;  %v11109_v34 = vpop.f32.mrb[25].mxu1 }
 0x541   : > { %11301 = vst [vmem:[%s16579_s25 + $0xa8] sm:$0xff] %v11269_v30  ;;  %v11110_v15 = vadd.f32 %v11109_v34, %v16536_v47  ;;  %v13232_v6 = vpop.f32.mrb[26].mxu1  ;;  %p13656_p2 = pnand %p13655_p12, %p13649_p3 }
 0x542   : > { %v11172_v46 = vmul.f32 %v16552_v58, %v11118_v31  ;;  %v11121_v26 = vadd.f32 %v13232_v6, %v16543_v37  ;;  %v11112_v50 = vpop.f32.mrb[27].mxu1 }
 0x543   : > { %v11170_v7 = vmul.f32 %v16552_v58, %v11110_v15  ;;  %v11113_v39 = vadd.f32 %v11112_v50, %v16539_v45 }
 0x544   : > { %v11210_v24 = vadd.f32 %v16560_v41, %v11172_v46  ;;  %v11173_v47 = vmul.f32 %v16552_v58, %v11121_v26 }
 0x545   : > { %v11208_v19 = vadd.f32 %v16560_v41, %v11170_v7  ;;  %v11171_v37 = vmul.f32 %v16552_v58, %v11113_v39 }
 0x546   : > { %v11274_v63 = vadd.f32 %v11242_v38, %v11210_v24  ;;  %v11211_v35 = vadd.f32 %v16560_v41, %v11173_v47 }
 0x547   : > { %v11272_v18 = vadd.f32 %v11240_v33, %v11208_v19  ;;  %v11209_v45 = vadd.f32 %v16560_v41, %v11171_v37 }
 0x548   : > { %11306 = vst [vmem:[%s16579_s25 + $0xd0] sm:$0xff] %v11274_v63  ;;  %v11275_v1 = vadd.f32 %v11243_v43, %v11211_v35 }
 0x549   : > { %11304 = vst [vmem:[%s16579_s25 + $0xc0] sm:$0xff] %v11272_v18  ;;  %v11273_v36 = vadd.f32 %v11241_v12, %v11209_v45 }
 0x54a   : > { %11307 = vst [vmem:[%s16579_s25 + $0xd8] sm:$0xff] %v11275_v1 }
 0x54b   : > { %11305 = vst [vmem:[%s16579_s25 + $0xc8] sm:$0xff] %v11273_v36 }
 0x54d   : > { %v13235_v53 = vpop.f32.mrb[28].mxu1 }
 0x54e   : > { %v11134_v59 = vadd.f32 %v13235_v53, %v16585_v51  ;;  %v11125_v13 = vpop.f32.mrb[29].mxu1 }
 0x54f   : > { %v11126_v2 = vadd.f32 %v11125_v13, %v16547_v0  ;;  %v13236_v52 = vpop.f32.mrb[30].mxu1 }
 0x550   : > { %v11176_v29 = vmul.f32 %v16552_v58, %v11134_v59  ;;  %v11137_v61 = vadd.f32 %v13236_v52, %v16587_v28  ;;  %v11128_v56 = vpop.f32.mrb[31].mxu1 }
 0x551   : > { %v11174_v40 = vmul.f32 %v16552_v58, %v11126_v2  ;;  %v11129_v23 = vadd.f32 %v11128_v56, %v16555_v57 }
 0x552   : > { %v11214_v51 = vadd.f32 %v16560_v41, %v11176_v29  ;;  %v11177_v54 = vmul.f32 %v16552_v58, %v11137_v61 }
 0x553   : > { %v11212_v0 = vadd.f32 %v16560_v41, %v11174_v40  ;;  %v11175_v28 = vmul.f32 %v16552_v58, %v11129_v23 }
 0x554   : > { %v11278_v14 = vadd.f32 %v11246_v16, %v11214_v51  ;;  %v11215_v57 = vadd.f32 %v16560_v41, %v11177_v54 }
 0x555   : > { %v11276_v22 = vadd.f32 %v11244_v20, %v11212_v0  ;;  %v11213_v8 = vadd.f32 %v16560_v41, %v11175_v28 }
 0x556   : > { %11310 = vst [vmem:[%s16579_s25 + $0xf0] sm:$0xff] %v11278_v14  ;;  %v11279_v32 = vadd.f32 %v11247_v55, %v11215_v57 }
 0x557   : > { %11308 = vst [vmem:[%s16579_s25 + $0xe0] sm:$0xff] %v11276_v22  ;;  %v11277_v58 = vadd.f32 %v11245_v60, %v11213_v8 }
 0x558   : > { %11311 = vst [vmem:[%s16579_s25 + $0xf8] sm:$0xff] %v11279_v32 }
 0x559   : > { %11309 = vst [vmem:[%s16579_s25 + $0xe8] sm:$0xff] %v11277_v58 }
 0x55a   : > { %13659 = shalt.err (!%p13656_p2)
}
 0x55b   : > { %s13660_s27 = scalar_lea.hbm %s16731_s22, 4096  ;;  %s13664_s12 = scalar_lea.hbm %s16790_s10, 8192 }
 0x55c   : > { %p13661_p13 = scmp.ne.s32.totalorder %s16731_s22, %s13660_s27  ;;  %p13665_p4 = scmp.lt.u32.totalorder %s16731_s22, %s16790_s10 }
 0x55d   : > { %p13666_p5 = scmp.lt.u32.totalorder %s13664_s12, %s13660_s27  ;;  %p13668_p11 = scmp.lt.u32.totalorder %s13660_s27, %s16731_s22 }
 0x55e   : > { %p13662_p6 = pnand %p13661_p13, %p16941_p0 }
 0x55f   : > { %p13667_p8 = por %p13666_p5, %p13665_p4 }
 0x560   : > { %p13663_p10 = pneg %p13662_p6 }
 0x561   : > { %p13669_p1 = por %p13668_p11, %p13667_p8 }
 0x563   : > { %p13670_p3 = pnand %p13669_p1, %p13663_p10 }
 0x565   : > { %13673 = shalt.err (!%p13670_p3)
}
 0x566   : > { %s13727_s26 = smov 128   ;;  %s13728_s13 = smov 8  }
 0x567   : > { %13247 = dma.vmem_to_hbm [thread:$0]  (%p16941_p0), %s16733_s18, 4096, %s16731_s22, %s11313_s17, %s13727_s26, %s13727_s26, %s13728_s13  }
 0x568 PF: > { %s16942_s20 = sld [smem:[#allocation15_spill]]  ;;  %s16943_s24 = sld [smem:[#allocation16_spill]] }
 0x569   : > { %p16945_p9 = scmp.ge.s32.totalorder %s13716_s16, 2 }
 0x56e   : > { %s11341_s29 = sand.u32 1, %s16942_s20   ;;  %p16944_p7 = scmp.ne.s32.totalorder %s16943_s24, 0 }
 0x56f   : > { %s11342_s27 = scalar_lea.sflag [#allocation7], %s11341_s29 }
 0x570   : > { %p13261_p12 = pnand %p16945_p9, %p16944_p7 }
 0x572   : > { %13699 = dma.done.wait (!%p13261_p12), %s11342_s27, 4096  }
 0x573   : > { %13701 = vsyncadd (!%p13261_p12), %s11342_s27, 4294963200  ;;  %p24_p2 = scmp.ge.s32.totalorder %s13894_s28, 4   ;;  %s16946_s13 = smov %s13708_s14 }
 0x574   : > { %s16947_s14 = smov %s13712_s15  ;;  %s16948_s15 = smov %s13910_s11 }
 0x575   : > { %s16949_s16 = smov %s13894_s28  ;;  %26 = sbr.rel (!%p24_p2) target bundleno = 6 (0x6), region = 119 }
 0x57c   :  { %11347 = vsyncpa [#allocation6], 1 }
 0x57d   :  { %11349 = vsyncpa [#allocation6 + $0x1], 1 }
 0x57e   :  { %11350 = vsyncpa [#allocation9], 1 }
 0x57f   :  { %11351 = vsyncpa [#allocation7], 1 }
 0x580   :  { %11353 = vsyncpa [#allocation7 + $0x1], 1 }

</bundles_post_ra>
